<compile_context>
chip_gen: v6e
topology: v6e:2x2x1
jax: 0.10.0
libtpu: 0.0.40
codegen_flags: <defaults>
</compile_context>

<pallas_src>
import functools

import jax
import jax.numpy as jnp
from jax import lax
from jax.experimental import pallas as pl
from jax.experimental.pallas import tpu as pltpu

INF = 1e9  # plain Python float: a module-level jnp scalar would be a captured const
_DIRS = ((-1, -1), (-1, 0), (-1, 1),
         (0, -1),           (0, 1),
         (1, -1),  (1, 0),  (1, 1))
_VI_UNROLL = 8     # relaxation rounds per convergence check (unrolled chunk)
_WALK_UNROLL = 8   # walk steps per termination check (unrolled chunk)


def _roll(x, shift, axis):
    # jnp.roll (static slices + concat) instead of pltpu.roll so the kernel also runs
    # under the TPU interpret mode; Mosaic lowers it to lane/sublane shifts anyway.
    return jnp.roll(x, shift, axis=axis)


def _bb_astar_kernel(src_ref, tgt_ref, w_ref, paths_ref, exp_ref, *, H, W, P):
    PW = P * W
    w = w_ref[0]  # (H, PW) packed node weights

    # ---- hoisted index maps and boundary masks (reused by VI and the walk) ----
    rows = lax.broadcasted_iota(jnp.int32, (H, PW), 0)
    cols = lax.broadcasted_iota(jnp.int32, (H, PW), 1)
    lcol = cols % W                       # local column inside each packed batch
    up_ok = rows >= 1                     # neighbour (r-1, .) exists
    down_ok = rows <= H - 2               # neighbour (r+1, .) exists
    left_ok = lcol >= 1                   # neighbour (., c-1) exists (same batch)
    right_ok = lcol <= W - 2              # neighbour (., c+1) exists (same batch)

    def nb_valid(dr, dc):
        m = None
        if dr == -1:
            m = up_ok
        elif dr == 1:
            m = down_ok
        if dc == -1:
            m = left_ok if m is None else jnp.logical_and(m, left_ok)
        elif dc == 1:
            m = right_ok if m is None else jnp.logical_and(m, right_ok)
        return m

    nbm = {(dr, dc): nb_valid(dr, dc) for dr, dc in _DIRS}

    # ---- build source / target one-hots from the SMEM (row, col) scalars ----
    g0 = pl.program_id(0) * P
    src_f = jnp.zeros((H, PW), jnp.float32)
    tgt_b = jnp.zeros((H, PW), jnp.bool_)
    for p in range(P):
        bi = g0 + p
        s_hit = jnp.logical_and(rows == src_ref[bi, 0], cols == p * W + src_ref[bi, 1])
        t_hit = jnp.logical_and(rows == tgt_ref[bi, 0], cols == p * W + tgt_ref[bi, 1])
        src_f = jnp.where(s_hit, 1.0, src_f)
        tgt_b = jnp.logical_or(tgt_b, t_hit)
    tgt_f = jnp.where(tgt_b, 1.0, 0.0)
    not_tgt_f = 1.0 - tgt_f

    # ---- 1. value iteration: D[v] = min cost of path v -> target (node weights) ----
    def neighbor_min(dv):
        # separable 8-neighbour min: 4 shifts per round instead of 16.
        l = jnp.where(left_ok, _roll(dv, 1, 1), INF)      # value of left neighbour
        r = jnp.where(right_ok, _roll(dv, -1, 1), INF)    # value of right neighbour
        h2 = jnp.minimum(l, r)                            # horizontal min (excl. centre)
        h3 = jnp.minimum(h2, dv)                          # horizontal 3-wide min
        u = jnp.where(up_ok, _roll(h3, 1, 0), INF)        # row above, 3-wide min
        dn = jnp.where(down_ok, _roll(h3, -1, 0), INF)    # row below, 3-wide min
        return jnp.minimum(jnp.minimum(u, dn), h2)

    def relax_chunk(dv):
        for _ in range(_VI_UNROLL):                       # unrolled straight-line chunk
            dv = jnp.where(tgt_b, w, jnp.minimum(dv, w + neighbor_min(dv)))
        return dv

    d0 = jnp.where(tgt_b, w, INF)
    d1 = relax_chunk(d0)

    def vi_cond(c):
        i, dv, dp = c
        # keep relaxing while something changed in the last chunk; H*W rounds is the
        # true worst case, so the bound stays even with early exit.
        return jnp.logical_and(i < H * W, jnp.max(dp - dv) > 0.0)

    def vi_body(c):
        i, dv, _ = c
        return i + _VI_UNROLL, relax_chunk(dv), dv

    _, d, _ = lax.while_loop(vi_cond, vi_body, (_VI_UNROLL, d1, d0))

    # ---- 3. expanded nodes: every node with a finite distance to target ----
    exp_ref[0] = jnp.where(d < INF * 0.5, 1.0, 0.0).astype(exp_ref.dtype)

    # ---- 2. greedy descent: per-cell successor direction, then a shift-only walk ----
    def shift_to_cell(x, dr, dc):
        # y[r, c] = x[r + dr, c + dc] if that neighbour exists (same batch), else INF
        y = x
        if dr != 0:
            y = _roll(y, -dr, 0)
        if dc != 0:
            y = _roll(y, -dc, 1)
        return jnp.where(nbm[(dr, dc)], y, INF)

    best = jnp.full((H, PW), INF, jnp.float32)
    best_dir = jnp.zeros((H, PW), jnp.int32)
    for k, (dr, dc) in enumerate(_DIRS):                  # computed once, not per step
        nd = shift_to_cell(d, dr, dc)
        take = nd < best
        best = jnp.where(take, nd, best)
        best_dir = jnp.where(take, k, best_dir)

    def move_mark(m, dr, dc):
        # place every mark of m at its (r + dr, c + dc) neighbour (0 outside the block)
        y = m
        if dr != 0:
            y = _roll(y, dr, 0)
        if dc != 0:
            y = _roll(y, dc, 1)
        return jnp.where(nbm[(-dr, -dc)], y, 0.0)

    def walk_step(cur, path):
        at_tgt = cur * tgt_f                              # finished walkers stay put
        moving = cur - at_tgt
        new = at_tgt
        for k, (dr, dc) in enumerate(_DIRS):              # select + shift, no reductions
            sel = jnp.where(best_dir == k, moving, 0.0)
            new = jnp.maximum(new, move_mark(sel, dr, dc))
        return new, jnp.maximum(path, new)

    def wk_cond(c):
        step, cur, _ = c
        return jnp.logical_and(step < H * W,
                               jnp.sum(cur * not_tgt_f) > 0.5)

    def wk_body(c):
        step, cur, path = c
        for _ in range(_WALK_UNROLL):
            cur, path = walk_step(cur, path)
        return step + _WALK_UNROLL, cur, path

    _, _, path = lax.while_loop(wk_cond, wk_body, (0, src_f, src_f))
    paths_ref[0] = path.astype(paths_ref.dtype)


def _choose_pack(B, W):
    """Largest batch-packing factor P (P | B, P*W <= 128 lanes), preferring to keep
    >= 2 grid steps (v7x megacore) when that costs at most half the lane fill."""
    cands = [p for p in range(1, B + 1) if B % p == 0 and p * W <= 128]
    if not cands:
        return 1
    p_lane = max(cands)
    mega = [p for p in cands if B // p >= 2]
    if mega and 2 * max(mega) >= p_lane:
        return max(mega)
    return p_lane


def bb_a_star_forward(weights, source, target, lambda_val=5.0):
    """Forward of BBAStar: returns (paths, exp_nodes), both [B, H, W] float32.

    `lambda_val` only affects the module's backward pass and is unused here.
    """
    del lambda_val
    B, H, W = weights.shape
    P = _choose_pack(B, W)
    G = B // P
    PW = P * W

    # lane-pack P batch elements side by side along the last (lane) dimension
    w_packed = (weights.astype(jnp.float32)
                .reshape(G, P, H, W).transpose(0, 2, 1, 3).reshape(G, H, PW))

    spec = pl.BlockSpec((1, H, PW), lambda g, src, tgt: (g, 0, 0))
    kernel = functools.partial(_bb_astar_kernel, H=H, W=W, P=P)

    paths_p, exp_p = pl.pallas_call(
        kernel,
        out_shape=(jax.ShapeDtypeStruct((G, H, PW), jnp.float32),
                   jax.ShapeDtypeStruct((G, H, PW), jnp.float32)),
        grid_spec=pltpu.PrefetchScalarGridSpec(
            num_scalar_prefetch=2,          # source, target (int32 [B, 2]) -> SMEM
            grid=(G,),
            in_specs=[spec],
            out_specs=(spec, spec)),
        compiler_params=pltpu.CompilerParams(
            dimension_semantics=("parallel",)),
    )(source.astype(jnp.int32), target.astype(jnp.int32), w_packed)

    def unpack(y):
        return y.reshape(G, H, P, W).transpose(0, 2, 1, 3).reshape(B, H, W)

    # BBAStarFunction.forward is the identity on paths, so return them directly.
    return unpack(paths_p), unpack(exp_p)


if __name__ == "__main__":
    key = jax.random.PRNGKey(0)
    B, H, W = 4, 16, 16
    weights = jax.random.uniform(key, (B, H, W), jnp.float32, 0.1, 1.0)
    source = jnp.array([[0, 0], [15, 0], [3, 7], [8, 2]], dtype=jnp.int32)
    target = jnp.array([[15, 15], [0, 15], [12, 10], [1, 14]], dtype=jnp.int32)

    paths, exp_nodes = bb_a_star_forward(weights, source, target, lambda_val=5.0)
    jax.block_until_ready((paths, exp_nodes))

    # light sanity checks: source & target lie on the returned path
    p = jax.device_get(paths)
    s = jax.device_get(source)
    t = jax.device_get(target)
    for b in range(B):
        assert p[b, s[b, 0], s[b, 1]] == 1.0, f"source missing from path (batch {b})"
        assert p[b, t[b, 0], t[b, 1]] == 1.0, f"target missing from path (batch {b})"

    print("KERNEL_OK")
</pallas_src>

<mosaic_0001>
module attributes {stable_mosaic.version = 11 : i64} {
  func.func @_bb_astar_kernel(%arg0: i32, %arg1: memref<4x2xi32, #tpu.memory_space<smem>>, %arg2: memref<4x2xi32, #tpu.memory_space<smem>>, %arg3: memref<1x16x32xf32, #tpu.memory_space<vmem>>, %arg4: memref<1x16x32xf32, #tpu.memory_space<vmem>>, %arg5: memref<1x16x32xf32, #tpu.memory_space<vmem>>) attributes {dimension_semantics = [#tpu.dimension_semantics<parallel>], iteration_bounds = array<i64: 2>, scalar_prefetch = 2 : i64, scratch_operands = 0 : i64, tpu.core_type = #tpu.core_type<tc>, window_params = [{transform_indices = @transform_0, window_bounds = array<i64: 1, 16, 32>}, {transform_indices = @transform_1, window_bounds = array<i64: 1, 16, 32>}, {transform_indices = @transform_2, window_bounds = array<i64: 1, 16, 32>}]} {
    %c0 = arith.constant 0 : index
    %c0_0 = arith.constant 0 : index
    %c0_1 = arith.constant 0 : index
    %0 = vector.load %arg3[%c0, %c0_0, %c0_1] : memref<1x16x32xf32, #tpu.memory_space<vmem>>, vector<1x16x32xf32>
    %1 = vector.shape_cast %0 : vector<1x16x32xf32> to vector<16x32xf32>
    %2 = tpu.iota {dimensions = array<i32: 0>} : vector<16x32xi32>
    %3 = tpu.iota {dimensions = array<i32: 1>} : vector<16x32xi32>
    %c16_i32 = arith.constant 16 : i32
    %c0_i32 = arith.constant 0 : i32
    %4 = arith.cmpi eq, %c16_i32, %c0_i32 : i32
    %c1_i32 = arith.constant 1 : i32
    %5 = arith.select %4, %c1_i32, %c16_i32 : i32
    %6 = vector.broadcast %5 : i32 to vector<16x32xi32>
    %7 = arith.remsi %3, %6 : vector<16x32xi32>
    %c0_i32_2 = arith.constant 0 : i32
    %8 = vector.broadcast %c0_i32_2 : i32 to vector<16x32xi32>
    %9 = arith.cmpi ne, %7, %8 : vector<16x32xi32>
    %c0_i32_3 = arith.constant 0 : i32
    %10 = vector.broadcast %c0_i32_3 : i32 to vector<16x32xi32>
    %11 = arith.cmpi slt, %7, %10 : vector<16x32xi32>
    %c0_i32_4 = arith.constant 0 : i32
    %12 = arith.cmpi slt, %5, %c0_i32_4 : i32
    %13 = vector.broadcast %12 : i1 to vector<16x32xi1>
    %14 = vector.broadcast %13 : vector<16x32xi1> to vector<16x32xi1>
    %15 = arith.xori %11, %14 : vector<16x32xi1>
    %16 = arith.andi %15, %9 : vector<16x32xi1>
    %17 = vector.broadcast %5 : i32 to vector<16x32xi32>
    %18 = arith.addi %7, %17 : vector<16x32xi32>
    %19 = arith.select %16, %18, %7 : vector<16x32xi1>, vector<16x32xi32>
    %c1_i32_5 = arith.constant 1 : i32
    %20 = vector.broadcast %c1_i32_5 : i32 to vector<16x32xi32>
    %21 = arith.cmpi sge, %2, %20 : vector<16x32xi32>
    %c14_i32 = arith.constant 14 : i32
    %22 = vector.broadcast %c14_i32 : i32 to vector<16x32xi32>
    %23 = arith.cmpi sle, %2, %22 : vector<16x32xi32>
    %c1_i32_6 = arith.constant 1 : i32
    %24 = vector.broadcast %c1_i32_6 : i32 to vector<16x32xi32>
    %25 = arith.cmpi sge, %19, %24 : vector<16x32xi32>
    %c14_i32_7 = arith.constant 14 : i32
    %26 = vector.broadcast %c14_i32_7 : i32 to vector<16x32xi32>
    %27 = arith.cmpi sle, %19, %26 : vector<16x32xi32>
    %28 = arith.andi %21, %25 : vector<16x32xi1>
    %29 = arith.andi %21, %27 : vector<16x32xi1>
    %30 = arith.andi %23, %25 : vector<16x32xi1>
    %31 = arith.andi %23, %27 : vector<16x32xi1>
    %c2_i32 = arith.constant 2 : i32
    %32 = arith.muli %arg0, %c2_i32 : i32
    %cst = arith.constant 0.000000e+00 : f32
    %33 = vector.broadcast %cst : f32 to vector<16x32xf32>
    %false = arith.constant false
    %34 = vector.broadcast %false : i1 to vector<16x32xi1>
    %c0_i32_8 = arith.constant 0 : i32
    %35 = arith.addi %32, %c0_i32_8 : i32
    %36 = arith.index_cast %35 : i32 to index
    %c0_9 = arith.constant 0 : index
    %37 = memref.load %arg1[%36, %c0_9] : memref<4x2xi32, #tpu.memory_space<smem>>
    %38 = vector.broadcast %37 : i32 to vector<16x32xi32>
    %39 = arith.cmpi eq, %2, %38 : vector<16x32xi32>
    %40 = arith.index_cast %35 : i32 to index
    %c1 = arith.constant 1 : index
    %41 = memref.load %arg1[%40, %c1] : memref<4x2xi32, #tpu.memory_space<smem>>
    %c0_i32_10 = arith.constant 0 : i32
    %42 = arith.addi %c0_i32_10, %41 : i32
    %43 = vector.broadcast %42 : i32 to vector<16x32xi32>
    %44 = arith.cmpi eq, %3, %43 : vector<16x32xi32>
    %45 = arith.andi %39, %44 : vector<16x32xi1>
    %46 = arith.index_cast %35 : i32 to index
    %c0_11 = arith.constant 0 : index
    %47 = memref.load %arg2[%46, %c0_11] : memref<4x2xi32, #tpu.memory_space<smem>>
    %48 = vector.broadcast %47 : i32 to vector<16x32xi32>
    %49 = arith.cmpi eq, %2, %48 : vector<16x32xi32>
    %50 = arith.index_cast %35 : i32 to index
    %c1_12 = arith.constant 1 : index
    %51 = memref.load %arg2[%50, %c1_12] : memref<4x2xi32, #tpu.memory_space<smem>>
    %c0_i32_13 = arith.constant 0 : i32
    %52 = arith.addi %c0_i32_13, %51 : i32
    %53 = vector.broadcast %52 : i32 to vector<16x32xi32>
    %54 = arith.cmpi eq, %3, %53 : vector<16x32xi32>
    %55 = arith.andi %49, %54 : vector<16x32xi1>
    %cst_14 = arith.constant 1.000000e+00 : f32
    %56 = vector.broadcast %cst_14 : f32 to vector<16x32xf32>
    %57 = arith.select %45, %56, %33 : vector<16x32xi1>, vector<16x32xf32>
    %58 = arith.ori %34, %55 : vector<16x32xi1>
    %c1_i32_15 = arith.constant 1 : i32
    %59 = arith.addi %32, %c1_i32_15 : i32
    %60 = arith.index_cast %59 : i32 to index
    %c0_16 = arith.constant 0 : index
    %61 = memref.load %arg1[%60, %c0_16] : memref<4x2xi32, #tpu.memory_space<smem>>
    %62 = vector.broadcast %61 : i32 to vector<16x32xi32>
    %63 = arith.cmpi eq, %2, %62 : vector<16x32xi32>
    %64 = arith.index_cast %59 : i32 to index
    %c1_17 = arith.constant 1 : index
    %65 = memref.load %arg1[%64, %c1_17] : memref<4x2xi32, #tpu.memory_space<smem>>
    %c16_i32_18 = arith.constant 16 : i32
    %66 = arith.addi %c16_i32_18, %65 : i32
    %67 = vector.broadcast %66 : i32 to vector<16x32xi32>
    %68 = arith.cmpi eq, %3, %67 : vector<16x32xi32>
    %69 = arith.andi %63, %68 : vector<16x32xi1>
    %70 = arith.index_cast %59 : i32 to index
    %c0_19 = arith.constant 0 : index
    %71 = memref.load %arg2[%70, %c0_19] : memref<4x2xi32, #tpu.memory_space<smem>>
    %72 = vector.broadcast %71 : i32 to vector<16x32xi32>
    %73 = arith.cmpi eq, %2, %72 : vector<16x32xi32>
    %74 = arith.index_cast %59 : i32 to index
    %c1_20 = arith.constant 1 : index
    %75 = memref.load %arg2[%74, %c1_20] : memref<4x2xi32, #tpu.memory_space<smem>>
    %c16_i32_21 = arith.constant 16 : i32
    %76 = arith.addi %c16_i32_21, %75 : i32
    %77 = vector.broadcast %76 : i32 to vector<16x32xi32>
    %78 = arith.cmpi eq, %3, %77 : vector<16x32xi32>
    %79 = arith.andi %73, %78 : vector<16x32xi1>
    %cst_22 = arith.constant 1.000000e+00 : f32
    %80 = vector.broadcast %cst_22 : f32 to vector<16x32xf32>
    %81 = arith.select %69, %80, %57 : vector<16x32xi1>, vector<16x32xf32>
    %82 = arith.ori %58, %79 : vector<16x32xi1>
    %cst_23 = arith.constant 1.000000e+00 : f32
    %cst_24 = arith.constant 0.000000e+00 : f32
    %83 = vector.broadcast %cst_23 : f32 to vector<16x32xf32>
    %84 = vector.broadcast %cst_24 : f32 to vector<16x32xf32>
    %85 = arith.select %82, %83, %84 : vector<16x32xi1>, vector<16x32xf32>
    %cst_25 = arith.constant 1.000000e+00 : f32
    %86 = vector.broadcast %cst_25 : f32 to vector<16x32xf32>
    %87 = arith.subf %86, %85 : vector<16x32xf32>
    %cst_26 = arith.constant 1.000000e+09 : f32
    %88 = vector.broadcast %cst_26 : f32 to vector<16x32xf32>
    %89 = arith.select %82, %1, %88 : vector<16x32xi1>, vector<16x32xf32>
    %90 = vector.extract_strided_slice %89 {offsets = [0, 31], sizes = [16, 1], strides = [1, 1]} : vector<16x32xf32> to vector<16x1xf32>
    %91 = vector.extract_strided_slice %89 {offsets = [0, 0], sizes = [16, 31], strides = [1, 1]} : vector<16x32xf32> to vector<16x31xf32>
    %92 = tpu.concatenate %90, %91 in 1 : vector<16x1xf32>, vector<16x31xf32> -> vector<16x32xf32>
    %cst_27 = arith.constant 1.000000e+09 : f32
    %93 = vector.broadcast %cst_27 : f32 to vector<16x32xf32>
    %94 = arith.select %25, %92, %93 : vector<16x32xi1>, vector<16x32xf32>
    %95 = vector.extract_strided_slice %89 {offsets = [0, 1], sizes = [16, 31], strides = [1, 1]} : vector<16x32xf32> to vector<16x31xf32>
    %96 = vector.extract_strided_slice %89 {offsets = [0, 0], sizes = [16, 1], strides = [1, 1]} : vector<16x32xf32> to vector<16x1xf32>
    %97 = tpu.concatenate %95, %96 in 1 : vector<16x31xf32>, vector<16x1xf32> -> vector<16x32xf32>
    %cst_28 = arith.constant 1.000000e+09 : f32
    %98 = vector.broadcast %cst_28 : f32 to vector<16x32xf32>
    %99 = arith.select %27, %97, %98 : vector<16x32xi1>, vector<16x32xf32>
    %100 = arith.minimumf %94, %99 : vector<16x32xf32>
    %101 = arith.minimumf %100, %89 : vector<16x32xf32>
    %102 = vector.extract_strided_slice %101 {offsets = [15, 0], sizes = [1, 32], strides = [1, 1]} : vector<16x32xf32> to vector<1x32xf32>
    %103 = vector.extract_strided_slice %101 {offsets = [0, 0], sizes = [15, 32], strides = [1, 1]} : vector<16x32xf32> to vector<15x32xf32>
    %104 = tpu.concatenate %102, %103 in 0 : vector<1x32xf32>, vector<15x32xf32> -> vector<16x32xf32>
    %cst_29 = arith.constant 1.000000e+09 : f32
    %105 = vector.broadcast %cst_29 : f32 to vector<16x32xf32>
    %106 = arith.select %21, %104, %105 : vector<16x32xi1>, vector<16x32xf32>
    %107 = vector.extract_strided_slice %101 {offsets = [1, 0], sizes = [15, 32], strides = [1, 1]} : vector<16x32xf32> to vector<15x32xf32>
    %108 = vector.extract_strided_slice %101 {offsets = [0, 0], sizes = [1, 32], strides = [1, 1]} : vector<16x32xf32> to vector<1x32xf32>
    %109 = tpu.concatenate %107, %108 in 0 : vector<15x32xf32>, vector<1x32xf32> -> vector<16x32xf32>
    %cst_30 = arith.constant 1.000000e+09 : f32
    %110 = vector.broadcast %cst_30 : f32 to vector<16x32xf32>
    %111 = arith.select %23, %109, %110 : vector<16x32xi1>, vector<16x32xf32>
    %112 = arith.minimumf %106, %111 : vector<16x32xf32>
    %113 = arith.minimumf %112, %100 : vector<16x32xf32>
    %114 = arith.addf %1, %113 : vector<16x32xf32>
    %115 = arith.minimumf %89, %114 : vector<16x32xf32>
    %116 = arith.select %82, %1, %115 : vector<16x32xi1>, vector<16x32xf32>
    %117 = vector.extract_strided_slice %116 {offsets = [0, 31], sizes = [16, 1], strides = [1, 1]} : vector<16x32xf32> to vector<16x1xf32>
    %118 = vector.extract_strided_slice %116 {offsets = [0, 0], sizes = [16, 31], strides = [1, 1]} : vector<16x32xf32> to vector<16x31xf32>
    %119 = tpu.concatenate %117, %118 in 1 : vector<16x1xf32>, vector<16x31xf32> -> vector<16x32xf32>
    %cst_31 = arith.constant 1.000000e+09 : f32
    %120 = vector.broadcast %cst_31 : f32 to vector<16x32xf32>
    %121 = arith.select %25, %119, %120 : vector<16x32xi1>, vector<16x32xf32>
    %122 = vector.extract_strided_slice %116 {offsets = [0, 1], sizes = [16, 31], strides = [1, 1]} : vector<16x32xf32> to vector<16x31xf32>
    %123 = vector.extract_strided_slice %116 {offsets = [0, 0], sizes = [16, 1], strides = [1, 1]} : vector<16x32xf32> to vector<16x1xf32>
    %124 = tpu.concatenate %122, %123 in 1 : vector<16x31xf32>, vector<16x1xf32> -> vector<16x32xf32>
    %cst_32 = arith.constant 1.000000e+09 : f32
    %125 = vector.broadcast %cst_32 : f32 to vector<16x32xf32>
    %126 = arith.select %27, %124, %125 : vector<16x32xi1>, vector<16x32xf32>
    %127 = arith.minimumf %121, %126 : vector<16x32xf32>
    %128 = arith.minimumf %127, %116 : vector<16x32xf32>
    %129 = vector.extract_strided_slice %128 {offsets = [15, 0], sizes = [1, 32], strides = [1, 1]} : vector<16x32xf32> to vector<1x32xf32>
    %130 = vector.extract_strided_slice %128 {offsets = [0, 0], sizes = [15, 32], strides = [1, 1]} : vector<16x32xf32> to vector<15x32xf32>
    %131 = tpu.concatenate %129, %130 in 0 : vector<1x32xf32>, vector<15x32xf32> -> vector<16x32xf32>
    %cst_33 = arith.constant 1.000000e+09 : f32
    %132 = vector.broadcast %cst_33 : f32 to vector<16x32xf32>
    %133 = arith.select %21, %131, %132 : vector<16x32xi1>, vector<16x32xf32>
    %134 = vector.extract_strided_slice %128 {offsets = [1, 0], sizes = [15, 32], strides = [1, 1]} : vector<16x32xf32> to vector<15x32xf32>
    %135 = vector.extract_strided_slice %128 {offsets = [0, 0], sizes = [1, 32], strides = [1, 1]} : vector<16x32xf32> to vector<1x32xf32>
    %136 = tpu.concatenate %134, %135 in 0 : vector<15x32xf32>, vector<1x32xf32> -> vector<16x32xf32>
    %cst_34 = arith.constant 1.000000e+09 : f32
    %137 = vector.broadcast %cst_34 : f32 to vector<16x32xf32>
    %138 = arith.select %23, %136, %137 : vector<16x32xi1>, vector<16x32xf32>
    %139 = arith.minimumf %133, %138 : vector<16x32xf32>
    %140 = arith.minimumf %139, %127 : vector<16x32xf32>
    %141 = arith.addf %1, %140 : vector<16x32xf32>
    %142 = arith.minimumf %116, %141 : vector<16x32xf32>
    %143 = arith.select %82, %1, %142 : vector<16x32xi1>, vector<16x32xf32>
    %144 = vector.extract_strided_slice %143 {offsets = [0, 31], sizes = [16, 1], strides = [1, 1]} : vector<16x32xf32> to vector<16x1xf32>
    %145 = vector.extract_strided_slice %143 {offsets = [0, 0], sizes = [16, 31], strides = [1, 1]} : vector<16x32xf32> to vector<16x31xf32>
    %146 = tpu.concatenate %144, %145 in 1 : vector<16x1xf32>, vector<16x31xf32> -> vector<16x32xf32>
    %cst_35 = arith.constant 1.000000e+09 : f32
    %147 = vector.broadcast %cst_35 : f32 to vector<16x32xf32>
    %148 = arith.select %25, %146, %147 : vector<16x32xi1>, vector<16x32xf32>
    %149 = vector.extract_strided_slice %143 {offsets = [0, 1], sizes = [16, 31], strides = [1, 1]} : vector<16x32xf32> to vector<16x31xf32>
    %150 = vector.extract_strided_slice %143 {offsets = [0, 0], sizes = [16, 1], strides = [1, 1]} : vector<16x32xf32> to vector<16x1xf32>
    %151 = tpu.concatenate %149, %150 in 1 : vector<16x31xf32>, vector<16x1xf32> -> vector<16x32xf32>
    %cst_36 = arith.constant 1.000000e+09 : f32
    %152 = vector.broadcast %cst_36 : f32 to vector<16x32xf32>
    %153 = arith.select %27, %151, %152 : vector<16x32xi1>, vector<16x32xf32>
    %154 = arith.minimumf %148, %153 : vector<16x32xf32>
    %155 = arith.minimumf %154, %143 : vector<16x32xf32>
    %156 = vector.extract_strided_slice %155 {offsets = [15, 0], sizes = [1, 32], strides = [1, 1]} : vector<16x32xf32> to vector<1x32xf32>
    %157 = vector.extract_strided_slice %155 {offsets = [0, 0], sizes = [15, 32], strides = [1, 1]} : vector<16x32xf32> to vector<15x32xf32>
    %158 = tpu.concatenate %156, %157 in 0 : vector<1x32xf32>, vector<15x32xf32> -> vector<16x32xf32>
    %cst_37 = arith.constant 1.000000e+09 : f32
    %159 = vector.broadcast %cst_37 : f32 to vector<16x32xf32>
    %160 = arith.select %21, %158, %159 : vector<16x32xi1>, vector<16x32xf32>
    %161 = vector.extract_strided_slice %155 {offsets = [1, 0], sizes = [15, 32], strides = [1, 1]} : vector<16x32xf32> to vector<15x32xf32>
    %162 = vector.extract_strided_slice %155 {offsets = [0, 0], sizes = [1, 32], strides = [1, 1]} : vector<16x32xf32> to vector<1x32xf32>
    %163 = tpu.concatenate %161, %162 in 0 : vector<15x32xf32>, vector<1x32xf32> -> vector<16x32xf32>
    %cst_38 = arith.constant 1.000000e+09 : f32
    %164 = vector.broadcast %cst_38 : f32 to vector<16x32xf32>
    %165 = arith.select %23, %163, %164 : vector<16x32xi1>, vector<16x32xf32>
    %166 = arith.minimumf %160, %165 : vector<16x32xf32>
    %167 = arith.minimumf %166, %154 : vector<16x32xf32>
    %168 = arith.addf %1, %167 : vector<16x32xf32>
    %169 = arith.minimumf %143, %168 : vector<16x32xf32>
    %170 = arith.select %82, %1, %169 : vector<16x32xi1>, vector<16x32xf32>
    %171 = vector.extract_strided_slice %170 {offsets = [0, 31], sizes = [16, 1], strides = [1, 1]} : vector<16x32xf32> to vector<16x1xf32>
    %172 = vector.extract_strided_slice %170 {offsets = [0, 0], sizes = [16, 31], strides = [1, 1]} : vector<16x32xf32> to vector<16x31xf32>
    %173 = tpu.concatenate %171, %172 in 1 : vector<16x1xf32>, vector<16x31xf32> -> vector<16x32xf32>
    %cst_39 = arith.constant 1.000000e+09 : f32
    %174 = vector.broadcast %cst_39 : f32 to vector<16x32xf32>
    %175 = arith.select %25, %173, %174 : vector<16x32xi1>, vector<16x32xf32>
    %176 = vector.extract_strided_slice %170 {offsets = [0, 1], sizes = [16, 31], strides = [1, 1]} : vector<16x32xf32> to vector<16x31xf32>
    %177 = vector.extract_strided_slice %170 {offsets = [0, 0], sizes = [16, 1], strides = [1, 1]} : vector<16x32xf32> to vector<16x1xf32>
    %178 = tpu.concatenate %176, %177 in 1 : vector<16x31xf32>, vector<16x1xf32> -> vector<16x32xf32>
    %cst_40 = arith.constant 1.000000e+09 : f32
    %179 = vector.broadcast %cst_40 : f32 to vector<16x32xf32>
    %180 = arith.select %27, %178, %179 : vector<16x32xi1>, vector<16x32xf32>
    %181 = arith.minimumf %175, %180 : vector<16x32xf32>
    %182 = arith.minimumf %181, %170 : vector<16x32xf32>
    %183 = vector.extract_strided_slice %182 {offsets = [15, 0], sizes = [1, 32], strides = [1, 1]} : vector<16x32xf32> to vector<1x32xf32>
    %184 = vector.extract_strided_slice %182 {offsets = [0, 0], sizes = [15, 32], strides = [1, 1]} : vector<16x32xf32> to vector<15x32xf32>
    %185 = tpu.concatenate %183, %184 in 0 : vector<1x32xf32>, vector<15x32xf32> -> vector<16x32xf32>
    %cst_41 = arith.constant 1.000000e+09 : f32
    %186 = vector.broadcast %cst_41 : f32 to vector<16x32xf32>
    %187 = arith.select %21, %185, %186 : vector<16x32xi1>, vector<16x32xf32>
    %188 = vector.extract_strided_slice %182 {offsets = [1, 0], sizes = [15, 32], strides = [1, 1]} : vector<16x32xf32> to vector<15x32xf32>
    %189 = vector.extract_strided_slice %182 {offsets = [0, 0], sizes = [1, 32], strides = [1, 1]} : vector<16x32xf32> to vector<1x32xf32>
    %190 = tpu.concatenate %188, %189 in 0 : vector<15x32xf32>, vector<1x32xf32> -> vector<16x32xf32>
    %cst_42 = arith.constant 1.000000e+09 : f32
    %191 = vector.broadcast %cst_42 : f32 to vector<16x32xf32>
    %192 = arith.select %23, %190, %191 : vector<16x32xi1>, vector<16x32xf32>
    %193 = arith.minimumf %187, %192 : vector<16x32xf32>
    %194 = arith.minimumf %193, %181 : vector<16x32xf32>
    %195 = arith.addf %1, %194 : vector<16x32xf32>
    %196 = arith.minimumf %170, %195 : vector<16x32xf32>
    %197 = arith.select %82, %1, %196 : vector<16x32xi1>, vector<16x32xf32>
    %198 = vector.extract_strided_slice %197 {offsets = [0, 31], sizes = [16, 1], strides = [1, 1]} : vector<16x32xf32> to vector<16x1xf32>
    %199 = vector.extract_strided_slice %197 {offsets = [0, 0], sizes = [16, 31], strides = [1, 1]} : vector<16x32xf32> to vector<16x31xf32>
    %200 = tpu.concatenate %198, %199 in 1 : vector<16x1xf32>, vector<16x31xf32> -> vector<16x32xf32>
    %cst_43 = arith.constant 1.000000e+09 : f32
    %201 = vector.broadcast %cst_43 : f32 to vector<16x32xf32>
    %202 = arith.select %25, %200, %201 : vector<16x32xi1>, vector<16x32xf32>
    %203 = vector.extract_strided_slice %197 {offsets = [0, 1], sizes = [16, 31], strides = [1, 1]} : vector<16x32xf32> to vector<16x31xf32>
    %204 = vector.extract_strided_slice %197 {offsets = [0, 0], sizes = [16, 1], strides = [1, 1]} : vector<16x32xf32> to vector<16x1xf32>
    %205 = tpu.concatenate %203, %204 in 1 : vector<16x31xf32>, vector<16x1xf32> -> vector<16x32xf32>
    %cst_44 = arith.constant 1.000000e+09 : f32
    %206 = vector.broadcast %cst_44 : f32 to vector<16x32xf32>
    %207 = arith.select %27, %205, %206 : vector<16x32xi1>, vector<16x32xf32>
    %208 = arith.minimumf %202, %207 : vector<16x32xf32>
    %209 = arith.minimumf %208, %197 : vector<16x32xf32>
    %210 = vector.extract_strided_slice %209 {offsets = [15, 0], sizes = [1, 32], strides = [1, 1]} : vector<16x32xf32> to vector<1x32xf32>
    %211 = vector.extract_strided_slice %209 {offsets = [0, 0], sizes = [15, 32], strides = [1, 1]} : vector<16x32xf32> to vector<15x32xf32>
    %212 = tpu.concatenate %210, %211 in 0 : vector<1x32xf32>, vector<15x32xf32> -> vector<16x32xf32>
    %cst_45 = arith.constant 1.000000e+09 : f32
    %213 = vector.broadcast %cst_45 : f32 to vector<16x32xf32>
    %214 = arith.select %21, %212, %213 : vector<16x32xi1>, vector<16x32xf32>
    %215 = vector.extract_strided_slice %209 {offsets = [1, 0], sizes = [15, 32], strides = [1, 1]} : vector<16x32xf32> to vector<15x32xf32>
    %216 = vector.extract_strided_slice %209 {offsets = [0, 0], sizes = [1, 32], strides = [1, 1]} : vector<16x32xf32> to vector<1x32xf32>
    %217 = tpu.concatenate %215, %216 in 0 : vector<15x32xf32>, vector<1x32xf32> -> vector<16x32xf32>
    %cst_46 = arith.constant 1.000000e+09 : f32
    %218 = vector.broadcast %cst_46 : f32 to vector<16x32xf32>
    %219 = arith.select %23, %217, %218 : vector<16x32xi1>, vector<16x32xf32>
    %220 = arith.minimumf %214, %219 : vector<16x32xf32>
    %221 = arith.minimumf %220, %208 : vector<16x32xf32>
    %222 = arith.addf %1, %221 : vector<16x32xf32>
    %223 = arith.minimumf %197, %222 : vector<16x32xf32>
    %224 = arith.select %82, %1, %223 : vector<16x32xi1>, vector<16x32xf32>
    %225 = vector.extract_strided_slice %224 {offsets = [0, 31], sizes = [16, 1], strides = [1, 1]} : vector<16x32xf32> to vector<16x1xf32>
    %226 = vector.extract_strided_slice %224 {offsets = [0, 0], sizes = [16, 31], strides = [1, 1]} : vector<16x32xf32> to vector<16x31xf32>
    %227 = tpu.concatenate %225, %226 in 1 : vector<16x1xf32>, vector<16x31xf32> -> vector<16x32xf32>
    %cst_47 = arith.constant 1.000000e+09 : f32
    %228 = vector.broadcast %cst_47 : f32 to vector<16x32xf32>
    %229 = arith.select %25, %227, %228 : vector<16x32xi1>, vector<16x32xf32>
    %230 = vector.extract_strided_slice %224 {offsets = [0, 1], sizes = [16, 31], strides = [1, 1]} : vector<16x32xf32> to vector<16x31xf32>
    %231 = vector.extract_strided_slice %224 {offsets = [0, 0], sizes = [16, 1], strides = [1, 1]} : vector<16x32xf32> to vector<16x1xf32>
    %232 = tpu.concatenate %230, %231 in 1 : vector<16x31xf32>, vector<16x1xf32> -> vector<16x32xf32>
    %cst_48 = arith.constant 1.000000e+09 : f32
    %233 = vector.broadcast %cst_48 : f32 to vector<16x32xf32>
    %234 = arith.select %27, %232, %233 : vector<16x32xi1>, vector<16x32xf32>
    %235 = arith.minimumf %229, %234 : vector<16x32xf32>
    %236 = arith.minimumf %235, %224 : vector<16x32xf32>
    %237 = vector.extract_strided_slice %236 {offsets = [15, 0], sizes = [1, 32], strides = [1, 1]} : vector<16x32xf32> to vector<1x32xf32>
    %238 = vector.extract_strided_slice %236 {offsets = [0, 0], sizes = [15, 32], strides = [1, 1]} : vector<16x32xf32> to vector<15x32xf32>
    %239 = tpu.concatenate %237, %238 in 0 : vector<1x32xf32>, vector<15x32xf32> -> vector<16x32xf32>
    %cst_49 = arith.constant 1.000000e+09 : f32
    %240 = vector.broadcast %cst_49 : f32 to vector<16x32xf32>
    %241 = arith.select %21, %239, %240 : vector<16x32xi1>, vector<16x32xf32>
    %242 = vector.extract_strided_slice %236 {offsets = [1, 0], sizes = [15, 32], strides = [1, 1]} : vector<16x32xf32> to vector<15x32xf32>
    %243 = vector.extract_strided_slice %236 {offsets = [0, 0], sizes = [1, 32], strides = [1, 1]} : vector<16x32xf32> to vector<1x32xf32>
    %244 = tpu.concatenate %242, %243 in 0 : vector<15x32xf32>, vector<1x32xf32> -> vector<16x32xf32>
    %cst_50 = arith.constant 1.000000e+09 : f32
    %245 = vector.broadcast %cst_50 : f32 to vector<16x32xf32>
    %246 = arith.select %23, %244, %245 : vector<16x32xi1>, vector<16x32xf32>
    %247 = arith.minimumf %241, %246 : vector<16x32xf32>
    %248 = arith.minimumf %247, %235 : vector<16x32xf32>
    %249 = arith.addf %1, %248 : vector<16x32xf32>
    %250 = arith.minimumf %224, %249 : vector<16x32xf32>
    %251 = arith.select %82, %1, %250 : vector<16x32xi1>, vector<16x32xf32>
    %252 = vector.extract_strided_slice %251 {offsets = [0, 31], sizes = [16, 1], strides = [1, 1]} : vector<16x32xf32> to vector<16x1xf32>
    %253 = vector.extract_strided_slice %251 {offsets = [0, 0], sizes = [16, 31], strides = [1, 1]} : vector<16x32xf32> to vector<16x31xf32>
    %254 = tpu.concatenate %252, %253 in 1 : vector<16x1xf32>, vector<16x31xf32> -> vector<16x32xf32>
    %cst_51 = arith.constant 1.000000e+09 : f32
    %255 = vector.broadcast %cst_51 : f32 to vector<16x32xf32>
    %256 = arith.select %25, %254, %255 : vector<16x32xi1>, vector<16x32xf32>
    %257 = vector.extract_strided_slice %251 {offsets = [0, 1], sizes = [16, 31], strides = [1, 1]} : vector<16x32xf32> to vector<16x31xf32>
    %258 = vector.extract_strided_slice %251 {offsets = [0, 0], sizes = [16, 1], strides = [1, 1]} : vector<16x32xf32> to vector<16x1xf32>
    %259 = tpu.concatenate %257, %258 in 1 : vector<16x31xf32>, vector<16x1xf32> -> vector<16x32xf32>
    %cst_52 = arith.constant 1.000000e+09 : f32
    %260 = vector.broadcast %cst_52 : f32 to vector<16x32xf32>
    %261 = arith.select %27, %259, %260 : vector<16x32xi1>, vector<16x32xf32>
    %262 = arith.minimumf %256, %261 : vector<16x32xf32>
    %263 = arith.minimumf %262, %251 : vector<16x32xf32>
    %264 = vector.extract_strided_slice %263 {offsets = [15, 0], sizes = [1, 32], strides = [1, 1]} : vector<16x32xf32> to vector<1x32xf32>
    %265 = vector.extract_strided_slice %263 {offsets = [0, 0], sizes = [15, 32], strides = [1, 1]} : vector<16x32xf32> to vector<15x32xf32>
    %266 = tpu.concatenate %264, %265 in 0 : vector<1x32xf32>, vector<15x32xf32> -> vector<16x32xf32>
    %cst_53 = arith.constant 1.000000e+09 : f32
    %267 = vector.broadcast %cst_53 : f32 to vector<16x32xf32>
    %268 = arith.select %21, %266, %267 : vector<16x32xi1>, vector<16x32xf32>
    %269 = vector.extract_strided_slice %263 {offsets = [1, 0], sizes = [15, 32], strides = [1, 1]} : vector<16x32xf32> to vector<15x32xf32>
    %270 = vector.extract_strided_slice %263 {offsets = [0, 0], sizes = [1, 32], strides = [1, 1]} : vector<16x32xf32> to vector<1x32xf32>
    %271 = tpu.concatenate %269, %270 in 0 : vector<15x32xf32>, vector<1x32xf32> -> vector<16x32xf32>
    %cst_54 = arith.constant 1.000000e+09 : f32
    %272 = vector.broadcast %cst_54 : f32 to vector<16x32xf32>
    %273 = arith.select %23, %271, %272 : vector<16x32xi1>, vector<16x32xf32>
    %274 = arith.minimumf %268, %273 : vector<16x32xf32>
    %275 = arith.minimumf %274, %262 : vector<16x32xf32>
    %276 = arith.addf %1, %275 : vector<16x32xf32>
    %277 = arith.minimumf %251, %276 : vector<16x32xf32>
    %278 = arith.select %82, %1, %277 : vector<16x32xi1>, vector<16x32xf32>
    %279 = vector.extract_strided_slice %278 {offsets = [0, 31], sizes = [16, 1], strides = [1, 1]} : vector<16x32xf32> to vector<16x1xf32>
    %280 = vector.extract_strided_slice %278 {offsets = [0, 0], sizes = [16, 31], strides = [1, 1]} : vector<16x32xf32> to vector<16x31xf32>
    %281 = tpu.concatenate %279, %280 in 1 : vector<16x1xf32>, vector<16x31xf32> -> vector<16x32xf32>
    %cst_55 = arith.constant 1.000000e+09 : f32
    %282 = vector.broadcast %cst_55 : f32 to vector<16x32xf32>
    %283 = arith.select %25, %281, %282 : vector<16x32xi1>, vector<16x32xf32>
    %284 = vector.extract_strided_slice %278 {offsets = [0, 1], sizes = [16, 31], strides = [1, 1]} : vector<16x32xf32> to vector<16x31xf32>
    %285 = vector.extract_strided_slice %278 {offsets = [0, 0], sizes = [16, 1], strides = [1, 1]} : vector<16x32xf32> to vector<16x1xf32>
    %286 = tpu.concatenate %284, %285 in 1 : vector<16x31xf32>, vector<16x1xf32> -> vector<16x32xf32>
    %cst_56 = arith.constant 1.000000e+09 : f32
    %287 = vector.broadcast %cst_56 : f32 to vector<16x32xf32>
    %288 = arith.select %27, %286, %287 : vector<16x32xi1>, vector<16x32xf32>
    %289 = arith.minimumf %283, %288 : vector<16x32xf32>
    %290 = arith.minimumf %289, %278 : vector<16x32xf32>
    %291 = vector.extract_strided_slice %290 {offsets = [15, 0], sizes = [1, 32], strides = [1, 1]} : vector<16x32xf32> to vector<1x32xf32>
    %292 = vector.extract_strided_slice %290 {offsets = [0, 0], sizes = [15, 32], strides = [1, 1]} : vector<16x32xf32> to vector<15x32xf32>
    %293 = tpu.concatenate %291, %292 in 0 : vector<1x32xf32>, vector<15x32xf32> -> vector<16x32xf32>
    %cst_57 = arith.constant 1.000000e+09 : f32
    %294 = vector.broadcast %cst_57 : f32 to vector<16x32xf32>
    %295 = arith.select %21, %293, %294 : vector<16x32xi1>, vector<16x32xf32>
    %296 = vector.extract_strided_slice %290 {offsets = [1, 0], sizes = [15, 32], strides = [1, 1]} : vector<16x32xf32> to vector<15x32xf32>
    %297 = vector.extract_strided_slice %290 {offsets = [0, 0], sizes = [1, 32], strides = [1, 1]} : vector<16x32xf32> to vector<1x32xf32>
    %298 = tpu.concatenate %296, %297 in 0 : vector<15x32xf32>, vector<1x32xf32> -> vector<16x32xf32>
    %cst_58 = arith.constant 1.000000e+09 : f32
    %299 = vector.broadcast %cst_58 : f32 to vector<16x32xf32>
    %300 = arith.select %23, %298, %299 : vector<16x32xi1>, vector<16x32xf32>
    %301 = arith.minimumf %295, %300 : vector<16x32xf32>
    %302 = arith.minimumf %301, %289 : vector<16x32xf32>
    %303 = arith.addf %1, %302 : vector<16x32xf32>
    %304 = arith.minimumf %278, %303 : vector<16x32xf32>
    %305 = arith.select %82, %1, %304 : vector<16x32xi1>, vector<16x32xf32>
    %c8_i32 = arith.constant 8 : i32
    %306:3 = scf.while (%arg6 = %c8_i32, %arg7 = %305, %arg8 = %89) : (i32, vector<16x32xf32>, vector<16x32xf32>) -> (i32, vector<16x32xf32>, vector<16x32xf32>) {
      %c256_i32 = arith.constant 256 : i32
      %404 = arith.cmpi slt, %arg6, %c256_i32 : i32
      %405 = arith.subf %arg8, %arg7 : vector<16x32xf32>
      %406 = vector.shape_cast %405 : vector<16x32xf32> to vector<1x16x32xf32>
      %cst_82 = arith.constant dense<0xFF800000> : vector<1xf32>
      %407 = vector.multi_reduction <maximumf>, %406, %cst_82 [1, 2] : vector<1x16x32xf32> to vector<1xf32>
      %408 = vector.shape_cast %407 : vector<1xf32> to vector<1x1x1xf32>
      %409 = vector.extract %408[0, 0, 0] : f32 from vector<1x1x1xf32>
      %cst_83 = arith.constant 0.000000e+00 : f32
      %410 = arith.cmpf ogt, %409, %cst_83 : f32
      %411 = arith.andi %404, %410 : i1
      scf.condition(%411) %arg6, %arg7, %arg8 : i32, vector<16x32xf32>, vector<16x32xf32>
    } do {
    ^bb0(%arg6: i32, %arg7: vector<16x32xf32>, %arg8: vector<16x32xf32>):
      %c8_i32_82 = arith.constant 8 : i32
      %404 = arith.addi %arg6, %c8_i32_82 : i32
      %405 = vector.extract_strided_slice %arg7 {offsets = [0, 31], sizes = [16, 1], strides = [1, 1]} : vector<16x32xf32> to vector<16x1xf32>
      %406 = vector.extract_strided_slice %arg7 {offsets = [0, 0], sizes = [16, 31], strides = [1, 1]} : vector<16x32xf32> to vector<16x31xf32>
      %407 = tpu.concatenate %405, %406 in 1 : vector<16x1xf32>, vector<16x31xf32> -> vector<16x32xf32>
      %cst_83 = arith.constant 1.000000e+09 : f32
      %408 = vector.broadcast %cst_83 : f32 to vector<16x32xf32>
      %409 = arith.select %25, %407, %408 : vector<16x32xi1>, vector<16x32xf32>
      %410 = vector.extract_strided_slice %arg7 {offsets = [0, 1], sizes = [16, 31], strides = [1, 1]} : vector<16x32xf32> to vector<16x31xf32>
      %411 = vector.extract_strided_slice %arg7 {offsets = [0, 0], sizes = [16, 1], strides = [1, 1]} : vector<16x32xf32> to vector<16x1xf32>
      %412 = tpu.concatenate %410, %411 in 1 : vector<16x31xf32>, vector<16x1xf32> -> vector<16x32xf32>
      %cst_84 = arith.constant 1.000000e+09 : f32
      %413 = vector.broadcast %cst_84 : f32 to vector<16x32xf32>
      %414 = arith.select %27, %412, %413 : vector<16x32xi1>, vector<16x32xf32>
      %415 = arith.minimumf %409, %414 : vector<16x32xf32>
      %416 = arith.minimumf %415, %arg7 : vector<16x32xf32>
      %417 = vector.extract_strided_slice %416 {offsets = [15, 0], sizes = [1, 32], strides = [1, 1]} : vector<16x32xf32> to vector<1x32xf32>
      %418 = vector.extract_strided_slice %416 {offsets = [0, 0], sizes = [15, 32], strides = [1, 1]} : vector<16x32xf32> to vector<15x32xf32>
      %419 = tpu.concatenate %417, %418 in 0 : vector<1x32xf32>, vector<15x32xf32> -> vector<16x32xf32>
      %cst_85 = arith.constant 1.000000e+09 : f32
      %420 = vector.broadcast %cst_85 : f32 to vector<16x32xf32>
      %421 = arith.select %21, %419, %420 : vector<16x32xi1>, vector<16x32xf32>
      %422 = vector.extract_strided_slice %416 {offsets = [1, 0], sizes = [15, 32], strides = [1, 1]} : vector<16x32xf32> to vector<15x32xf32>
      %423 = vector.extract_strided_slice %416 {offsets = [0, 0], sizes = [1, 32], strides = [1, 1]} : vector<16x32xf32> to vector<1x32xf32>
      %424 = tpu.concatenate %422, %423 in 0 : vector<15x32xf32>, vector<1x32xf32> -> vector<16x32xf32>
      %cst_86 = arith.constant 1.000000e+09 : f32
      %425 = vector.broadcast %cst_86 : f32 to vector<16x32xf32>
      %426 = arith.select %23, %424, %425 : vector<16x32xi1>, vector<16x32xf32>
      %427 = arith.minimumf %421, %426 : vector<16x32xf32>
      %428 = arith.minimumf %427, %415 : vector<16x32xf32>
      %429 = arith.addf %1, %428 : vector<16x32xf32>
      %430 = arith.minimumf %arg7, %429 : vector<16x32xf32>
      %431 = arith.select %82, %1, %430 : vector<16x32xi1>, vector<16x32xf32>
      %432 = vector.extract_strided_slice %431 {offsets = [0, 31], sizes = [16, 1], strides = [1, 1]} : vector<16x32xf32> to vector<16x1xf32>
      %433 = vector.extract_strided_slice %431 {offsets = [0, 0], sizes = [16, 31], strides = [1, 1]} : vector<16x32xf32> to vector<16x31xf32>
      %434 = tpu.concatenate %432, %433 in 1 : vector<16x1xf32>, vector<16x31xf32> -> vector<16x32xf32>
      %cst_87 = arith.constant 1.000000e+09 : f32
      %435 = vector.broadcast %cst_87 : f32 to vector<16x32xf32>
      %436 = arith.select %25, %434, %435 : vector<16x32xi1>, vector<16x32xf32>
      %437 = vector.extract_strided_slice %431 {offsets = [0, 1], sizes = [16, 31], strides = [1, 1]} : vector<16x32xf32> to vector<16x31xf32>
      %438 = vector.extract_strided_slice %431 {offsets = [0, 0], sizes = [16, 1], strides = [1, 1]} : vector<16x32xf32> to vector<16x1xf32>
      %439 = tpu.concatenate %437, %438 in 1 : vector<16x31xf32>, vector<16x1xf32> -> vector<16x32xf32>
      %cst_88 = arith.constant 1.000000e+09 : f32
      %440 = vector.broadcast %cst_88 : f32 to vector<16x32xf32>
      %441 = arith.select %27, %439, %440 : vector<16x32xi1>, vector<16x32xf32>
      %442 = arith.minimumf %436, %441 : vector<16x32xf32>
      %443 = arith.minimumf %442, %431 : vector<16x32xf32>
      %444 = vector.extract_strided_slice %443 {offsets = [15, 0], sizes = [1, 32], strides = [1, 1]} : vector<16x32xf32> to vector<1x32xf32>
      %445 = vector.extract_strided_slice %443 {offsets = [0, 0], sizes = [15, 32], strides = [1, 1]} : vector<16x32xf32> to vector<15x32xf32>
      %446 = tpu.concatenate %444, %445 in 0 : vector<1x32xf32>, vector<15x32xf32> -> vector<16x32xf32>
      %cst_89 = arith.constant 1.000000e+09 : f32
      %447 = vector.broadcast %cst_89 : f32 to vector<16x32xf32>
      %448 = arith.select %21, %446, %447 : vector<16x32xi1>, vector<16x32xf32>
      %449 = vector.extract_strided_slice %443 {offsets = [1, 0], sizes = [15, 32], strides = [1, 1]} : vector<16x32xf32> to vector<15x32xf32>
      %450 = vector.extract_strided_slice %443 {offsets = [0, 0], sizes = [1, 32], strides = [1, 1]} : vector<16x32xf32> to vector<1x32xf32>
      %451 = tpu.concatenate %449, %450 in 0 : vector<15x32xf32>, vector<1x32xf32> -> vector<16x32xf32>
      %cst_90 = arith.constant 1.000000e+09 : f32
      %452 = vector.broadcast %cst_90 : f32 to vector<16x32xf32>
      %453 = arith.select %23, %451, %452 : vector<16x32xi1>, vector<16x32xf32>
      %454 = arith.minimumf %448, %453 : vector<16x32xf32>
      %455 = arith.minimumf %454, %442 : vector<16x32xf32>
      %456 = arith.addf %1, %455 : vector<16x32xf32>
      %457 = arith.minimumf %431, %456 : vector<16x32xf32>
      %458 = arith.select %82, %1, %457 : vector<16x32xi1>, vector<16x32xf32>
      %459 = vector.extract_strided_slice %458 {offsets = [0, 31], sizes = [16, 1], strides = [1, 1]} : vector<16x32xf32> to vector<16x1xf32>
      %460 = vector.extract_strided_slice %458 {offsets = [0, 0], sizes = [16, 31], strides = [1, 1]} : vector<16x32xf32> to vector<16x31xf32>
      %461 = tpu.concatenate %459, %460 in 1 : vector<16x1xf32>, vector<16x31xf32> -> vector<16x32xf32>
      %cst_91 = arith.constant 1.000000e+09 : f32
      %462 = vector.broadcast %cst_91 : f32 to vector<16x32xf32>
      %463 = arith.select %25, %461, %462 : vector<16x32xi1>, vector<16x32xf32>
      %464 = vector.extract_strided_slice %458 {offsets = [0, 1], sizes = [16, 31], strides = [1, 1]} : vector<16x32xf32> to vector<16x31xf32>
      %465 = vector.extract_strided_slice %458 {offsets = [0, 0], sizes = [16, 1], strides = [1, 1]} : vector<16x32xf32> to vector<16x1xf32>
      %466 = tpu.concatenate %464, %465 in 1 : vector<16x31xf32>, vector<16x1xf32> -> vector<16x32xf32>
      %cst_92 = arith.constant 1.000000e+09 : f32
      %467 = vector.broadcast %cst_92 : f32 to vector<16x32xf32>
      %468 = arith.select %27, %466, %467 : vector<16x32xi1>, vector<16x32xf32>
      %469 = arith.minimumf %463, %468 : vector<16x32xf32>
      %470 = arith.minimumf %469, %458 : vector<16x32xf32>
      %471 = vector.extract_strided_slice %470 {offsets = [15, 0], sizes = [1, 32], strides = [1, 1]} : vector<16x32xf32> to vector<1x32xf32>
      %472 = vector.extract_strided_slice %470 {offsets = [0, 0], sizes = [15, 32], strides = [1, 1]} : vector<16x32xf32> to vector<15x32xf32>
      %473 = tpu.concatenate %471, %472 in 0 : vector<1x32xf32>, vector<15x32xf32> -> vector<16x32xf32>
      %cst_93 = arith.constant 1.000000e+09 : f32
      %474 = vector.broadcast %cst_93 : f32 to vector<16x32xf32>
      %475 = arith.select %21, %473, %474 : vector<16x32xi1>, vector<16x32xf32>
      %476 = vector.extract_strided_slice %470 {offsets = [1, 0], sizes = [15, 32], strides = [1, 1]} : vector<16x32xf32> to vector<15x32xf32>
      %477 = vector.extract_strided_slice %470 {offsets = [0, 0], sizes = [1, 32], strides = [1, 1]} : vector<16x32xf32> to vector<1x32xf32>
      %478 = tpu.concatenate %476, %477 in 0 : vector<15x32xf32>, vector<1x32xf32> -> vector<16x32xf32>
      %cst_94 = arith.constant 1.000000e+09 : f32
      %479 = vector.broadcast %cst_94 : f32 to vector<16x32xf32>
      %480 = arith.select %23, %478, %479 : vector<16x32xi1>, vector<16x32xf32>
      %481 = arith.minimumf %475, %480 : vector<16x32xf32>
      %482 = arith.minimumf %481, %469 : vector<16x32xf32>
      %483 = arith.addf %1, %482 : vector<16x32xf32>
      %484 = arith.minimumf %458, %483 : vector<16x32xf32>
      %485 = arith.select %82, %1, %484 : vector<16x32xi1>, vector<16x32xf32>
      %486 = vector.extract_strided_slice %485 {offsets = [0, 31], sizes = [16, 1], strides = [1, 1]} : vector<16x32xf32> to vector<16x1xf32>
      %487 = vector.extract_strided_slice %485 {offsets = [0, 0], sizes = [16, 31], strides = [1, 1]} : vector<16x32xf32> to vector<16x31xf32>
      %488 = tpu.concatenate %486, %487 in 1 : vector<16x1xf32>, vector<16x31xf32> -> vector<16x32xf32>
      %cst_95 = arith.constant 1.000000e+09 : f32
      %489 = vector.broadcast %cst_95 : f32 to vector<16x32xf32>
      %490 = arith.select %25, %488, %489 : vector<16x32xi1>, vector<16x32xf32>
      %491 = vector.extract_strided_slice %485 {offsets = [0, 1], sizes = [16, 31], strides = [1, 1]} : vector<16x32xf32> to vector<16x31xf32>
      %492 = vector.extract_strided_slice %485 {offsets = [0, 0], sizes = [16, 1], strides = [1, 1]} : vector<16x32xf32> to vector<16x1xf32>
      %493 = tpu.concatenate %491, %492 in 1 : vector<16x31xf32>, vector<16x1xf32> -> vector<16x32xf32>
      %cst_96 = arith.constant 1.000000e+09 : f32
      %494 = vector.broadcast %cst_96 : f32 to vector<16x32xf32>
      %495 = arith.select %27, %493, %494 : vector<16x32xi1>, vector<16x32xf32>
      %496 = arith.minimumf %490, %495 : vector<16x32xf32>
      %497 = arith.minimumf %496, %485 : vector<16x32xf32>
      %498 = vector.extract_strided_slice %497 {offsets = [15, 0], sizes = [1, 32], strides = [1, 1]} : vector<16x32xf32> to vector<1x32xf32>
      %499 = vector.extract_strided_slice %497 {offsets = [0, 0], sizes = [15, 32], strides = [1, 1]} : vector<16x32xf32> to vector<15x32xf32>
      %500 = tpu.concatenate %498, %499 in 0 : vector<1x32xf32>, vector<15x32xf32> -> vector<16x32xf32>
      %cst_97 = arith.constant 1.000000e+09 : f32
      %501 = vector.broadcast %cst_97 : f32 to vector<16x32xf32>
      %502 = arith.select %21, %500, %501 : vector<16x32xi1>, vector<16x32xf32>
      %503 = vector.extract_strided_slice %497 {offsets = [1, 0], sizes = [15, 32], strides = [1, 1]} : vector<16x32xf32> to vector<15x32xf32>
      %504 = vector.extract_strided_slice %497 {offsets = [0, 0], sizes = [1, 32], strides = [1, 1]} : vector<16x32xf32> to vector<1x32xf32>
      %505 = tpu.concatenate %503, %504 in 0 : vector<15x32xf32>, vector<1x32xf32> -> vector<16x32xf32>
      %cst_98 = arith.constant 1.000000e+09 : f32
      %506 = vector.broadcast %cst_98 : f32 to vector<16x32xf32>
      %507 = arith.select %23, %505, %506 : vector<16x32xi1>, vector<16x32xf32>
      %508 = arith.minimumf %502, %507 : vector<16x32xf32>
      %509 = arith.minimumf %508, %496 : vector<16x32xf32>
      %510 = arith.addf %1, %509 : vector<16x32xf32>
      %511 = arith.minimumf %485, %510 : vector<16x32xf32>
      %512 = arith.select %82, %1, %511 : vector<16x32xi1>, vector<16x32xf32>
      %513 = vector.extract_strided_slice %512 {offsets = [0, 31], sizes = [16, 1], strides = [1, 1]} : vector<16x32xf32> to vector<16x1xf32>
      %514 = vector.extract_strided_slice %512 {offsets = [0, 0], sizes = [16, 31], strides = [1, 1]} : vector<16x32xf32> to vector<16x31xf32>
      %515 = tpu.concatenate %513, %514 in 1 : vector<16x1xf32>, vector<16x31xf32> -> vector<16x32xf32>
      %cst_99 = arith.constant 1.000000e+09 : f32
      %516 = vector.broadcast %cst_99 : f32 to vector<16x32xf32>
      %517 = arith.select %25, %515, %516 : vector<16x32xi1>, vector<16x32xf32>
      %518 = vector.extract_strided_slice %512 {offsets = [0, 1], sizes = [16, 31], strides = [1, 1]} : vector<16x32xf32> to vector<16x31xf32>
      %519 = vector.extract_strided_slice %512 {offsets = [0, 0], sizes = [16, 1], strides = [1, 1]} : vector<16x32xf32> to vector<16x1xf32>
      %520 = tpu.concatenate %518, %519 in 1 : vector<16x31xf32>, vector<16x1xf32> -> vector<16x32xf32>
      %cst_100 = arith.constant 1.000000e+09 : f32
      %521 = vector.broadcast %cst_100 : f32 to vector<16x32xf32>
      %522 = arith.select %27, %520, %521 : vector<16x32xi1>, vector<16x32xf32>
      %523 = arith.minimumf %517, %522 : vector<16x32xf32>
      %524 = arith.minimumf %523, %512 : vector<16x32xf32>
      %525 = vector.extract_strided_slice %524 {offsets = [15, 0], sizes = [1, 32], strides = [1, 1]} : vector<16x32xf32> to vector<1x32xf32>
      %526 = vector.extract_strided_slice %524 {offsets = [0, 0], sizes = [15, 32], strides = [1, 1]} : vector<16x32xf32> to vector<15x32xf32>
      %527 = tpu.concatenate %525, %526 in 0 : vector<1x32xf32>, vector<15x32xf32> -> vector<16x32xf32>
      %cst_101 = arith.constant 1.000000e+09 : f32
      %528 = vector.broadcast %cst_101 : f32 to vector<16x32xf32>
      %529 = arith.select %21, %527, %528 : vector<16x32xi1>, vector<16x32xf32>
      %530 = vector.extract_strided_slice %524 {offsets = [1, 0], sizes = [15, 32], strides = [1, 1]} : vector<16x32xf32> to vector<15x32xf32>
      %531 = vector.extract_strided_slice %524 {offsets = [0, 0], sizes = [1, 32], strides = [1, 1]} : vector<16x32xf32> to vector<1x32xf32>
      %532 = tpu.concatenate %530, %531 in 0 : vector<15x32xf32>, vector<1x32xf32> -> vector<16x32xf32>
      %cst_102 = arith.constant 1.000000e+09 : f32
      %533 = vector.broadcast %cst_102 : f32 to vector<16x32xf32>
      %534 = arith.select %23, %532, %533 : vector<16x32xi1>, vector<16x32xf32>
      %535 = arith.minimumf %529, %534 : vector<16x32xf32>
      %536 = arith.minimumf %535, %523 : vector<16x32xf32>
      %537 = arith.addf %1, %536 : vector<16x32xf32>
      %538 = arith.minimumf %512, %537 : vector<16x32xf32>
      %539 = arith.select %82, %1, %538 : vector<16x32xi1>, vector<16x32xf32>
      %540 = vector.extract_strided_slice %539 {offsets = [0, 31], sizes = [16, 1], strides = [1, 1]} : vector<16x32xf32> to vector<16x1xf32>
      %541 = vector.extract_strided_slice %539 {offsets = [0, 0], sizes = [16, 31], strides = [1, 1]} : vector<16x32xf32> to vector<16x31xf32>
      %542 = tpu.concatenate %540, %541 in 1 : vector<16x1xf32>, vector<16x31xf32> -> vector<16x32xf32>
      %cst_103 = arith.constant 1.000000e+09 : f32
      %543 = vector.broadcast %cst_103 : f32 to vector<16x32xf32>
      %544 = arith.select %25, %542, %543 : vector<16x32xi1>, vector<16x32xf32>
      %545 = vector.extract_strided_slice %539 {offsets = [0, 1], sizes = [16, 31], strides = [1, 1]} : vector<16x32xf32> to vector<16x31xf32>
      %546 = vector.extract_strided_slice %539 {offsets = [0, 0], sizes = [16, 1], strides = [1, 1]} : vector<16x32xf32> to vector<16x1xf32>
      %547 = tpu.concatenate %545, %546 in 1 : vector<16x31xf32>, vector<16x1xf32> -> vector<16x32xf32>
      %cst_104 = arith.constant 1.000000e+09 : f32
      %548 = vector.broadcast %cst_104 : f32 to vector<16x32xf32>
      %549 = arith.select %27, %547, %548 : vector<16x32xi1>, vector<16x32xf32>
      %550 = arith.minimumf %544, %549 : vector<16x32xf32>
      %551 = arith.minimumf %550, %539 : vector<16x32xf32>
      %552 = vector.extract_strided_slice %551 {offsets = [15, 0], sizes = [1, 32], strides = [1, 1]} : vector<16x32xf32> to vector<1x32xf32>
      %553 = vector.extract_strided_slice %551 {offsets = [0, 0], sizes = [15, 32], strides = [1, 1]} : vector<16x32xf32> to vector<15x32xf32>
      %554 = tpu.concatenate %552, %553 in 0 : vector<1x32xf32>, vector<15x32xf32> -> vector<16x32xf32>
      %cst_105 = arith.constant 1.000000e+09 : f32
      %555 = vector.broadcast %cst_105 : f32 to vector<16x32xf32>
      %556 = arith.select %21, %554, %555 : vector<16x32xi1>, vector<16x32xf32>
      %557 = vector.extract_strided_slice %551 {offsets = [1, 0], sizes = [15, 32], strides = [1, 1]} : vector<16x32xf32> to vector<15x32xf32>
      %558 = vector.extract_strided_slice %551 {offsets = [0, 0], sizes = [1, 32], strides = [1, 1]} : vector<16x32xf32> to vector<1x32xf32>
      %559 = tpu.concatenate %557, %558 in 0 : vector<15x32xf32>, vector<1x32xf32> -> vector<16x32xf32>
      %cst_106 = arith.constant 1.000000e+09 : f32
      %560 = vector.broadcast %cst_106 : f32 to vector<16x32xf32>
      %561 = arith.select %23, %559, %560 : vector<16x32xi1>, vector<16x32xf32>
      %562 = arith.minimumf %556, %561 : vector<16x32xf32>
      %563 = arith.minimumf %562, %550 : vector<16x32xf32>
      %564 = arith.addf %1, %563 : vector<16x32xf32>
      %565 = arith.minimumf %539, %564 : vector<16x32xf32>
      %566 = arith.select %82, %1, %565 : vector<16x32xi1>, vector<16x32xf32>
      %567 = vector.extract_strided_slice %566 {offsets = [0, 31], sizes = [16, 1], strides = [1, 1]} : vector<16x32xf32> to vector<16x1xf32>
      %568 = vector.extract_strided_slice %566 {offsets = [0, 0], sizes = [16, 31], strides = [1, 1]} : vector<16x32xf32> to vector<16x31xf32>
      %569 = tpu.concatenate %567, %568 in 1 : vector<16x1xf32>, vector<16x31xf32> -> vector<16x32xf32>
      %cst_107 = arith.constant 1.000000e+09 : f32
      %570 = vector.broadcast %cst_107 : f32 to vector<16x32xf32>
      %571 = arith.select %25, %569, %570 : vector<16x32xi1>, vector<16x32xf32>
      %572 = vector.extract_strided_slice %566 {offsets = [0, 1], sizes = [16, 31], strides = [1, 1]} : vector<16x32xf32> to vector<16x31xf32>
      %573 = vector.extract_strided_slice %566 {offsets = [0, 0], sizes = [16, 1], strides = [1, 1]} : vector<16x32xf32> to vector<16x1xf32>
      %574 = tpu.concatenate %572, %573 in 1 : vector<16x31xf32>, vector<16x1xf32> -> vector<16x32xf32>
      %cst_108 = arith.constant 1.000000e+09 : f32
      %575 = vector.broadcast %cst_108 : f32 to vector<16x32xf32>
      %576 = arith.select %27, %574, %575 : vector<16x32xi1>, vector<16x32xf32>
      %577 = arith.minimumf %571, %576 : vector<16x32xf32>
      %578 = arith.minimumf %577, %566 : vector<16x32xf32>
      %579 = vector.extract_strided_slice %578 {offsets = [15, 0], sizes = [1, 32], strides = [1, 1]} : vector<16x32xf32> to vector<1x32xf32>
      %580 = vector.extract_strided_slice %578 {offsets = [0, 0], sizes = [15, 32], strides = [1, 1]} : vector<16x32xf32> to vector<15x32xf32>
      %581 = tpu.concatenate %579, %580 in 0 : vector<1x32xf32>, vector<15x32xf32> -> vector<16x32xf32>
      %cst_109 = arith.constant 1.000000e+09 : f32
      %582 = vector.broadcast %cst_109 : f32 to vector<16x32xf32>
      %583 = arith.select %21, %581, %582 : vector<16x32xi1>, vector<16x32xf32>
      %584 = vector.extract_strided_slice %578 {offsets = [1, 0], sizes = [15, 32], strides = [1, 1]} : vector<16x32xf32> to vector<15x32xf32>
      %585 = vector.extract_strided_slice %578 {offsets = [0, 0], sizes = [1, 32], strides = [1, 1]} : vector<16x32xf32> to vector<1x32xf32>
      %586 = tpu.concatenate %584, %585 in 0 : vector<15x32xf32>, vector<1x32xf32> -> vector<16x32xf32>
      %cst_110 = arith.constant 1.000000e+09 : f32
      %587 = vector.broadcast %cst_110 : f32 to vector<16x32xf32>
      %588 = arith.select %23, %586, %587 : vector<16x32xi1>, vector<16x32xf32>
      %589 = arith.minimumf %583, %588 : vector<16x32xf32>
      %590 = arith.minimumf %589, %577 : vector<16x32xf32>
      %591 = arith.addf %1, %590 : vector<16x32xf32>
      %592 = arith.minimumf %566, %591 : vector<16x32xf32>
      %593 = arith.select %82, %1, %592 : vector<16x32xi1>, vector<16x32xf32>
      %594 = vector.extract_strided_slice %593 {offsets = [0, 31], sizes = [16, 1], strides = [1, 1]} : vector<16x32xf32> to vector<16x1xf32>
      %595 = vector.extract_strided_slice %593 {offsets = [0, 0], sizes = [16, 31], strides = [1, 1]} : vector<16x32xf32> to vector<16x31xf32>
      %596 = tpu.concatenate %594, %595 in 1 : vector<16x1xf32>, vector<16x31xf32> -> vector<16x32xf32>
      %cst_111 = arith.constant 1.000000e+09 : f32
      %597 = vector.broadcast %cst_111 : f32 to vector<16x32xf32>
      %598 = arith.select %25, %596, %597 : vector<16x32xi1>, vector<16x32xf32>
      %599 = vector.extract_strided_slice %593 {offsets = [0, 1], sizes = [16, 31], strides = [1, 1]} : vector<16x32xf32> to vector<16x31xf32>
      %600 = vector.extract_strided_slice %593 {offsets = [0, 0], sizes = [16, 1], strides = [1, 1]} : vector<16x32xf32> to vector<16x1xf32>
      %601 = tpu.concatenate %599, %600 in 1 : vector<16x31xf32>, vector<16x1xf32> -> vector<16x32xf32>
      %cst_112 = arith.constant 1.000000e+09 : f32
      %602 = vector.broadcast %cst_112 : f32 to vector<16x32xf32>
      %603 = arith.select %27, %601, %602 : vector<16x32xi1>, vector<16x32xf32>
      %604 = arith.minimumf %598, %603 : vector<16x32xf32>
      %605 = arith.minimumf %604, %593 : vector<16x32xf32>
      %606 = vector.extract_strided_slice %605 {offsets = [15, 0], sizes = [1, 32], strides = [1, 1]} : vector<16x32xf32> to vector<1x32xf32>
      %607 = vector.extract_strided_slice %605 {offsets = [0, 0], sizes = [15, 32], strides = [1, 1]} : vector<16x32xf32> to vector<15x32xf32>
      %608 = tpu.concatenate %606, %607 in 0 : vector<1x32xf32>, vector<15x32xf32> -> vector<16x32xf32>
      %cst_113 = arith.constant 1.000000e+09 : f32
      %609 = vector.broadcast %cst_113 : f32 to vector<16x32xf32>
      %610 = arith.select %21, %608, %609 : vector<16x32xi1>, vector<16x32xf32>
      %611 = vector.extract_strided_slice %605 {offsets = [1, 0], sizes = [15, 32], strides = [1, 1]} : vector<16x32xf32> to vector<15x32xf32>
      %612 = vector.extract_strided_slice %605 {offsets = [0, 0], sizes = [1, 32], strides = [1, 1]} : vector<16x32xf32> to vector<1x32xf32>
      %613 = tpu.concatenate %611, %612 in 0 : vector<15x32xf32>, vector<1x32xf32> -> vector<16x32xf32>
      %cst_114 = arith.constant 1.000000e+09 : f32
      %614 = vector.broadcast %cst_114 : f32 to vector<16x32xf32>
      %615 = arith.select %23, %613, %614 : vector<16x32xi1>, vector<16x32xf32>
      %616 = arith.minimumf %610, %615 : vector<16x32xf32>
      %617 = arith.minimumf %616, %604 : vector<16x32xf32>
      %618 = arith.addf %1, %617 : vector<16x32xf32>
      %619 = arith.minimumf %593, %618 : vector<16x32xf32>
      %620 = arith.select %82, %1, %619 : vector<16x32xi1>, vector<16x32xf32>
      scf.yield %404, %620, %arg7 : i32, vector<16x32xf32>, vector<16x32xf32>
    }
    %cst_59 = arith.constant 5.000000e+08 : f32
    %307 = vector.broadcast %cst_59 : f32 to vector<16x32xf32>
    %308 = arith.cmpf olt, %306#1, %307 : vector<16x32xf32>
    %cst_60 = arith.constant 1.000000e+00 : f32
    %cst_61 = arith.constant 0.000000e+00 : f32
    %309 = vector.broadcast %cst_60 : f32 to vector<16x32xf32>
    %310 = vector.broadcast %cst_61 : f32 to vector<16x32xf32>
    %311 = arith.select %308, %309, %310 : vector<16x32xi1>, vector<16x32xf32>
    %c0_62 = arith.constant 0 : index
    %c0_63 = arith.constant 0 : index
    %c0_64 = arith.constant 0 : index
    %312 = vector.load %arg5[%c0_62, %c0_63, %c0_64] : memref<1x16x32xf32, #tpu.memory_space<vmem>>, vector<1x16x32xf32>
    %313 = vector.shape_cast %312 : vector<1x16x32xf32> to vector<16x32xf32>
    %314 = vector.shape_cast %311 : vector<16x32xf32> to vector<1x16x32xf32>
    tpu.vector_store %arg5[%c0_62, %c0_63, %c0_64], %314 {strides = array<i32>} : memref<1x16x32xf32, #tpu.memory_space<vmem>>, vector<1x16x32xf32>,
    %cst_65 = arith.constant 1.000000e+09 : f32
    %315 = vector.broadcast %cst_65 : f32 to vector<16x32xf32>
    %c0_i32_66 = arith.constant 0 : i32
    %316 = vector.broadcast %c0_i32_66 : i32 to vector<16x32xi32>
    %317 = vector.extract_strided_slice %306#1 {offsets = [15, 0], sizes = [1, 32], strides = [1, 1]} : vector<16x32xf32> to vector<1x32xf32>
    %318 = vector.extract_strided_slice %306#1 {offsets = [0, 0], sizes = [15, 32], strides = [1, 1]} : vector<16x32xf32> to vector<15x32xf32>
    %319 = tpu.concatenate %317, %318 in 0 : vector<1x32xf32>, vector<15x32xf32> -> vector<16x32xf32>
    %320 = vector.extract_strided_slice %319 {offsets = [0, 31], sizes = [16, 1], strides = [1, 1]} : vector<16x32xf32> to vector<16x1xf32>
    %321 = vector.extract_strided_slice %319 {offsets = [0, 0], sizes = [16, 31], strides = [1, 1]} : vector<16x32xf32> to vector<16x31xf32>
    %322 = tpu.concatenate %320, %321 in 1 : vector<16x1xf32>, vector<16x31xf32> -> vector<16x32xf32>
    %cst_67 = arith.constant 1.000000e+09 : f32
    %323 = vector.broadcast %cst_67 : f32 to vector<16x32xf32>
    %324 = arith.select %28, %322, %323 : vector<16x32xi1>, vector<16x32xf32>
    %325 = arith.cmpf olt, %324, %315 : vector<16x32xf32>
    %326 = arith.select %325, %324, %315 : vector<16x32xi1>, vector<16x32xf32>
    %c0_i32_68 = arith.constant 0 : i32
    %327 = vector.broadcast %c0_i32_68 : i32 to vector<16x32xi32>
    %328 = arith.select %325, %327, %316 : vector<16x32xi1>, vector<16x32xi32>
    %329 = vector.extract_strided_slice %306#1 {offsets = [15, 0], sizes = [1, 32], strides = [1, 1]} : vector<16x32xf32> to vector<1x32xf32>
    %330 = vector.extract_strided_slice %306#1 {offsets = [0, 0], sizes = [15, 32], strides = [1, 1]} : vector<16x32xf32> to vector<15x32xf32>
    %331 = tpu.concatenate %329, %330 in 0 : vector<1x32xf32>, vector<15x32xf32> -> vector<16x32xf32>
    %cst_69 = arith.constant 1.000000e+09 : f32
    %332 = vector.broadcast %cst_69 : f32 to vector<16x32xf32>
    %333 = arith.select %21, %331, %332 : vector<16x32xi1>, vector<16x32xf32>
    %334 = arith.cmpf olt, %333, %326 : vector<16x32xf32>
    %335 = arith.select %334, %333, %326 : vector<16x32xi1>, vector<16x32xf32>
    %c1_i32_70 = arith.constant 1 : i32
    %336 = vector.broadcast %c1_i32_70 : i32 to vector<16x32xi32>
    %337 = arith.select %334, %336, %328 : vector<16x32xi1>, vector<16x32xi32>
    %338 = vector.extract_strided_slice %306#1 {offsets = [15, 0], sizes = [1, 32], strides = [1, 1]} : vector<16x32xf32> to vector<1x32xf32>
    %339 = vector.extract_strided_slice %306#1 {offsets = [0, 0], sizes = [15, 32], strides = [1, 1]} : vector<16x32xf32> to vector<15x32xf32>
    %340 = tpu.concatenate %338, %339 in 0 : vector<1x32xf32>, vector<15x32xf32> -> vector<16x32xf32>
    %341 = vector.extract_strided_slice %340 {offsets = [0, 1], sizes = [16, 31], strides = [1, 1]} : vector<16x32xf32> to vector<16x31xf32>
    %342 = vector.extract_strided_slice %340 {offsets = [0, 0], sizes = [16, 1], strides = [1, 1]} : vector<16x32xf32> to vector<16x1xf32>
    %343 = tpu.concatenate %341, %342 in 1 : vector<16x31xf32>, vector<16x1xf32> -> vector<16x32xf32>
    %cst_71 = arith.constant 1.000000e+09 : f32
    %344 = vector.broadcast %cst_71 : f32 to vector<16x32xf32>
    %345 = arith.select %29, %343, %344 : vector<16x32xi1>, vector<16x32xf32>
    %346 = arith.cmpf olt, %345, %335 : vector<16x32xf32>
    %347 = arith.select %346, %345, %335 : vector<16x32xi1>, vector<16x32xf32>
    %c2_i32_72 = arith.constant 2 : i32
    %348 = vector.broadcast %c2_i32_72 : i32 to vector<16x32xi32>
    %349 = arith.select %346, %348, %337 : vector<16x32xi1>, vector<16x32xi32>
    %350 = vector.extract_strided_slice %306#1 {offsets = [0, 31], sizes = [16, 1], strides = [1, 1]} : vector<16x32xf32> to vector<16x1xf32>
    %351 = vector.extract_strided_slice %306#1 {offsets = [0, 0], sizes = [16, 31], strides = [1, 1]} : vector<16x32xf32> to vector<16x31xf32>
    %352 = tpu.concatenate %350, %351 in 1 : vector<16x1xf32>, vector<16x31xf32> -> vector<16x32xf32>
    %cst_73 = arith.constant 1.000000e+09 : f32
    %353 = vector.broadcast %cst_73 : f32 to vector<16x32xf32>
    %354 = arith.select %25, %352, %353 : vector<16x32xi1>, vector<16x32xf32>
    %355 = arith.cmpf olt, %354, %347 : vector<16x32xf32>
    %356 = arith.select %355, %354, %347 : vector<16x32xi1>, vector<16x32xf32>
    %c3_i32 = arith.constant 3 : i32
    %357 = vector.broadcast %c3_i32 : i32 to vector<16x32xi32>
    %358 = arith.select %355, %357, %349 : vector<16x32xi1>, vector<16x32xi32>
    %359 = vector.extract_strided_slice %306#1 {offsets = [0, 1], sizes = [16, 31], strides = [1, 1]} : vector<16x32xf32> to vector<16x31xf32>
    %360 = vector.extract_strided_slice %306#1 {offsets = [0, 0], sizes = [16, 1], strides = [1, 1]} : vector<16x32xf32> to vector<16x1xf32>
    %361 = tpu.concatenate %359, %360 in 1 : vector<16x31xf32>, vector<16x1xf32> -> vector<16x32xf32>
    %cst_74 = arith.constant 1.000000e+09 : f32
    %362 = vector.broadcast %cst_74 : f32 to vector<16x32xf32>
    %363 = arith.select %27, %361, %362 : vector<16x32xi1>, vector<16x32xf32>
    %364 = arith.cmpf olt, %363, %356 : vector<16x32xf32>
    %365 = arith.select %364, %363, %356 : vector<16x32xi1>, vector<16x32xf32>
    %c4_i32 = arith.constant 4 : i32
    %366 = vector.broadcast %c4_i32 : i32 to vector<16x32xi32>
    %367 = arith.select %364, %366, %358 : vector<16x32xi1>, vector<16x32xi32>
    %368 = vector.extract_strided_slice %306#1 {offsets = [1, 0], sizes = [15, 32], strides = [1, 1]} : vector<16x32xf32> to vector<15x32xf32>
    %369 = vector.extract_strided_slice %306#1 {offsets = [0, 0], sizes = [1, 32], strides = [1, 1]} : vector<16x32xf32> to vector<1x32xf32>
    %370 = tpu.concatenate %368, %369 in 0 : vector<15x32xf32>, vector<1x32xf32> -> vector<16x32xf32>
    %371 = vector.extract_strided_slice %370 {offsets = [0, 31], sizes = [16, 1], strides = [1, 1]} : vector<16x32xf32> to vector<16x1xf32>
    %372 = vector.extract_strided_slice %370 {offsets = [0, 0], sizes = [16, 31], strides = [1, 1]} : vector<16x32xf32> to vector<16x31xf32>
    %373 = tpu.concatenate %371, %372 in 1 : vector<16x1xf32>, vector<16x31xf32> -> vector<16x32xf32>
    %cst_75 = arith.constant 1.000000e+09 : f32
    %374 = vector.broadcast %cst_75 : f32 to vector<16x32xf32>
    %375 = arith.select %30, %373, %374 : vector<16x32xi1>, vector<16x32xf32>
    %376 = arith.cmpf olt, %375, %365 : vector<16x32xf32>
    %377 = arith.select %376, %375, %365 : vector<16x32xi1>, vector<16x32xf32>
    %c5_i32 = arith.constant 5 : i32
    %378 = vector.broadcast %c5_i32 : i32 to vector<16x32xi32>
    %379 = arith.select %376, %378, %367 : vector<16x32xi1>, vector<16x32xi32>
    %380 = vector.extract_strided_slice %306#1 {offsets = [1, 0], sizes = [15, 32], strides = [1, 1]} : vector<16x32xf32> to vector<15x32xf32>
    %381 = vector.extract_strided_slice %306#1 {offsets = [0, 0], sizes = [1, 32], strides = [1, 1]} : vector<16x32xf32> to vector<1x32xf32>
    %382 = tpu.concatenate %380, %381 in 0 : vector<15x32xf32>, vector<1x32xf32> -> vector<16x32xf32>
    %cst_76 = arith.constant 1.000000e+09 : f32
    %383 = vector.broadcast %cst_76 : f32 to vector<16x32xf32>
    %384 = arith.select %23, %382, %383 : vector<16x32xi1>, vector<16x32xf32>
    %385 = arith.cmpf olt, %384, %377 : vector<16x32xf32>
    %386 = arith.select %385, %384, %377 : vector<16x32xi1>, vector<16x32xf32>
    %c6_i32 = arith.constant 6 : i32
    %387 = vector.broadcast %c6_i32 : i32 to vector<16x32xi32>
    %388 = arith.select %385, %387, %379 : vector<16x32xi1>, vector<16x32xi32>
    %389 = vector.extract_strided_slice %306#1 {offsets = [1, 0], sizes = [15, 32], strides = [1, 1]} : vector<16x32xf32> to vector<15x32xf32>
    %390 = vector.extract_strided_slice %306#1 {offsets = [0, 0], sizes = [1, 32], strides = [1, 1]} : vector<16x32xf32> to vector<1x32xf32>
    %391 = tpu.concatenate %389, %390 in 0 : vector<15x32xf32>, vector<1x32xf32> -> vector<16x32xf32>
    %392 = vector.extract_strided_slice %391 {offsets = [0, 1], sizes = [16, 31], strides = [1, 1]} : vector<16x32xf32> to vector<16x31xf32>
    %393 = vector.extract_strided_slice %391 {offsets = [0, 0], sizes = [16, 1], strides = [1, 1]} : vector<16x32xf32> to vector<16x1xf32>
    %394 = tpu.concatenate %392, %393 in 1 : vector<16x31xf32>, vector<16x1xf32> -> vector<16x32xf32>
    %cst_77 = arith.constant 1.000000e+09 : f32
    %395 = vector.broadcast %cst_77 : f32 to vector<16x32xf32>
    %396 = arith.select %31, %394, %395 : vector<16x32xi1>, vector<16x32xf32>
    %397 = arith.cmpf olt, %396, %386 : vector<16x32xf32>
    %c7_i32 = arith.constant 7 : i32
    %398 = vector.broadcast %c7_i32 : i32 to vector<16x32xi32>
    %399 = arith.select %397, %398, %388 : vector<16x32xi1>, vector<16x32xi32>
    %c0_i32_78 = arith.constant 0 : i32
    %400:3 = scf.while (%arg6 = %c0_i32_78, %arg7 = %81, %arg8 = %81) : (i32, vector<16x32xf32>, vector<16x32xf32>) -> (i32, vector<16x32xf32>, vector<16x32xf32>) {
      %c256_i32 = arith.constant 256 : i32
      %404 = arith.cmpi slt, %arg6, %c256_i32 : i32
      %405 = arith.mulf %arg7, %87 : vector<16x32xf32>
      %406 = vector.shape_cast %405 : vector<16x32xf32> to vector<1x16x32xf32>
      %cst_82 = arith.constant dense<0.000000e+00> : vector<1xf32>
      %407 = vector.multi_reduction <add>, %406, %cst_82 [1, 2] : vector<1x16x32xf32> to vector<1xf32>
      %408 = vector.shape_cast %407 : vector<1xf32> to vector<1x1x1xf32>
      %409 = vector.extract %408[0, 0, 0] : f32 from vector<1x1x1xf32>
      %cst_83 = arith.constant 5.000000e-01 : f32
      %410 = arith.cmpf ogt, %409, %cst_83 : f32
      %411 = arith.andi %404, %410 : i1
      scf.condition(%411) %arg6, %arg7, %arg8 : i32, vector<16x32xf32>, vector<16x32xf32>
    } do {
    ^bb0(%arg6: i32, %arg7: vector<16x32xf32>, %arg8: vector<16x32xf32>):
      %404 = arith.mulf %arg7, %85 : vector<16x32xf32>
      %405 = arith.subf %arg7, %404 : vector<16x32xf32>
      %c0_i32_82 = arith.constant 0 : i32
      %406 = vector.broadcast %c0_i32_82 : i32 to vector<16x32xi32>
      %407 = arith.cmpi eq, %399, %406 : vector<16x32xi32>
      %cst_83 = arith.constant 0.000000e+00 : f32
      %408 = vector.broadcast %cst_83 : f32 to vector<16x32xf32>
      %409 = arith.select %407, %405, %408 : vector<16x32xi1>, vector<16x32xf32>
      %410 = vector.extract_strided_slice %409 {offsets = [1, 0], sizes = [15, 32], strides = [1, 1]} : vector<16x32xf32> to vector<15x32xf32>
      %411 = vector.extract_strided_slice %409 {offsets = [0, 0], sizes = [1, 32], strides = [1, 1]} : vector<16x32xf32> to vector<1x32xf32>
      %412 = tpu.concatenate %410, %411 in 0 : vector<15x32xf32>, vector<1x32xf32> -> vector<16x32xf32>
      %413 = vector.extract_strided_slice %412 {offsets = [0, 1], sizes = [16, 31], strides = [1, 1]} : vector<16x32xf32> to vector<16x31xf32>
      %414 = vector.extract_strided_slice %412 {offsets = [0, 0], sizes = [16, 1], strides = [1, 1]} : vector<16x32xf32> to vector<16x1xf32>
      %415 = tpu.concatenate %413, %414 in 1 : vector<16x31xf32>, vector<16x1xf32> -> vector<16x32xf32>
      %cst_84 = arith.constant 0.000000e+00 : f32
      %416 = vector.broadcast %cst_84 : f32 to vector<16x32xf32>
      %417 = arith.select %31, %415, %416 : vector<16x32xi1>, vector<16x32xf32>
      %418 = arith.maximumf %404, %417 : vector<16x32xf32>
      %c1_i32_85 = arith.constant 1 : i32
      %419 = vector.broadcast %c1_i32_85 : i32 to vector<16x32xi32>
      %420 = arith.cmpi eq, %399, %419 : vector<16x32xi32>
      %cst_86 = arith.constant 0.000000e+00 : f32
      %421 = vector.broadcast %cst_86 : f32 to vector<16x32xf32>
      %422 = arith.select %420, %405, %421 : vector<16x32xi1>, vector<16x32xf32>
      %423 = vector.extract_strided_slice %422 {offsets = [1, 0], sizes = [15, 32], strides = [1, 1]} : vector<16x32xf32> to vector<15x32xf32>
      %424 = vector.extract_strided_slice %422 {offsets = [0, 0], sizes = [1, 32], strides = [1, 1]} : vector<16x32xf32> to vector<1x32xf32>
      %425 = tpu.concatenate %423, %424 in 0 : vector<15x32xf32>, vector<1x32xf32> -> vector<16x32xf32>
      %cst_87 = arith.constant 0.000000e+00 : f32
      %426 = vector.broadcast %cst_87 : f32 to vector<16x32xf32>
      %427 = arith.select %23, %425, %426 : vector<16x32xi1>, vector<16x32xf32>
      %428 = arith.maximumf %418, %427 : vector<16x32xf32>
      %c2_i32_88 = arith.constant 2 : i32
      %429 = vector.broadcast %c2_i32_88 : i32 to vector<16x32xi32>
      %430 = arith.cmpi eq, %399, %429 : vector<16x32xi32>
      %cst_89 = arith.constant 0.000000e+00 : f32
      %431 = vector.broadcast %cst_89 : f32 to vector<16x32xf32>
      %432 = arith.select %430, %405, %431 : vector<16x32xi1>, vector<16x32xf32>
      %433 = vector.extract_strided_slice %432 {offsets = [1, 0], sizes = [15, 32], strides = [1, 1]} : vector<16x32xf32> to vector<15x32xf32>
      %434 = vector.extract_strided_slice %432 {offsets = [0, 0], sizes = [1, 32], strides = [1, 1]} : vector<16x32xf32> to vector<1x32xf32>
      %435 = tpu.concatenate %433, %434 in 0 : vector<15x32xf32>, vector<1x32xf32> -> vector<16x32xf32>
      %436 = vector.extract_strided_slice %435 {offsets = [0, 31], sizes = [16, 1], strides = [1, 1]} : vector<16x32xf32> to vector<16x1xf32>
      %437 = vector.extract_strided_slice %435 {offsets = [0, 0], sizes = [16, 31], strides = [1, 1]} : vector<16x32xf32> to vector<16x31xf32>
      %438 = tpu.concatenate %436, %437 in 1 : vector<16x1xf32>, vector<16x31xf32> -> vector<16x32xf32>
      %cst_90 = arith.constant 0.000000e+00 : f32
      %439 = vector.broadcast %cst_90 : f32 to vector<16x32xf32>
      %440 = arith.select %30, %438, %439 : vector<16x32xi1>, vector<16x32xf32>
      %441 = arith.maximumf %428, %440 : vector<16x32xf32>
      %c3_i32_91 = arith.constant 3 : i32
      %442 = vector.broadcast %c3_i32_91 : i32 to vector<16x32xi32>
      %443 = arith.cmpi eq, %399, %442 : vector<16x32xi32>
      %cst_92 = arith.constant 0.000000e+00 : f32
      %444 = vector.broadcast %cst_92 : f32 to vector<16x32xf32>
      %445 = arith.select %443, %405, %444 : vector<16x32xi1>, vector<16x32xf32>
      %446 = vector.extract_strided_slice %445 {offsets = [0, 1], sizes = [16, 31], strides = [1, 1]} : vector<16x32xf32> to vector<16x31xf32>
      %447 = vector.extract_strided_slice %445 {offsets = [0, 0], sizes = [16, 1], strides = [1, 1]} : vector<16x32xf32> to vector<16x1xf32>
      %448 = tpu.concatenate %446, %447 in 1 : vector<16x31xf32>, vector<16x1xf32> -> vector<16x32xf32>
      %cst_93 = arith.constant 0.000000e+00 : f32
      %449 = vector.broadcast %cst_93 : f32 to vector<16x32xf32>
      %450 = arith.select %27, %448, %449 : vector<16x32xi1>, vector<16x32xf32>
      %451 = arith.maximumf %441, %450 : vector<16x32xf32>
      %c4_i32_94 = arith.constant 4 : i32
      %452 = vector.broadcast %c4_i32_94 : i32 to vector<16x32xi32>
      %453 = arith.cmpi eq, %399, %452 : vector<16x32xi32>
      %cst_95 = arith.constant 0.000000e+00 : f32
      %454 = vector.broadcast %cst_95 : f32 to vector<16x32xf32>
      %455 = arith.select %453, %405, %454 : vector<16x32xi1>, vector<16x32xf32>
      %456 = vector.extract_strided_slice %455 {offsets = [0, 31], sizes = [16, 1], strides = [1, 1]} : vector<16x32xf32> to vector<16x1xf32>
      %457 = vector.extract_strided_slice %455 {offsets = [0, 0], sizes = [16, 31], strides = [1, 1]} : vector<16x32xf32> to vector<16x31xf32>
      %458 = tpu.concatenate %456, %457 in 1 : vector<16x1xf32>, vector<16x31xf32> -> vector<16x32xf32>
      %cst_96 = arith.constant 0.000000e+00 : f32
      %459 = vector.broadcast %cst_96 : f32 to vector<16x32xf32>
      %460 = arith.select %25, %458, %459 : vector<16x32xi1>, vector<16x32xf32>
      %461 = arith.maximumf %451, %460 : vector<16x32xf32>
      %c5_i32_97 = arith.constant 5 : i32
      %462 = vector.broadcast %c5_i32_97 : i32 to vector<16x32xi32>
      %463 = arith.cmpi eq, %399, %462 : vector<16x32xi32>
      %cst_98 = arith.constant 0.000000e+00 : f32
      %464 = vector.broadcast %cst_98 : f32 to vector<16x32xf32>
      %465 = arith.select %463, %405, %464 : vector<16x32xi1>, vector<16x32xf32>
      %466 = vector.extract_strided_slice %465 {offsets = [15, 0], sizes = [1, 32], strides = [1, 1]} : vector<16x32xf32> to vector<1x32xf32>
      %467 = vector.extract_strided_slice %465 {offsets = [0, 0], sizes = [15, 32], strides = [1, 1]} : vector<16x32xf32> to vector<15x32xf32>
      %468 = tpu.concatenate %466, %467 in 0 : vector<1x32xf32>, vector<15x32xf32> -> vector<16x32xf32>
      %469 = vector.extract_strided_slice %468 {offsets = [0, 1], sizes = [16, 31], strides = [1, 1]} : vector<16x32xf32> to vector<16x31xf32>
      %470 = vector.extract_strided_slice %468 {offsets = [0, 0], sizes = [16, 1], strides = [1, 1]} : vector<16x32xf32> to vector<16x1xf32>
      %471 = tpu.concatenate %469, %470 in 1 : vector<16x31xf32>, vector<16x1xf32> -> vector<16x32xf32>
      %cst_99 = arith.constant 0.000000e+00 : f32
      %472 = vector.broadcast %cst_99 : f32 to vector<16x32xf32>
      %473 = arith.select %29, %471, %472 : vector<16x32xi1>, vector<16x32xf32>
      %474 = arith.maximumf %461, %473 : vector<16x32xf32>
      %c6_i32_100 = arith.constant 6 : i32
      %475 = vector.broadcast %c6_i32_100 : i32 to vector<16x32xi32>
      %476 = arith.cmpi eq, %399, %475 : vector<16x32xi32>
      %cst_101 = arith.constant 0.000000e+00 : f32
      %477 = vector.broadcast %cst_101 : f32 to vector<16x32xf32>
      %478 = arith.select %476, %405, %477 : vector<16x32xi1>, vector<16x32xf32>
      %479 = vector.extract_strided_slice %478 {offsets = [15, 0], sizes = [1, 32], strides = [1, 1]} : vector<16x32xf32> to vector<1x32xf32>
      %480 = vector.extract_strided_slice %478 {offsets = [0, 0], sizes = [15, 32], strides = [1, 1]} : vector<16x32xf32> to vector<15x32xf32>
      %481 = tpu.concatenate %479, %480 in 0 : vector<1x32xf32>, vector<15x32xf32> -> vector<16x32xf32>
      %cst_102 = arith.constant 0.000000e+00 : f32
      %482 = vector.broadcast %cst_102 : f32 to vector<16x32xf32>
      %483 = arith.select %21, %481, %482 : vector<16x32xi1>, vector<16x32xf32>
      %484 = arith.maximumf %474, %483 : vector<16x32xf32>
      %c7_i32_103 = arith.constant 7 : i32
      %485 = vector.broadcast %c7_i32_103 : i32 to vector<16x32xi32>
      %486 = arith.cmpi eq, %399, %485 : vector<16x32xi32>
      %cst_104 = arith.constant 0.000000e+00 : f32
      %487 = vector.broadcast %cst_104 : f32 to vector<16x32xf32>
      %488 = arith.select %486, %405, %487 : vector<16x32xi1>, vector<16x32xf32>
      %489 = vector.extract_strided_slice %488 {offsets = [15, 0], sizes = [1, 32], strides = [1, 1]} : vector<16x32xf32> to vector<1x32xf32>
      %490 = vector.extract_strided_slice %488 {offsets = [0, 0], sizes = [15, 32], strides = [1, 1]} : vector<16x32xf32> to vector<15x32xf32>
      %491 = tpu.concatenate %489, %490 in 0 : vector<1x32xf32>, vector<15x32xf32> -> vector<16x32xf32>
      %492 = vector.extract_strided_slice %491 {offsets = [0, 31], sizes = [16, 1], strides = [1, 1]} : vector<16x32xf32> to vector<16x1xf32>
      %493 = vector.extract_strided_slice %491 {offsets = [0, 0], sizes = [16, 31], strides = [1, 1]} : vector<16x32xf32> to vector<16x31xf32>
      %494 = tpu.concatenate %492, %493 in 1 : vector<16x1xf32>, vector<16x31xf32> -> vector<16x32xf32>
      %cst_105 = arith.constant 0.000000e+00 : f32
      %495 = vector.broadcast %cst_105 : f32 to vector<16x32xf32>
      %496 = arith.select %28, %494, %495 : vector<16x32xi1>, vector<16x32xf32>
      %497 = arith.maximumf %484, %496 : vector<16x32xf32>
      %498 = arith.maximumf %arg8, %497 : vector<16x32xf32>
      %499 = arith.mulf %497, %85 : vector<16x32xf32>
      %500 = arith.subf %497, %499 : vector<16x32xf32>
      %c0_i32_106 = arith.constant 0 : i32
      %501 = vector.broadcast %c0_i32_106 : i32 to vector<16x32xi32>
      %502 = arith.cmpi eq, %399, %501 : vector<16x32xi32>
      %cst_107 = arith.constant 0.000000e+00 : f32
      %503 = vector.broadcast %cst_107 : f32 to vector<16x32xf32>
      %504 = arith.select %502, %500, %503 : vector<16x32xi1>, vector<16x32xf32>
      %505 = vector.extract_strided_slice %504 {offsets = [1, 0], sizes = [15, 32], strides = [1, 1]} : vector<16x32xf32> to vector<15x32xf32>
      %506 = vector.extract_strided_slice %504 {offsets = [0, 0], sizes = [1, 32], strides = [1, 1]} : vector<16x32xf32> to vector<1x32xf32>
      %507 = tpu.concatenate %505, %506 in 0 : vector<15x32xf32>, vector<1x32xf32> -> vector<16x32xf32>
      %508 = vector.extract_strided_slice %507 {offsets = [0, 1], sizes = [16, 31], strides = [1, 1]} : vector<16x32xf32> to vector<16x31xf32>
      %509 = vector.extract_strided_slice %507 {offsets = [0, 0], sizes = [16, 1], strides = [1, 1]} : vector<16x32xf32> to vector<16x1xf32>
      %510 = tpu.concatenate %508, %509 in 1 : vector<16x31xf32>, vector<16x1xf32> -> vector<16x32xf32>
      %cst_108 = arith.constant 0.000000e+00 : f32
      %511 = vector.broadcast %cst_108 : f32 to vector<16x32xf32>
      %512 = arith.select %31, %510, %511 : vector<16x32xi1>, vector<16x32xf32>
      %513 = arith.maximumf %499, %512 : vector<16x32xf32>
      %c1_i32_109 = arith.constant 1 : i32
      %514 = vector.broadcast %c1_i32_109 : i32 to vector<16x32xi32>
      %515 = arith.cmpi eq, %399, %514 : vector<16x32xi32>
      %cst_110 = arith.constant 0.000000e+00 : f32
      %516 = vector.broadcast %cst_110 : f32 to vector<16x32xf32>
      %517 = arith.select %515, %500, %516 : vector<16x32xi1>, vector<16x32xf32>
      %518 = vector.extract_strided_slice %517 {offsets = [1, 0], sizes = [15, 32], strides = [1, 1]} : vector<16x32xf32> to vector<15x32xf32>
      %519 = vector.extract_strided_slice %517 {offsets = [0, 0], sizes = [1, 32], strides = [1, 1]} : vector<16x32xf32> to vector<1x32xf32>
      %520 = tpu.concatenate %518, %519 in 0 : vector<15x32xf32>, vector<1x32xf32> -> vector<16x32xf32>
      %cst_111 = arith.constant 0.000000e+00 : f32
      %521 = vector.broadcast %cst_111 : f32 to vector<16x32xf32>
      %522 = arith.select %23, %520, %521 : vector<16x32xi1>, vector<16x32xf32>
      %523 = arith.maximumf %513, %522 : vector<16x32xf32>
      %c2_i32_112 = arith.constant 2 : i32
      %524 = vector.broadcast %c2_i32_112 : i32 to vector<16x32xi32>
      %525 = arith.cmpi eq, %399, %524 : vector<16x32xi32>
      %cst_113 = arith.constant 0.000000e+00 : f32
      %526 = vector.broadcast %cst_113 : f32 to vector<16x32xf32>
      %527 = arith.select %525, %500, %526 : vector<16x32xi1>, vector<16x32xf32>
      %528 = vector.extract_strided_slice %527 {offsets = [1, 0], sizes = [15, 32], strides = [1, 1]} : vector<16x32xf32> to vector<15x32xf32>
      %529 = vector.extract_strided_slice %527 {offsets = [0, 0], sizes = [1, 32], strides = [1, 1]} : vector<16x32xf32> to vector<1x32xf32>
      %530 = tpu.concatenate %528, %529 in 0 : vector<15x32xf32>, vector<1x32xf32> -> vector<16x32xf32>
      %531 = vector.extract_strided_slice %530 {offsets = [0, 31], sizes = [16, 1], strides = [1, 1]} : vector<16x32xf32> to vector<16x1xf32>
      %532 = vector.extract_strided_slice %530 {offsets = [0, 0], sizes = [16, 31], strides = [1, 1]} : vector<16x32xf32> to vector<16x31xf32>
      %533 = tpu.concatenate %531, %532 in 1 : vector<16x1xf32>, vector<16x31xf32> -> vector<16x32xf32>
      %cst_114 = arith.constant 0.000000e+00 : f32
      %534 = vector.broadcast %cst_114 : f32 to vector<16x32xf32>
      %535 = arith.select %30, %533, %534 : vector<16x32xi1>, vector<16x32xf32>
      %536 = arith.maximumf %523, %535 : vector<16x32xf32>
      %c3_i32_115 = arith.constant 3 : i32
      %537 = vector.broadcast %c3_i32_115 : i32 to vector<16x32xi32>
      %538 = arith.cmpi eq, %399, %537 : vector<16x32xi32>
      %cst_116 = arith.constant 0.000000e+00 : f32
      %539 = vector.broadcast %cst_116 : f32 to vector<16x32xf32>
      %540 = arith.select %538, %500, %539 : vector<16x32xi1>, vector<16x32xf32>
      %541 = vector.extract_strided_slice %540 {offsets = [0, 1], sizes = [16, 31], strides = [1, 1]} : vector<16x32xf32> to vector<16x31xf32>
      %542 = vector.extract_strided_slice %540 {offsets = [0, 0], sizes = [16, 1], strides = [1, 1]} : vector<16x32xf32> to vector<16x1xf32>
      %543 = tpu.concatenate %541, %542 in 1 : vector<16x31xf32>, vector<16x1xf32> -> vector<16x32xf32>
      %cst_117 = arith.constant 0.000000e+00 : f32
      %544 = vector.broadcast %cst_117 : f32 to vector<16x32xf32>
      %545 = arith.select %27, %543, %544 : vector<16x32xi1>, vector<16x32xf32>
      %546 = arith.maximumf %536, %545 : vector<16x32xf32>
      %c4_i32_118 = arith.constant 4 : i32
      %547 = vector.broadcast %c4_i32_118 : i32 to vector<16x32xi32>
      %548 = arith.cmpi eq, %399, %547 : vector<16x32xi32>
      %cst_119 = arith.constant 0.000000e+00 : f32
      %549 = vector.broadcast %cst_119 : f32 to vector<16x32xf32>
      %550 = arith.select %548, %500, %549 : vector<16x32xi1>, vector<16x32xf32>
      %551 = vector.extract_strided_slice %550 {offsets = [0, 31], sizes = [16, 1], strides = [1, 1]} : vector<16x32xf32> to vector<16x1xf32>
      %552 = vector.extract_strided_slice %550 {offsets = [0, 0], sizes = [16, 31], strides = [1, 1]} : vector<16x32xf32> to vector<16x31xf32>
      %553 = tpu.concatenate %551, %552 in 1 : vector<16x1xf32>, vector<16x31xf32> -> vector<16x32xf32>
      %cst_120 = arith.constant 0.000000e+00 : f32
      %554 = vector.broadcast %cst_120 : f32 to vector<16x32xf32>
      %555 = arith.select %25, %553, %554 : vector<16x32xi1>, vector<16x32xf32>
      %556 = arith.maximumf %546, %555 : vector<16x32xf32>
      %c5_i32_121 = arith.constant 5 : i32
      %557 = vector.broadcast %c5_i32_121 : i32 to vector<16x32xi32>
      %558 = arith.cmpi eq, %399, %557 : vector<16x32xi32>
      %cst_122 = arith.constant 0.000000e+00 : f32
      %559 = vector.broadcast %cst_122 : f32 to vector<16x32xf32>
      %560 = arith.select %558, %500, %559 : vector<16x32xi1>, vector<16x32xf32>
      %561 = vector.extract_strided_slice %560 {offsets = [15, 0], sizes = [1, 32], strides = [1, 1]} : vector<16x32xf32> to vector<1x32xf32>
      %562 = vector.extract_strided_slice %560 {offsets = [0, 0], sizes = [15, 32], strides = [1, 1]} : vector<16x32xf32> to vector<15x32xf32>
      %563 = tpu.concatenate %561, %562 in 0 : vector<1x32xf32>, vector<15x32xf32> -> vector<16x32xf32>
      %564 = vector.extract_strided_slice %563 {offsets = [0, 1], sizes = [16, 31], strides = [1, 1]} : vector<16x32xf32> to vector<16x31xf32>
      %565 = vector.extract_strided_slice %563 {offsets = [0, 0], sizes = [16, 1], strides = [1, 1]} : vector<16x32xf32> to vector<16x1xf32>
      %566 = tpu.concatenate %564, %565 in 1 : vector<16x31xf32>, vector<16x1xf32> -> vector<16x32xf32>
      %cst_123 = arith.constant 0.000000e+00 : f32
      %567 = vector.broadcast %cst_123 : f32 to vector<16x32xf32>
      %568 = arith.select %29, %566, %567 : vector<16x32xi1>, vector<16x32xf32>
      %569 = arith.maximumf %556, %568 : vector<16x32xf32>
      %c6_i32_124 = arith.constant 6 : i32
      %570 = vector.broadcast %c6_i32_124 : i32 to vector<16x32xi32>
      %571 = arith.cmpi eq, %399, %570 : vector<16x32xi32>
      %cst_125 = arith.constant 0.000000e+00 : f32
      %572 = vector.broadcast %cst_125 : f32 to vector<16x32xf32>
      %573 = arith.select %571, %500, %572 : vector<16x32xi1>, vector<16x32xf32>
      %574 = vector.extract_strided_slice %573 {offsets = [15, 0], sizes = [1, 32], strides = [1, 1]} : vector<16x32xf32> to vector<1x32xf32>
      %575 = vector.extract_strided_slice %573 {offsets = [0, 0], sizes = [15, 32], strides = [1, 1]} : vector<16x32xf32> to vector<15x32xf32>
      %576 = tpu.concatenate %574, %575 in 0 : vector<1x32xf32>, vector<15x32xf32> -> vector<16x32xf32>
      %cst_126 = arith.constant 0.000000e+00 : f32
      %577 = vector.broadcast %cst_126 : f32 to vector<16x32xf32>
      %578 = arith.select %21, %576, %577 : vector<16x32xi1>, vector<16x32xf32>
      %579 = arith.maximumf %569, %578 : vector<16x32xf32>
      %c7_i32_127 = arith.constant 7 : i32
      %580 = vector.broadcast %c7_i32_127 : i32 to vector<16x32xi32>
      %581 = arith.cmpi eq, %399, %580 : vector<16x32xi32>
      %cst_128 = arith.constant 0.000000e+00 : f32
      %582 = vector.broadcast %cst_128 : f32 to vector<16x32xf32>
      %583 = arith.select %581, %500, %582 : vector<16x32xi1>, vector<16x32xf32>
      %584 = vector.extract_strided_slice %583 {offsets = [15, 0], sizes = [1, 32], strides = [1, 1]} : vector<16x32xf32> to vector<1x32xf32>
      %585 = vector.extract_strided_slice %583 {offsets = [0, 0], sizes = [15, 32], strides = [1, 1]} : vector<16x32xf32> to vector<15x32xf32>
      %586 = tpu.concatenate %584, %585 in 0 : vector<1x32xf32>, vector<15x32xf32> -> vector<16x32xf32>
      %587 = vector.extract_strided_slice %586 {offsets = [0, 31], sizes = [16, 1], strides = [1, 1]} : vector<16x32xf32> to vector<16x1xf32>
      %588 = vector.extract_strided_slice %586 {offsets = [0, 0], sizes = [16, 31], strides = [1, 1]} : vector<16x32xf32> to vector<16x31xf32>
      %589 = tpu.concatenate %587, %588 in 1 : vector<16x1xf32>, vector<16x31xf32> -> vector<16x32xf32>
      %cst_129 = arith.constant 0.000000e+00 : f32
      %590 = vector.broadcast %cst_129 : f32 to vector<16x32xf32>
      %591 = arith.select %28, %589, %590 : vector<16x32xi1>, vector<16x32xf32>
      %592 = arith.maximumf %579, %591 : vector<16x32xf32>
      %593 = arith.maximumf %498, %592 : vector<16x32xf32>
      %594 = arith.mulf %592, %85 : vector<16x32xf32>
      %595 = arith.subf %592, %594 : vector<16x32xf32>
      %c0_i32_130 = arith.constant 0 : i32
      %596 = vector.broadcast %c0_i32_130 : i32 to vector<16x32xi32>
      %597 = arith.cmpi eq, %399, %596 : vector<16x32xi32>
      %cst_131 = arith.constant 0.000000e+00 : f32
      %598 = vector.broadcast %cst_131 : f32 to vector<16x32xf32>
      %599 = arith.select %597, %595, %598 : vector<16x32xi1>, vector<16x32xf32>
      %600 = vector.extract_strided_slice %599 {offsets = [1, 0], sizes = [15, 32], strides = [1, 1]} : vector<16x32xf32> to vector<15x32xf32>
      %601 = vector.extract_strided_slice %599 {offsets = [0, 0], sizes = [1, 32], strides = [1, 1]} : vector<16x32xf32> to vector<1x32xf32>
      %602 = tpu.concatenate %600, %601 in 0 : vector<15x32xf32>, vector<1x32xf32> -> vector<16x32xf32>
      %603 = vector.extract_strided_slice %602 {offsets = [0, 1], sizes = [16, 31], strides = [1, 1]} : vector<16x32xf32> to vector<16x31xf32>
      %604 = vector.extract_strided_slice %602 {offsets = [0, 0], sizes = [16, 1], strides = [1, 1]} : vector<16x32xf32> to vector<16x1xf32>
      %605 = tpu.concatenate %603, %604 in 1 : vector<16x31xf32>, vector<16x1xf32> -> vector<16x32xf32>
      %cst_132 = arith.constant 0.000000e+00 : f32
      %606 = vector.broadcast %cst_132 : f32 to vector<16x32xf32>
      %607 = arith.select %31, %605, %606 : vector<16x32xi1>, vector<16x32xf32>
      %608 = arith.maximumf %594, %607 : vector<16x32xf32>
      %c1_i32_133 = arith.constant 1 : i32
      %609 = vector.broadcast %c1_i32_133 : i32 to vector<16x32xi32>
      %610 = arith.cmpi eq, %399, %609 : vector<16x32xi32>
      %cst_134 = arith.constant 0.000000e+00 : f32
      %611 = vector.broadcast %cst_134 : f32 to vector<16x32xf32>
      %612 = arith.select %610, %595, %611 : vector<16x32xi1>, vector<16x32xf32>
      %613 = vector.extract_strided_slice %612 {offsets = [1, 0], sizes = [15, 32], strides = [1, 1]} : vector<16x32xf32> to vector<15x32xf32>
      %614 = vector.extract_strided_slice %612 {offsets = [0, 0], sizes = [1, 32], strides = [1, 1]} : vector<16x32xf32> to vector<1x32xf32>
      %615 = tpu.concatenate %613, %614 in 0 : vector<15x32xf32>, vector<1x32xf32> -> vector<16x32xf32>
      %cst_135 = arith.constant 0.000000e+00 : f32
      %616 = vector.broadcast %cst_135 : f32 to vector<16x32xf32>
      %617 = arith.select %23, %615, %616 : vector<16x32xi1>, vector<16x32xf32>
      %618 = arith.maximumf %608, %617 : vector<16x32xf32>
      %c2_i32_136 = arith.constant 2 : i32
      %619 = vector.broadcast %c2_i32_136 : i32 to vector<16x32xi32>
      %620 = arith.cmpi eq, %399, %619 : vector<16x32xi32>
      %cst_137 = arith.constant 0.000000e+00 : f32
      %621 = vector.broadcast %cst_137 : f32 to vector<16x32xf32>
      %622 = arith.select %620, %595, %621 : vector<16x32xi1>, vector<16x32xf32>
      %623 = vector.extract_strided_slice %622 {offsets = [1, 0], sizes = [15, 32], strides = [1, 1]} : vector<16x32xf32> to vector<15x32xf32>
      %624 = vector.extract_strided_slice %622 {offsets = [0, 0], sizes = [1, 32], strides = [1, 1]} : vector<16x32xf32> to vector<1x32xf32>
      %625 = tpu.concatenate %623, %624 in 0 : vector<15x32xf32>, vector<1x32xf32> -> vector<16x32xf32>
      %626 = vector.extract_strided_slice %625 {offsets = [0, 31], sizes = [16, 1], strides = [1, 1]} : vector<16x32xf32> to vector<16x1xf32>
      %627 = vector.extract_strided_slice %625 {offsets = [0, 0], sizes = [16, 31], strides = [1, 1]} : vector<16x32xf32> to vector<16x31xf32>
      %628 = tpu.concatenate %626, %627 in 1 : vector<16x1xf32>, vector<16x31xf32> -> vector<16x32xf32>
      %cst_138 = arith.constant 0.000000e+00 : f32
      %629 = vector.broadcast %cst_138 : f32 to vector<16x32xf32>
      %630 = arith.select %30, %628, %629 : vector<16x32xi1>, vector<16x32xf32>
      %631 = arith.maximumf %618, %630 : vector<16x32xf32>
      %c3_i32_139 = arith.constant 3 : i32
      %632 = vector.broadcast %c3_i32_139 : i32 to vector<16x32xi32>
      %633 = arith.cmpi eq, %399, %632 : vector<16x32xi32>
      %cst_140 = arith.constant 0.000000e+00 : f32
      %634 = vector.broadcast %cst_140 : f32 to vector<16x32xf32>
      %635 = arith.select %633, %595, %634 : vector<16x32xi1>, vector<16x32xf32>
      %636 = vector.extract_strided_slice %635 {offsets = [0, 1], sizes = [16, 31], strides = [1, 1]} : vector<16x32xf32> to vector<16x31xf32>
      %637 = vector.extract_strided_slice %635 {offsets = [0, 0], sizes = [16, 1], strides = [1, 1]} : vector<16x32xf32> to vector<16x1xf32>
      %638 = tpu.concatenate %636, %637 in 1 : vector<16x31xf32>, vector<16x1xf32> -> vector<16x32xf32>
      %cst_141 = arith.constant 0.000000e+00 : f32
      %639 = vector.broadcast %cst_141 : f32 to vector<16x32xf32>
      %640 = arith.select %27, %638, %639 : vector<16x32xi1>, vector<16x32xf32>
      %641 = arith.maximumf %631, %640 : vector<16x32xf32>
      %c4_i32_142 = arith.constant 4 : i32
      %642 = vector.broadcast %c4_i32_142 : i32 to vector<16x32xi32>
      %643 = arith.cmpi eq, %399, %642 : vector<16x32xi32>
      %cst_143 = arith.constant 0.000000e+00 : f32
      %644 = vector.broadcast %cst_143 : f32 to vector<16x32xf32>
      %645 = arith.select %643, %595, %644 : vector<16x32xi1>, vector<16x32xf32>
      %646 = vector.extract_strided_slice %645 {offsets = [0, 31], sizes = [16, 1], strides = [1, 1]} : vector<16x32xf32> to vector<16x1xf32>
      %647 = vector.extract_strided_slice %645 {offsets = [0, 0], sizes = [16, 31], strides = [1, 1]} : vector<16x32xf32> to vector<16x31xf32>
      %648 = tpu.concatenate %646, %647 in 1 : vector<16x1xf32>, vector<16x31xf32> -> vector<16x32xf32>
      %cst_144 = arith.constant 0.000000e+00 : f32
      %649 = vector.broadcast %cst_144 : f32 to vector<16x32xf32>
      %650 = arith.select %25, %648, %649 : vector<16x32xi1>, vector<16x32xf32>
      %651 = arith.maximumf %641, %650 : vector<16x32xf32>
      %c5_i32_145 = arith.constant 5 : i32
      %652 = vector.broadcast %c5_i32_145 : i32 to vector<16x32xi32>
      %653 = arith.cmpi eq, %399, %652 : vector<16x32xi32>
      %cst_146 = arith.constant 0.000000e+00 : f32
      %654 = vector.broadcast %cst_146 : f32 to vector<16x32xf32>
      %655 = arith.select %653, %595, %654 : vector<16x32xi1>, vector<16x32xf32>
      %656 = vector.extract_strided_slice %655 {offsets = [15, 0], sizes = [1, 32], strides = [1, 1]} : vector<16x32xf32> to vector<1x32xf32>
      %657 = vector.extract_strided_slice %655 {offsets = [0, 0], sizes = [15, 32], strides = [1, 1]} : vector<16x32xf32> to vector<15x32xf32>
      %658 = tpu.concatenate %656, %657 in 0 : vector<1x32xf32>, vector<15x32xf32> -> vector<16x32xf32>
      %659 = vector.extract_strided_slice %658 {offsets = [0, 1], sizes = [16, 31], strides = [1, 1]} : vector<16x32xf32> to vector<16x31xf32>
      %660 = vector.extract_strided_slice %658 {offsets = [0, 0], sizes = [16, 1], strides = [1, 1]} : vector<16x32xf32> to vector<16x1xf32>
      %661 = tpu.concatenate %659, %660 in 1 : vector<16x31xf32>, vector<16x1xf32> -> vector<16x32xf32>
      %cst_147 = arith.constant 0.000000e+00 : f32
      %662 = vector.broadcast %cst_147 : f32 to vector<16x32xf32>
      %663 = arith.select %29, %661, %662 : vector<16x32xi1>, vector<16x32xf32>
      %664 = arith.maximumf %651, %663 : vector<16x32xf32>
      %c6_i32_148 = arith.constant 6 : i32
      %665 = vector.broadcast %c6_i32_148 : i32 to vector<16x32xi32>
      %666 = arith.cmpi eq, %399, %665 : vector<16x32xi32>
      %cst_149 = arith.constant 0.000000e+00 : f32
      %667 = vector.broadcast %cst_149 : f32 to vector<16x32xf32>
      %668 = arith.select %666, %595, %667 : vector<16x32xi1>, vector<16x32xf32>
      %669 = vector.extract_strided_slice %668 {offsets = [15, 0], sizes = [1, 32], strides = [1, 1]} : vector<16x32xf32> to vector<1x32xf32>
      %670 = vector.extract_strided_slice %668 {offsets = [0, 0], sizes = [15, 32], strides = [1, 1]} : vector<16x32xf32> to vector<15x32xf32>
      %671 = tpu.concatenate %669, %670 in 0 : vector<1x32xf32>, vector<15x32xf32> -> vector<16x32xf32>
      %cst_150 = arith.constant 0.000000e+00 : f32
      %672 = vector.broadcast %cst_150 : f32 to vector<16x32xf32>
      %673 = arith.select %21, %671, %672 : vector<16x32xi1>, vector<16x32xf32>
      %674 = arith.maximumf %664, %673 : vector<16x32xf32>
      %c7_i32_151 = arith.constant 7 : i32
      %675 = vector.broadcast %c7_i32_151 : i32 to vector<16x32xi32>
      %676 = arith.cmpi eq, %399, %675 : vector<16x32xi32>
      %cst_152 = arith.constant 0.000000e+00 : f32
      %677 = vector.broadcast %cst_152 : f32 to vector<16x32xf32>
      %678 = arith.select %676, %595, %677 : vector<16x32xi1>, vector<16x32xf32>
      %679 = vector.extract_strided_slice %678 {offsets = [15, 0], sizes = [1, 32], strides = [1, 1]} : vector<16x32xf32> to vector<1x32xf32>
      %680 = vector.extract_strided_slice %678 {offsets = [0, 0], sizes = [15, 32], strides = [1, 1]} : vector<16x32xf32> to vector<15x32xf32>
      %681 = tpu.concatenate %679, %680 in 0 : vector<1x32xf32>, vector<15x32xf32> -> vector<16x32xf32>
      %682 = vector.extract_strided_slice %681 {offsets = [0, 31], sizes = [16, 1], strides = [1, 1]} : vector<16x32xf32> to vector<16x1xf32>
      %683 = vector.extract_strided_slice %681 {offsets = [0, 0], sizes = [16, 31], strides = [1, 1]} : vector<16x32xf32> to vector<16x31xf32>
      %684 = tpu.concatenate %682, %683 in 1 : vector<16x1xf32>, vector<16x31xf32> -> vector<16x32xf32>
      %cst_153 = arith.constant 0.000000e+00 : f32
      %685 = vector.broadcast %cst_153 : f32 to vector<16x32xf32>
      %686 = arith.select %28, %684, %685 : vector<16x32xi1>, vector<16x32xf32>
      %687 = arith.maximumf %674, %686 : vector<16x32xf32>
      %688 = arith.maximumf %593, %687 : vector<16x32xf32>
      %689 = arith.mulf %687, %85 : vector<16x32xf32>
      %690 = arith.subf %687, %689 : vector<16x32xf32>
      %c0_i32_154 = arith.constant 0 : i32
      %691 = vector.broadcast %c0_i32_154 : i32 to vector<16x32xi32>
      %692 = arith.cmpi eq, %399, %691 : vector<16x32xi32>
      %cst_155 = arith.constant 0.000000e+00 : f32
      %693 = vector.broadcast %cst_155 : f32 to vector<16x32xf32>
      %694 = arith.select %692, %690, %693 : vector<16x32xi1>, vector<16x32xf32>
      %695 = vector.extract_strided_slice %694 {offsets = [1, 0], sizes = [15, 32], strides = [1, 1]} : vector<16x32xf32> to vector<15x32xf32>
      %696 = vector.extract_strided_slice %694 {offsets = [0, 0], sizes = [1, 32], strides = [1, 1]} : vector<16x32xf32> to vector<1x32xf32>
      %697 = tpu.concatenate %695, %696 in 0 : vector<15x32xf32>, vector<1x32xf32> -> vector<16x32xf32>
      %698 = vector.extract_strided_slice %697 {offsets = [0, 1], sizes = [16, 31], strides = [1, 1]} : vector<16x32xf32> to vector<16x31xf32>
      %699 = vector.extract_strided_slice %697 {offsets = [0, 0], sizes = [16, 1], strides = [1, 1]} : vector<16x32xf32> to vector<16x1xf32>
      %700 = tpu.concatenate %698, %699 in 1 : vector<16x31xf32>, vector<16x1xf32> -> vector<16x32xf32>
      %cst_156 = arith.constant 0.000000e+00 : f32
      %701 = vector.broadcast %cst_156 : f32 to vector<16x32xf32>
      %702 = arith.select %31, %700, %701 : vector<16x32xi1>, vector<16x32xf32>
      %703 = arith.maximumf %689, %702 : vector<16x32xf32>
      %c1_i32_157 = arith.constant 1 : i32
      %704 = vector.broadcast %c1_i32_157 : i32 to vector<16x32xi32>
      %705 = arith.cmpi eq, %399, %704 : vector<16x32xi32>
      %cst_158 = arith.constant 0.000000e+00 : f32
      %706 = vector.broadcast %cst_158 : f32 to vector<16x32xf32>
      %707 = arith.select %705, %690, %706 : vector<16x32xi1>, vector<16x32xf32>
      %708 = vector.extract_strided_slice %707 {offsets = [1, 0], sizes = [15, 32], strides = [1, 1]} : vector<16x32xf32> to vector<15x32xf32>
      %709 = vector.extract_strided_slice %707 {offsets = [0, 0], sizes = [1, 32], strides = [1, 1]} : vector<16x32xf32> to vector<1x32xf32>
      %710 = tpu.concatenate %708, %709 in 0 : vector<15x32xf32>, vector<1x32xf32> -> vector<16x32xf32>
      %cst_159 = arith.constant 0.000000e+00 : f32
      %711 = vector.broadcast %cst_159 : f32 to vector<16x32xf32>
      %712 = arith.select %23, %710, %711 : vector<16x32xi1>, vector<16x32xf32>
      %713 = arith.maximumf %703, %712 : vector<16x32xf32>
      %c2_i32_160 = arith.constant 2 : i32
      %714 = vector.broadcast %c2_i32_160 : i32 to vector<16x32xi32>
      %715 = arith.cmpi eq, %399, %714 : vector<16x32xi32>
      %cst_161 = arith.constant 0.000000e+00 : f32
      %716 = vector.broadcast %cst_161 : f32 to vector<16x32xf32>
      %717 = arith.select %715, %690, %716 : vector<16x32xi1>, vector<16x32xf32>
      %718 = vector.extract_strided_slice %717 {offsets = [1, 0], sizes = [15, 32], strides = [1, 1]} : vector<16x32xf32> to vector<15x32xf32>
      %719 = vector.extract_strided_slice %717 {offsets = [0, 0], sizes = [1, 32], strides = [1, 1]} : vector<16x32xf32> to vector<1x32xf32>
      %720 = tpu.concatenate %718, %719 in 0 : vector<15x32xf32>, vector<1x32xf32> -> vector<16x32xf32>
      %721 = vector.extract_strided_slice %720 {offsets = [0, 31], sizes = [16, 1], strides = [1, 1]} : vector<16x32xf32> to vector<16x1xf32>
      %722 = vector.extract_strided_slice %720 {offsets = [0, 0], sizes = [16, 31], strides = [1, 1]} : vector<16x32xf32> to vector<16x31xf32>
      %723 = tpu.concatenate %721, %722 in 1 : vector<16x1xf32>, vector<16x31xf32> -> vector<16x32xf32>
      %cst_162 = arith.constant 0.000000e+00 : f32
      %724 = vector.broadcast %cst_162 : f32 to vector<16x32xf32>
      %725 = arith.select %30, %723, %724 : vector<16x32xi1>, vector<16x32xf32>
      %726 = arith.maximumf %713, %725 : vector<16x32xf32>
      %c3_i32_163 = arith.constant 3 : i32
      %727 = vector.broadcast %c3_i32_163 : i32 to vector<16x32xi32>
      %728 = arith.cmpi eq, %399, %727 : vector<16x32xi32>
      %cst_164 = arith.constant 0.000000e+00 : f32
      %729 = vector.broadcast %cst_164 : f32 to vector<16x32xf32>
      %730 = arith.select %728, %690, %729 : vector<16x32xi1>, vector<16x32xf32>
      %731 = vector.extract_strided_slice %730 {offsets = [0, 1], sizes = [16, 31], strides = [1, 1]} : vector<16x32xf32> to vector<16x31xf32>
      %732 = vector.extract_strided_slice %730 {offsets = [0, 0], sizes = [16, 1], strides = [1, 1]} : vector<16x32xf32> to vector<16x1xf32>
      %733 = tpu.concatenate %731, %732 in 1 : vector<16x31xf32>, vector<16x1xf32> -> vector<16x32xf32>
      %cst_165 = arith.constant 0.000000e+00 : f32
      %734 = vector.broadcast %cst_165 : f32 to vector<16x32xf32>
      %735 = arith.select %27, %733, %734 : vector<16x32xi1>, vector<16x32xf32>
      %736 = arith.maximumf %726, %735 : vector<16x32xf32>
      %c4_i32_166 = arith.constant 4 : i32
      %737 = vector.broadcast %c4_i32_166 : i32 to vector<16x32xi32>
      %738 = arith.cmpi eq, %399, %737 : vector<16x32xi32>
      %cst_167 = arith.constant 0.000000e+00 : f32
      %739 = vector.broadcast %cst_167 : f32 to vector<16x32xf32>
      %740 = arith.select %738, %690, %739 : vector<16x32xi1>, vector<16x32xf32>
      %741 = vector.extract_strided_slice %740 {offsets = [0, 31], sizes = [16, 1], strides = [1, 1]} : vector<16x32xf32> to vector<16x1xf32>
      %742 = vector.extract_strided_slice %740 {offsets = [0, 0], sizes = [16, 31], strides = [1, 1]} : vector<16x32xf32> to vector<16x31xf32>
      %743 = tpu.concatenate %741, %742 in 1 : vector<16x1xf32>, vector<16x31xf32> -> vector<16x32xf32>
      %cst_168 = arith.constant 0.000000e+00 : f32
      %744 = vector.broadcast %cst_168 : f32 to vector<16x32xf32>
      %745 = arith.select %25, %743, %744 : vector<16x32xi1>, vector<16x32xf32>
      %746 = arith.maximumf %736, %745 : vector<16x32xf32>
      %c5_i32_169 = arith.constant 5 : i32
      %747 = vector.broadcast %c5_i32_169 : i32 to vector<16x32xi32>
      %748 = arith.cmpi eq, %399, %747 : vector<16x32xi32>
      %cst_170 = arith.constant 0.000000e+00 : f32
      %749 = vector.broadcast %cst_170 : f32 to vector<16x32xf32>
      %750 = arith.select %748, %690, %749 : vector<16x32xi1>, vector<16x32xf32>
      %751 = vector.extract_strided_slice %750 {offsets = [15, 0], sizes = [1, 32], strides = [1, 1]} : vector<16x32xf32> to vector<1x32xf32>
      %752 = vector.extract_strided_slice %750 {offsets = [0, 0], sizes = [15, 32], strides = [1, 1]} : vector<16x32xf32> to vector<15x32xf32>
      %753 = tpu.concatenate %751, %752 in 0 : vector<1x32xf32>, vector<15x32xf32> -> vector<16x32xf32>
      %754 = vector.extract_strided_slice %753 {offsets = [0, 1], sizes = [16, 31], strides = [1, 1]} : vector<16x32xf32> to vector<16x31xf32>
      %755 = vector.extract_strided_slice %753 {offsets = [0, 0], sizes = [16, 1], strides = [1, 1]} : vector<16x32xf32> to vector<16x1xf32>
      %756 = tpu.concatenate %754, %755 in 1 : vector<16x31xf32>, vector<16x1xf32> -> vector<16x32xf32>
      %cst_171 = arith.constant 0.000000e+00 : f32
      %757 = vector.broadcast %cst_171 : f32 to vector<16x32xf32>
      %758 = arith.select %29, %756, %757 : vector<16x32xi1>, vector<16x32xf32>
      %759 = arith.maximumf %746, %758 : vector<16x32xf32>
      %c6_i32_172 = arith.constant 6 : i32
      %760 = vector.broadcast %c6_i32_172 : i32 to vector<16x32xi32>
      %761 = arith.cmpi eq, %399, %760 : vector<16x32xi32>
      %cst_173 = arith.constant 0.000000e+00 : f32
      %762 = vector.broadcast %cst_173 : f32 to vector<16x32xf32>
      %763 = arith.select %761, %690, %762 : vector<16x32xi1>, vector<16x32xf32>
      %764 = vector.extract_strided_slice %763 {offsets = [15, 0], sizes = [1, 32], strides = [1, 1]} : vector<16x32xf32> to vector<1x32xf32>
      %765 = vector.extract_strided_slice %763 {offsets = [0, 0], sizes = [15, 32], strides = [1, 1]} : vector<16x32xf32> to vector<15x32xf32>
      %766 = tpu.concatenate %764, %765 in 0 : vector<1x32xf32>, vector<15x32xf32> -> vector<16x32xf32>
      %cst_174 = arith.constant 0.000000e+00 : f32
      %767 = vector.broadcast %cst_174 : f32 to vector<16x32xf32>
      %768 = arith.select %21, %766, %767 : vector<16x32xi1>, vector<16x32xf32>
      %769 = arith.maximumf %759, %768 : vector<16x32xf32>
      %c7_i32_175 = arith.constant 7 : i32
      %770 = vector.broadcast %c7_i32_175 : i32 to vector<16x32xi32>
      %771 = arith.cmpi eq, %399, %770 : vector<16x32xi32>
      %cst_176 = arith.constant 0.000000e+00 : f32
      %772 = vector.broadcast %cst_176 : f32 to vector<16x32xf32>
      %773 = arith.select %771, %690, %772 : vector<16x32xi1>, vector<16x32xf32>
      %774 = vector.extract_strided_slice %773 {offsets = [15, 0], sizes = [1, 32], strides = [1, 1]} : vector<16x32xf32> to vector<1x32xf32>
      %775 = vector.extract_strided_slice %773 {offsets = [0, 0], sizes = [15, 32], strides = [1, 1]} : vector<16x32xf32> to vector<15x32xf32>
      %776 = tpu.concatenate %774, %775 in 0 : vector<1x32xf32>, vector<15x32xf32> -> vector<16x32xf32>
      %777 = vector.extract_strided_slice %776 {offsets = [0, 31], sizes = [16, 1], strides = [1, 1]} : vector<16x32xf32> to vector<16x1xf32>
      %778 = vector.extract_strided_slice %776 {offsets = [0, 0], sizes = [16, 31], strides = [1, 1]} : vector<16x32xf32> to vector<16x31xf32>
      %779 = tpu.concatenate %777, %778 in 1 : vector<16x1xf32>, vector<16x31xf32> -> vector<16x32xf32>
      %cst_177 = arith.constant 0.000000e+00 : f32
      %780 = vector.broadcast %cst_177 : f32 to vector<16x32xf32>
      %781 = arith.select %28, %779, %780 : vector<16x32xi1>, vector<16x32xf32>
      %782 = arith.maximumf %769, %781 : vector<16x32xf32>
      %783 = arith.maximumf %688, %782 : vector<16x32xf32>
      %784 = arith.mulf %782, %85 : vector<16x32xf32>
      %785 = arith.subf %782, %784 : vector<16x32xf32>
      %c0_i32_178 = arith.constant 0 : i32
      %786 = vector.broadcast %c0_i32_178 : i32 to vector<16x32xi32>
      %787 = arith.cmpi eq, %399, %786 : vector<16x32xi32>
      %cst_179 = arith.constant 0.000000e+00 : f32
      %788 = vector.broadcast %cst_179 : f32 to vector<16x32xf32>
      %789 = arith.select %787, %785, %788 : vector<16x32xi1>, vector<16x32xf32>
      %790 = vector.extract_strided_slice %789 {offsets = [1, 0], sizes = [15, 32], strides = [1, 1]} : vector<16x32xf32> to vector<15x32xf32>
      %791 = vector.extract_strided_slice %789 {offsets = [0, 0], sizes = [1, 32], strides = [1, 1]} : vector<16x32xf32> to vector<1x32xf32>
      %792 = tpu.concatenate %790, %791 in 0 : vector<15x32xf32>, vector<1x32xf32> -> vector<16x32xf32>
      %793 = vector.extract_strided_slice %792 {offsets = [0, 1], sizes = [16, 31], strides = [1, 1]} : vector<16x32xf32> to vector<16x31xf32>
      %794 = vector.extract_strided_slice %792 {offsets = [0, 0], sizes = [16, 1], strides = [1, 1]} : vector<16x32xf32> to vector<16x1xf32>
      %795 = tpu.concatenate %793, %794 in 1 : vector<16x31xf32>, vector<16x1xf32> -> vector<16x32xf32>
      %cst_180 = arith.constant 0.000000e+00 : f32
      %796 = vector.broadcast %cst_180 : f32 to vector<16x32xf32>
      %797 = arith.select %31, %795, %796 : vector<16x32xi1>, vector<16x32xf32>
      %798 = arith.maximumf %784, %797 : vector<16x32xf32>
      %c1_i32_181 = arith.constant 1 : i32
      %799 = vector.broadcast %c1_i32_181 : i32 to vector<16x32xi32>
      %800 = arith.cmpi eq, %399, %799 : vector<16x32xi32>
      %cst_182 = arith.constant 0.000000e+00 : f32
      %801 = vector.broadcast %cst_182 : f32 to vector<16x32xf32>
      %802 = arith.select %800, %785, %801 : vector<16x32xi1>, vector<16x32xf32>
      %803 = vector.extract_strided_slice %802 {offsets = [1, 0], sizes = [15, 32], strides = [1, 1]} : vector<16x32xf32> to vector<15x32xf32>
      %804 = vector.extract_strided_slice %802 {offsets = [0, 0], sizes = [1, 32], strides = [1, 1]} : vector<16x32xf32> to vector<1x32xf32>
      %805 = tpu.concatenate %803, %804 in 0 : vector<15x32xf32>, vector<1x32xf32> -> vector<16x32xf32>
      %cst_183 = arith.constant 0.000000e+00 : f32
      %806 = vector.broadcast %cst_183 : f32 to vector<16x32xf32>
      %807 = arith.select %23, %805, %806 : vector<16x32xi1>, vector<16x32xf32>
      %808 = arith.maximumf %798, %807 : vector<16x32xf32>
      %c2_i32_184 = arith.constant 2 : i32
      %809 = vector.broadcast %c2_i32_184 : i32 to vector<16x32xi32>
      %810 = arith.cmpi eq, %399, %809 : vector<16x32xi32>
      %cst_185 = arith.constant 0.000000e+00 : f32
      %811 = vector.broadcast %cst_185 : f32 to vector<16x32xf32>
      %812 = arith.select %810, %785, %811 : vector<16x32xi1>, vector<16x32xf32>
      %813 = vector.extract_strided_slice %812 {offsets = [1, 0], sizes = [15, 32], strides = [1, 1]} : vector<16x32xf32> to vector<15x32xf32>
      %814 = vector.extract_strided_slice %812 {offsets = [0, 0], sizes = [1, 32], strides = [1, 1]} : vector<16x32xf32> to vector<1x32xf32>
      %815 = tpu.concatenate %813, %814 in 0 : vector<15x32xf32>, vector<1x32xf32> -> vector<16x32xf32>
      %816 = vector.extract_strided_slice %815 {offsets = [0, 31], sizes = [16, 1], strides = [1, 1]} : vector<16x32xf32> to vector<16x1xf32>
      %817 = vector.extract_strided_slice %815 {offsets = [0, 0], sizes = [16, 31], strides = [1, 1]} : vector<16x32xf32> to vector<16x31xf32>
      %818 = tpu.concatenate %816, %817 in 1 : vector<16x1xf32>, vector<16x31xf32> -> vector<16x32xf32>
      %cst_186 = arith.constant 0.000000e+00 : f32
      %819 = vector.broadcast %cst_186 : f32 to vector<16x32xf32>
      %820 = arith.select %30, %818, %819 : vector<16x32xi1>, vector<16x32xf32>
      %821 = arith.maximumf %808, %820 : vector<16x32xf32>
      %c3_i32_187 = arith.constant 3 : i32
      %822 = vector.broadcast %c3_i32_187 : i32 to vector<16x32xi32>
      %823 = arith.cmpi eq, %399, %822 : vector<16x32xi32>
      %cst_188 = arith.constant 0.000000e+00 : f32
      %824 = vector.broadcast %cst_188 : f32 to vector<16x32xf32>
      %825 = arith.select %823, %785, %824 : vector<16x32xi1>, vector<16x32xf32>
      %826 = vector.extract_strided_slice %825 {offsets = [0, 1], sizes = [16, 31], strides = [1, 1]} : vector<16x32xf32> to vector<16x31xf32>
      %827 = vector.extract_strided_slice %825 {offsets = [0, 0], sizes = [16, 1], strides = [1, 1]} : vector<16x32xf32> to vector<16x1xf32>
      %828 = tpu.concatenate %826, %827 in 1 : vector<16x31xf32>, vector<16x1xf32> -> vector<16x32xf32>
      %cst_189 = arith.constant 0.000000e+00 : f32
      %829 = vector.broadcast %cst_189 : f32 to vector<16x32xf32>
      %830 = arith.select %27, %828, %829 : vector<16x32xi1>, vector<16x32xf32>
      %831 = arith.maximumf %821, %830 : vector<16x32xf32>
      %c4_i32_190 = arith.constant 4 : i32
      %832 = vector.broadcast %c4_i32_190 : i32 to vector<16x32xi32>
      %833 = arith.cmpi eq, %399, %832 : vector<16x32xi32>
      %cst_191 = arith.constant 0.000000e+00 : f32
      %834 = vector.broadcast %cst_191 : f32 to vector<16x32xf32>
      %835 = arith.select %833, %785, %834 : vector<16x32xi1>, vector<16x32xf32>
      %836 = vector.extract_strided_slice %835 {offsets = [0, 31], sizes = [16, 1], strides = [1, 1]} : vector<16x32xf32> to vector<16x1xf32>
      %837 = vector.extract_strided_slice %835 {offsets = [0, 0], sizes = [16, 31], strides = [1, 1]} : vector<16x32xf32> to vector<16x31xf32>
      %838 = tpu.concatenate %836, %837 in 1 : vector<16x1xf32>, vector<16x31xf32> -> vector<16x32xf32>
      %cst_192 = arith.constant 0.000000e+00 : f32
      %839 = vector.broadcast %cst_192 : f32 to vector<16x32xf32>
      %840 = arith.select %25, %838, %839 : vector<16x32xi1>, vector<16x32xf32>
      %841 = arith.maximumf %831, %840 : vector<16x32xf32>
      %c5_i32_193 = arith.constant 5 : i32
      %842 = vector.broadcast %c5_i32_193 : i32 to vector<16x32xi32>
      %843 = arith.cmpi eq, %399, %842 : vector<16x32xi32>
      %cst_194 = arith.constant 0.000000e+00 : f32
      %844 = vector.broadcast %cst_194 : f32 to vector<16x32xf32>
      %845 = arith.select %843, %785, %844 : vector<16x32xi1>, vector<16x32xf32>
      %846 = vector.extract_strided_slice %845 {offsets = [15, 0], sizes = [1, 32], strides = [1, 1]} : vector<16x32xf32> to vector<1x32xf32>
      %847 = vector.extract_strided_slice %845 {offsets = [0, 0], sizes = [15, 32], strides = [1, 1]} : vector<16x32xf32> to vector<15x32xf32>
      %848 = tpu.concatenate %846, %847 in 0 : vector<1x32xf32>, vector<15x32xf32> -> vector<16x32xf32>
      %849 = vector.extract_strided_slice %848 {offsets = [0, 1], sizes = [16, 31], strides = [1, 1]} : vector<16x32xf32> to vector<16x31xf32>
      %850 = vector.extract_strided_slice %848 {offsets = [0, 0], sizes = [16, 1], strides = [1, 1]} : vector<16x32xf32> to vector<16x1xf32>
      %851 = tpu.concatenate %849, %850 in 1 : vector<16x31xf32>, vector<16x1xf32> -> vector<16x32xf32>
      %cst_195 = arith.constant 0.000000e+00 : f32
      %852 = vector.broadcast %cst_195 : f32 to vector<16x32xf32>
      %853 = arith.select %29, %851, %852 : vector<16x32xi1>, vector<16x32xf32>
      %854 = arith.maximumf %841, %853 : vector<16x32xf32>
      %c6_i32_196 = arith.constant 6 : i32
      %855 = vector.broadcast %c6_i32_196 : i32 to vector<16x32xi32>
      %856 = arith.cmpi eq, %399, %855 : vector<16x32xi32>
      %cst_197 = arith.constant 0.000000e+00 : f32
      %857 = vector.broadcast %cst_197 : f32 to vector<16x32xf32>
      %858 = arith.select %856, %785, %857 : vector<16x32xi1>, vector<16x32xf32>
      %859 = vector.extract_strided_slice %858 {offsets = [15, 0], sizes = [1, 32], strides = [1, 1]} : vector<16x32xf32> to vector<1x32xf32>
      %860 = vector.extract_strided_slice %858 {offsets = [0, 0], sizes = [15, 32], strides = [1, 1]} : vector<16x32xf32> to vector<15x32xf32>
      %861 = tpu.concatenate %859, %860 in 0 : vector<1x32xf32>, vector<15x32xf32> -> vector<16x32xf32>
      %cst_198 = arith.constant 0.000000e+00 : f32
      %862 = vector.broadcast %cst_198 : f32 to vector<16x32xf32>
      %863 = arith.select %21, %861, %862 : vector<16x32xi1>, vector<16x32xf32>
      %864 = arith.maximumf %854, %863 : vector<16x32xf32>
      %c7_i32_199 = arith.constant 7 : i32
      %865 = vector.broadcast %c7_i32_199 : i32 to vector<16x32xi32>
      %866 = arith.cmpi eq, %399, %865 : vector<16x32xi32>
      %cst_200 = arith.constant 0.000000e+00 : f32
      %867 = vector.broadcast %cst_200 : f32 to vector<16x32xf32>
      %868 = arith.select %866, %785, %867 : vector<16x32xi1>, vector<16x32xf32>
      %869 = vector.extract_strided_slice %868 {offsets = [15, 0], sizes = [1, 32], strides = [1, 1]} : vector<16x32xf32> to vector<1x32xf32>
      %870 = vector.extract_strided_slice %868 {offsets = [0, 0], sizes = [15, 32], strides = [1, 1]} : vector<16x32xf32> to vector<15x32xf32>
      %871 = tpu.concatenate %869, %870 in 0 : vector<1x32xf32>, vector<15x32xf32> -> vector<16x32xf32>
      %872 = vector.extract_strided_slice %871 {offsets = [0, 31], sizes = [16, 1], strides = [1, 1]} : vector<16x32xf32> to vector<16x1xf32>
      %873 = vector.extract_strided_slice %871 {offsets = [0, 0], sizes = [16, 31], strides = [1, 1]} : vector<16x32xf32> to vector<16x31xf32>
      %874 = tpu.concatenate %872, %873 in 1 : vector<16x1xf32>, vector<16x31xf32> -> vector<16x32xf32>
      %cst_201 = arith.constant 0.000000e+00 : f32
      %875 = vector.broadcast %cst_201 : f32 to vector<16x32xf32>
      %876 = arith.select %28, %874, %875 : vector<16x32xi1>, vector<16x32xf32>
      %877 = arith.maximumf %864, %876 : vector<16x32xf32>
      %878 = arith.maximumf %783, %877 : vector<16x32xf32>
      %879 = arith.mulf %877, %85 : vector<16x32xf32>
      %880 = arith.subf %877, %879 : vector<16x32xf32>
      %c0_i32_202 = arith.constant 0 : i32
      %881 = vector.broadcast %c0_i32_202 : i32 to vector<16x32xi32>
      %882 = arith.cmpi eq, %399, %881 : vector<16x32xi32>
      %cst_203 = arith.constant 0.000000e+00 : f32
      %883 = vector.broadcast %cst_203 : f32 to vector<16x32xf32>
      %884 = arith.select %882, %880, %883 : vector<16x32xi1>, vector<16x32xf32>
      %885 = vector.extract_strided_slice %884 {offsets = [1, 0], sizes = [15, 32], strides = [1, 1]} : vector<16x32xf32> to vector<15x32xf32>
      %886 = vector.extract_strided_slice %884 {offsets = [0, 0], sizes = [1, 32], strides = [1, 1]} : vector<16x32xf32> to vector<1x32xf32>
      %887 = tpu.concatenate %885, %886 in 0 : vector<15x32xf32>, vector<1x32xf32> -> vector<16x32xf32>
      %888 = vector.extract_strided_slice %887 {offsets = [0, 1], sizes = [16, 31], strides = [1, 1]} : vector<16x32xf32> to vector<16x31xf32>
      %889 = vector.extract_strided_slice %887 {offsets = [0, 0], sizes = [16, 1], strides = [1, 1]} : vector<16x32xf32> to vector<16x1xf32>
      %890 = tpu.concatenate %888, %889 in 1 : vector<16x31xf32>, vector<16x1xf32> -> vector<16x32xf32>
      %cst_204 = arith.constant 0.000000e+00 : f32
      %891 = vector.broadcast %cst_204 : f32 to vector<16x32xf32>
      %892 = arith.select %31, %890, %891 : vector<16x32xi1>, vector<16x32xf32>
      %893 = arith.maximumf %879, %892 : vector<16x32xf32>
      %c1_i32_205 = arith.constant 1 : i32
      %894 = vector.broadcast %c1_i32_205 : i32 to vector<16x32xi32>
      %895 = arith.cmpi eq, %399, %894 : vector<16x32xi32>
      %cst_206 = arith.constant 0.000000e+00 : f32
      %896 = vector.broadcast %cst_206 : f32 to vector<16x32xf32>
      %897 = arith.select %895, %880, %896 : vector<16x32xi1>, vector<16x32xf32>
      %898 = vector.extract_strided_slice %897 {offsets = [1, 0], sizes = [15, 32], strides = [1, 1]} : vector<16x32xf32> to vector<15x32xf32>
      %899 = vector.extract_strided_slice %897 {offsets = [0, 0], sizes = [1, 32], strides = [1, 1]} : vector<16x32xf32> to vector<1x32xf32>
      %900 = tpu.concatenate %898, %899 in 0 : vector<15x32xf32>, vector<1x32xf32> -> vector<16x32xf32>
      %cst_207 = arith.constant 0.000000e+00 : f32
      %901 = vector.broadcast %cst_207 : f32 to vector<16x32xf32>
      %902 = arith.select %23, %900, %901 : vector<16x32xi1>, vector<16x32xf32>
      %903 = arith.maximumf %893, %902 : vector<16x32xf32>
      %c2_i32_208 = arith.constant 2 : i32
      %904 = vector.broadcast %c2_i32_208 : i32 to vector<16x32xi32>
      %905 = arith.cmpi eq, %399, %904 : vector<16x32xi32>
      %cst_209 = arith.constant 0.000000e+00 : f32
      %906 = vector.broadcast %cst_209 : f32 to vector<16x32xf32>
      %907 = arith.select %905, %880, %906 : vector<16x32xi1>, vector<16x32xf32>
      %908 = vector.extract_strided_slice %907 {offsets = [1, 0], sizes = [15, 32], strides = [1, 1]} : vector<16x32xf32> to vector<15x32xf32>
      %909 = vector.extract_strided_slice %907 {offsets = [0, 0], sizes = [1, 32], strides = [1, 1]} : vector<16x32xf32> to vector<1x32xf32>
      %910 = tpu.concatenate %908, %909 in 0 : vector<15x32xf32>, vector<1x32xf32> -> vector<16x32xf32>
      %911 = vector.extract_strided_slice %910 {offsets = [0, 31], sizes = [16, 1], strides = [1, 1]} : vector<16x32xf32> to vector<16x1xf32>
      %912 = vector.extract_strided_slice %910 {offsets = [0, 0], sizes = [16, 31], strides = [1, 1]} : vector<16x32xf32> to vector<16x31xf32>
      %913 = tpu.concatenate %911, %912 in 1 : vector<16x1xf32>, vector<16x31xf32> -> vector<16x32xf32>
      %cst_210 = arith.constant 0.000000e+00 : f32
      %914 = vector.broadcast %cst_210 : f32 to vector<16x32xf32>
      %915 = arith.select %30, %913, %914 : vector<16x32xi1>, vector<16x32xf32>
      %916 = arith.maximumf %903, %915 : vector<16x32xf32>
      %c3_i32_211 = arith.constant 3 : i32
      %917 = vector.broadcast %c3_i32_211 : i32 to vector<16x32xi32>
      %918 = arith.cmpi eq, %399, %917 : vector<16x32xi32>
      %cst_212 = arith.constant 0.000000e+00 : f32
      %919 = vector.broadcast %cst_212 : f32 to vector<16x32xf32>
      %920 = arith.select %918, %880, %919 : vector<16x32xi1>, vector<16x32xf32>
      %921 = vector.extract_strided_slice %920 {offsets = [0, 1], sizes = [16, 31], strides = [1, 1]} : vector<16x32xf32> to vector<16x31xf32>
      %922 = vector.extract_strided_slice %920 {offsets = [0, 0], sizes = [16, 1], strides = [1, 1]} : vector<16x32xf32> to vector<16x1xf32>
      %923 = tpu.concatenate %921, %922 in 1 : vector<16x31xf32>, vector<16x1xf32> -> vector<16x32xf32>
      %cst_213 = arith.constant 0.000000e+00 : f32
      %924 = vector.broadcast %cst_213 : f32 to vector<16x32xf32>
      %925 = arith.select %27, %923, %924 : vector<16x32xi1>, vector<16x32xf32>
      %926 = arith.maximumf %916, %925 : vector<16x32xf32>
      %c4_i32_214 = arith.constant 4 : i32
      %927 = vector.broadcast %c4_i32_214 : i32 to vector<16x32xi32>
      %928 = arith.cmpi eq, %399, %927 : vector<16x32xi32>
      %cst_215 = arith.constant 0.000000e+00 : f32
      %929 = vector.broadcast %cst_215 : f32 to vector<16x32xf32>
      %930 = arith.select %928, %880, %929 : vector<16x32xi1>, vector<16x32xf32>
      %931 = vector.extract_strided_slice %930 {offsets = [0, 31], sizes = [16, 1], strides = [1, 1]} : vector<16x32xf32> to vector<16x1xf32>
      %932 = vector.extract_strided_slice %930 {offsets = [0, 0], sizes = [16, 31], strides = [1, 1]} : vector<16x32xf32> to vector<16x31xf32>
      %933 = tpu.concatenate %931, %932 in 1 : vector<16x1xf32>, vector<16x31xf32> -> vector<16x32xf32>
      %cst_216 = arith.constant 0.000000e+00 : f32
      %934 = vector.broadcast %cst_216 : f32 to vector<16x32xf32>
      %935 = arith.select %25, %933, %934 : vector<16x32xi1>, vector<16x32xf32>
      %936 = arith.maximumf %926, %935 : vector<16x32xf32>
      %c5_i32_217 = arith.constant 5 : i32
      %937 = vector.broadcast %c5_i32_217 : i32 to vector<16x32xi32>
      %938 = arith.cmpi eq, %399, %937 : vector<16x32xi32>
      %cst_218 = arith.constant 0.000000e+00 : f32
      %939 = vector.broadcast %cst_218 : f32 to vector<16x32xf32>
      %940 = arith.select %938, %880, %939 : vector<16x32xi1>, vector<16x32xf32>
      %941 = vector.extract_strided_slice %940 {offsets = [15, 0], sizes = [1, 32], strides = [1, 1]} : vector<16x32xf32> to vector<1x32xf32>
      %942 = vector.extract_strided_slice %940 {offsets = [0, 0], sizes = [15, 32], strides = [1, 1]} : vector<16x32xf32> to vector<15x32xf32>
      %943 = tpu.concatenate %941, %942 in 0 : vector<1x32xf32>, vector<15x32xf32> -> vector<16x32xf32>
      %944 = vector.extract_strided_slice %943 {offsets = [0, 1], sizes = [16, 31], strides = [1, 1]} : vector<16x32xf32> to vector<16x31xf32>
      %945 = vector.extract_strided_slice %943 {offsets = [0, 0], sizes = [16, 1], strides = [1, 1]} : vector<16x32xf32> to vector<16x1xf32>
      %946 = tpu.concatenate %944, %945 in 1 : vector<16x31xf32>, vector<16x1xf32> -> vector<16x32xf32>
      %cst_219 = arith.constant 0.000000e+00 : f32
      %947 = vector.broadcast %cst_219 : f32 to vector<16x32xf32>
      %948 = arith.select %29, %946, %947 : vector<16x32xi1>, vector<16x32xf32>
      %949 = arith.maximumf %936, %948 : vector<16x32xf32>
      %c6_i32_220 = arith.constant 6 : i32
      %950 = vector.broadcast %c6_i32_220 : i32 to vector<16x32xi32>
      %951 = arith.cmpi eq, %399, %950 : vector<16x32xi32>
      %cst_221 = arith.constant 0.000000e+00 : f32
      %952 = vector.broadcast %cst_221 : f32 to vector<16x32xf32>
      %953 = arith.select %951, %880, %952 : vector<16x32xi1>, vector<16x32xf32>
      %954 = vector.extract_strided_slice %953 {offsets = [15, 0], sizes = [1, 32], strides = [1, 1]} : vector<16x32xf32> to vector<1x32xf32>
      %955 = vector.extract_strided_slice %953 {offsets = [0, 0], sizes = [15, 32], strides = [1, 1]} : vector<16x32xf32> to vector<15x32xf32>
      %956 = tpu.concatenate %954, %955 in 0 : vector<1x32xf32>, vector<15x32xf32> -> vector<16x32xf32>
      %cst_222 = arith.constant 0.000000e+00 : f32
      %957 = vector.broadcast %cst_222 : f32 to vector<16x32xf32>
      %958 = arith.select %21, %956, %957 : vector<16x32xi1>, vector<16x32xf32>
      %959 = arith.maximumf %949, %958 : vector<16x32xf32>
      %c7_i32_223 = arith.constant 7 : i32
      %960 = vector.broadcast %c7_i32_223 : i32 to vector<16x32xi32>
      %961 = arith.cmpi eq, %399, %960 : vector<16x32xi32>
      %cst_224 = arith.constant 0.000000e+00 : f32
      %962 = vector.broadcast %cst_224 : f32 to vector<16x32xf32>
      %963 = arith.select %961, %880, %962 : vector<16x32xi1>, vector<16x32xf32>
      %964 = vector.extract_strided_slice %963 {offsets = [15, 0], sizes = [1, 32], strides = [1, 1]} : vector<16x32xf32> to vector<1x32xf32>
      %965 = vector.extract_strided_slice %963 {offsets = [0, 0], sizes = [15, 32], strides = [1, 1]} : vector<16x32xf32> to vector<15x32xf32>
      %966 = tpu.concatenate %964, %965 in 0 : vector<1x32xf32>, vector<15x32xf32> -> vector<16x32xf32>
      %967 = vector.extract_strided_slice %966 {offsets = [0, 31], sizes = [16, 1], strides = [1, 1]} : vector<16x32xf32> to vector<16x1xf32>
      %968 = vector.extract_strided_slice %966 {offsets = [0, 0], sizes = [16, 31], strides = [1, 1]} : vector<16x32xf32> to vector<16x31xf32>
      %969 = tpu.concatenate %967, %968 in 1 : vector<16x1xf32>, vector<16x31xf32> -> vector<16x32xf32>
      %cst_225 = arith.constant 0.000000e+00 : f32
      %970 = vector.broadcast %cst_225 : f32 to vector<16x32xf32>
      %971 = arith.select %28, %969, %970 : vector<16x32xi1>, vector<16x32xf32>
      %972 = arith.maximumf %959, %971 : vector<16x32xf32>
      %973 = arith.maximumf %878, %972 : vector<16x32xf32>
      %974 = arith.mulf %972, %85 : vector<16x32xf32>
      %975 = arith.subf %972, %974 : vector<16x32xf32>
      %c0_i32_226 = arith.constant 0 : i32
      %976 = vector.broadcast %c0_i32_226 : i32 to vector<16x32xi32>
      %977 = arith.cmpi eq, %399, %976 : vector<16x32xi32>
      %cst_227 = arith.constant 0.000000e+00 : f32
      %978 = vector.broadcast %cst_227 : f32 to vector<16x32xf32>
      %979 = arith.select %977, %975, %978 : vector<16x32xi1>, vector<16x32xf32>
      %980 = vector.extract_strided_slice %979 {offsets = [1, 0], sizes = [15, 32], strides = [1, 1]} : vector<16x32xf32> to vector<15x32xf32>
      %981 = vector.extract_strided_slice %979 {offsets = [0, 0], sizes = [1, 32], strides = [1, 1]} : vector<16x32xf32> to vector<1x32xf32>
      %982 = tpu.concatenate %980, %981 in 0 : vector<15x32xf32>, vector<1x32xf32> -> vector<16x32xf32>
      %983 = vector.extract_strided_slice %982 {offsets = [0, 1], sizes = [16, 31], strides = [1, 1]} : vector<16x32xf32> to vector<16x31xf32>
      %984 = vector.extract_strided_slice %982 {offsets = [0, 0], sizes = [16, 1], strides = [1, 1]} : vector<16x32xf32> to vector<16x1xf32>
      %985 = tpu.concatenate %983, %984 in 1 : vector<16x31xf32>, vector<16x1xf32> -> vector<16x32xf32>
      %cst_228 = arith.constant 0.000000e+00 : f32
      %986 = vector.broadcast %cst_228 : f32 to vector<16x32xf32>
      %987 = arith.select %31, %985, %986 : vector<16x32xi1>, vector<16x32xf32>
      %988 = arith.maximumf %974, %987 : vector<16x32xf32>
      %c1_i32_229 = arith.constant 1 : i32
      %989 = vector.broadcast %c1_i32_229 : i32 to vector<16x32xi32>
      %990 = arith.cmpi eq, %399, %989 : vector<16x32xi32>
      %cst_230 = arith.constant 0.000000e+00 : f32
      %991 = vector.broadcast %cst_230 : f32 to vector<16x32xf32>
      %992 = arith.select %990, %975, %991 : vector<16x32xi1>, vector<16x32xf32>
      %993 = vector.extract_strided_slice %992 {offsets = [1, 0], sizes = [15, 32], strides = [1, 1]} : vector<16x32xf32> to vector<15x32xf32>
      %994 = vector.extract_strided_slice %992 {offsets = [0, 0], sizes = [1, 32], strides = [1, 1]} : vector<16x32xf32> to vector<1x32xf32>
      %995 = tpu.concatenate %993, %994 in 0 : vector<15x32xf32>, vector<1x32xf32> -> vector<16x32xf32>
      %cst_231 = arith.constant 0.000000e+00 : f32
      %996 = vector.broadcast %cst_231 : f32 to vector<16x32xf32>
      %997 = arith.select %23, %995, %996 : vector<16x32xi1>, vector<16x32xf32>
      %998 = arith.maximumf %988, %997 : vector<16x32xf32>
      %c2_i32_232 = arith.constant 2 : i32
      %999 = vector.broadcast %c2_i32_232 : i32 to vector<16x32xi32>
      %1000 = arith.cmpi eq, %399, %999 : vector<16x32xi32>
      %cst_233 = arith.constant 0.000000e+00 : f32
      %1001 = vector.broadcast %cst_233 : f32 to vector<16x32xf32>
      %1002 = arith.select %1000, %975, %1001 : vector<16x32xi1>, vector<16x32xf32>
      %1003 = vector.extract_strided_slice %1002 {offsets = [1, 0], sizes = [15, 32], strides = [1, 1]} : vector<16x32xf32> to vector<15x32xf32>
      %1004 = vector.extract_strided_slice %1002 {offsets = [0, 0], sizes = [1, 32], strides = [1, 1]} : vector<16x32xf32> to vector<1x32xf32>
      %1005 = tpu.concatenate %1003, %1004 in 0 : vector<15x32xf32>, vector<1x32xf32> -> vector<16x32xf32>
      %1006 = vector.extract_strided_slice %1005 {offsets = [0, 31], sizes = [16, 1], strides = [1, 1]} : vector<16x32xf32> to vector<16x1xf32>
      %1007 = vector.extract_strided_slice %1005 {offsets = [0, 0], sizes = [16, 31], strides = [1, 1]} : vector<16x32xf32> to vector<16x31xf32>
      %1008 = tpu.concatenate %1006, %1007 in 1 : vector<16x1xf32>, vector<16x31xf32> -> vector<16x32xf32>
      %cst_234 = arith.constant 0.000000e+00 : f32
      %1009 = vector.broadcast %cst_234 : f32 to vector<16x32xf32>
      %1010 = arith.select %30, %1008, %1009 : vector<16x32xi1>, vector<16x32xf32>
      %1011 = arith.maximumf %998, %1010 : vector<16x32xf32>
      %c3_i32_235 = arith.constant 3 : i32
      %1012 = vector.broadcast %c3_i32_235 : i32 to vector<16x32xi32>
      %1013 = arith.cmpi eq, %399, %1012 : vector<16x32xi32>
      %cst_236 = arith.constant 0.000000e+00 : f32
      %1014 = vector.broadcast %cst_236 : f32 to vector<16x32xf32>
      %1015 = arith.select %1013, %975, %1014 : vector<16x32xi1>, vector<16x32xf32>
      %1016 = vector.extract_strided_slice %1015 {offsets = [0, 1], sizes = [16, 31], strides = [1, 1]} : vector<16x32xf32> to vector<16x31xf32>
      %1017 = vector.extract_strided_slice %1015 {offsets = [0, 0], sizes = [16, 1], strides = [1, 1]} : vector<16x32xf32> to vector<16x1xf32>
      %1018 = tpu.concatenate %1016, %1017 in 1 : vector<16x31xf32>, vector<16x1xf32> -> vector<16x32xf32>
      %cst_237 = arith.constant 0.000000e+00 : f32
      %1019 = vector.broadcast %cst_237 : f32 to vector<16x32xf32>
      %1020 = arith.select %27, %1018, %1019 : vector<16x32xi1>, vector<16x32xf32>
      %1021 = arith.maximumf %1011, %1020 : vector<16x32xf32>
      %c4_i32_238 = arith.constant 4 : i32
      %1022 = vector.broadcast %c4_i32_238 : i32 to vector<16x32xi32>
      %1023 = arith.cmpi eq, %399, %1022 : vector<16x32xi32>
      %cst_239 = arith.constant 0.000000e+00 : f32
      %1024 = vector.broadcast %cst_239 : f32 to vector<16x32xf32>
      %1025 = arith.select %1023, %975, %1024 : vector<16x32xi1>, vector<16x32xf32>
      %1026 = vector.extract_strided_slice %1025 {offsets = [0, 31], sizes = [16, 1], strides = [1, 1]} : vector<16x32xf32> to vector<16x1xf32>
      %1027 = vector.extract_strided_slice %1025 {offsets = [0, 0], sizes = [16, 31], strides = [1, 1]} : vector<16x32xf32> to vector<16x31xf32>
      %1028 = tpu.concatenate %1026, %1027 in 1 : vector<16x1xf32>, vector<16x31xf32> -> vector<16x32xf32>
      %cst_240 = arith.constant 0.000000e+00 : f32
      %1029 = vector.broadcast %cst_240 : f32 to vector<16x32xf32>
      %1030 = arith.select %25, %1028, %1029 : vector<16x32xi1>, vector<16x32xf32>
      %1031 = arith.maximumf %1021, %1030 : vector<16x32xf32>
      %c5_i32_241 = arith.constant 5 : i32
      %1032 = vector.broadcast %c5_i32_241 : i32 to vector<16x32xi32>
      %1033 = arith.cmpi eq, %399, %1032 : vector<16x32xi32>
      %cst_242 = arith.constant 0.000000e+00 : f32
      %1034 = vector.broadcast %cst_242 : f32 to vector<16x32xf32>
      %1035 = arith.select %1033, %975, %1034 : vector<16x32xi1>, vector<16x32xf32>
      %1036 = vector.extract_strided_slice %1035 {offsets = [15, 0], sizes = [1, 32], strides = [1, 1]} : vector<16x32xf32> to vector<1x32xf32>
      %1037 = vector.extract_strided_slice %1035 {offsets = [0, 0], sizes = [15, 32], strides = [1, 1]} : vector<16x32xf32> to vector<15x32xf32>
      %1038 = tpu.concatenate %1036, %1037 in 0 : vector<1x32xf32>, vector<15x32xf32> -> vector<16x32xf32>
      %1039 = vector.extract_strided_slice %1038 {offsets = [0, 1], sizes = [16, 31], strides = [1, 1]} : vector<16x32xf32> to vector<16x31xf32>
      %1040 = vector.extract_strided_slice %1038 {offsets = [0, 0], sizes = [16, 1], strides = [1, 1]} : vector<16x32xf32> to vector<16x1xf32>
      %1041 = tpu.concatenate %1039, %1040 in 1 : vector<16x31xf32>, vector<16x1xf32> -> vector<16x32xf32>
      %cst_243 = arith.constant 0.000000e+00 : f32
      %1042 = vector.broadcast %cst_243 : f32 to vector<16x32xf32>
      %1043 = arith.select %29, %1041, %1042 : vector<16x32xi1>, vector<16x32xf32>
      %1044 = arith.maximumf %1031, %1043 : vector<16x32xf32>
      %c6_i32_244 = arith.constant 6 : i32
      %1045 = vector.broadcast %c6_i32_244 : i32 to vector<16x32xi32>
      %1046 = arith.cmpi eq, %399, %1045 : vector<16x32xi32>
      %cst_245 = arith.constant 0.000000e+00 : f32
      %1047 = vector.broadcast %cst_245 : f32 to vector<16x32xf32>
      %1048 = arith.select %1046, %975, %1047 : vector<16x32xi1>, vector<16x32xf32>
      %1049 = vector.extract_strided_slice %1048 {offsets = [15, 0], sizes = [1, 32], strides = [1, 1]} : vector<16x32xf32> to vector<1x32xf32>
      %1050 = vector.extract_strided_slice %1048 {offsets = [0, 0], sizes = [15, 32], strides = [1, 1]} : vector<16x32xf32> to vector<15x32xf32>
      %1051 = tpu.concatenate %1049, %1050 in 0 : vector<1x32xf32>, vector<15x32xf32> -> vector<16x32xf32>
      %cst_246 = arith.constant 0.000000e+00 : f32
      %1052 = vector.broadcast %cst_246 : f32 to vector<16x32xf32>
      %1053 = arith.select %21, %1051, %1052 : vector<16x32xi1>, vector<16x32xf32>
      %1054 = arith.maximumf %1044, %1053 : vector<16x32xf32>
      %c7_i32_247 = arith.constant 7 : i32
      %1055 = vector.broadcast %c7_i32_247 : i32 to vector<16x32xi32>
      %1056 = arith.cmpi eq, %399, %1055 : vector<16x32xi32>
      %cst_248 = arith.constant 0.000000e+00 : f32
      %1057 = vector.broadcast %cst_248 : f32 to vector<16x32xf32>
      %1058 = arith.select %1056, %975, %1057 : vector<16x32xi1>, vector<16x32xf32>
      %1059 = vector.extract_strided_slice %1058 {offsets = [15, 0], sizes = [1, 32], strides = [1, 1]} : vector<16x32xf32> to vector<1x32xf32>
      %1060 = vector.extract_strided_slice %1058 {offsets = [0, 0], sizes = [15, 32], strides = [1, 1]} : vector<16x32xf32> to vector<15x32xf32>
      %1061 = tpu.concatenate %1059, %1060 in 0 : vector<1x32xf32>, vector<15x32xf32> -> vector<16x32xf32>
      %1062 = vector.extract_strided_slice %1061 {offsets = [0, 31], sizes = [16, 1], strides = [1, 1]} : vector<16x32xf32> to vector<16x1xf32>
      %1063 = vector.extract_strided_slice %1061 {offsets = [0, 0], sizes = [16, 31], strides = [1, 1]} : vector<16x32xf32> to vector<16x31xf32>
      %1064 = tpu.concatenate %1062, %1063 in 1 : vector<16x1xf32>, vector<16x31xf32> -> vector<16x32xf32>
      %cst_249 = arith.constant 0.000000e+00 : f32
      %1065 = vector.broadcast %cst_249 : f32 to vector<16x32xf32>
      %1066 = arith.select %28, %1064, %1065 : vector<16x32xi1>, vector<16x32xf32>
      %1067 = arith.maximumf %1054, %1066 : vector<16x32xf32>
      %1068 = arith.maximumf %973, %1067 : vector<16x32xf32>
      %1069 = arith.mulf %1067, %85 : vector<16x32xf32>
      %1070 = arith.subf %1067, %1069 : vector<16x32xf32>
      %c0_i32_250 = arith.constant 0 : i32
      %1071 = vector.broadcast %c0_i32_250 : i32 to vector<16x32xi32>
      %1072 = arith.cmpi eq, %399, %1071 : vector<16x32xi32>
      %cst_251 = arith.constant 0.000000e+00 : f32
      %1073 = vector.broadcast %cst_251 : f32 to vector<16x32xf32>
      %1074 = arith.select %1072, %1070, %1073 : vector<16x32xi1>, vector<16x32xf32>
      %1075 = vector.extract_strided_slice %1074 {offsets = [1, 0], sizes = [15, 32], strides = [1, 1]} : vector<16x32xf32> to vector<15x32xf32>
      %1076 = vector.extract_strided_slice %1074 {offsets = [0, 0], sizes = [1, 32], strides = [1, 1]} : vector<16x32xf32> to vector<1x32xf32>
      %1077 = tpu.concatenate %1075, %1076 in 0 : vector<15x32xf32>, vector<1x32xf32> -> vector<16x32xf32>
      %1078 = vector.extract_strided_slice %1077 {offsets = [0, 1], sizes = [16, 31], strides = [1, 1]} : vector<16x32xf32> to vector<16x31xf32>
      %1079 = vector.extract_strided_slice %1077 {offsets = [0, 0], sizes = [16, 1], strides = [1, 1]} : vector<16x32xf32> to vector<16x1xf32>
      %1080 = tpu.concatenate %1078, %1079 in 1 : vector<16x31xf32>, vector<16x1xf32> -> vector<16x32xf32>
      %cst_252 = arith.constant 0.000000e+00 : f32
      %1081 = vector.broadcast %cst_252 : f32 to vector<16x32xf32>
      %1082 = arith.select %31, %1080, %1081 : vector<16x32xi1>, vector<16x32xf32>
      %1083 = arith.maximumf %1069, %1082 : vector<16x32xf32>
      %c1_i32_253 = arith.constant 1 : i32
      %1084 = vector.broadcast %c1_i32_253 : i32 to vector<16x32xi32>
      %1085 = arith.cmpi eq, %399, %1084 : vector<16x32xi32>
      %cst_254 = arith.constant 0.000000e+00 : f32
      %1086 = vector.broadcast %cst_254 : f32 to vector<16x32xf32>
      %1087 = arith.select %1085, %1070, %1086 : vector<16x32xi1>, vector<16x32xf32>
      %1088 = vector.extract_strided_slice %1087 {offsets = [1, 0], sizes = [15, 32], strides = [1, 1]} : vector<16x32xf32> to vector<15x32xf32>
      %1089 = vector.extract_strided_slice %1087 {offsets = [0, 0], sizes = [1, 32], strides = [1, 1]} : vector<16x32xf32> to vector<1x32xf32>
      %1090 = tpu.concatenate %1088, %1089 in 0 : vector<15x32xf32>, vector<1x32xf32> -> vector<16x32xf32>
      %cst_255 = arith.constant 0.000000e+00 : f32
      %1091 = vector.broadcast %cst_255 : f32 to vector<16x32xf32>
      %1092 = arith.select %23, %1090, %1091 : vector<16x32xi1>, vector<16x32xf32>
      %1093 = arith.maximumf %1083, %1092 : vector<16x32xf32>
      %c2_i32_256 = arith.constant 2 : i32
      %1094 = vector.broadcast %c2_i32_256 : i32 to vector<16x32xi32>
      %1095 = arith.cmpi eq, %399, %1094 : vector<16x32xi32>
      %cst_257 = arith.constant 0.000000e+00 : f32
      %1096 = vector.broadcast %cst_257 : f32 to vector<16x32xf32>
      %1097 = arith.select %1095, %1070, %1096 : vector<16x32xi1>, vector<16x32xf32>
      %1098 = vector.extract_strided_slice %1097 {offsets = [1, 0], sizes = [15, 32], strides = [1, 1]} : vector<16x32xf32> to vector<15x32xf32>
      %1099 = vector.extract_strided_slice %1097 {offsets = [0, 0], sizes = [1, 32], strides = [1, 1]} : vector<16x32xf32> to vector<1x32xf32>
      %1100 = tpu.concatenate %1098, %1099 in 0 : vector<15x32xf32>, vector<1x32xf32> -> vector<16x32xf32>
      %1101 = vector.extract_strided_slice %1100 {offsets = [0, 31], sizes = [16, 1], strides = [1, 1]} : vector<16x32xf32> to vector<16x1xf32>
      %1102 = vector.extract_strided_slice %1100 {offsets = [0, 0], sizes = [16, 31], strides = [1, 1]} : vector<16x32xf32> to vector<16x31xf32>
      %1103 = tpu.concatenate %1101, %1102 in 1 : vector<16x1xf32>, vector<16x31xf32> -> vector<16x32xf32>
      %cst_258 = arith.constant 0.000000e+00 : f32
      %1104 = vector.broadcast %cst_258 : f32 to vector<16x32xf32>
      %1105 = arith.select %30, %1103, %1104 : vector<16x32xi1>, vector<16x32xf32>
      %1106 = arith.maximumf %1093, %1105 : vector<16x32xf32>
      %c3_i32_259 = arith.constant 3 : i32
      %1107 = vector.broadcast %c3_i32_259 : i32 to vector<16x32xi32>
      %1108 = arith.cmpi eq, %399, %1107 : vector<16x32xi32>
      %cst_260 = arith.constant 0.000000e+00 : f32
      %1109 = vector.broadcast %cst_260 : f32 to vector<16x32xf32>
      %1110 = arith.select %1108, %1070, %1109 : vector<16x32xi1>, vector<16x32xf32>
      %1111 = vector.extract_strided_slice %1110 {offsets = [0, 1], sizes = [16, 31], strides = [1, 1]} : vector<16x32xf32> to vector<16x31xf32>
      %1112 = vector.extract_strided_slice %1110 {offsets = [0, 0], sizes = [16, 1], strides = [1, 1]} : vector<16x32xf32> to vector<16x1xf32>
      %1113 = tpu.concatenate %1111, %1112 in 1 : vector<16x31xf32>, vector<16x1xf32> -> vector<16x32xf32>
      %cst_261 = arith.constant 0.000000e+00 : f32
      %1114 = vector.broadcast %cst_261 : f32 to vector<16x32xf32>
      %1115 = arith.select %27, %1113, %1114 : vector<16x32xi1>, vector<16x32xf32>
      %1116 = arith.maximumf %1106, %1115 : vector<16x32xf32>
      %c4_i32_262 = arith.constant 4 : i32
      %1117 = vector.broadcast %c4_i32_262 : i32 to vector<16x32xi32>
      %1118 = arith.cmpi eq, %399, %1117 : vector<16x32xi32>
      %cst_263 = arith.constant 0.000000e+00 : f32
      %1119 = vector.broadcast %cst_263 : f32 to vector<16x32xf32>
      %1120 = arith.select %1118, %1070, %1119 : vector<16x32xi1>, vector<16x32xf32>
      %1121 = vector.extract_strided_slice %1120 {offsets = [0, 31], sizes = [16, 1], strides = [1, 1]} : vector<16x32xf32> to vector<16x1xf32>
      %1122 = vector.extract_strided_slice %1120 {offsets = [0, 0], sizes = [16, 31], strides = [1, 1]} : vector<16x32xf32> to vector<16x31xf32>
      %1123 = tpu.concatenate %1121, %1122 in 1 : vector<16x1xf32>, vector<16x31xf32> -> vector<16x32xf32>
      %cst_264 = arith.constant 0.000000e+00 : f32
      %1124 = vector.broadcast %cst_264 : f32 to vector<16x32xf32>
      %1125 = arith.select %25, %1123, %1124 : vector<16x32xi1>, vector<16x32xf32>
      %1126 = arith.maximumf %1116, %1125 : vector<16x32xf32>
      %c5_i32_265 = arith.constant 5 : i32
      %1127 = vector.broadcast %c5_i32_265 : i32 to vector<16x32xi32>
      %1128 = arith.cmpi eq, %399, %1127 : vector<16x32xi32>
      %cst_266 = arith.constant 0.000000e+00 : f32
      %1129 = vector.broadcast %cst_266 : f32 to vector<16x32xf32>
      %1130 = arith.select %1128, %1070, %1129 : vector<16x32xi1>, vector<16x32xf32>
      %1131 = vector.extract_strided_slice %1130 {offsets = [15, 0], sizes = [1, 32], strides = [1, 1]} : vector<16x32xf32> to vector<1x32xf32>
      %1132 = vector.extract_strided_slice %1130 {offsets = [0, 0], sizes = [15, 32], strides = [1, 1]} : vector<16x32xf32> to vector<15x32xf32>
      %1133 = tpu.concatenate %1131, %1132 in 0 : vector<1x32xf32>, vector<15x32xf32> -> vector<16x32xf32>
      %1134 = vector.extract_strided_slice %1133 {offsets = [0, 1], sizes = [16, 31], strides = [1, 1]} : vector<16x32xf32> to vector<16x31xf32>
      %1135 = vector.extract_strided_slice %1133 {offsets = [0, 0], sizes = [16, 1], strides = [1, 1]} : vector<16x32xf32> to vector<16x1xf32>
      %1136 = tpu.concatenate %1134, %1135 in 1 : vector<16x31xf32>, vector<16x1xf32> -> vector<16x32xf32>
      %cst_267 = arith.constant 0.000000e+00 : f32
      %1137 = vector.broadcast %cst_267 : f32 to vector<16x32xf32>
      %1138 = arith.select %29, %1136, %1137 : vector<16x32xi1>, vector<16x32xf32>
      %1139 = arith.maximumf %1126, %1138 : vector<16x32xf32>
      %c6_i32_268 = arith.constant 6 : i32
      %1140 = vector.broadcast %c6_i32_268 : i32 to vector<16x32xi32>
      %1141 = arith.cmpi eq, %399, %1140 : vector<16x32xi32>
      %cst_269 = arith.constant 0.000000e+00 : f32
      %1142 = vector.broadcast %cst_269 : f32 to vector<16x32xf32>
      %1143 = arith.select %1141, %1070, %1142 : vector<16x32xi1>, vector<16x32xf32>
      %1144 = vector.extract_strided_slice %1143 {offsets = [15, 0], sizes = [1, 32], strides = [1, 1]} : vector<16x32xf32> to vector<1x32xf32>
      %1145 = vector.extract_strided_slice %1143 {offsets = [0, 0], sizes = [15, 32], strides = [1, 1]} : vector<16x32xf32> to vector<15x32xf32>
      %1146 = tpu.concatenate %1144, %1145 in 0 : vector<1x32xf32>, vector<15x32xf32> -> vector<16x32xf32>
      %cst_270 = arith.constant 0.000000e+00 : f32
      %1147 = vector.broadcast %cst_270 : f32 to vector<16x32xf32>
      %1148 = arith.select %21, %1146, %1147 : vector<16x32xi1>, vector<16x32xf32>
      %1149 = arith.maximumf %1139, %1148 : vector<16x32xf32>
      %c7_i32_271 = arith.constant 7 : i32
      %1150 = vector.broadcast %c7_i32_271 : i32 to vector<16x32xi32>
      %1151 = arith.cmpi eq, %399, %1150 : vector<16x32xi32>
      %cst_272 = arith.constant 0.000000e+00 : f32
      %1152 = vector.broadcast %cst_272 : f32 to vector<16x32xf32>
      %1153 = arith.select %1151, %1070, %1152 : vector<16x32xi1>, vector<16x32xf32>
      %1154 = vector.extract_strided_slice %1153 {offsets = [15, 0], sizes = [1, 32], strides = [1, 1]} : vector<16x32xf32> to vector<1x32xf32>
      %1155 = vector.extract_strided_slice %1153 {offsets = [0, 0], sizes = [15, 32], strides = [1, 1]} : vector<16x32xf32> to vector<15x32xf32>
      %1156 = tpu.concatenate %1154, %1155 in 0 : vector<1x32xf32>, vector<15x32xf32> -> vector<16x32xf32>
      %1157 = vector.extract_strided_slice %1156 {offsets = [0, 31], sizes = [16, 1], strides = [1, 1]} : vector<16x32xf32> to vector<16x1xf32>
      %1158 = vector.extract_strided_slice %1156 {offsets = [0, 0], sizes = [16, 31], strides = [1, 1]} : vector<16x32xf32> to vector<16x31xf32>
      %1159 = tpu.concatenate %1157, %1158 in 1 : vector<16x1xf32>, vector<16x31xf32> -> vector<16x32xf32>
      %cst_273 = arith.constant 0.000000e+00 : f32
      %1160 = vector.broadcast %cst_273 : f32 to vector<16x32xf32>
      %1161 = arith.select %28, %1159, %1160 : vector<16x32xi1>, vector<16x32xf32>
      %1162 = arith.maximumf %1149, %1161 : vector<16x32xf32>
      %1163 = arith.maximumf %1068, %1162 : vector<16x32xf32>
      %c8_i32_274 = arith.constant 8 : i32
      %1164 = arith.addi %arg6, %c8_i32_274 : i32
      scf.yield %1164, %1162, %1163 : i32, vector<16x32xf32>, vector<16x32xf32>
    }
    %c0_79 = arith.constant 0 : index
    %c0_80 = arith.constant 0 : index
    %c0_81 = arith.constant 0 : index
    %401 = vector.load %arg4[%c0_79, %c0_80, %c0_81] : memref<1x16x32xf32, #tpu.memory_space<vmem>>, vector<1x16x32xf32>
    %402 = vector.shape_cast %401 : vector<1x16x32xf32> to vector<16x32xf32>
    %403 = vector.shape_cast %400#2 : vector<16x32xf32> to vector<1x16x32xf32>
    tpu.vector_store %arg4[%c0_79, %c0_80, %c0_81], %403 {strides = array<i32>} : memref<1x16x32xf32, #tpu.memory_space<vmem>>, vector<1x16x32xf32>,
    return
  }
  func.func @transform_0(%arg0: i32, %arg1: memref<4x2xi32, #tpu.memory_space<smem>>, %arg2: memref<4x2xi32, #tpu.memory_space<smem>>) -> (i32, i32, i32) {
    %c0_i32 = arith.constant 0 : i32
    %c0_i32_0 = arith.constant 0 : i32
    %c0_i32_1 = arith.constant 0 : i32
    return %arg0, %c0_i32, %c0_i32_0 : i32, i32, i32
  }
  func.func @transform_1(%arg0: i32, %arg1: memref<4x2xi32, #tpu.memory_space<smem>>, %arg2: memref<4x2xi32, #tpu.memory_space<smem>>) -> (i32, i32, i32) {
    %c0_i32 = arith.constant 0 : i32
    %c0_i32_0 = arith.constant 0 : i32
    %c0_i32_1 = arith.constant 0 : i32
    return %arg0, %c0_i32, %c0_i32_0 : i32, i32, i32
  }
  func.func @transform_2(%arg0: i32, %arg1: memref<4x2xi32, #tpu.memory_space<smem>>, %arg2: memref<4x2xi32, #tpu.memory_space<smem>>) -> (i32, i32, i32) {
    %c0_i32 = arith.constant 0 : i32
    %c0_i32_0 = arith.constant 0 : i32
    %c0_i32_1 = arith.constant 0 : i32
    return %arg0, %c0_i32, %c0_i32_0 : i32, i32, i32
  }
}

</mosaic_0001>

<bundles_post_ra>
// kernel: tpu_custom_call.1
= control target key start
LH: loop header
LB: loop body
LE: loop exit
PB: predicated region body
PF: predicated region fallthrough
CT: control target
= control target key end

     0   :  { %s6195_s0 = inlined_call_operand.vmem [shape: s32[4,2], index: 0, kind: input, shape index: {}]   ;;  %s6196_s2 = inlined_call_operand.hbm [shape: f32[2,16,32], index: 2, kind: input, shape index: {}]   ;;  %s6197_s3 = inlined_call_operand.hbm [shape: f32[2,16,32], index: 3, kind: output, shape index: {0}]   ;;  %s6198_s4 = inlined_call_operand.hbm [shape: f32[2,16,32], index: 4, kind: output, shape index: {1}]   ;;  %s6199_s1 = inlined_call_operand.vmem [shape: s32[4,2], index: 1, kind: input, shape index: {}]  }
   0x1   :  { %s10_s17 = sshll.u32 %s6195_s0, 4  ;;  %s14_s20 = sshll.u32 %s6199_s1, 4  ;;  %s11_s17 = int_to_ptr.vmem [resolvable:$true] %s10_s17  ;;  %s15_s20 = int_to_ptr.vmem [resolvable:$true] %s14_s20 }
   0x2   :  { %s3584_s21 = scalar_lea.vmem %s11_s17, 64  ;;  %p3589_p1 = scmp.lt.s32.totalorder %s11_s17, %s11_s17 }
   0x3   :  { %p3585_p0 = scmp.ne.s32.totalorder %s11_s17, %s3584_s21  ;;  %p3590_p2 = scmp.lt.s32.totalorder %s3584_s21, %s3584_s21 }
   0x5   :  { %p3591_p3 = por %p3590_p2, %p3589_p1 }
   0x7   :  { %p3592_p4 = pnand %p3591_p3, %p3585_p0 }
   0x9   :  { %3595 = shalt.err (!%p3592_p4)  }
   0xa   :  { %s3830_s22 = smov [#allocation3]   ;;  %s3596_s23 = scalar_lea.vmem %s15_s20, 64 }
   0xb   :  { %13 = dma.vmem_to_smem %s11_s17, 64, %s3830_s22, [#allocation2] }
   0xc   :  { %p3597_p5 = scmp.ne.s32.totalorder %s15_s20, %s3596_s23  ;;  %p3601_p6 = scmp.lt.s32.totalorder %s15_s20, %s15_s20 }
   0xd   :  { %p3602_p7 = scmp.lt.s32.totalorder %s3596_s23, %s3596_s23 }
   0xf   :  { %p3603_p8 = por %p3602_p7, %p3601_p6 }
  0x11   :  { %p3604_p9 = pnand %p3603_p8, %p3597_p5 }
  0x13   :  { %3607 = shalt.err (!%p3604_p9)  }
  0x14   :  { %s3831_s0 = smov [#allocation4]  }
  0x15   :  { %17 = dma.vmem_to_smem %s15_s20, 64, %s3831_s0, [#allocation2] }
  0x16   :  { %3752 = dma.done.wait [#allocation2], 128 }
  0x17   :  { %3753 = vsyncadd [#allocation2], 4294967168 }
  0x18   :  { %19 = sfence }
  0x19   :  { %20 = vsyncpa [#allocation6], 0 }
  0x1a   :  { %22 = vsyncpa [#allocation6 + $0x1], 0 }
  0x1b   :  { %23 = vsyncpa [#allocation7], 0 }
  0x1c   :  { %25 = vsyncpa [#allocation7 + $0x1], 0 }
  0x1d   :  { %26 = vsyncpa [#allocation10], 0 }
  0x1e   :  { %28 = vsyncpa [#allocation10 + $0x1], 0  ;;  %s3884_s1 = smov 0   ;;  %s3886_s24 = smov 0  }
  0x1f   :  { %s3888_s25 = smov 0   ;;  %s3890_s26 = smov 0  }
  0x20 LB: > { %s3905_s27 = sadd.s32 4294967295, %s3780_s26   ;;  %s3379_s28 = sadd.s32 4294967294, %s3780_s26   ;;  %s3780_s26 = sphi %s3890_s26, %s6584_s26   ;;  %s3776_s25 = sphi %s3888_s25, %s6583_s25   ;;  %s3772_s24 = sphi %s3886_s24, %s6582_s24   ;;  %s3768_s1 = sphi %s3884_s1, %s6581_s1  }
  0x21   : > { %s3909_s29 = sadd.s32 1, %s3780_s26   ;;  %s41_s30 = sadd.s32 1, %s3776_s25 }
  0x22   : > { %s38_s5 = ssub.s32 %s3780_s26, %s3909_s29  ;;  %p48_p10 = scmp.ne.s32.totalorder %s3776_s25, %s3772_s24 }
  0x23   : > { %p39_p11 = scmp.eq.s32.totalorder %s38_s5, 0  ;;  %p49_p12 = scmp.eq.s32.totalorder %s3780_s26, 0 }
  0x24   : > { %p54_p13 = scmp.ne.s32.totalorder %s3772_s24, %s3768_s1  ;;  %p55_p0 = scmp.eq.s32.totalorder %s3905_s27, 0 }
  0x25   : > { %s3921_s6 = scalar_select %p39_p11, %s3776_s25, %s41_s30  }
  0x26   : > { %p3923_p1 = por %p49_p12, %p48_p10  ;;  %p3927_p2 = por %p55_p0, %p54_p13 }
  0x27   : > { %p78_p3 = scmp.eq.s32.totalorder %s3905_s27, 1  ;;  %p84_p4 = scmp.eq.s32.totalorder %s3379_s28, 1 }
  0x28   : > { %s6226_s8 = scalar_select %p3927_p2, 1, 0 }
  0x29   : > { %p3434_p6 = scmp.lt.s32.totalorder %s3780_s26, 2  ;;  %p3934_p7 = por %p78_p3, %p48_p10 }
  0x2a   : > { %p3938_p8 = por %p84_p4, %p54_p13  ;;  %s130_s11 = sand.u32 1, %s3776_s25  }
  0x2b   : > { %s6227_s9 = scalar_select %p3934_p7, 1, 0 }
  0x2c   : > { %s6228_s10 = scalar_select %p3938_p8, 1, 0 }
  0x2d   : > { %s3402_s12 = sshll.u32 %s3780_s26, 8  ;;  %s3382_s13 = sshll.u32 %s130_s11, 4 }
  0x2e   : > { %s3947_s16 = scalar_lea.hbm %s6196_s2, %s3402_s12  ;;  %s134_s17 = scalar_lea.vmem [#allocation5], %s3382_s13 }
  0x2f   : > { %s141_s18 = sshll.u32 %s134_s17, 4  ;;  %p3951_p9 = pnand %p3434_p6, %p3923_p1  ;;  %s3955_s18 = int_to_ptr.vmem [resolvable:$true] %s141_s18 }
  0x30   : > { %s3957_s20 = scalar_lea.sflag [#allocation6], %s130_s11  ;;  %s3608_s21 = scalar_lea.hbm %s3947_s16, 256 }
  0x31   : > { %p3609_p10 = scmp.ne.s32.totalorder %s3947_s16, %s3608_s21  ;;  %p3610_p11 = pneg %p3951_p9 }
  0x32   : > { %s3613_s0 = scalar_lea.hbm %s6196_s2, 512  ;;  %p3614_p0 = scmp.lt.s32.totalorder %s3947_s16, %s6196_s2 }
  0x33   : > { %p3611_p12 = pnand %p3610_p11, %p3609_p10  ;;  %p3615_p1 = scmp.lt.s32.totalorder %s3613_s0, %s3608_s21 }
  0x35   : > { %p3612_p13 = pneg %p3611_p12  ;;  %p3616_p3 = por %p3615_p1, %p3614_p0 }
  0x37   : > { %p3617_p4 = pnand %p3616_p3, %p3612_p13 }
  0x39   : > { %3620 = shalt.err (!%p3617_p4)
}
  0x3a   : > { %s3621_s5 = scalar_lea.vmem %s3955_s18, 256  ;;  %s3832_s7 = smov [#allocation5]  }
  0x3b   : > { %p3622_p6 = scmp.ne.s32.totalorder %s3955_s18, %s3621_s5  ;;  %s3626_s11 = sshll.u32 %s3832_s7, 4  ;;  %s3627_s11 = int_to_ptr.vmem [resolvable:$false] %s3626_s11 }
  0x3c   : > { %s3628_s12 = scalar_lea.vmem %s3627_s11, 512  ;;  %p3629_p12 = scmp.lt.s32.totalorder %s3955_s18, %s3627_s11 }
  0x3d   : > { %p3624_p5 = pnand %p3622_p6, %p3610_p11  ;;  %p3630_p8 = scmp.lt.s32.totalorder %s3628_s12, %s3621_s5 }
  0x3f   : > { %p3625_p10 = pneg %p3624_p5  ;;  %p3631_p7 = por %p3630_p8, %p3629_p12 }
  0x41   : > { %p3632_p2 = pnand %p3631_p7, %p3625_p10 }
  0x43   : > { %3635 = shalt.err (!%p3632_p2)
}
  0x44   : > { %s3833_s13 = smov 128   ;;  %s3834_s14 = smov 8  }
  0x45   : > { %3426 = dma.hbm_to_vmem [thread:$0]  (!%p3951_p9), %s3947_s16, 256, %s3955_s18, %s3957_s20, %s3833_s13, %s3833_s13, %s3834_s14  }
  0x46   : > { %p3385_p5 = scmp.ge.s32.totalorder %s3780_s26, 1  ;;  %p149_p11 = scmp.lt.s32.totalorder %s3780_s26, 3 }
  0x48   : > { %p150_p13 = pnand %p3385_p5, %p149_p11 }
  0x49   : > { %s3981_s15 = sand.u32 (!%p150_p13), 1, %s3772_s24   ;;  %p6230_p2 = scmp.ne.s32.totalorder (!%p150_p13), %s6226_s8, 0 }
  0x4a   : > { %153 = sbr.rel (%p150_p13) target bundleno = 4843 (0x12eb), region = 24  ;;  %s3984_s17 = sshll.u32 (!%p150_p13), %s3981_s15, 4 }
  0x4b   : > { %s156_s21 = scalar_lea.sflag (!%p150_p13), [#allocation6], %s3981_s15  ;;  %s159_s22 = scalar_lea.vmem (!%p150_p13), [#allocation5], %s3984_s17 }
  0x4f   : > { %3755 = dma.done.wait (%p6230_p2), %s156_s21, 256  }
  0x50   : > { %3757 = vsyncadd (%p6230_p2), %s156_s21, 4294967040  ;;  %v187_v0 = vlaneseq  ;;  %s3993_s16 = sshll.u32 %s3905_s27, 8  ;;  %v3835_v16 = vmov 0.0   ;;  %v4066_v24 = vld [vmem:[%s159_s22] sm:$0xff]  ;;  %v4079_v26 = vld [vmem:[%s159_s22 + $0x8] sm:$0xff]  ;;  %s3836_s13 = smov 1  }
  0x51   : > { %s220_s18 = sld [smem:[#allocation3 + %s3993_s16]]  ;;  %s224_s19 = sadd.s32 1, %s3993_s16 }
  0x52   : > { %s225_s20 = sld [smem:[#allocation3 + %s224_s19]]  ;;  %s3405_s23 = sadd.s32 128, %s3993_s16  ;;  %v3999_v1 = vshrl.u32 %v187_v0, 7  ;;  %v191_v3 = vand.u32 127, %v187_v0 }
  0x53   : > { %s230_s0 = sld [smem:[#allocation4 + %s3993_s16]]  ;;  %s247_s5 = sadd.s32 1, %s3405_s23 }
  0x54   : > { %s234_s28 = sld [smem:[#allocation4 + %s224_s19]]  ;;  %v4002_v2 = vadd.s32 8, %v3999_v1  ;;  %s3837_s14 = smov 97   ;;  %v196_v32 = vand.u32 15, %v191_v3 }
  0x55   : > { %s243_s30 = sld [smem:[#allocation3 + %s3405_s23]]  ;;  %s3838_s21 = smov 127  }
  0x56   : > { %s248_s8 = sld [smem:[#allocation3 + %s247_s5]]  ;;  %s3839_s22 = smov 31  }
  0x57   : > { %v221_v4 = vstv %s220_s18  ;;  %s254_s27 = sld [smem:[#allocation4 + %s3405_s23]]  ;;  %s4455_s18 = scalar_lea.vmem [#allocation8], %s3984_s17 }
  0x58   : > { %vm4005_vm0 = vcmp.eq.s32.totalorder %v3999_v1, %v221_v4  ;;  %vm4010_vm1 = vcmp.eq.s32.totalorder %v4002_v2, %v221_v4  ;;  %v226_v7 = vstv %s225_s20  ;;  %s258_s7 = sld [smem:[#allocation4 + %s247_s5]]  ;;  %s4458_s19 = scalar_lea.vmem [#allocation9], %s3984_s17 }
  0x59   : > { %vm4014_vm2 = vcmp.eq.s32.totalorder %v191_v3, %v226_v7  ;;  %v231_v9 = vstv %s230_s0 }
  0x5a   : > { %vm228_vm3 = vmand %vm4005_vm0, %vm4014_vm2  ;;  %vm4023_vm4 = vcmp.eq.s32.totalorder %v3999_v1, %v231_v9  ;;  %v235_v11 = vstv %s234_s28  ;;  %vm4032_vm6 = vcmp.eq.s32.totalorder %v4002_v2, %v231_v9 }
  0x5b   : > { %vm229_vm5 = vmand %vm4010_vm1, %vm4014_vm2  ;;  %vm4036_vm7 = vcmp.eq.s32.totalorder %v191_v3, %v235_v11  ;;  %v244_v14 = vstv %s243_s30  ;;  %v239_v17 = vsel %vm228_vm3, 1.0, %v3835_v16 }
  0x5c   : > { %vm245_vm8 = vcmp.eq.s32.totalorder %v3999_v1, %v244_v14  ;;  %vm4042_vm9 = vcmp.eq.s32.totalorder %v4002_v2, %v244_v14  ;;  %s249_s11 = sadd.s32 16, %s248_s8  ;;  %vm237_vm10 = vmand %vm4023_vm4, %vm4036_vm7  ;;  %v240_v20 = vsel %vm229_vm5, 1.0, %v3835_v16  ;;  %vm4120_vm4 = vcmp.ge.s32.totalorder %v196_v32, 1 }
  0x5d   : > { %v250_v18 = vstv %s249_s11  ;;  %v255_v19 = vstv %s254_s27  ;;  %vm238_vm11 = vmand %vm4032_vm6, %vm4036_vm7  ;;  %vm6203_vm6 = vcmp.ge.s32.totalorder %v3999_v1, 1  ;;  %vm4125_vm7 = vcmp.le.s32.totalorder %v196_v32, 14 }
  0x5e   : > { %vm251_vm12 = vcmp.eq.s32.totalorder %v191_v3, %v250_v18  ;;  %vm256_vm13 = vcmp.eq.s32.totalorder %v3999_v1, %v255_v19  ;;  %s259_s12 = sadd.s32 16, %s258_s7  ;;  %vm257_vm15 = vcmp.eq.s32.totalorder %v4002_v2, %v255_v19 }
  0x5f   : > { %vm252_vm14 = vmand %vm245_vm8, %vm251_vm12  ;;  %v260_v21 = vstv %s259_s12 }
  0x60   : > { %vm253_vm0 = vmand %vm4042_vm9, %vm251_vm12  ;;  %vm261_vm1 = vcmp.eq.s32.totalorder %v191_v3, %v260_v21  ;;  %v4060_v22 = vsel %vm252_vm14, 1.0, %v239_v17   ;;  %vm6209_vm14 = vcmask 7168  }
  0x61   : > { %vm262_vm2 = vmand %vm256_vm13, %vm261_vm1  ;;  %v4062_v23 = vsel %vm253_vm0, 1.0, %v240_v20   ;;  %vm6202_vm0 = vcmask 1040384  }
  0x62   : > { %vm263_vm3 = vmand %vm257_vm15, %vm261_vm1  ;;  %vm6206_vm15 = vcmask 252928   ;;  %vm6204_vm1 = vcmask 1046528  }
  0x63   : > { %vm4073_vm5 = vmor %vm237_vm10, %vm262_vm2  ;;  %vm6210_vm10 = vcmp.le.s32.totalorder %v4002_v2, 14  ;;  %vm6205_vm2 = vcmask 261120  }
  0x64   : > { %vm4086_vm8 = vmor %vm238_vm11, %vm263_vm3  ;;  %v4093_v28 = vsel %vm4073_vm5, 1.0, %v3835_v16  ;;  %v4098_v29 = vsel %vm4073_vm5, %v4066_v24, 1e+09 }
  0x65   : > { %v4103_v30 = vsel %vm4086_vm8, 1.0, %v3835_v16  ;;  %v270_v31 = vsub.f32 1.0, %v4093_v28  ;;  %282 = vrot.lane.b32.xlu1 %v4098_v29, %s3836_s13  ;;  %276 = vrot.lane.b32.xlu0 %v4098_v29, %s3837_s14  ;;  %v4114_v34 = vsel %vm4086_vm8, %v4079_v26, 1e+09  ;;  %vm4133_vm9 = vmand %vm6203_vm6, %vm4120_vm4 }
  0x66   : > { %v271_v33 = vsub.f32 1.0, %v4103_v30  ;;  %vm4142_vm11 = vmand %vm6203_vm6, %vm4125_vm7 }
  0x67   : > { %vm4154_vm12 = vmand %vm6210_vm10, %vm4120_vm4 }
  0x68   : > { %vm4162_vm13 = vmand %vm6210_vm10, %vm4125_vm7 }
  0x69   : > { %284 = vrot.lane.b32.xlu1 %v4114_v34, %s3836_s13  ;;  %278 = vrot.lane.b32.xlu0 %v4114_v34, %s3837_s14 }
  0x6d   : > { %295 = vrot.lane.b32.xlu1 %v4114_v34, %s3838_s21  ;;  %293 = vrot.lane.b32.xlu0 %v4098_v29, %s3838_s21 }
  0x71   : > { %301 = vrot.lane.b32.xlu1 %v4114_v34, %s3839_s22  ;;  %299 = vrot.lane.b32.xlu0 %v4098_v29, %s3839_s22 }
  0xd7   : > { %v283_v41 = vpop.permute.xlu1 %282  ;;  %v277_v42 = vpop.permute.xlu0 %276 }
  0xd8   : > { %v289_v47 = vsel %vm6209_vm14, %v277_v42, %v283_v41 }
  0xd9   : > { %v291_v51 = vsel %vm4120_vm4, %v289_v47, 1e+09 }
  0xdb   : > { %v285_v43 = vpop.permute.xlu1 %284  ;;  %v279_v44 = vpop.permute.xlu0 %278 }
  0xdc   : > { %v290_v48 = vsel %vm6209_vm14, %v279_v44, %v285_v43 }
  0xdd   : > { %v292_v54 = vsel %vm4120_vm4, %v290_v48, 1e+09 }
  0xdf   : > { %v296_v45 = vpop.permute.xlu1 %295  ;;  %v294_v46 = vpop.permute.xlu0 %293 }
  0xe3   : > { %v302_v49 = vpop.permute.xlu1 %301  ;;  %v300_v50 = vpop.permute.xlu0 %299 }
  0xe4   : > { %v307_v52 = vsel %vm6206_vm15, %v296_v45, %v302_v49  ;;  %v306_v53 = vsel %vm6206_vm15, %v294_v46, %v300_v50 }
  0xe5   : > { %v309_v55 = vsel %vm4125_vm7, %v307_v52, 1e+09  ;;  %v308_v56 = vsel %vm4125_vm7, %v306_v53, 1e+09 }
  0xe6   : > { %v311_v57 = vmin.f32 %v292_v54, %v309_v55  ;;  %v310_v58 = vmin.f32 %v291_v51, %v308_v56 }
  0xe8   : > { %v313_v59 = vmin.f32 %v311_v57, %v4114_v34  ;;  %v312_v60 = vmin.f32 %v310_v58, %v4098_v29 }
  0xea   : > { %v315_v61 = vrot.slane %v313_v59, 7  ;;  %v328_v62 = vrot.slane %v313_v59, 1  ;;  %v319_v63 = vrot.slane %v312_v60, 7  ;;  %v327_v0 = vrot.slane %v312_v60, 1 }
  0xec   : > { %v320_v3 = vsel %vm6202_vm0, %v319_v63, %v315_v61  ;;  %v323_v4 = vsel %vm6202_vm0, %v315_v61, %v319_v63  ;;  %v329_v5 = vsel %vm6204_vm1, %v327_v0, %v328_v62  ;;  %v333_v6 = vsel %vm6204_vm1, %v328_v62, %v327_v0 }
  0xed   : > { %v324_v7 = vsel %vm6203_vm6, %v323_v4, 1e+09  ;;  %v335_v8 = vsel %vm6210_vm10, %v333_v6, 1e+09 }
  0xee   : > { %v336_v9 = vmin.f32 %v324_v7, %v329_v5  ;;  %v337_v10 = vmin.f32 %v320_v3, %v335_v8 }
  0xf0   : > { %v338_v11 = vmin.f32 %v336_v9, %v310_v58  ;;  %v339_v12 = vmin.f32 %v337_v10, %v311_v57 }
  0xf2   : > { %v340_v13 = vadd.f32 %v338_v11, %v4066_v24  ;;  %v341_v14 = vadd.f32 %v339_v12, %v4079_v26 }
  0xf4   : > { %v342_v15 = vmin.f32 %v4098_v29, %v340_v13  ;;  %v343_v17 = vmin.f32 %v4114_v34, %v341_v14 }
  0xf6   : > { %v344_v18 = vsel %vm4073_vm5, %v4066_v24, %v342_v15  ;;  %v345_v19 = vsel %vm4086_vm8, %v4079_v26, %v343_v17 }
  0xf7   : > { %348 = vrot.lane.b32.xlu0 %v344_v18, %s3837_s14  ;;  %350 = vrot.lane.b32.xlu1 %v345_v19, %s3837_s14 }
  0xfb   : > { %354 = vrot.lane.b32.xlu0 %v344_v18, %s3836_s13  ;;  %356 = vrot.lane.b32.xlu1 %v345_v19, %s3836_s13 }
  0xff   : > { %364 = vrot.lane.b32.xlu0 %v344_v18, %s3838_s21  ;;  %366 = vrot.lane.b32.xlu1 %v345_v19, %s3838_s21 }
 0x103   : > { %370 = vrot.lane.b32.xlu0 %v344_v18, %s3839_s22  ;;  %372 = vrot.lane.b32.xlu1 %v345_v19, %s3839_s22 }
 0x169   : > { %v349_v20 = vpop.permute.xlu0 %348  ;;  %v351_v21 = vpop.permute.xlu1 %350 }
 0x16d   : > { %v355_v32 = vpop.permute.xlu0 %354  ;;  %v357_v41 = vpop.permute.xlu1 %356 }
 0x16e   : > { %v360_v44 = vsel %vm6209_vm14, %v349_v20, %v355_v32  ;;  %v361_v45 = vsel %vm6209_vm14, %v351_v21, %v357_v41 }
 0x16f   : > { %v362_v48 = vsel %vm4120_vm4, %v360_v44, 1e+09  ;;  %v363_v51 = vsel %vm4120_vm4, %v361_v45, 1e+09 }
 0x171   : > { %v365_v42 = vpop.permute.xlu0 %364  ;;  %v367_v43 = vpop.permute.xlu1 %366 }
 0x175   : > { %v371_v46 = vpop.permute.xlu0 %370  ;;  %v373_v47 = vpop.permute.xlu1 %372 }
 0x176   : > { %v376_v49 = vsel %vm6206_vm15, %v365_v42, %v371_v46  ;;  %v377_v50 = vsel %vm6206_vm15, %v367_v43, %v373_v47 }
 0x177   : > { %v378_v52 = vsel %vm4125_vm7, %v376_v49, 1e+09  ;;  %v379_v53 = vsel %vm4125_vm7, %v377_v50, 1e+09 }
 0x178   : > { %v380_v54 = vmin.f32 %v362_v48, %v378_v52  ;;  %v381_v55 = vmin.f32 %v363_v51, %v379_v53 }
 0x17a   : > { %v382_v56 = vmin.f32 %v380_v54, %v344_v18  ;;  %v383_v57 = vmin.f32 %v381_v55, %v345_v19 }
 0x17c   : > { %v388_v58 = vrot.slane %v382_v56, 7  ;;  %v395_v59 = vrot.slane %v382_v56, 1  ;;  %v385_v60 = vrot.slane %v383_v57, 7  ;;  %v396_v61 = vrot.slane %v383_v57, 1 }
 0x17e   : > { %v389_v62 = vsel %vm6202_vm0, %v388_v58, %v385_v60  ;;  %v392_v63 = vsel %vm6202_vm0, %v385_v60, %v388_v58  ;;  %v397_v0 = vsel %vm6204_vm1, %v395_v59, %v396_v61  ;;  %v401_v3 = vsel %vm6204_vm1, %v396_v61, %v395_v59 }
 0x17f   : > { %v393_v4 = vsel %vm6203_vm6, %v392_v63, 1e+09  ;;  %v403_v5 = vsel %vm6210_vm10, %v401_v3, 1e+09 }
 0x180   : > { %v404_v6 = vmin.f32 %v393_v4, %v397_v0  ;;  %v405_v7 = vmin.f32 %v389_v62, %v403_v5 }
 0x182   : > { %v406_v8 = vmin.f32 %v404_v6, %v380_v54  ;;  %v407_v9 = vmin.f32 %v405_v7, %v381_v55 }
 0x184   : > { %v409_v10 = vadd.f32 %v407_v9, %v4079_v26  ;;  %v408_v11 = vadd.f32 %v406_v8, %v4066_v24 }
 0x186   : > { %v411_v12 = vmin.f32 %v345_v19, %v409_v10  ;;  %v410_v13 = vmin.f32 %v344_v18, %v408_v11 }
 0x188   : > { %v412_v14 = vsel %vm4073_vm5, %v4066_v24, %v410_v13  ;;  %v413_v15 = vsel %vm4086_vm8, %v4079_v26, %v411_v12 }
 0x189   : > { %416 = vrot.lane.b32.xlu0 %v412_v14, %s3837_s14  ;;  %418 = vrot.lane.b32.xlu1 %v413_v15, %s3837_s14 }
 0x18d   : > { %422 = vrot.lane.b32.xlu0 %v412_v14, %s3836_s13  ;;  %424 = vrot.lane.b32.xlu1 %v413_v15, %s3836_s13 }
 0x191   : > { %432 = vrot.lane.b32.xlu0 %v412_v14, %s3838_s21  ;;  %434 = vrot.lane.b32.xlu1 %v413_v15, %s3838_s21 }
 0x195   : > { %438 = vrot.lane.b32.xlu0 %v412_v14, %s3839_s22  ;;  %440 = vrot.lane.b32.xlu1 %v413_v15, %s3839_s22 }
 0x1fb   : > { %v417_v17 = vpop.permute.xlu0 %416  ;;  %v419_v18 = vpop.permute.xlu1 %418 }
 0x1ff   : > { %v423_v19 = vpop.permute.xlu0 %422  ;;  %v425_v20 = vpop.permute.xlu1 %424 }
 0x200   : > { %v428_v41 = vsel %vm6209_vm14, %v417_v17, %v423_v19  ;;  %v429_v42 = vsel %vm6209_vm14, %v419_v18, %v425_v20 }
 0x201   : > { %v430_v45 = vsel %vm4120_vm4, %v428_v41, 1e+09  ;;  %v431_v48 = vsel %vm4120_vm4, %v429_v42, 1e+09 }
 0x203   : > { %v433_v21 = vpop.permute.xlu0 %432  ;;  %v435_v32 = vpop.permute.xlu1 %434 }
 0x207   : > { %v439_v43 = vpop.permute.xlu0 %438  ;;  %v441_v44 = vpop.permute.xlu1 %440 }
 0x208   : > { %v444_v46 = vsel %vm6206_vm15, %v433_v21, %v439_v43  ;;  %v445_v47 = vsel %vm6206_vm15, %v435_v32, %v441_v44 }
 0x209   : > { %v446_v49 = vsel %vm4125_vm7, %v444_v46, 1e+09  ;;  %v447_v50 = vsel %vm4125_vm7, %v445_v47, 1e+09 }
 0x20a   : > { %v448_v51 = vmin.f32 %v430_v45, %v446_v49  ;;  %v449_v52 = vmin.f32 %v431_v48, %v447_v50 }
 0x20c   : > { %v450_v53 = vmin.f32 %v448_v51, %v412_v14  ;;  %v451_v54 = vmin.f32 %v449_v52, %v413_v15 }
 0x20e   : > { %v456_v55 = vrot.slane %v450_v53, 7  ;;  %v463_v56 = vrot.slane %v450_v53, 1  ;;  %v453_v57 = vrot.slane %v451_v54, 7  ;;  %v464_v58 = vrot.slane %v451_v54, 1 }
 0x210   : > { %v457_v59 = vsel %vm6202_vm0, %v456_v55, %v453_v57  ;;  %v460_v60 = vsel %vm6202_vm0, %v453_v57, %v456_v55  ;;  %v465_v61 = vsel %vm6204_vm1, %v463_v56, %v464_v58  ;;  %v469_v62 = vsel %vm6204_vm1, %v464_v58, %v463_v56 }
 0x211   : > { %v461_v63 = vsel %vm6203_vm6, %v460_v60, 1e+09  ;;  %v471_v0 = vsel %vm6210_vm10, %v469_v62, 1e+09 }
 0x212   : > { %v472_v3 = vmin.f32 %v461_v63, %v465_v61  ;;  %v473_v4 = vmin.f32 %v457_v59, %v471_v0 }
 0x214   : > { %v474_v5 = vmin.f32 %v472_v3, %v448_v51  ;;  %v475_v6 = vmin.f32 %v473_v4, %v449_v52 }
 0x216   : > { %v477_v7 = vadd.f32 %v475_v6, %v4079_v26  ;;  %v476_v8 = vadd.f32 %v474_v5, %v4066_v24 }
 0x218   : > { %v479_v9 = vmin.f32 %v413_v15, %v477_v7  ;;  %v478_v10 = vmin.f32 %v412_v14, %v476_v8 }
 0x21a   : > { %v480_v11 = vsel %vm4073_vm5, %v4066_v24, %v478_v10  ;;  %v481_v12 = vsel %vm4086_vm8, %v4079_v26, %v479_v9 }
 0x21b   : > { %484 = vrot.lane.b32.xlu0 %v480_v11, %s3837_s14  ;;  %486 = vrot.lane.b32.xlu1 %v481_v12, %s3837_s14 }
 0x21f   : > { %490 = vrot.lane.b32.xlu0 %v480_v11, %s3836_s13  ;;  %492 = vrot.lane.b32.xlu1 %v481_v12, %s3836_s13 }
 0x223   : > { %500 = vrot.lane.b32.xlu0 %v480_v11, %s3838_s21  ;;  %502 = vrot.lane.b32.xlu1 %v481_v12, %s3838_s21 }
 0x227   : > { %506 = vrot.lane.b32.xlu0 %v480_v11, %s3839_s22  ;;  %508 = vrot.lane.b32.xlu1 %v481_v12, %s3839_s22 }
 0x28d   : > { %v485_v13 = vpop.permute.xlu0 %484  ;;  %v487_v14 = vpop.permute.xlu1 %486 }
 0x291   : > { %v491_v15 = vpop.permute.xlu0 %490  ;;  %v493_v17 = vpop.permute.xlu1 %492 }
 0x292   : > { %v496_v20 = vsel %vm6209_vm14, %v485_v13, %v491_v15  ;;  %v497_v21 = vsel %vm6209_vm14, %v487_v14, %v493_v17 }
 0x293   : > { %v498_v42 = vsel %vm4120_vm4, %v496_v20, 1e+09  ;;  %v499_v45 = vsel %vm4120_vm4, %v497_v21, 1e+09 }
 0x295   : > { %v501_v18 = vpop.permute.xlu0 %500  ;;  %v503_v19 = vpop.permute.xlu1 %502 }
 0x299   : > { %v507_v32 = vpop.permute.xlu0 %506  ;;  %v509_v41 = vpop.permute.xlu1 %508 }
 0x29a   : > { %v512_v43 = vsel %vm6206_vm15, %v501_v18, %v507_v32  ;;  %v513_v44 = vsel %vm6206_vm15, %v503_v19, %v509_v41 }
 0x29b   : > { %v514_v46 = vsel %vm4125_vm7, %v512_v43, 1e+09  ;;  %v515_v47 = vsel %vm4125_vm7, %v513_v44, 1e+09 }
 0x29c   : > { %v516_v48 = vmin.f32 %v498_v42, %v514_v46  ;;  %v517_v49 = vmin.f32 %v499_v45, %v515_v47 }
 0x29e   : > { %v518_v50 = vmin.f32 %v516_v48, %v480_v11  ;;  %v519_v51 = vmin.f32 %v517_v49, %v481_v12 }
 0x2a0   : > { %v524_v52 = vrot.slane %v518_v50, 7  ;;  %v531_v53 = vrot.slane %v518_v50, 1  ;;  %v521_v54 = vrot.slane %v519_v51, 7  ;;  %v532_v55 = vrot.slane %v519_v51, 1 }
 0x2a2   : > { %v525_v56 = vsel %vm6202_vm0, %v524_v52, %v521_v54  ;;  %v528_v57 = vsel %vm6202_vm0, %v521_v54, %v524_v52  ;;  %v533_v58 = vsel %vm6204_vm1, %v531_v53, %v532_v55  ;;  %v537_v59 = vsel %vm6204_vm1, %v532_v55, %v531_v53 }
 0x2a3   : > { %v529_v60 = vsel %vm6203_vm6, %v528_v57, 1e+09  ;;  %v539_v61 = vsel %vm6210_vm10, %v537_v59, 1e+09 }
 0x2a4   : > { %v540_v62 = vmin.f32 %v529_v60, %v533_v58  ;;  %v541_v63 = vmin.f32 %v525_v56, %v539_v61 }
 0x2a6   : > { %v542_v0 = vmin.f32 %v540_v62, %v516_v48  ;;  %v543_v3 = vmin.f32 %v541_v63, %v517_v49 }
 0x2a8   : > { %v545_v4 = vadd.f32 %v543_v3, %v4079_v26  ;;  %v544_v5 = vadd.f32 %v542_v0, %v4066_v24 }
 0x2aa   : > { %v547_v6 = vmin.f32 %v481_v12, %v545_v4  ;;  %v546_v7 = vmin.f32 %v480_v11, %v544_v5 }
 0x2ac   : > { %v548_v8 = vsel %vm4073_vm5, %v4066_v24, %v546_v7  ;;  %v549_v9 = vsel %vm4086_vm8, %v4079_v26, %v547_v6 }
 0x2ad   : > { %552 = vrot.lane.b32.xlu0 %v548_v8, %s3837_s14  ;;  %554 = vrot.lane.b32.xlu1 %v549_v9, %s3837_s14 }
 0x2b1   : > { %558 = vrot.lane.b32.xlu0 %v548_v8, %s3836_s13  ;;  %560 = vrot.lane.b32.xlu1 %v549_v9, %s3836_s13 }
 0x2b5   : > { %568 = vrot.lane.b32.xlu0 %v548_v8, %s3838_s21  ;;  %570 = vrot.lane.b32.xlu1 %v549_v9, %s3838_s21 }
 0x2b9   : > { %574 = vrot.lane.b32.xlu0 %v548_v8, %s3839_s22  ;;  %576 = vrot.lane.b32.xlu1 %v549_v9, %s3839_s22 }
 0x31f   : > { %v553_v10 = vpop.permute.xlu0 %552  ;;  %v555_v11 = vpop.permute.xlu1 %554 }
 0x323   : > { %v559_v12 = vpop.permute.xlu0 %558  ;;  %v561_v13 = vpop.permute.xlu1 %560 }
 0x324   : > { %v564_v17 = vsel %vm6209_vm14, %v553_v10, %v559_v12  ;;  %v565_v18 = vsel %vm6209_vm14, %v555_v11, %v561_v13 }
 0x325   : > { %v566_v21 = vsel %vm4120_vm4, %v564_v17, 1e+09  ;;  %v567_v42 = vsel %vm4120_vm4, %v565_v18, 1e+09 }
 0x327   : > { %v569_v14 = vpop.permute.xlu0 %568  ;;  %v571_v15 = vpop.permute.xlu1 %570 }
 0x32b   : > { %v575_v19 = vpop.permute.xlu0 %574  ;;  %v577_v20 = vpop.permute.xlu1 %576 }
 0x32c   : > { %v580_v32 = vsel %vm6206_vm15, %v569_v14, %v575_v19  ;;  %v581_v41 = vsel %vm6206_vm15, %v571_v15, %v577_v20 }
 0x32d   : > { %v582_v43 = vsel %vm4125_vm7, %v580_v32, 1e+09  ;;  %v583_v44 = vsel %vm4125_vm7, %v581_v41, 1e+09 }
 0x32e   : > { %v584_v45 = vmin.f32 %v566_v21, %v582_v43  ;;  %v585_v46 = vmin.f32 %v567_v42, %v583_v44 }
 0x330   : > { %v586_v47 = vmin.f32 %v584_v45, %v548_v8  ;;  %v587_v48 = vmin.f32 %v585_v46, %v549_v9 }
 0x332   : > { %v592_v49 = vrot.slane %v586_v47, 7  ;;  %v599_v50 = vrot.slane %v586_v47, 1  ;;  %v589_v51 = vrot.slane %v587_v48, 7  ;;  %v600_v52 = vrot.slane %v587_v48, 1 }
 0x334   : > { %v593_v53 = vsel %vm6202_vm0, %v592_v49, %v589_v51  ;;  %v596_v54 = vsel %vm6202_vm0, %v589_v51, %v592_v49  ;;  %v601_v55 = vsel %vm6204_vm1, %v599_v50, %v600_v52  ;;  %v605_v56 = vsel %vm6204_vm1, %v600_v52, %v599_v50 }
 0x335   : > { %v597_v57 = vsel %vm6203_vm6, %v596_v54, 1e+09  ;;  %v607_v58 = vsel %vm6210_vm10, %v605_v56, 1e+09 }
 0x336   : > { %v608_v59 = vmin.f32 %v597_v57, %v601_v55  ;;  %v609_v60 = vmin.f32 %v593_v53, %v607_v58 }
 0x338   : > { %v610_v61 = vmin.f32 %v608_v59, %v584_v45  ;;  %v611_v62 = vmin.f32 %v609_v60, %v585_v46 }
 0x33a   : > { %v613_v63 = vadd.f32 %v611_v62, %v4079_v26  ;;  %v612_v0 = vadd.f32 %v610_v61, %v4066_v24 }
 0x33c   : > { %v615_v3 = vmin.f32 %v549_v9, %v613_v63  ;;  %v614_v4 = vmin.f32 %v548_v8, %v612_v0 }
 0x33e   : > { %v616_v5 = vsel %vm4073_vm5, %v4066_v24, %v614_v4  ;;  %v617_v6 = vsel %vm4086_vm8, %v4079_v26, %v615_v3 }
 0x33f   : > { %620 = vrot.lane.b32.xlu0 %v616_v5, %s3837_s14  ;;  %622 = vrot.lane.b32.xlu1 %v617_v6, %s3837_s14 }
 0x343   : > { %626 = vrot.lane.b32.xlu0 %v616_v5, %s3836_s13  ;;  %628 = vrot.lane.b32.xlu1 %v617_v6, %s3836_s13 }
 0x347   : > { %636 = vrot.lane.b32.xlu0 %v616_v5, %s3838_s21  ;;  %638 = vrot.lane.b32.xlu1 %v617_v6, %s3838_s21 }
 0x34b   : > { %642 = vrot.lane.b32.xlu0 %v616_v5, %s3839_s22  ;;  %644 = vrot.lane.b32.xlu1 %v617_v6, %s3839_s22 }
 0x3b1   : > { %v621_v7 = vpop.permute.xlu0 %620  ;;  %v623_v8 = vpop.permute.xlu1 %622 }
 0x3b5   : > { %v627_v9 = vpop.permute.xlu0 %626  ;;  %v629_v10 = vpop.permute.xlu1 %628 }
 0x3b6   : > { %v632_v13 = vsel %vm6209_vm14, %v621_v7, %v627_v9  ;;  %v633_v14 = vsel %vm6209_vm14, %v623_v8, %v629_v10 }
 0x3b7   : > { %v634_v18 = vsel %vm4120_vm4, %v632_v13, 1e+09  ;;  %v635_v21 = vsel %vm4120_vm4, %v633_v14, 1e+09 }
 0x3b9   : > { %v637_v11 = vpop.permute.xlu0 %636  ;;  %v639_v12 = vpop.permute.xlu1 %638 }
 0x3bd   : > { %v643_v15 = vpop.permute.xlu0 %642  ;;  %v645_v17 = vpop.permute.xlu1 %644 }
 0x3be   : > { %v648_v19 = vsel %vm6206_vm15, %v637_v11, %v643_v15  ;;  %v649_v20 = vsel %vm6206_vm15, %v639_v12, %v645_v17 }
 0x3bf   : > { %v650_v32 = vsel %vm4125_vm7, %v648_v19, 1e+09  ;;  %v651_v41 = vsel %vm4125_vm7, %v649_v20, 1e+09 }
 0x3c0   : > { %v652_v42 = vmin.f32 %v634_v18, %v650_v32  ;;  %v653_v43 = vmin.f32 %v635_v21, %v651_v41 }
 0x3c2   : > { %v654_v44 = vmin.f32 %v652_v42, %v616_v5  ;;  %v655_v45 = vmin.f32 %v653_v43, %v617_v6 }
 0x3c4   : > { %v660_v46 = vrot.slane %v654_v44, 7  ;;  %v667_v47 = vrot.slane %v654_v44, 1  ;;  %v657_v48 = vrot.slane %v655_v45, 7  ;;  %v668_v49 = vrot.slane %v655_v45, 1 }
 0x3c6   : > { %v661_v50 = vsel %vm6202_vm0, %v660_v46, %v657_v48  ;;  %v664_v51 = vsel %vm6202_vm0, %v657_v48, %v660_v46  ;;  %v669_v52 = vsel %vm6204_vm1, %v667_v47, %v668_v49  ;;  %v673_v53 = vsel %vm6204_vm1, %v668_v49, %v667_v47 }
 0x3c7   : > { %v665_v54 = vsel %vm6203_vm6, %v664_v51, 1e+09  ;;  %v675_v55 = vsel %vm6210_vm10, %v673_v53, 1e+09 }
 0x3c8   : > { %v676_v56 = vmin.f32 %v665_v54, %v669_v52  ;;  %v677_v57 = vmin.f32 %v661_v50, %v675_v55 }
 0x3ca   : > { %v678_v58 = vmin.f32 %v676_v56, %v652_v42  ;;  %v679_v59 = vmin.f32 %v677_v57, %v653_v43 }
 0x3cc   : > { %v681_v60 = vadd.f32 %v679_v59, %v4079_v26  ;;  %v680_v61 = vadd.f32 %v678_v58, %v4066_v24 }
 0x3ce   : > { %v683_v62 = vmin.f32 %v617_v6, %v681_v60  ;;  %v682_v63 = vmin.f32 %v616_v5, %v680_v61 }
 0x3d0   : > { %v684_v0 = vsel %vm4073_vm5, %v4066_v24, %v682_v63  ;;  %v685_v3 = vsel %vm4086_vm8, %v4079_v26, %v683_v62 }
 0x3d1   : > { %688 = vrot.lane.b32.xlu0 %v684_v0, %s3837_s14  ;;  %690 = vrot.lane.b32.xlu1 %v685_v3, %s3837_s14 }
 0x3d5   : > { %694 = vrot.lane.b32.xlu0 %v684_v0, %s3836_s13  ;;  %696 = vrot.lane.b32.xlu1 %v685_v3, %s3836_s13 }
 0x3d9   : > { %704 = vrot.lane.b32.xlu0 %v684_v0, %s3838_s21  ;;  %706 = vrot.lane.b32.xlu1 %v685_v3, %s3838_s21 }
 0x3dd   : > { %710 = vrot.lane.b32.xlu0 %v684_v0, %s3839_s22  ;;  %712 = vrot.lane.b32.xlu1 %v685_v3, %s3839_s22 }
 0x443   : > { %v689_v4 = vpop.permute.xlu0 %688  ;;  %v691_v5 = vpop.permute.xlu1 %690 }
 0x447   : > { %v695_v6 = vpop.permute.xlu0 %694  ;;  %v697_v7 = vpop.permute.xlu1 %696 }
 0x448   : > { %v700_v10 = vsel %vm6209_vm14, %v689_v4, %v695_v6  ;;  %v701_v11 = vsel %vm6209_vm14, %v691_v5, %v697_v7 }
 0x449   : > { %v702_v14 = vsel %vm4120_vm4, %v700_v10, 1e+09  ;;  %v703_v18 = vsel %vm4120_vm4, %v701_v11, 1e+09 }
 0x44b   : > { %v705_v8 = vpop.permute.xlu0 %704  ;;  %v707_v9 = vpop.permute.xlu1 %706 }
 0x44f   : > { %v711_v12 = vpop.permute.xlu0 %710  ;;  %v713_v13 = vpop.permute.xlu1 %712 }
 0x450   : > { %v716_v15 = vsel %vm6206_vm15, %v705_v8, %v711_v12  ;;  %v717_v17 = vsel %vm6206_vm15, %v707_v9, %v713_v13 }
 0x451   : > { %v718_v19 = vsel %vm4125_vm7, %v716_v15, 1e+09  ;;  %v719_v20 = vsel %vm4125_vm7, %v717_v17, 1e+09 }
 0x452   : > { %v720_v21 = vmin.f32 %v702_v14, %v718_v19  ;;  %v721_v32 = vmin.f32 %v703_v18, %v719_v20 }
 0x454   : > { %v722_v41 = vmin.f32 %v720_v21, %v684_v0  ;;  %v723_v42 = vmin.f32 %v721_v32, %v685_v3 }
 0x456   : > { %v728_v43 = vrot.slane %v722_v41, 7  ;;  %v735_v44 = vrot.slane %v722_v41, 1  ;;  %v725_v45 = vrot.slane %v723_v42, 7  ;;  %v736_v46 = vrot.slane %v723_v42, 1 }
 0x458   : > { %v729_v47 = vsel %vm6202_vm0, %v728_v43, %v725_v45  ;;  %v732_v48 = vsel %vm6202_vm0, %v725_v45, %v728_v43  ;;  %v737_v49 = vsel %vm6204_vm1, %v735_v44, %v736_v46  ;;  %v741_v50 = vsel %vm6204_vm1, %v736_v46, %v735_v44 }
 0x459   : > { %v733_v51 = vsel %vm6203_vm6, %v732_v48, 1e+09  ;;  %v743_v52 = vsel %vm6210_vm10, %v741_v50, 1e+09 }
 0x45a   : > { %v744_v53 = vmin.f32 %v733_v51, %v737_v49  ;;  %v745_v54 = vmin.f32 %v729_v47, %v743_v52 }
 0x45c   : > { %v746_v55 = vmin.f32 %v744_v53, %v720_v21  ;;  %v747_v56 = vmin.f32 %v745_v54, %v721_v32 }
 0x45e   : > { %v749_v57 = vadd.f32 %v747_v56, %v4079_v26  ;;  %v748_v58 = vadd.f32 %v746_v55, %v4066_v24 }
 0x460   : > { %v751_v59 = vmin.f32 %v685_v3, %v749_v57  ;;  %v750_v60 = vmin.f32 %v684_v0, %v748_v58 }
 0x462   : > { %v752_v61 = vsel %vm4073_vm5, %v4066_v24, %v750_v60  ;;  %v753_v62 = vsel %vm4086_vm8, %v4079_v26, %v751_v59 }
 0x463   : > { %756 = vrot.lane.b32.xlu0 %v752_v61, %s3837_s14  ;;  %758 = vrot.lane.b32.xlu1 %v753_v62, %s3837_s14 }
 0x467   : > { %762 = vrot.lane.b32.xlu0 %v752_v61, %s3836_s13  ;;  %764 = vrot.lane.b32.xlu1 %v753_v62, %s3836_s13 }
 0x46b   : > { %772 = vrot.lane.b32.xlu0 %v752_v61, %s3838_s21  ;;  %774 = vrot.lane.b32.xlu1 %v753_v62, %s3838_s21 }
 0x46f   : > { %778 = vrot.lane.b32.xlu0 %v752_v61, %s3839_s22  ;;  %780 = vrot.lane.b32.xlu1 %v753_v62, %s3839_s22 }
 0x4d5   : > { %v757_v63 = vpop.permute.xlu0 %756  ;;  %v759_v0 = vpop.permute.xlu1 %758 }
 0x4d9   : > { %v763_v3 = vpop.permute.xlu0 %762  ;;  %v765_v4 = vpop.permute.xlu1 %764 }
 0x4da   : > { %v768_v7 = vsel %vm6209_vm14, %v757_v63, %v763_v3  ;;  %v769_v8 = vsel %vm6209_vm14, %v759_v0, %v765_v4 }
 0x4db   : > { %v770_v11 = vsel %vm4120_vm4, %v768_v7, 1e+09  ;;  %v771_v14 = vsel %vm4120_vm4, %v769_v8, 1e+09 }
 0x4dd   : > { %v773_v5 = vpop.permute.xlu0 %772  ;;  %v775_v6 = vpop.permute.xlu1 %774 }
 0x4e1   : > { %v779_v9 = vpop.permute.xlu0 %778  ;;  %v781_v10 = vpop.permute.xlu1 %780 }
 0x4e2   : > { %v784_v12 = vsel %vm6206_vm15, %v773_v5, %v779_v9  ;;  %v785_v13 = vsel %vm6206_vm15, %v775_v6, %v781_v10 }
 0x4e3   : > { %v786_v15 = vsel %vm4125_vm7, %v784_v12, 1e+09  ;;  %v787_v17 = vsel %vm4125_vm7, %v785_v13, 1e+09 }
 0x4e4   : > { %v788_v18 = vmin.f32 %v770_v11, %v786_v15  ;;  %v789_v19 = vmin.f32 %v771_v14, %v787_v17 }
 0x4e6   : > { %v790_v20 = vmin.f32 %v788_v18, %v752_v61  ;;  %v791_v21 = vmin.f32 %v789_v19, %v753_v62 }
 0x4e8   : > { %v796_v32 = vrot.slane %v790_v20, 7  ;;  %v803_v41 = vrot.slane %v790_v20, 1  ;;  %v793_v42 = vrot.slane %v791_v21, 7  ;;  %v804_v43 = vrot.slane %v791_v21, 1 }
 0x4ea   : > { %v797_v44 = vsel %vm6202_vm0, %v796_v32, %v793_v42  ;;  %v800_v45 = vsel %vm6202_vm0, %v793_v42, %v796_v32  ;;  %v805_v46 = vsel %vm6204_vm1, %v803_v41, %v804_v43  ;;  %v809_v47 = vsel %vm6204_vm1, %v804_v43, %v803_v41 }
 0x4eb   : > { %v801_v48 = vsel %vm6203_vm6, %v800_v45, 1e+09  ;;  %v811_v49 = vsel %vm6210_vm10, %v809_v47, 1e+09 }
 0x4ec   : > { %v812_v50 = vmin.f32 %v801_v48, %v805_v46  ;;  %v813_v51 = vmin.f32 %v797_v44, %v811_v49 }
 0x4ee   : > { %v814_v52 = vmin.f32 %v812_v50, %v788_v18  ;;  %v815_v53 = vmin.f32 %v813_v51, %v789_v19 }
 0x4f0   : > { %v816_v54 = vadd.f32 %v814_v52, %v4066_v24  ;;  %v817_v55 = vadd.f32 %v815_v53, %v4079_v26 }
 0x4f2   : > { %v818_v56 = vmin.f32 %v752_v61, %v816_v54  ;;  %v819_v57 = vmin.f32 %v753_v62, %v817_v55 }
 0x4f4   : > { %v820_v58 = vsel %vm4073_vm5, %v4066_v24, %v818_v56   ;;  %v821_v59 = vsel %vm4086_vm8, %v4079_v26, %v819_v57  }
 0x4f5   : > { %v3289_v60 = vsub.f32 %v4098_v29, %v820_v58  ;;  %v3290_v63 = vsub.f32 %v4114_v34, %v821_v59  ;;  %v6261_v29 = vmov %v821_v59  ;;  %v6262_v34 = vmov %v820_v58 }
 0x4f7   : > { %v3292_v61 = vsel %vm6205_vm2, %v3289_v60, -inf  ;;  %v3293_v62 = vsel %vm6205_vm2, %v3290_v63, -inf }
 0x4f8   : > { %v3294_v0 = vmax.f32 %v3292_v61, %v3293_v62 }
 0x4fa   : > { %3295 = vmax.xlane.f32.xlu0 %v3294_v0 }
 0x583   : > { %v3296_v3 = vpop.xlane.xlu0 %3295 }
 0x584   : > { %v3297_v4 = vrot.slane %v3296_v3, 4 }
 0x586   : > { %v3298_v5 = vmax.f32 %v3296_v3, %v3297_v4 }
 0x588   : > { %v3299_v6 = vrot.slane %v3298_v5, 2 }
 0x58a   : > { %v3300_v7 = vmax.f32 %v3298_v5, %v3299_v6 }
 0x58c   : > { %v3301_v8 = vrot.slane %v3300_v7, 1 }
 0x58e   : > { %v3302_v9 = vmax.f32 %v3300_v7, %v3301_v8 }
 0x590   : > { %3409 = vpush %v3302_v9 }
 0x5c1   : > { %s3410_s17 = spop %3409 }
 0x5c2   : > { %p3304_p7 = scmp.gt.f32.partialorder %s3410_s17, 0.0 }
 0x5c3   : > { %s4472_s20 = smov (%p3304_p7), 8  }
 0x5c4   : > { %3306 = sbr.rel (!%p3304_p7) target bundleno = 2864 (0xb30), region = 94 }
 0x5c9 LB: >> { %s3840_s23 = smov 1   ;;  %s3841_s0 = smov 97   ;;  %s3792_s20 = sphi %s4472_s20, %s6265_s20   ;;  %v3788_v58 = vphi %v820_v58, %v6264_v58   ;;  %v3784_v59 = vphi %v821_v59, %v6263_v59  }
 0x5ca   : >> { %858 = vrot.lane.b32.xlu1 %v3788_v58, %s3840_s23  ;;  %852 = vrot.lane.b32.xlu0 %v3788_v58, %s3841_s0  ;;  %s3842_s28 = smov 127   ;;  %s3843_s30 = smov 31  }
 0x5cb   : >> { %s849_s5 = sadd.s32 8, %s3792_s20  }
 0x5cc   : >> { %p828_p8 = scmp.lt.s32.totalorder %s849_s5, 256  ;;  %s6265_s20 = smov %s849_s5 }
 0x5ce   : >> { %860 = vrot.lane.b32.xlu1 %v3784_v59, %s3840_s23  ;;  %854 = vrot.lane.b32.xlu0 %v3784_v59, %s3841_s0 }
 0x5d2   : >> { %870 = vrot.lane.b32.xlu1 %v3784_v59, %s3842_s28  ;;  %868 = vrot.lane.b32.xlu0 %v3788_v58, %s3842_s28 }
 0x5d6   : >> { %876 = vrot.lane.b32.xlu1 %v3784_v59, %s3843_s30  ;;  %874 = vrot.lane.b32.xlu0 %v3788_v58, %s3843_s30 }
 0x63c   : >> { %v859_v10 = vpop.permute.xlu1 %858  ;;  %v853_v11 = vpop.permute.xlu0 %852 }
 0x63d   : >> { %v864_v17 = vsel %vm6209_vm14, %v853_v11, %v859_v10 }
 0x63e   : >> { %v866_v21 = vsel %vm4120_vm4, %v864_v17, 1e+09 }
 0x640   : >> { %v861_v12 = vpop.permute.xlu1 %860  ;;  %v855_v13 = vpop.permute.xlu0 %854 }
 0x641   : >> { %v865_v18 = vsel %vm6209_vm14, %v855_v13, %v861_v12 }
 0x642   : >> { %v867_v42 = vsel %vm4120_vm4, %v865_v18, 1e+09 }
 0x644   : >> { %v871_v14 = vpop.permute.xlu1 %870  ;;  %v869_v15 = vpop.permute.xlu0 %868 }
 0x648   : >> { %v877_v19 = vpop.permute.xlu1 %876  ;;  %v875_v20 = vpop.permute.xlu0 %874 }
 0x649   : >> { %v881_v32 = vsel %vm6206_vm15, %v871_v14, %v877_v19  ;;  %v880_v41 = vsel %vm6206_vm15, %v869_v15, %v875_v20 }
 0x64a   : >> { %v883_v43 = vsel %vm4125_vm7, %v881_v32, 1e+09  ;;  %v882_v44 = vsel %vm4125_vm7, %v880_v41, 1e+09 }
 0x64b   : >> { %v885_v45 = vmin.f32 %v867_v42, %v883_v43  ;;  %v884_v46 = vmin.f32 %v866_v21, %v882_v44 }
 0x64d   : >> { %v887_v47 = vmin.f32 %v885_v45, %v3784_v59  ;;  %v886_v48 = vmin.f32 %v884_v46, %v3788_v58 }
 0x64f   : >> { %v889_v49 = vrot.slane %v887_v47, 7  ;;  %v900_v50 = vrot.slane %v887_v47, 1  ;;  %v892_v51 = vrot.slane %v886_v48, 7  ;;  %v899_v52 = vrot.slane %v886_v48, 1 }
 0x651   : >> { %v893_v53 = vsel %vm6202_vm0, %v892_v51, %v889_v49  ;;  %v896_v54 = vsel %vm6202_vm0, %v889_v49, %v892_v51  ;;  %v901_v55 = vsel %vm6204_vm1, %v899_v52, %v900_v50  ;;  %v905_v56 = vsel %vm6204_vm1, %v900_v50, %v899_v52 }
 0x652   : >> { %v897_v57 = vsel %vm6203_vm6, %v896_v54, 1e+09  ;;  %v907_v60 = vsel %vm6210_vm10, %v905_v56, 1e+09 }
 0x653   : >> { %v908_v63 = vmin.f32 %v897_v57, %v901_v55  ;;  %v909_v61 = vmin.f32 %v893_v53, %v907_v60 }
 0x655   : >> { %v910_v62 = vmin.f32 %v908_v63, %v884_v46  ;;  %v911_v0 = vmin.f32 %v909_v61, %v885_v45 }
 0x657   : >> { %v912_v3 = vadd.f32 %v910_v62, %v4066_v24  ;;  %v913_v4 = vadd.f32 %v911_v0, %v4079_v26 }
 0x659   : >> { %v914_v5 = vmin.f32 %v3788_v58, %v912_v3  ;;  %v915_v6 = vmin.f32 %v3784_v59, %v913_v4 }
 0x65b   : >> { %v916_v7 = vsel %vm4073_vm5, %v4066_v24, %v914_v5  ;;  %v917_v8 = vsel %vm4086_vm8, %v4079_v26, %v915_v6 }
 0x65c   : >> { %920 = vrot.lane.b32.xlu0 %v916_v7, %s3841_s0  ;;  %922 = vrot.lane.b32.xlu1 %v917_v8, %s3841_s0 }
 0x660   : >> { %926 = vrot.lane.b32.xlu0 %v916_v7, %s3840_s23  ;;  %928 = vrot.lane.b32.xlu1 %v917_v8, %s3840_s23 }
 0x664   : >> { %936 = vrot.lane.b32.xlu0 %v916_v7, %s3842_s28  ;;  %938 = vrot.lane.b32.xlu1 %v917_v8, %s3842_s28 }
 0x668   : >> { %942 = vrot.lane.b32.xlu0 %v916_v7, %s3843_s30  ;;  %944 = vrot.lane.b32.xlu1 %v917_v8, %s3843_s30 }
 0x6ce   : >> { %v921_v9 = vpop.permute.xlu0 %920  ;;  %v923_v29 = vpop.permute.xlu1 %922 }
 0x6d2   : >> { %v927_v34 = vpop.permute.xlu0 %926  ;;  %v929_v10 = vpop.permute.xlu1 %928 }
 0x6d3   : >> { %v932_v13 = vsel %vm6209_vm14, %v921_v9, %v927_v34  ;;  %v933_v14 = vsel %vm6209_vm14, %v923_v29, %v929_v10 }
 0x6d4   : >> { %v934_v18 = vsel %vm4120_vm4, %v932_v13, 1e+09  ;;  %v935_v21 = vsel %vm4120_vm4, %v933_v14, 1e+09 }
 0x6d6   : >> { %v937_v11 = vpop.permute.xlu0 %936  ;;  %v939_v12 = vpop.permute.xlu1 %938 }
 0x6da   : >> { %v943_v15 = vpop.permute.xlu0 %942  ;;  %v945_v17 = vpop.permute.xlu1 %944 }
 0x6db   : >> { %v948_v19 = vsel %vm6206_vm15, %v937_v11, %v943_v15  ;;  %v949_v20 = vsel %vm6206_vm15, %v939_v12, %v945_v17 }
 0x6dc   : >> { %v950_v32 = vsel %vm4125_vm7, %v948_v19, 1e+09  ;;  %v951_v41 = vsel %vm4125_vm7, %v949_v20, 1e+09 }
 0x6dd   : >> { %v952_v42 = vmin.f32 %v934_v18, %v950_v32  ;;  %v953_v43 = vmin.f32 %v935_v21, %v951_v41 }
 0x6df   : >> { %v954_v44 = vmin.f32 %v952_v42, %v916_v7  ;;  %v955_v45 = vmin.f32 %v953_v43, %v917_v8 }
 0x6e1   : >> { %v960_v46 = vrot.slane %v954_v44, 7  ;;  %v967_v47 = vrot.slane %v954_v44, 1  ;;  %v957_v48 = vrot.slane %v955_v45, 7  ;;  %v968_v49 = vrot.slane %v955_v45, 1 }
 0x6e3   : >> { %v961_v50 = vsel %vm6202_vm0, %v960_v46, %v957_v48  ;;  %v964_v51 = vsel %vm6202_vm0, %v957_v48, %v960_v46  ;;  %v969_v52 = vsel %vm6204_vm1, %v967_v47, %v968_v49  ;;  %v973_v53 = vsel %vm6204_vm1, %v968_v49, %v967_v47 }
 0x6e4   : >> { %v965_v54 = vsel %vm6203_vm6, %v964_v51, 1e+09  ;;  %v975_v55 = vsel %vm6210_vm10, %v973_v53, 1e+09 }
 0x6e5   : >> { %v976_v56 = vmin.f32 %v965_v54, %v969_v52  ;;  %v977_v57 = vmin.f32 %v961_v50, %v975_v55 }
 0x6e7   : >> { %v978_v60 = vmin.f32 %v976_v56, %v952_v42  ;;  %v979_v63 = vmin.f32 %v977_v57, %v953_v43 }
 0x6e9   : >> { %v981_v61 = vadd.f32 %v979_v63, %v4079_v26  ;;  %v980_v62 = vadd.f32 %v978_v60, %v4066_v24 }
 0x6eb   : >> { %v983_v0 = vmin.f32 %v917_v8, %v981_v61  ;;  %v982_v3 = vmin.f32 %v916_v7, %v980_v62 }
 0x6ed   : >> { %v985_v4 = vsel %vm4086_vm8, %v4079_v26, %v983_v0  ;;  %v984_v5 = vsel %vm4073_vm5, %v4066_v24, %v982_v3 }
 0x6ee   : >> { %988 = vrot.lane.b32.xlu0 %v984_v5, %s3841_s0  ;;  %990 = vrot.lane.b32.xlu1 %v985_v4, %s3841_s0 }
 0x6f2   : >> { %994 = vrot.lane.b32.xlu0 %v984_v5, %s3840_s23  ;;  %996 = vrot.lane.b32.xlu1 %v985_v4, %s3840_s23 }
 0x6f6   : >> { %1004 = vrot.lane.b32.xlu0 %v984_v5, %s3842_s28  ;;  %1006 = vrot.lane.b32.xlu1 %v985_v4, %s3842_s28 }
 0x6fa   : >> { %1010 = vrot.lane.b32.xlu0 %v984_v5, %s3843_s30  ;;  %1012 = vrot.lane.b32.xlu1 %v985_v4, %s3843_s30 }
 0x760   : >> { %v989_v6 = vpop.permute.xlu0 %988  ;;  %v991_v7 = vpop.permute.xlu1 %990 }
 0x764   : >> { %v995_v8 = vpop.permute.xlu0 %994  ;;  %v997_v9 = vpop.permute.xlu1 %996 }
 0x765   : >> { %v1000_v10 = vsel %vm6209_vm14, %v989_v6, %v995_v8  ;;  %v1001_v11 = vsel %vm6209_vm14, %v991_v7, %v997_v9 }
 0x766   : >> { %v1002_v14 = vsel %vm4120_vm4, %v1000_v10, 1e+09  ;;  %v1003_v18 = vsel %vm4120_vm4, %v1001_v11, 1e+09 }
 0x768   : >> { %v1005_v29 = vpop.permute.xlu0 %1004  ;;  %v1007_v34 = vpop.permute.xlu1 %1006 }
 0x76c   : >> { %v1011_v12 = vpop.permute.xlu0 %1010  ;;  %v1013_v13 = vpop.permute.xlu1 %1012 }
 0x76d   : >> { %v1016_v15 = vsel %vm6206_vm15, %v1005_v29, %v1011_v12  ;;  %v1017_v17 = vsel %vm6206_vm15, %v1007_v34, %v1013_v13 }
 0x76e   : >> { %v1018_v19 = vsel %vm4125_vm7, %v1016_v15, 1e+09  ;;  %v1019_v20 = vsel %vm4125_vm7, %v1017_v17, 1e+09 }
 0x76f   : >> { %v1020_v21 = vmin.f32 %v1002_v14, %v1018_v19  ;;  %v1021_v32 = vmin.f32 %v1003_v18, %v1019_v20 }
 0x771   : >> { %v1022_v41 = vmin.f32 %v1020_v21, %v984_v5  ;;  %v1023_v42 = vmin.f32 %v1021_v32, %v985_v4 }
 0x773   : >> { %v1028_v43 = vrot.slane %v1022_v41, 7  ;;  %v1035_v44 = vrot.slane %v1022_v41, 1  ;;  %v1025_v45 = vrot.slane %v1023_v42, 7  ;;  %v1036_v46 = vrot.slane %v1023_v42, 1 }
 0x775   : >> { %v1029_v47 = vsel %vm6202_vm0, %v1028_v43, %v1025_v45  ;;  %v1032_v48 = vsel %vm6202_vm0, %v1025_v45, %v1028_v43  ;;  %v1037_v49 = vsel %vm6204_vm1, %v1035_v44, %v1036_v46  ;;  %v1041_v50 = vsel %vm6204_vm1, %v1036_v46, %v1035_v44 }
 0x776   : >> { %v1033_v51 = vsel %vm6203_vm6, %v1032_v48, 1e+09  ;;  %v1043_v52 = vsel %vm6210_vm10, %v1041_v50, 1e+09 }
 0x777   : >> { %v1044_v53 = vmin.f32 %v1033_v51, %v1037_v49  ;;  %v1045_v54 = vmin.f32 %v1029_v47, %v1043_v52 }
 0x779   : >> { %v1046_v55 = vmin.f32 %v1044_v53, %v1020_v21  ;;  %v1047_v56 = vmin.f32 %v1045_v54, %v1021_v32 }
 0x77b   : >> { %v1049_v57 = vadd.f32 %v1047_v56, %v4079_v26  ;;  %v1048_v60 = vadd.f32 %v1046_v55, %v4066_v24 }
 0x77d   : >> { %v1051_v63 = vmin.f32 %v985_v4, %v1049_v57  ;;  %v1050_v61 = vmin.f32 %v984_v5, %v1048_v60 }
 0x77f   : >> { %v1053_v62 = vsel %vm4086_vm8, %v4079_v26, %v1051_v63  ;;  %v1052_v0 = vsel %vm4073_vm5, %v4066_v24, %v1050_v61 }
 0x780   : >> { %1056 = vrot.lane.b32.xlu0 %v1052_v0, %s3841_s0  ;;  %1058 = vrot.lane.b32.xlu1 %v1053_v62, %s3841_s0 }
 0x784   : >> { %1062 = vrot.lane.b32.xlu0 %v1052_v0, %s3840_s23  ;;  %1064 = vrot.lane.b32.xlu1 %v1053_v62, %s3840_s23 }
 0x788   : >> { %1072 = vrot.lane.b32.xlu0 %v1052_v0, %s3842_s28  ;;  %1074 = vrot.lane.b32.xlu1 %v1053_v62, %s3842_s28 }
 0x78c   : >> { %1078 = vrot.lane.b32.xlu0 %v1052_v0, %s3843_s30  ;;  %1080 = vrot.lane.b32.xlu1 %v1053_v62, %s3843_s30 }
 0x7f2   : >> { %v1057_v3 = vpop.permute.xlu0 %1056  ;;  %v1059_v4 = vpop.permute.xlu1 %1058 }
 0x7f6   : >> { %v1063_v5 = vpop.permute.xlu0 %1062  ;;  %v1065_v6 = vpop.permute.xlu1 %1064 }
 0x7f7   : >> { %v1068_v9 = vsel %vm6209_vm14, %v1057_v3, %v1063_v5  ;;  %v1069_v29 = vsel %vm6209_vm14, %v1059_v4, %v1065_v6 }
 0x7f8   : >> { %v1070_v11 = vsel %vm4120_vm4, %v1068_v9, 1e+09  ;;  %v1071_v14 = vsel %vm4120_vm4, %v1069_v29, 1e+09 }
 0x7fa   : >> { %v1073_v7 = vpop.permute.xlu0 %1072  ;;  %v1075_v8 = vpop.permute.xlu1 %1074 }
 0x7fe   : >> { %v1079_v34 = vpop.permute.xlu0 %1078  ;;  %v1081_v10 = vpop.permute.xlu1 %1080 }
 0x7ff   : >> { %v1084_v12 = vsel %vm6206_vm15, %v1073_v7, %v1079_v34  ;;  %v1085_v13 = vsel %vm6206_vm15, %v1075_v8, %v1081_v10 }
 0x800   : >> { %v1086_v15 = vsel %vm4125_vm7, %v1084_v12, 1e+09  ;;  %v1087_v17 = vsel %vm4125_vm7, %v1085_v13, 1e+09 }
 0x801   : >> { %v1088_v18 = vmin.f32 %v1070_v11, %v1086_v15  ;;  %v1089_v19 = vmin.f32 %v1071_v14, %v1087_v17 }
 0x803   : >> { %v1090_v20 = vmin.f32 %v1088_v18, %v1052_v0  ;;  %v1091_v21 = vmin.f32 %v1089_v19, %v1053_v62 }
 0x805   : >> { %v1096_v32 = vrot.slane %v1090_v20, 7  ;;  %v1103_v41 = vrot.slane %v1090_v20, 1  ;;  %v1093_v42 = vrot.slane %v1091_v21, 7  ;;  %v1104_v43 = vrot.slane %v1091_v21, 1 }
 0x807   : >> { %v1097_v44 = vsel %vm6202_vm0, %v1096_v32, %v1093_v42  ;;  %v1100_v45 = vsel %vm6202_vm0, %v1093_v42, %v1096_v32  ;;  %v1105_v46 = vsel %vm6204_vm1, %v1103_v41, %v1104_v43  ;;  %v1109_v47 = vsel %vm6204_vm1, %v1104_v43, %v1103_v41 }
 0x808   : >> { %v1101_v48 = vsel %vm6203_vm6, %v1100_v45, 1e+09  ;;  %v1111_v49 = vsel %vm6210_vm10, %v1109_v47, 1e+09 }
 0x809   : >> { %v1112_v50 = vmin.f32 %v1101_v48, %v1105_v46  ;;  %v1113_v51 = vmin.f32 %v1097_v44, %v1111_v49 }
 0x80b   : >> { %v1114_v52 = vmin.f32 %v1112_v50, %v1088_v18  ;;  %v1115_v53 = vmin.f32 %v1113_v51, %v1089_v19 }
 0x80d   : >> { %v1117_v54 = vadd.f32 %v1115_v53, %v4079_v26  ;;  %v1116_v55 = vadd.f32 %v1114_v52, %v4066_v24 }
 0x80f   : >> { %v1119_v56 = vmin.f32 %v1053_v62, %v1117_v54  ;;  %v1118_v57 = vmin.f32 %v1052_v0, %v1116_v55 }
 0x811   : >> { %v1121_v60 = vsel %vm4086_vm8, %v4079_v26, %v1119_v56  ;;  %v1120_v63 = vsel %vm4073_vm5, %v4066_v24, %v1118_v57 }
 0x812   : >> { %1124 = vrot.lane.b32.xlu0 %v1120_v63, %s3841_s0  ;;  %1126 = vrot.lane.b32.xlu1 %v1121_v60, %s3841_s0 }
 0x816   : >> { %1130 = vrot.lane.b32.xlu0 %v1120_v63, %s3840_s23  ;;  %1132 = vrot.lane.b32.xlu1 %v1121_v60, %s3840_s23 }
 0x81a   : >> { %1140 = vrot.lane.b32.xlu0 %v1120_v63, %s3842_s28  ;;  %1142 = vrot.lane.b32.xlu1 %v1121_v60, %s3842_s28 }
 0x81e   : >> { %1146 = vrot.lane.b32.xlu0 %v1120_v63, %s3843_s30  ;;  %1148 = vrot.lane.b32.xlu1 %v1121_v60, %s3843_s30 }
 0x884   : >> { %v1125_v61 = vpop.permute.xlu0 %1124  ;;  %v1127_v62 = vpop.permute.xlu1 %1126 }
 0x888   : >> { %v1131_v0 = vpop.permute.xlu0 %1130  ;;  %v1133_v3 = vpop.permute.xlu1 %1132 }
 0x889   : >> { %v1136_v6 = vsel %vm6209_vm14, %v1125_v61, %v1131_v0  ;;  %v1137_v7 = vsel %vm6209_vm14, %v1127_v62, %v1133_v3 }
 0x88a   : >> { %v1138_v29 = vsel %vm4120_vm4, %v1136_v6, 1e+09  ;;  %v1139_v11 = vsel %vm4120_vm4, %v1137_v7, 1e+09 }
 0x88c   : >> { %v1141_v4 = vpop.permute.xlu0 %1140  ;;  %v1143_v5 = vpop.permute.xlu1 %1142 }
 0x890   : >> { %v1147_v8 = vpop.permute.xlu0 %1146  ;;  %v1149_v9 = vpop.permute.xlu1 %1148 }
 0x891   : >> { %v1152_v34 = vsel %vm6206_vm15, %v1141_v4, %v1147_v8  ;;  %v1153_v10 = vsel %vm6206_vm15, %v1143_v5, %v1149_v9 }
 0x892   : >> { %v1154_v12 = vsel %vm4125_vm7, %v1152_v34, 1e+09  ;;  %v1155_v13 = vsel %vm4125_vm7, %v1153_v10, 1e+09 }
 0x893   : >> { %v1156_v14 = vmin.f32 %v1138_v29, %v1154_v12  ;;  %v1157_v15 = vmin.f32 %v1139_v11, %v1155_v13 }
 0x895   : >> { %v1158_v17 = vmin.f32 %v1156_v14, %v1120_v63  ;;  %v1159_v18 = vmin.f32 %v1157_v15, %v1121_v60 }
 0x897   : >> { %v1164_v19 = vrot.slane %v1158_v17, 7  ;;  %v1171_v20 = vrot.slane %v1158_v17, 1  ;;  %v1161_v21 = vrot.slane %v1159_v18, 7  ;;  %v1172_v32 = vrot.slane %v1159_v18, 1 }
 0x899   : >> { %v1165_v41 = vsel %vm6202_vm0, %v1164_v19, %v1161_v21  ;;  %v1168_v42 = vsel %vm6202_vm0, %v1161_v21, %v1164_v19  ;;  %v1173_v43 = vsel %vm6204_vm1, %v1171_v20, %v1172_v32  ;;  %v1177_v44 = vsel %vm6204_vm1, %v1172_v32, %v1171_v20 }
 0x89a   : >> { %v1169_v45 = vsel %vm6203_vm6, %v1168_v42, 1e+09  ;;  %v1179_v46 = vsel %vm6210_vm10, %v1177_v44, 1e+09 }
 0x89b   : >> { %v1180_v47 = vmin.f32 %v1169_v45, %v1173_v43  ;;  %v1181_v48 = vmin.f32 %v1165_v41, %v1179_v46 }
 0x89d   : >> { %v1182_v49 = vmin.f32 %v1180_v47, %v1156_v14  ;;  %v1183_v50 = vmin.f32 %v1181_v48, %v1157_v15 }
 0x89f   : >> { %v1185_v51 = vadd.f32 %v1183_v50, %v4079_v26  ;;  %v1184_v52 = vadd.f32 %v1182_v49, %v4066_v24 }
 0x8a1   : >> { %v1187_v53 = vmin.f32 %v1121_v60, %v1185_v51  ;;  %v1186_v54 = vmin.f32 %v1120_v63, %v1184_v52 }
 0x8a3   : >> { %v1189_v55 = vsel %vm4086_vm8, %v4079_v26, %v1187_v53  ;;  %v1188_v56 = vsel %vm4073_vm5, %v4066_v24, %v1186_v54 }
 0x8a4   : >> { %1192 = vrot.lane.b32.xlu0 %v1188_v56, %s3841_s0  ;;  %1194 = vrot.lane.b32.xlu1 %v1189_v55, %s3841_s0 }
 0x8a8   : >> { %1198 = vrot.lane.b32.xlu0 %v1188_v56, %s3840_s23  ;;  %1200 = vrot.lane.b32.xlu1 %v1189_v55, %s3840_s23 }
 0x8ac   : >> { %1208 = vrot.lane.b32.xlu0 %v1188_v56, %s3842_s28  ;;  %1210 = vrot.lane.b32.xlu1 %v1189_v55, %s3842_s28 }
 0x8b0   : >> { %1214 = vrot.lane.b32.xlu0 %v1188_v56, %s3843_s30  ;;  %1216 = vrot.lane.b32.xlu1 %v1189_v55, %s3843_s30 }
 0x916   : >> { %v1193_v57 = vpop.permute.xlu0 %1192  ;;  %v1195_v60 = vpop.permute.xlu1 %1194 }
 0x91a   : >> { %v1199_v63 = vpop.permute.xlu0 %1198  ;;  %v1201_v61 = vpop.permute.xlu1 %1200 }
 0x91b   : >> { %v1204_v3 = vsel %vm6209_vm14, %v1193_v57, %v1199_v63  ;;  %v1205_v4 = vsel %vm6209_vm14, %v1195_v60, %v1201_v61 }
 0x91c   : >> { %v1206_v7 = vsel %vm4120_vm4, %v1204_v3, 1e+09  ;;  %v1207_v29 = vsel %vm4120_vm4, %v1205_v4, 1e+09 }
 0x91e   : >> { %v1209_v62 = vpop.permute.xlu0 %1208  ;;  %v1211_v0 = vpop.permute.xlu1 %1210 }
 0x922   : >> { %v1215_v5 = vpop.permute.xlu0 %1214  ;;  %v1217_v6 = vpop.permute.xlu1 %1216 }
 0x923   : >> { %v1220_v8 = vsel %vm6206_vm15, %v1209_v62, %v1215_v5  ;;  %v1221_v9 = vsel %vm6206_vm15, %v1211_v0, %v1217_v6 }
 0x924   : >> { %v1222_v34 = vsel %vm4125_vm7, %v1220_v8, 1e+09  ;;  %v1223_v10 = vsel %vm4125_vm7, %v1221_v9, 1e+09 }
 0x925   : >> { %v1224_v11 = vmin.f32 %v1206_v7, %v1222_v34  ;;  %v1225_v12 = vmin.f32 %v1207_v29, %v1223_v10 }
 0x927   : >> { %v1226_v13 = vmin.f32 %v1224_v11, %v1188_v56  ;;  %v1227_v14 = vmin.f32 %v1225_v12, %v1189_v55 }
 0x929   : >> { %v1232_v15 = vrot.slane %v1226_v13, 7  ;;  %v1239_v17 = vrot.slane %v1226_v13, 1  ;;  %v1229_v18 = vrot.slane %v1227_v14, 7  ;;  %v1240_v19 = vrot.slane %v1227_v14, 1 }
 0x92b   : >> { %v1233_v20 = vsel %vm6202_vm0, %v1232_v15, %v1229_v18  ;;  %v1236_v21 = vsel %vm6202_vm0, %v1229_v18, %v1232_v15  ;;  %v1241_v32 = vsel %vm6204_vm1, %v1239_v17, %v1240_v19  ;;  %v1245_v41 = vsel %vm6204_vm1, %v1240_v19, %v1239_v17 }
 0x92c   : >> { %v1237_v42 = vsel %vm6203_vm6, %v1236_v21, 1e+09  ;;  %v1247_v43 = vsel %vm6210_vm10, %v1245_v41, 1e+09 }
 0x92d   : >> { %v1248_v44 = vmin.f32 %v1237_v42, %v1241_v32  ;;  %v1249_v45 = vmin.f32 %v1233_v20, %v1247_v43 }
 0x92f   : >> { %v1250_v46 = vmin.f32 %v1248_v44, %v1224_v11  ;;  %v1251_v47 = vmin.f32 %v1249_v45, %v1225_v12 }
 0x931   : >> { %v1253_v48 = vadd.f32 %v1251_v47, %v4079_v26  ;;  %v1252_v49 = vadd.f32 %v1250_v46, %v4066_v24 }
 0x933   : >> { %v1255_v50 = vmin.f32 %v1189_v55, %v1253_v48  ;;  %v1254_v51 = vmin.f32 %v1188_v56, %v1252_v49 }
 0x935   : >> { %v1257_v52 = vsel %vm4086_vm8, %v4079_v26, %v1255_v50  ;;  %v1256_v53 = vsel %vm4073_vm5, %v4066_v24, %v1254_v51 }
 0x936   : >> { %1260 = vrot.lane.b32.xlu0 %v1256_v53, %s3841_s0  ;;  %1262 = vrot.lane.b32.xlu1 %v1257_v52, %s3841_s0 }
 0x93a   : >> { %1266 = vrot.lane.b32.xlu0 %v1256_v53, %s3840_s23  ;;  %1268 = vrot.lane.b32.xlu1 %v1257_v52, %s3840_s23 }
 0x93e   : >> { %1276 = vrot.lane.b32.xlu0 %v1256_v53, %s3842_s28  ;;  %1278 = vrot.lane.b32.xlu1 %v1257_v52, %s3842_s28 }
 0x942   : >> { %1282 = vrot.lane.b32.xlu0 %v1256_v53, %s3843_s30  ;;  %1284 = vrot.lane.b32.xlu1 %v1257_v52, %s3843_s30 }
 0x9a8   : >> { %v1261_v54 = vpop.permute.xlu0 %1260  ;;  %v1263_v55 = vpop.permute.xlu1 %1262 }
 0x9ac   : >> { %v1267_v56 = vpop.permute.xlu0 %1266  ;;  %v1269_v57 = vpop.permute.xlu1 %1268 }
 0x9ad   : >> { %v1272_v61 = vsel %vm6209_vm14, %v1261_v54, %v1267_v56  ;;  %v1273_v62 = vsel %vm6209_vm14, %v1263_v55, %v1269_v57 }
 0x9ae   : >> { %v1274_v4 = vsel %vm4120_vm4, %v1272_v61, 1e+09  ;;  %v1275_v7 = vsel %vm4120_vm4, %v1273_v62, 1e+09 }
 0x9b0   : >> { %v1277_v60 = vpop.permute.xlu0 %1276  ;;  %v1279_v63 = vpop.permute.xlu1 %1278 }
 0x9b4   : >> { %v1283_v0 = vpop.permute.xlu0 %1282  ;;  %v1285_v3 = vpop.permute.xlu1 %1284 }
 0x9b5   : >> { %v1288_v5 = vsel %vm6206_vm15, %v1277_v60, %v1283_v0  ;;  %v1289_v6 = vsel %vm6206_vm15, %v1279_v63, %v1285_v3 }
 0x9b6   : >> { %v1290_v8 = vsel %vm4125_vm7, %v1288_v5, 1e+09  ;;  %v1291_v9 = vsel %vm4125_vm7, %v1289_v6, 1e+09 }
 0x9b7   : >> { %v1292_v29 = vmin.f32 %v1274_v4, %v1290_v8  ;;  %v1293_v34 = vmin.f32 %v1275_v7, %v1291_v9 }
 0x9b9   : >> { %v1294_v10 = vmin.f32 %v1292_v29, %v1256_v53  ;;  %v1295_v11 = vmin.f32 %v1293_v34, %v1257_v52 }
 0x9bb   : >> { %v1300_v12 = vrot.slane %v1294_v10, 7  ;;  %v1307_v13 = vrot.slane %v1294_v10, 1  ;;  %v1297_v14 = vrot.slane %v1295_v11, 7  ;;  %v1308_v15 = vrot.slane %v1295_v11, 1 }
 0x9bd   : >> { %v1301_v17 = vsel %vm6202_vm0, %v1300_v12, %v1297_v14  ;;  %v1304_v18 = vsel %vm6202_vm0, %v1297_v14, %v1300_v12  ;;  %v1309_v19 = vsel %vm6204_vm1, %v1307_v13, %v1308_v15  ;;  %v1313_v20 = vsel %vm6204_vm1, %v1308_v15, %v1307_v13 }
 0x9be   : >> { %v1305_v21 = vsel %vm6203_vm6, %v1304_v18, 1e+09  ;;  %v1315_v32 = vsel %vm6210_vm10, %v1313_v20, 1e+09 }
 0x9bf   : >> { %v1316_v41 = vmin.f32 %v1305_v21, %v1309_v19  ;;  %v1317_v42 = vmin.f32 %v1301_v17, %v1315_v32 }
 0x9c1   : >> { %v1318_v43 = vmin.f32 %v1316_v41, %v1292_v29  ;;  %v1319_v44 = vmin.f32 %v1317_v42, %v1293_v34 }
 0x9c3   : >> { %v1321_v45 = vadd.f32 %v1319_v44, %v4079_v26  ;;  %v1320_v46 = vadd.f32 %v1318_v43, %v4066_v24 }
 0x9c5   : >> { %v1323_v47 = vmin.f32 %v1257_v52, %v1321_v45  ;;  %v1322_v48 = vmin.f32 %v1256_v53, %v1320_v46 }
 0x9c7   : >> { %v1325_v49 = vsel %vm4086_vm8, %v4079_v26, %v1323_v47  ;;  %v1324_v50 = vsel %vm4073_vm5, %v4066_v24, %v1322_v48 }
 0x9c8   : >> { %1328 = vrot.lane.b32.xlu0 %v1324_v50, %s3841_s0  ;;  %1330 = vrot.lane.b32.xlu1 %v1325_v49, %s3841_s0 }
 0x9cc   : >> { %1334 = vrot.lane.b32.xlu0 %v1324_v50, %s3840_s23  ;;  %1336 = vrot.lane.b32.xlu1 %v1325_v49, %s3840_s23 }
 0x9d0   : >> { %1344 = vrot.lane.b32.xlu0 %v1324_v50, %s3842_s28  ;;  %1346 = vrot.lane.b32.xlu1 %v1325_v49, %s3842_s28 }
 0x9d4   : >> { %1350 = vrot.lane.b32.xlu0 %v1324_v50, %s3843_s30  ;;  %1352 = vrot.lane.b32.xlu1 %v1325_v49, %s3843_s30 }
 0xa3a   : >> { %v1329_v51 = vpop.permute.xlu0 %1328  ;;  %v1331_v52 = vpop.permute.xlu1 %1330 }
 0xa3e   : >> { %v1335_v53 = vpop.permute.xlu0 %1334  ;;  %v1337_v54 = vpop.permute.xlu1 %1336 }
 0xa3f   : >> { %v1340_v57 = vsel %vm6209_vm14, %v1329_v51, %v1335_v53  ;;  %v1341_v60 = vsel %vm6209_vm14, %v1331_v52, %v1337_v54 }
 0xa40   : >> { %v1342_v62 = vsel %vm4120_vm4, %v1340_v57, 1e+09  ;;  %v1343_v4 = vsel %vm4120_vm4, %v1341_v60, 1e+09 }
 0xa42   : >> { %v1345_v55 = vpop.permute.xlu0 %1344  ;;  %v1347_v56 = vpop.permute.xlu1 %1346 }
 0xa46   : >> { %v1351_v63 = vpop.permute.xlu0 %1350  ;;  %v1353_v61 = vpop.permute.xlu1 %1352 }
 0xa47   : >> { %v1356_v0 = vsel %vm6206_vm15, %v1345_v55, %v1351_v63  ;;  %v1357_v3 = vsel %vm6206_vm15, %v1347_v56, %v1353_v61 }
 0xa48   : >> { %v1358_v5 = vsel %vm4125_vm7, %v1356_v0, 1e+09  ;;  %v1359_v6 = vsel %vm4125_vm7, %v1357_v3, 1e+09 }
 0xa49   : >> { %v1360_v7 = vmin.f32 %v1342_v62, %v1358_v5  ;;  %v1361_v8 = vmin.f32 %v1343_v4, %v1359_v6 }
 0xa4b   : >> { %v1362_v9 = vmin.f32 %v1360_v7, %v1324_v50  ;;  %v1363_v29 = vmin.f32 %v1361_v8, %v1325_v49 }
 0xa4d   : >> { %v1368_v34 = vrot.slane %v1362_v9, 7  ;;  %v1375_v10 = vrot.slane %v1362_v9, 1  ;;  %v1365_v11 = vrot.slane %v1363_v29, 7  ;;  %v1376_v12 = vrot.slane %v1363_v29, 1 }
 0xa4f   : >> { %v1369_v13 = vsel %vm6202_vm0, %v1368_v34, %v1365_v11  ;;  %v1372_v14 = vsel %vm6202_vm0, %v1365_v11, %v1368_v34  ;;  %v1377_v15 = vsel %vm6204_vm1, %v1375_v10, %v1376_v12  ;;  %v1381_v17 = vsel %vm6204_vm1, %v1376_v12, %v1375_v10 }
 0xa50   : >> { %v1373_v18 = vsel %vm6203_vm6, %v1372_v14, 1e+09  ;;  %v1383_v19 = vsel %vm6210_vm10, %v1381_v17, 1e+09 }
 0xa51   : >> { %v1384_v20 = vmin.f32 %v1373_v18, %v1377_v15  ;;  %v1385_v21 = vmin.f32 %v1369_v13, %v1383_v19 }
 0xa53   : >> { %v1386_v32 = vmin.f32 %v1384_v20, %v1360_v7  ;;  %v1387_v41 = vmin.f32 %v1385_v21, %v1361_v8 }
 0xa55   : >> { %v1388_v42 = vadd.f32 %v1386_v32, %v4066_v24  ;;  %v1389_v43 = vadd.f32 %v1387_v41, %v4079_v26 }
 0xa57   : >> { %v1390_v44 = vmin.f32 %v1324_v50, %v1388_v42  ;;  %v1391_v45 = vmin.f32 %v1325_v49, %v1389_v43 }
 0xa59   : >> { %v1392_v46 = vsel %vm4073_vm5, %v4066_v24, %v1390_v44   ;;  %v1393_v47 = vsel %vm4086_vm8, %v4079_v26, %v1391_v45  }
 0xa5a   : >> { %v829_v48 = vsub.f32 %v3788_v58, %v1392_v46  ;;  %v830_v51 = vsub.f32 %v3784_v59, %v1393_v47  ;;  %v6263_v59 = vmov %v1393_v47  ;;  %v6264_v58 = vmov %v1392_v46 }
 0xa5c   : >> { %v832_v52 = vsel %vm6205_vm2, %v829_v48, -inf  ;;  %v833_v53 = vsel %vm6205_vm2, %v830_v51, -inf }
 0xa5d   : >> { %v834_v54 = vmax.f32 %v832_v52, %v833_v53 }
 0xa5f   : >> { %835 = vmax.xlane.f32.xlu0 %v834_v54 }
 0xae8   : >> { %v836_v49 = vpop.xlane.xlu0 %835 }
 0xae9   : >> { %v837_v50 = vrot.slane %v836_v49, 4 }
 0xaeb   : >> { %v838_v55 = vmax.f32 %v836_v49, %v837_v50 }
 0xaed   : >> { %v839_v56 = vrot.slane %v838_v55, 2 }
 0xaef   : >> { %v840_v57 = vmax.f32 %v838_v55, %v839_v56 }
 0xaf1   : >> { %v841_v60 = vrot.slane %v840_v57, 1 }
 0xaf3   : >> { %v842_v63 = vmax.f32 %v840_v57, %v841_v60 }
 0xaf5   : >> { %3411 = vpush %v842_v63 }
 0xb26   : >> { %s3412_s8 = spop %3411 }
 0xb27   : >> { %p844_p9 = scmp.gt.f32.partialorder %s3412_s8, 0.0 }
 0xb29   : >> { %p845_p0 = pnand %p844_p9, %p828_p8 }
 0xb2a   : > { %v6266_v29 = vmov (%p845_p0), %v1393_v47  ;;  %v6267_v34 = vmov (%p845_p0), %v1392_v46 }
 0xb2b   : > { %848 = sbr.rel (!%p845_p0) target bundleno = 1481 (0x5c9), region = 100 }
 0xb30 PF: > { %v1402_v58 = vrot.slane %v3796_v29, 7  ;;  %v1405_v61 = vrot.slane %v3800_v34, 7  ;;  %v1505_v24 = vrot.slane %v3800_v34, 1  ;;  %v1506_v25 = vrot.slane %v3796_v29, 1  ;;  %v3800_v34 = vphi %v6262_v34, %v6267_v34   ;;  %v3796_v29 = vphi %v6261_v29, %v6266_v29  }
 0xb31   : > { %vm1394_vm3 = vcmp.lt.f32.partialorder %v3800_v34, 5e+08  ;;  %vm1395_vm5 = vcmp.lt.f32.partialorder %v3796_v29, 5e+08 }
 0xb32   : > { %v1409_v62 = vsel %vm6202_vm0, %v1402_v58, %v1405_v61  ;;  %v4808_v0 = vsel %vm6202_vm0, %v1405_v61, %v1402_v58  ;;  %v4829_v26 = vsel %vm6204_vm1, %v1506_v25, %v1505_v24  ;;  %v4832_v27 = vsel %vm6204_vm1, %v1505_v24, %v1506_v25 }
 0xb33   : > { %1417 = vrot.lane.b32.xlu1 %v1409_v62, %s3836_s13  ;;  %1411 = vrot.lane.b32.xlu0 %v1409_v62, %s3837_s14  ;;  %v1396_v59 = vsel %vm1394_vm3, 1.0, %v3835_v16  ;;  %v1397_v3 = vsel %vm1395_vm5, 1.0, %v3835_v16  ;;  %v1431_v17 = vsel %vm6203_vm6, %v1409_v62, 1e+09 }
 0xb34   : > { %1399 = vst.msk [vmem:[%s4458_s19] sm:$0xff] %vm6205_vm2, %v1396_v59  ;;  %1400 = vst.msk [vmem:[%s4458_s19 + $0x8] sm:$0xff] %vm6205_vm2, %v1397_v3 }
 0xb37   : > { %1419 = vrot.lane.b32.xlu1 %v4808_v0, %s3836_s13  ;;  %1413 = vrot.lane.b32.xlu0 %v4808_v0, %s3837_s14 }
 0xb3b   : > { %1441 = vrot.lane.b32.xlu1 %v4808_v0, %s3838_s21  ;;  %1439 = vrot.lane.b32.xlu0 %v1409_v62, %s3838_s21 }
 0xb3f   : > { %1447 = vrot.lane.b32.xlu1 %v4808_v0, %s3839_s22  ;;  %1445 = vrot.lane.b32.xlu0 %v1409_v62, %s3839_s22 }
 0xb43   : > { %1463 = vrot.lane.b32.xlu1 %v3796_v29, %s3837_s14  ;;  %1461 = vrot.lane.b32.xlu0 %v3800_v34, %s3837_s14 }
 0xb47   : > { %1469 = vrot.lane.b32.xlu1 %v3796_v29, %s3836_s13  ;;  %1467 = vrot.lane.b32.xlu0 %v3800_v34, %s3836_s13 }
 0xb4b   : > { %1485 = vrot.lane.b32.xlu1 %v3796_v29, %s3838_s21  ;;  %1483 = vrot.lane.b32.xlu0 %v3800_v34, %s3838_s21 }
 0xb4f   : > { %1491 = vrot.lane.b32.xlu1 %v3796_v29, %s3839_s22  ;;  %1489 = vrot.lane.b32.xlu0 %v3800_v34, %s3839_s22 }
 0xb53   : > { %1515 = vrot.lane.b32.xlu1 %v4829_v26, %s3837_s14  ;;  %1513 = vrot.lane.b32.xlu0 %v4832_v27, %s3837_s14 }
 0xb57   : > { %1521 = vrot.lane.b32.xlu1 %v4829_v26, %s3836_s13  ;;  %1519 = vrot.lane.b32.xlu0 %v4832_v27, %s3836_s13 }
 0xb5b   : > { %1545 = vrot.lane.b32.xlu1 %v4829_v26, %s3838_s21  ;;  %1543 = vrot.lane.b32.xlu0 %v4832_v27, %s3838_s21 }
 0xb5f   : > { %1551 = vrot.lane.b32.xlu1 %v4829_v26, %s3839_s22  ;;  %1549 = vrot.lane.b32.xlu0 %v4832_v27, %s3839_s22 }
 0xba5   : > { %v1418_v16 = vpop.permute.xlu1 %1417  ;;  %v1412_v4 = vpop.permute.xlu0 %1411 }
 0xba6   : > { %v1423_v9 = vsel %vm6209_vm14, %v1412_v4, %v1418_v16 }
 0xba7   : > { %v1425_v11 = vsel %vm4133_vm9, %v1423_v9, 1e+09 }
 0xba8   : > { %vm1427_vm8 = vcmp.lt.f32.partialorder %v1425_v11, 1e+09 }
 0xba9   : > { %v1420_v5 = vpop.permute.xlu1 %1419  ;;  %v1414_v6 = vpop.permute.xlu0 %1413  ;;  %v1429_v15 = vsel %vm1427_vm8, %v1425_v11, 1e+09 }
 0xbaa   : > { %v1424_v29 = vsel %vm6209_vm14, %v1414_v6, %v1420_v5  ;;  %vm1433_vm5 = vcmp.lt.f32.partialorder %v1431_v17, %v1429_v15 }
 0xbab   : > { %v1426_v12 = vsel %vm4120_vm4, %v1424_v29, 1e+09  ;;  %v1435_v48 = vsel %vm1433_vm5, %v1431_v17, %v1429_v15 }
 0xbac   : > { %vm1428_vm3 = vcmp.lt.f32.partialorder %v1426_v12, 1e+09 }
 0xbad   : > { %v1442_v7 = vpop.permute.xlu1 %1441  ;;  %v1440_v8 = vpop.permute.xlu0 %1439  ;;  %v1430_v18 = vsel %vm1428_vm3, %v1426_v12, 1e+09 }
 0xbae   : > { %vm1434_vm0 = vcmp.lt.f32.partialorder %v4808_v0, %v1430_v18 }
 0xbaf   : > { %v1436_v47 = vsel %vm1434_vm0, %v4808_v0, %v1430_v18 }
 0xbb1   : > { %v1448_v34 = vpop.permute.xlu1 %1447  ;;  %v1446_v10 = vpop.permute.xlu0 %1445 }
 0xbb2   : > { %v1452_v21 = vsel %vm6206_vm15, %v1442_v7, %v1448_v34  ;;  %v1451_v32 = vsel %vm6206_vm15, %v1440_v8, %v1446_v10  ;;  %v1536_v7 = vsel %vm6210_vm10, %v4829_v26, 1e+09  ;;  %v3844_v8 = vmov 0  }
 0xbb3   : > { %v1454_v41 = vsel %vm4125_vm7, %v1452_v21, 1e+09  ;;  %v1453_v42 = vsel %vm4142_vm11, %v1451_v32, 1e+09  ;;  %v1438_v9 = vsel %vm1434_vm0, 1, %v3844_v8  ;;  %v1437_v29 = vsel %vm1433_vm5, 1, %v3844_v8 }
 0xbb4   : > { %vm1456_vm8 = vcmp.lt.f32.partialorder %v1454_v41, %v1436_v47  ;;  %vm1455_vm3 = vcmp.lt.f32.partialorder %v1453_v42, %v1435_v48 }
 0xbb5   : > { %v1464_v13 = vpop.permute.xlu1 %1463  ;;  %v1462_v14 = vpop.permute.xlu0 %1461  ;;  %v1458_v55 = vsel %vm1456_vm8, %v1454_v41, %v1436_v47  ;;  %v1457_v56 = vsel %vm1455_vm3, %v1453_v42, %v1435_v48 }
 0xbb9   : > { %v1470_v19 = vpop.permute.xlu1 %1469  ;;  %v1468_v20 = vpop.permute.xlu0 %1467 }
 0xbba   : > { %v1474_v45 = vsel %vm6209_vm14, %v1464_v13, %v1470_v19  ;;  %v1473_v46 = vsel %vm6209_vm14, %v1462_v14, %v1468_v20  ;;  %v1460_v13 = vsel %vm1456_vm8, 2, %v1438_v9  ;;  %v1459_v14 = vsel %vm1455_vm3, 2, %v1437_v29 }
 0xbbb   : > { %v1476_v51 = vsel %vm4120_vm4, %v1474_v45, 1e+09  ;;  %v1475_v52 = vsel %vm4120_vm4, %v1473_v46, 1e+09  ;;  %vm6270_vm8 = vcmask 252928  }
 0xbbc   : > { %vm6208_vm6 = vcmp.lt.f32.partialorder %v1476_v51, %v1458_v55  ;;  %vm6207_vm1 = vcmp.lt.f32.partialorder %v1475_v52, %v1457_v56  ;;  %vm6269_vm10 = vcmp.lt.f32.partialorder %v1475_v52, %v1457_v56  ;;  %vm6271_vm3 = vmmov %vm6270_vm8 }
 0xbbd   : > { %v1486_v43 = vpop.permute.xlu1 %1485  ;;  %v1484_v44 = vpop.permute.xlu0 %1483  ;;  %v1480_v61 = vsel %vm6208_vm6, %v1476_v51, %v1458_v55  ;;  %v1479_v62 = vsel %vm6207_vm1, %v1475_v52, %v1457_v56  ;;  %v1481_v19 = vsel %vm6269_vm10, 3, %v1459_v14  ;;  %v3319_v52 = vmul.f32 %v270_v31, %v4060_v22 }
 0xbc1   : > { %v1492_v53 = vpop.permute.xlu1 %1491  ;;  %v1490_v54 = vpop.permute.xlu0 %1489 }
 0xbc2   : > { %v1496_v49 = vsel %vm6206_vm15, %v1486_v43, %v1492_v53  ;;  %v1495_v50 = vsel %vm6206_vm15, %v1484_v44, %v1490_v54  ;;  %v3320_v53 = vmul.f32 %v271_v33, %v4062_v23 }
 0xbc3   : > { %v1498_v57 = vsel %vm4125_vm7, %v1496_v49, 1e+09  ;;  %v1497_v60 = vsel %vm4125_vm7, %v1495_v50, 1e+09 }
 0xbc4   : > { %vm1500_vm2 = vcmp.lt.f32.partialorder %v1498_v57, %v1480_v61  ;;  %vm1499_vm15 = vcmp.lt.f32.partialorder %v1497_v60, %v1479_v62 }
 0xbc5   : > { %v1516_v63 = vpop.permute.xlu1 %1515  ;;  %v1514_v58 = vpop.permute.xlu0 %1513  ;;  %v1502_v16 = vsel %vm1500_vm2, %v1498_v57, %v1480_v61  ;;  %v1501_v5 = vsel %vm1499_vm15, %v1497_v60, %v1479_v62  ;;  %v1503_v0 = vsel %vm1499_vm15, 4, %v1481_v19  ;;  %v6274_v61 = vmov %v4062_v23 }
 0xbc6   : > { %v6275_v62 = vmov %v4060_v22 }
 0xbc9   : > { %v1522_v24 = vpop.permute.xlu1 %1521  ;;  %v1520_v25 = vpop.permute.xlu0 %1519 }
 0xbca   : > { %v1526_v59 = vsel %vm6209_vm14, %v1516_v63, %v1522_v24  ;;  %v1525_v3 = vsel %vm6209_vm14, %v1514_v58, %v1520_v25  ;;  %vm6268_vm14 = vcmp.lt.f32.partialorder %v1476_v51, %v1458_v55 }
 0xbcb   : > { %v1528_v4 = vsel %vm4154_vm12, %v1526_v59, 1e+09  ;;  %v1527_v6 = vsel %vm4120_vm4, %v1525_v3, 1e+09  ;;  %v1482_v26 = vsel %vm6268_vm14, 3, %v1460_v13 }
 0xbcc   : > { %vm1530_vm1 = vcmp.lt.f32.partialorder %v1528_v4, %v1502_v16  ;;  %vm1529_vm6 = vcmp.lt.f32.partialorder %v1527_v6, %v1501_v5  ;;  %v1504_v20 = vsel %vm1500_vm2, 4, %v1482_v26 }
 0xbcd   : > { %v1532_v34 = vsel %vm1530_vm1, %v1528_v4, %v1502_v16  ;;  %v1531_v10 = vsel %vm1529_vm6, %v1527_v6, %v1501_v5  ;;  %v1546_v11 = vpop.permute.xlu1 %1545  ;;  %v1544_v12 = vpop.permute.xlu0 %1543  ;;  %v1534_v15 = vsel %vm1530_vm1, 5, %v1504_v20  ;;  %v1533_v17 = vsel %vm1529_vm6, 5, %v1503_v0 }
 0xbce   : > { %vm1538_vm0 = vcmp.lt.f32.partialorder %v1536_v7, %v1532_v34  ;;  %vm1537_vm5 = vcmp.lt.f32.partialorder %v4832_v27, %v1531_v10  ;;  %vm6272_vm6 = vcmask 261120  }
 0xbcf   : > { %v1540_v42 = vsel %vm1538_vm0, %v1536_v7, %v1532_v34  ;;  %v1539_v44 = vsel %vm1537_vm5, %v4832_v27, %v1531_v10  ;;  %v1542_v46 = vsel %vm1538_vm0, 6, %v1534_v15  ;;  %v1541_v47 = vsel %vm1537_vm5, 6, %v1533_v17  ;;  %vm6273_vm15 = vmmov %vm6272_vm6 }
 0xbd0   : > { %v3321_v27 = vsel %vm6272_vm6, %v3319_v52, 0.0  ;;  %v3322_v54 = vsel %vm6273_vm15, %v3320_v53, 0.0 }
 0xbd1   : > { %v1552_v18 = vpop.permute.xlu1 %1551  ;;  %v1550_v21 = vpop.permute.xlu0 %1549  ;;  %v3323_v49 = vadd.f32 %v3322_v54, %v3321_v27 }
 0xbd2   : > { %v1556_v32 = vsel %vm6270_vm8, %v1546_v11, %v1552_v18  ;;  %v1555_v41 = vsel %vm6271_vm3, %v1544_v12, %v1550_v21 }
 0xbd3   : > { %v1558_v43 = vsel %vm4162_vm13, %v1556_v32, 1e+09  ;;  %v1557_v45 = vsel %vm4125_vm7, %v1555_v41, 1e+09  ;;  %3324 = vadd.xlane.f32.xlu0 %v3323_v49 }
 0xbd4   : > { %vm1560_vm10 = vcmp.lt.f32.partialorder %v1558_v43, %v1540_v42  ;;  %vm1559_vm14 = vcmp.lt.f32.partialorder %v1557_v45, %v1539_v44 }
 0xbd5   : > { %v4923_v48 = vsel %vm1560_vm10, 7, %v1542_v46  ;;  %v4925_v51 = vsel %vm1559_vm14, 7, %v1541_v47 }
 0xc5c   : > { %v3325_v50 = vpop.xlane.xlu0 %3324 }
 0xc5d   : > { %v3326_v55 = vrot.slane %v3325_v50, 4 }
 0xc5f   : > { %v3327_v56 = vadd.f32 %v3326_v55, %v3325_v50 }
 0xc61   : > { %v3328_v57 = vrot.slane %v3327_v56, 2 }
 0xc63   : > { %v3329_v60 = vadd.f32 %v3328_v57, %v3327_v56 }
 0xc65   : > { %v3330_v63 = vrot.slane %v3329_v60, 1 }
 0xc67   : > { %v3331_v58 = vadd.f32 %v3330_v63, %v3329_v60 }
 0xc69   : > { %3413 = vpush %v3331_v58 }
 0xc9a   : > { %s3414_s27 = spop %3413 }
 0xc9b   : > { %p3333_p1 = scmp.gt.f32.partialorder %s3414_s27, 0.5 }
 0xc9c   : > { %v6276_v24 = vmov (%p3333_p1), %v4062_v23  ;;  %v6277_v25 = vmov (%p3333_p1), %v4060_v22  ;;  %s4953_s7 = smov (%p3333_p1), 0  }
 0xc9d   : > { %3335 = sbr.rel (!%p3333_p1) target bundleno = 4795 (0x12bb), region = 105 }
 0xca2 LB: >> { %v4967_v59 = vmul.f32 %v3816_v22, %v4093_v28  ;;  %v4970_v3 = vmul.f32 %v3812_v23, %v4103_v30  ;;  %vm6220_vm1 = vcmp.eq.s32.totalorder %v4925_v51, 0  ;;  %vm6218_vm2 = vcmp.eq.s32.totalorder %v4923_v48, 0  ;;  %s3845_s11 = smov 31   ;;  %s3846_s12 = smov 127   ;;  %s3820_s7 = sphi %s4953_s7, %s6573_s7   ;;  %v3816_v22 = vphi %v4060_v22, %v3169_v22   ;;  %v3812_v23 = vphi %v4062_v23, %v3170_v23   ;;  %v3808_v25 = vphi %v6277_v25, %v6572_v25   ;;  %v3804_v24 = vphi %v6276_v24, %v6571_v24  }
 0xca3   : >> { %vm6214_vm0 = vcmp.eq.s32.totalorder %v4925_v51, 2  ;;  %vm6213_vm5 = vcmp.eq.s32.totalorder %v4923_v48, 2  ;;  %vm6278_vm8 = vcmask 1046528   ;;  %vm6212_vm3 = vcmp.eq.s32.totalorder %v4925_v51, 1  ;;  %s3847_s13 = smov 97   ;;  %s3848_s14 = smov 1  }
 0xca4   : >> { %v4975_v16 = vsub.f32 %v3816_v22, %v4967_v59  ;;  %v4978_v4 = vsub.f32 %v3812_v23, %v4970_v3  ;;  %vm6211_vm10 = vcmp.eq.s32.totalorder %v4923_v48, 1  ;;  %vm6279_vm14 = vmmov %vm6278_vm8  ;;  %s3173_s21 = sadd.s32 8, %s3820_s7  }
 0xca5   : >> { %vm6280_vm6 = vmmov %vm6278_vm8  ;;  %p1569_p3 = scmp.lt.s32.totalorder %s3173_s21, 256  ;;  %s6573_s7 = smov %s3173_s21 }
 0xca6   : >> { %v1595_v5 = vsel %vm6220_vm1, %v4975_v16, 0.0  ;;  %v1596_v6 = vsel %vm6218_vm2, %v4978_v4, 0.0  ;;  %v1643_v22 = vsel %vm6214_vm0, %v4975_v16, 0.0  ;;  %v1644_v23 = vsel %vm6213_vm5, %v4978_v4, 0.0  ;;  %vm6281_vm15 = vmmov %vm6280_vm6 }
 0xca7   : >> { %v1599_v7 = vrot.slane %v1595_v5, 1  ;;  %v1600_v8 = vrot.slane %v1596_v6, 1  ;;  %v1647_v34 = vrot.slane %v1643_v22, 1  ;;  %v1648_v10 = vrot.slane %v1644_v23, 1 }
 0xca8   : >> { %v1626_v11 = vsel %vm6212_vm3, %v4975_v16, 0.0  ;;  %v1627_v12 = vsel %vm6211_vm10, %v4978_v4, 0.0  ;;  %vm1673_vm10 = vcmp.eq.s32.totalorder %v4923_v48, 3  ;;  %vm1672_vm3 = vcmp.eq.s32.totalorder %v4925_v51, 3 }
 0xca9   : >> { %v1601_v9 = vsel %vm6278_vm8, %v1599_v7, %v1600_v8  ;;  %v1604_v29 = vsel %vm6279_vm14, %v1600_v8, %v1599_v7  ;;  %v1630_v13 = vrot.slane %v1626_v11, 1  ;;  %v1631_v14 = vrot.slane %v1627_v12, 1  ;;  %vm6282_vm8 = vmmov %vm6280_vm6 }
 0xcaa   : >> { %1612 = vrot.lane.b32.xlu1 %v1601_v9, %s3845_s11  ;;  %1606 = vrot.lane.b32.xlu0 %v1601_v9, %s3846_s12  ;;  %v1652_v26 = vsel %vm6280_vm6, %v1648_v10, %v1647_v34  ;;  %v1649_v19 = vsel %vm6281_vm15, %v1647_v34, %v1648_v10  ;;  %vm6283_vm14 = vmmov %vm6280_vm6  ;;  %v1675_v15 = vsel %vm1673_vm10, %v4978_v4, 0.0  ;;  %v1674_v17 = vsel %vm1672_vm3, %v4975_v16, 0.0 }
 0xcab   : >> { %v5011_v20 = vsel %vm6282_vm8, %v1631_v14, %v1630_v13  ;;  %v5014_v0 = vsel %vm6283_vm14, %v1630_v13, %v1631_v14  ;;  %vm6223_vm6 = vcmp.eq.s32.totalorder %v4923_v48, 4  ;;  %vm6222_vm15 = vcmp.eq.s32.totalorder %v4925_v51, 4 }
 0xcac   : >> { %vm6215_vm8 = vcmp.eq.s32.totalorder %v4925_v51, 5  ;;  %vm6216_vm14 = vcmp.eq.s32.totalorder %v4923_v48, 5  ;;  %v1699_v18 = vsel %vm6223_vm6, %v4978_v4, 0.0  ;;  %v1698_v21 = vsel %vm6222_vm15, %v4975_v16, 0.0 }
 0xcad   : >> { %vm6217_vm5 = vcmp.eq.s32.totalorder %v4925_v51, 6  ;;  %vm6219_vm0 = vcmp.eq.s32.totalorder %v4923_v48, 6  ;;  %v1722_v32 = vsel %vm6215_vm8, %v4975_v16, 0.0  ;;  %v1723_v41 = vsel %vm6216_vm14, %v4978_v4, 0.0 }
 0xcae   : >> { %1614 = vrot.lane.b32.xlu1 %v1604_v29, %s3845_s11  ;;  %1608 = vrot.lane.b32.xlu0 %v1604_v29, %s3846_s12  ;;  %v1753_v42 = vsel %vm6217_vm5, %v4975_v16, 0.0  ;;  %v1754_v43 = vsel %vm6219_vm0, %v4978_v4, 0.0  ;;  %v1725_v46 = vrot.slane %v1723_v41, 7  ;;  %v1728_v47 = vrot.slane %v1722_v32, 7 }
 0xcaf   : >> { %v1756_v44 = vrot.slane %v1754_v43, 7  ;;  %v1759_v45 = vrot.slane %v1753_v42, 7  ;;  %vm6284_vm8 = vcmask 1040384   ;;  %vm6224_vm5 = vcmp.eq.s32.totalorder %v4925_v51, 7 }
 0xcb0   : >> { %vm6285_vm14 = vmmov %vm6284_vm8  ;;  %vm6221_vm2 = vcmp.eq.s32.totalorder %v4923_v48, 7  ;;  %v1770_v49 = vsel %vm6224_vm5, %v4975_v16, 0.0 }
 0xcb1   : >> { %v5059_v52 = vsel %vm6284_vm8, %v1756_v44, %v1759_v45  ;;  %v5062_v53 = vsel %vm6285_vm14, %v1759_v45, %v1756_v44  ;;  %vm6286_vm0 = vmmov %vm6284_vm8  ;;  %v1771_v50 = vsel %vm6221_vm2, %v4978_v4, 0.0  ;;  %v1776_v56 = vrot.slane %v1770_v49, 7 }
 0xcb2   : >> { %1656 = vrot.lane.b32.xlu1 %v1652_v26, %s3847_s13  ;;  %1654 = vrot.lane.b32.xlu0 %v1649_v19, %s3847_s13  ;;  %v1729_v27 = vsel %vm6286_vm0, %v1728_v47, %v1725_v46  ;;  %vm6287_vm1 = vmmov %vm6286_vm0  ;;  %v1773_v55 = vrot.slane %v1771_v50, 7  ;;  %vm6289_vm8 = vcmask 252928  }
 0xcb3   : >> { %v1731_v54 = vsel %vm6287_vm1, %v1725_v46, %v1728_v47  ;;  %vm6288_vm1 = vmmov %vm6286_vm0 }
 0xcb4   : >> { %v1777_v57 = vsel %vm6286_vm0, %v1776_v56, %v1773_v55  ;;  %v1779_v60 = vsel %vm6288_vm1, %v1773_v55, %v1776_v56  ;;  %vm6290_vm14 = vmmov %vm6289_vm8  ;;  %vm6291_vm0 = vcmask 7168  }
 0xcb5   : >> { %vm6292_vm1 = vmmov %vm6291_vm0 }
 0xcb6   : >> { %1662 = vrot.lane.b32.xlu1 %v1652_v26, %s3848_s14  ;;  %1660 = vrot.lane.b32.xlu0 %v1649_v19, %s3848_s14  ;;  %vm6294_vm2 = vmmov %vm6290_vm14 }
 0xcba   : >> { %1680 = vrot.lane.b32.xlu1 %v1675_v15, %s3846_s12  ;;  %1678 = vrot.lane.b32.xlu0 %v1674_v17, %s3846_s12 }
 0xcbe   : >> { %1686 = vrot.lane.b32.xlu1 %v1675_v15, %s3845_s11  ;;  %1684 = vrot.lane.b32.xlu0 %v1674_v17, %s3845_s11 }
 0xcc2   : >> { %1704 = vrot.lane.b32.xlu1 %v1699_v18, %s3847_s13  ;;  %1702 = vrot.lane.b32.xlu0 %v1698_v21, %s3847_s13 }
 0xcc6   : >> { %1710 = vrot.lane.b32.xlu1 %v1699_v18, %s3848_s14  ;;  %1708 = vrot.lane.b32.xlu0 %v1698_v21, %s3848_s14 }
 0xcca   : >> { %1735 = vrot.lane.b32.xlu1 %v1729_v27, %s3846_s12  ;;  %1733 = vrot.lane.b32.xlu0 %v1731_v54, %s3846_s12 }
 0xcce   : >> { %1741 = vrot.lane.b32.xlu1 %v1729_v27, %s3845_s11  ;;  %1739 = vrot.lane.b32.xlu0 %v1731_v54, %s3845_s11 }
 0xcd2   : >> { %1783 = vrot.lane.b32.xlu1 %v1777_v57, %s3847_s13  ;;  %1781 = vrot.lane.b32.xlu0 %v1779_v60, %s3847_s13 }
 0xcd6   : >> { %1789 = vrot.lane.b32.xlu1 %v1777_v57, %s3848_s14  ;;  %1787 = vrot.lane.b32.xlu0 %v1779_v60, %s3848_s14 }
 0xd1c   : >> { %v1613_v63 = vpop.permute.xlu1 %1612  ;;  %v1607_v58 = vpop.permute.xlu0 %1606 }
 0xd1d   : >> { %v1618_v9 = vsel %vm6289_vm8, %v1607_v58, %v1613_v63  ;;  %vm6293_vm8 = vcmp.le.s32.totalorder %v4002_v2, 14 }
 0xd1e   : >> { %v1620_v34 = vsel %vm4125_vm7, %v1618_v9, 0.0  ;;  %v1638_v15 = vsel %vm6293_vm8, %v5011_v20, 0.0  ;;  %vm6296_vm8 = vmmov %vm6294_vm2 }
 0xd1f   : >> { %v1622_v13 = vmax.f32 %v4967_v59, %v1620_v34 }
 0xd20   : >> { %v1615_v61 = vpop.permute.xlu1 %1614  ;;  %v1609_v62 = vpop.permute.xlu0 %1608 }
 0xd21   : >> { %v1619_v29 = vsel %vm6290_vm14, %v1609_v62, %v1615_v61  ;;  %v1639_v42 = vmax.f32 %v1622_v13, %v5014_v0 }
 0xd22   : >> { %v1621_v10 = vsel %vm4162_vm13, %v1619_v29, 0.0 }
 0xd23   : >> { %v1623_v14 = vmax.f32 %v4970_v3, %v1621_v10 }
 0xd24   : >> { %v1657_v16 = vpop.permute.xlu1 %1656  ;;  %v1655_v4 = vpop.permute.xlu0 %1654 }
 0xd25   : >> { %v1640_v3 = vmax.f32 %v1623_v14, %v1638_v15 }
 0xd28   : >> { %v1663_v5 = vpop.permute.xlu1 %1662  ;;  %v1661_v6 = vpop.permute.xlu0 %1660 }
 0xd29   : >> { %v1667_v26 = vsel %vm6291_vm0, %v1657_v16, %v1663_v5  ;;  %v1666_v19 = vsel %vm6292_vm1, %v1655_v4, %v1661_v6  ;;  %vm6295_vm1 = vmmov %vm6291_vm0 }
 0xd2a   : >> { %v1669_v41 = vsel %vm4154_vm12, %v1667_v26, 0.0  ;;  %v1668_v59 = vsel %vm4120_vm4, %v1666_v19, 0.0 }
 0xd2b   : >> { %v1671_v27 = vmax.f32 %v1640_v3, %v1669_v41  ;;  %v1670_v54 = vmax.f32 %v1639_v42, %v1668_v59 }
 0xd2c   : >> { %v1681_v7 = vpop.permute.xlu1 %1680  ;;  %v1679_v8 = vpop.permute.xlu0 %1678 }
 0xd30   : >> { %v1687_v22 = vpop.permute.xlu1 %1686  ;;  %v1685_v23 = vpop.permute.xlu0 %1684 }
 0xd31   : >> { %v1691_v21 = vsel %vm6290_vm14, %v1681_v7, %v1687_v22  ;;  %v1690_v32 = vsel %vm6294_vm2, %v1679_v8, %v1685_v23  ;;  %vm6297_vm14 = vcmp.ge.s32.totalorder %v3999_v1, 1 }
 0xd32   : >> { %v1693_v20 = vsel %vm4125_vm7, %v1691_v21, 0.0  ;;  %v1692_v45 = vsel %vm4125_vm7, %v1690_v32, 0.0  ;;  %v1764_v4 = vsel %vm6297_vm14, %v5059_v52, 0.0  ;;  %vm6301_vm14 = vcmp.eq.s32.totalorder %v4925_v51, 2 }
 0xd33   : >> { %v1695_v50 = vmax.f32 %v1671_v27, %v1693_v20  ;;  %v1694_v55 = vmax.f32 %v1670_v54, %v1692_v45 }
 0xd34   : >> { %v1705_v11 = vpop.permute.xlu1 %1704  ;;  %v1703_v12 = vpop.permute.xlu0 %1702 }
 0xd38   : >> { %v1711_v17 = vpop.permute.xlu1 %1710  ;;  %v1709_v18 = vpop.permute.xlu0 %1708 }
 0xd39   : >> { %v1715_v43 = vsel %vm6291_vm0, %v1705_v11, %v1711_v17  ;;  %v1714_v44 = vsel %vm6295_vm1, %v1703_v12, %v1709_v18  ;;  %vm6298_vm1 = vmmov %vm6291_vm0 }
 0xd3a   : >> { %v1717_v49 = vsel %vm4120_vm4, %v1715_v43, 0.0  ;;  %v1716_v0 = vsel %vm4120_vm4, %v1714_v44, 0.0 }
 0xd3b   : >> { %v1719_v60 = vmax.f32 %v1695_v50, %v1717_v49  ;;  %v1718_v63 = vmax.f32 %v1694_v55, %v1716_v0 }
 0xd3c   : >> { %v1736_v46 = vpop.permute.xlu1 %1735  ;;  %v1734_v47 = vpop.permute.xlu0 %1733 }
 0xd40   : >> { %v1742_v56 = vpop.permute.xlu1 %1741  ;;  %v1740_v57 = vpop.permute.xlu0 %1739 }
 0xd41   : >> { %v1746_v58 = vsel %vm6294_vm2, %v1736_v46, %v1742_v56  ;;  %v1745_v61 = vsel %vm6296_vm8, %v1734_v47, %v1740_v57  ;;  %vm6299_vm2 = vcmp.eq.s32.totalorder %v4925_v51, 0  ;;  %vm6300_vm8 = vcmp.eq.s32.totalorder %v4923_v48, 0 }
 0xd42   : >> { %v1748_v62 = vsel %vm4125_vm7, %v1746_v58, 0.0  ;;  %v1747_v16 = vsel %vm4142_vm11, %v1745_v61, 0.0 }
 0xd43   : >> { %v1750_v5 = vmax.f32 %v1719_v60, %v1748_v62  ;;  %v1749_v6 = vmax.f32 %v1718_v63, %v1747_v16 }
 0xd44   : >> { %v1784_v7 = vpop.permute.xlu1 %1783  ;;  %v1782_v8 = vpop.permute.xlu0 %1781 }
 0xd45   : >> { %v1767_v22 = vmax.f32 %v1750_v5, %v5062_v53  ;;  %v1766_v23 = vmax.f32 %v1749_v6, %v1764_v4 }
 0xd48   : >> { %v1790_v9 = vpop.permute.xlu1 %1789  ;;  %v1788_v29 = vpop.permute.xlu0 %1787 }
 0xd49   : >> { %v1794_v34 = vsel %vm6291_vm0, %v1784_v7, %v1790_v9  ;;  %v1793_v10 = vsel %vm6298_vm1, %v1782_v8, %v1788_v29  ;;  %vm6302_vm0 = vcmp.eq.s32.totalorder %v4923_v48, 2  ;;  %vm6303_vm1 = vcmp.eq.s32.totalorder %v4925_v51, 5 }
 0xd4a   : >> { %v1796_v11 = vsel %vm4120_vm4, %v1794_v34, 0.0  ;;  %v1795_v12 = vsel %vm4133_vm9, %v1793_v10, 0.0 }
 0xd4b   : >> { %v5132_v52 = vmax.f32 %v1767_v22, %v1796_v11  ;;  %v5134_v13 = vmax.f32 %v1766_v23, %v1795_v12 }
 0xd4d   : >> { %v5138_v53 = vmul.f32 %v5132_v52, %v4103_v30  ;;  %v5142_v14 = vmul.f32 %v5134_v13, %v4093_v28 }
 0xd4f   : >> { %v1804_v26 = vsub.f32 %v5132_v52, %v5138_v53  ;;  %v1803_v19 = vsub.f32 %v5134_v13, %v5142_v14 }
 0xd51   : >> { %v1879_v15 = vsel %vm1673_vm10, %v1804_v26, 0.0  ;;  %v1878_v17 = vsel %vm1672_vm3, %v1803_v19, 0.0  ;;  %v1901_v18 = vsel %vm6223_vm6, %v1804_v26, 0.0  ;;  %v1900_v21 = vsel %vm6222_vm15, %v1803_v19, 0.0 }
 0xd52   : >> { %1884 = vrot.lane.b32.xlu1 %v1879_v15, %s3846_s12  ;;  %1882 = vrot.lane.b32.xlu0 %v1878_v17, %s3846_s12  ;;  %v1805_v32 = vsel %vm6299_vm2, %v1803_v19, 0.0  ;;  %v1806_v41 = vsel %vm6300_vm8, %v1804_v26, 0.0  ;;  %v1849_v59 = vsel %vm6301_vm14, %v1803_v19, 0.0  ;;  %v1850_v3 = vsel %vm6302_vm0, %v1804_v26, 0.0 }
 0xd53   : >> { %v1809_v42 = vrot.slane %v1805_v32, 1  ;;  %v1810_v43 = vrot.slane %v1806_v41, 1  ;;  %v1853_v44 = vrot.slane %v1849_v59, 1  ;;  %v1854_v20 = vrot.slane %v1850_v3, 1 }
 0xd54   : >> { %v1922_v45 = vsel %vm6303_vm1, %v1803_v19, 0.0  ;;  %vm6304_vm15 = vcmp.eq.s32.totalorder %v4923_v48, 5  ;;  %v1966_v47 = vsel %vm6224_vm5, %v1803_v19, 0.0  ;;  %vm6305_vm2 = vcmp.eq.s32.totalorder %v4923_v48, 7 }
 0xd55   : >> { %v1923_v46 = vsel %vm6304_vm15, %v1804_v26, 0.0  ;;  %v1967_v27 = vsel %vm6305_vm2, %v1804_v26, 0.0  ;;  %vm6306_vm8 = vcmask 1046528   ;;  %v1928_v56 = vrot.slane %v1922_v45, 7 }
 0xd56   : >> { %v1814_v54 = vsel %vm6306_vm8, %v1810_v43, %v1809_v42  ;;  %vm6307_vm14 = vmmov %vm6306_vm8  ;;  %1890 = vrot.lane.b32.xlu1 %v1879_v15, %s3845_s11  ;;  %1888 = vrot.lane.b32.xlu0 %v1878_v17, %s3845_s11  ;;  %v1925_v55 = vrot.slane %v1923_v46, 7  ;;  %v1969_v57 = vrot.slane %v1967_v27, 7  ;;  %v1972_v60 = vrot.slane %v1966_v47, 7 }
 0xd57   : >> { %v1811_v49 = vsel %vm6307_vm14, %v1809_v42, %v1810_v43  ;;  %vm6308_vm0 = vmmov %vm6306_vm8  ;;  %vm6310_vm15 = vcmp.eq.s32.totalorder %v4925_v51, 1  ;;  %vm6311_vm1 = vcmp.eq.s32.totalorder %v4923_v48, 1  ;;  %vm6312_vm2 = vcmp.eq.s32.totalorder %v4925_v51, 6 }
 0xd58   : >> { %v1858_v0 = vsel %vm6308_vm0, %v1854_v20, %v1853_v44  ;;  %vm6309_vm6 = vmmov %vm6308_vm0  ;;  %v1834_v63 = vsel %vm6310_vm15, %v1803_v19, 0.0  ;;  %v1835_v58 = vsel %vm6311_vm1, %v1804_v26, 0.0  ;;  %v1951_v61 = vsel %vm6312_vm2, %v1803_v19, 0.0 }
 0xd59   : >> { %v1855_v50 = vsel %vm6309_vm6, %v1853_v44, %v1854_v20  ;;  %vm6313_vm8 = vcmp.eq.s32.totalorder %v4923_v48, 6  ;;  %vm6314_vm6 = vcmask 1040384   ;;  %v1838_v7 = vrot.slane %v1834_v63, 1 }
 0xd5a   : >> { %v1952_v62 = vsel %vm6313_vm8, %v1804_v26, 0.0  ;;  %v1929_v16 = vsel %vm6314_vm6, %v1928_v56, %v1925_v55  ;;  %vm6315_vm14 = vmmov %vm6314_vm6  ;;  %v1839_v8 = vrot.slane %v1835_v58, 1  ;;  %v1957_v23 = vrot.slane %v1951_v61, 7  ;;  %1906 = vrot.lane.b32.xlu1 %v1901_v18, %s3847_s13  ;;  %1904 = vrot.lane.b32.xlu0 %v1900_v21, %s3847_s13 }
 0xd5b   : >> { %v1931_v4 = vsel %vm6315_vm14, %v1925_v55, %v1928_v56  ;;  %vm6316_vm0 = vmmov %vm6314_vm6  ;;  %v1954_v22 = vrot.slane %v1952_v62, 7  ;;  %vm6318_vm15 = vcmask 1046528  }
 0xd5c   : >> { %v1973_v5 = vsel %vm6316_vm0, %v1972_v60, %v1969_v57  ;;  %vm6317_vm5 = vmmov %vm6316_vm0  ;;  %v1844_v9 = vsel %vm6318_vm15, %v1839_v8, %v1838_v7 }
 0xd5d   : >> { %v1975_v6 = vsel %vm6317_vm5, %v1969_v57, %v1972_v60  ;;  %vm6319_vm1 = vmmov %vm6318_vm15  ;;  %vm6322_vm5 = vcmask 252928   ;;  %vm6326_vm15 = vcmp.le.s32.totalorder %v4002_v2, 14 }
 0xd5e   : >> { %v1840_v29 = vsel %vm6319_vm1, %v1838_v7, %v1839_v8  ;;  %vm6320_vm2 = vmmov %vm6316_vm0  ;;  %1912 = vrot.lane.b32.xlu1 %v1901_v18, %s3848_s14  ;;  %1910 = vrot.lane.b32.xlu0 %v1900_v21, %s3848_s14  ;;  %vm6327_vm1 = vcmask 7168  }
 0xd5f   : >> { %v5197_v34 = vsel %vm6320_vm2, %v1957_v23, %v1954_v22  ;;  %vm6321_vm8 = vmmov %vm6316_vm0 }
 0xd60   : >> { %v5200_v10 = vsel %vm6321_vm8, %v1954_v22, %v1957_v23  ;;  %vm6323_vm6 = vmmov %vm6322_vm5 }
 0xd61   : >> { %vm6324_vm14 = vmmov %vm6322_vm5 }
 0xd62   : >> { %1818 = vrot.lane.b32.xlu1 %v1814_v54, %s3846_s12  ;;  %1816 = vrot.lane.b32.xlu0 %v1811_v49, %s3846_s12  ;;  %vm6325_vm0 = vmmov %vm6322_vm5 }
 0xd63   : >> { %vm6328_vm2 = vmmov %vm6327_vm1 }
 0xd64   : >> { %vm6329_vm8 = vmmov %vm6327_vm1 }
 0xd66   : >> { %1824 = vrot.lane.b32.xlu1 %v1814_v54, %s3845_s11  ;;  %1822 = vrot.lane.b32.xlu0 %v1811_v49, %s3845_s11 }
 0xd6a   : >> { %1862 = vrot.lane.b32.xlu1 %v1858_v0, %s3847_s13  ;;  %1860 = vrot.lane.b32.xlu0 %v1855_v50, %s3847_s13 }
 0xd6e   : >> { %1868 = vrot.lane.b32.xlu1 %v1858_v0, %s3848_s14  ;;  %1866 = vrot.lane.b32.xlu0 %v1855_v50, %s3848_s14  ;;  %v1846_v0 = vsel %vm6326_vm15, %v1844_v9, 0.0  ;;  %vm6334_vm15 = vmmov %vm6327_vm1 }
 0xd72   : >> { %1935 = vrot.lane.b32.xlu1 %v1929_v16, %s3846_s12  ;;  %1933 = vrot.lane.b32.xlu0 %v1931_v4, %s3846_s12 }
 0xd76   : >> { %1941 = vrot.lane.b32.xlu1 %v1929_v16, %s3845_s11  ;;  %1939 = vrot.lane.b32.xlu0 %v1931_v4, %s3845_s11 }
 0xd7a   : >> { %1979 = vrot.lane.b32.xlu1 %v1973_v5, %s3847_s13  ;;  %1977 = vrot.lane.b32.xlu0 %v1975_v6, %s3847_s13 }
 0xd7e   : >> { %1985 = vrot.lane.b32.xlu1 %v1973_v5, %s3848_s14  ;;  %1983 = vrot.lane.b32.xlu0 %v1975_v6, %s3848_s14 }
 0xdc4   : >> { %v1885_v11 = vpop.permute.xlu1 %1884  ;;  %v1883_v12 = vpop.permute.xlu0 %1882 }
 0xdc8   : >> { %v1891_v26 = vpop.permute.xlu1 %1890  ;;  %v1889_v19 = vpop.permute.xlu0 %1888 }
 0xdc9   : >> { %v1895_v54 = vsel %vm6324_vm14, %v1885_v11, %v1891_v26  ;;  %v1894_v49 = vsel %vm6325_vm0, %v1883_v12, %v1889_v19  ;;  %vm6332_vm14 = vmmov %vm6325_vm0 }
 0xdca   : >> { %v1897_v62 = vsel %vm4125_vm7, %v1895_v54, 0.0  ;;  %v1896_v16 = vsel %vm4125_vm7, %v1894_v49, 0.0  ;;  %v1800_v54 = vmax.f32 %v3804_v24, %v5132_v52 }
 0xdcc   : >> { %v1907_v15 = vpop.permute.xlu1 %1906  ;;  %v1905_v17 = vpop.permute.xlu0 %1904 }
 0xdd0   : >> { %v1913_v18 = vpop.permute.xlu1 %1912  ;;  %v1911_v21 = vpop.permute.xlu0 %1910 }
 0xdd1   : >> { %v1917_v6 = vsel %vm6329_vm8, %v1907_v15, %v1913_v18  ;;  %vm6336_vm8 = vcmp.eq.s32.totalorder %v4925_v51, 4 }
 0xdd2   : >> { %v1919_v23 = vsel %vm4120_vm4, %v1917_v6, 0.0 }
 0xdd4   : >> { %v1819_v32 = vpop.permute.xlu1 %1818  ;;  %v1817_v41 = vpop.permute.xlu0 %1816 }
 0xdd8   : >> { %v1825_v59 = vpop.permute.xlu1 %1824  ;;  %v1823_v3 = vpop.permute.xlu0 %1822 }
 0xdd9   : >> { %v1829_v42 = vsel %vm6322_vm5, %v1819_v32, %v1825_v59  ;;  %v1828_v43 = vsel %vm6323_vm6, %v1817_v41, %v1823_v3  ;;  %vm6330_vm5 = vmmov %vm6327_vm1 }
 0xdda   : >> { %v1831_v44 = vsel %vm4162_vm13, %v1829_v42, 0.0  ;;  %v1830_v20 = vsel %vm4125_vm7, %v1828_v43, 0.0  ;;  %v1916_v7 = vsel %vm6330_vm5, %v1905_v17, %v1911_v21  ;;  %vm6331_vm6 = vmmov %vm6325_vm0  ;;  %vm6333_vm0 = vcmp.ge.s32.totalorder %v3999_v1, 1 }
 0xddb   : >> { %v1833_v47 = vmax.f32 %v5138_v53, %v1831_v44  ;;  %v1832_v27 = vmax.f32 %v5142_v14, %v1830_v20  ;;  %v1918_v9 = vsel %vm4120_vm4, %v1916_v7, 0.0  ;;  %v1962_v3 = vsel %vm6333_vm0, %v5200_v10, 0.0 }
 0xddc   : >> { %v1863_v45 = vpop.permute.xlu1 %1862  ;;  %v1861_v46 = vpop.permute.xlu0 %1860  ;;  %v1799_v10 = vmax.f32 %v3808_v25, %v5134_v13  ;;  %vm6337_vm5 = vcmp.eq.s32.totalorder %v4925_v51, 0  ;;  %vm6340_vm0 = vcmp.eq.s32.totalorder %v4923_v48, 2 }
 0xddd   : >> { %v1848_v56 = vmax.f32 %v1833_v47, %v1846_v0  ;;  %v1847_v60 = vmax.f32 %v1832_v27, %v1840_v29 }
 0xde0   : >> { %v1869_v50 = vpop.permute.xlu1 %1868  ;;  %v1867_v55 = vpop.permute.xlu0 %1866 }
 0xde1   : >> { %v1873_v57 = vsel %vm6327_vm1, %v1863_v45, %v1869_v50  ;;  %v1872_v63 = vsel %vm6328_vm2, %v1861_v46, %v1867_v55  ;;  %vm6335_vm2 = vcmp.eq.s32.totalorder %v4923_v48, 4 }
 0xde2   : >> { %v1875_v53 = vsel %vm4154_vm12, %v1873_v57, 0.0  ;;  %v1874_v14 = vsel %vm4120_vm4, %v1872_v63, 0.0 }
 0xde3   : >> { %v1877_v58 = vmax.f32 %v1848_v56, %v1875_v53  ;;  %v1876_v61 = vmax.f32 %v1847_v60, %v1874_v14 }
 0xde4   : >> { %v1936_v4 = vpop.permute.xlu1 %1935  ;;  %v1934_v5 = vpop.permute.xlu0 %1933 }
 0xde5   : >> { %v1899_v8 = vmax.f32 %v1877_v58, %v1897_v62  ;;  %v1898_v22 = vmax.f32 %v1876_v61, %v1896_v16 }
 0xde7   : >> { %v1921_v12 = vmax.f32 %v1899_v8, %v1919_v23  ;;  %v1920_v19 = vmax.f32 %v1898_v22, %v1918_v9 }
 0xde8   : >> { %v1942_v29 = vpop.permute.xlu1 %1941  ;;  %v1940_v11 = vpop.permute.xlu0 %1939 }
 0xde9   : >> { %v1946_v26 = vsel %vm6331_vm6, %v1936_v4, %v1942_v29  ;;  %v1945_v32 = vsel %vm6332_vm14, %v1934_v5, %v1940_v11  ;;  %vm6338_vm6 = vcmp.eq.s32.totalorder %v4923_v48, 0  ;;  %vm6339_vm14 = vcmp.eq.s32.totalorder %v4925_v51, 2 }
 0xdea   : >> { %v1948_v15 = vsel %vm4125_vm7, %v1946_v26, 0.0  ;;  %v1947_v17 = vsel %vm4142_vm11, %v1945_v32, 0.0 }
 0xdeb   : >> { %v1950_v18 = vmax.f32 %v1921_v12, %v1948_v15  ;;  %v1949_v21 = vmax.f32 %v1920_v19, %v1947_v17 }
 0xdec   : >> { %v1980_v41 = vpop.permute.xlu1 %1979  ;;  %v1978_v59 = vpop.permute.xlu0 %1977 }
 0xded   : >> { %v1965_v42 = vmax.f32 %v1950_v18, %v5197_v34  ;;  %v1964_v43 = vmax.f32 %v1949_v21, %v1962_v3 }
 0xdf0   : >> { %v1986_v44 = vpop.permute.xlu1 %1985  ;;  %v1984_v20 = vpop.permute.xlu0 %1983 }
 0xdf1   : >> { %v1990_v45 = vsel %vm6334_vm15, %v1980_v41, %v1986_v44  ;;  %v1989_v46 = vsel %vm6327_vm1, %v1978_v59, %v1984_v20  ;;  %vm6341_vm15 = vcmp.eq.s32.totalorder %v4925_v51, 5  ;;  %vm6342_vm1 = vcmp.eq.s32.totalorder %v4923_v48, 5 }
 0xdf2   : >> { %v1992_v47 = vsel %vm4120_vm4, %v1990_v45, 0.0  ;;  %v1991_v27 = vsel %vm4133_vm9, %v1989_v46, 0.0 }
 0xdf3   : >> { %v1994_v34 = vmax.f32 %v1965_v42, %v1992_v47  ;;  %v1993_v49 = vmax.f32 %v1964_v43, %v1991_v27 }
 0xdf5   : >> { %v5268_v0 = vmax.f32 %v1800_v54, %v1994_v34  ;;  %v5271_v50 = vmul.f32 %v1994_v34, %v4103_v30  ;;  %v5273_v55 = vmax.f32 %v1799_v10, %v1993_v49  ;;  %v5276_v56 = vmul.f32 %v1993_v49, %v4093_v28 }
 0xdf7   : >> { %v2000_v57 = vsub.f32 %v1994_v34, %v5271_v50  ;;  %v1999_v60 = vsub.f32 %v1993_v49, %v5276_v56 }
 0xdf9   : >> { %v2075_v24 = vsel %vm1673_vm10, %v2000_v57, 0.0  ;;  %v2074_v25 = vsel %vm1672_vm3, %v1999_v60, 0.0  ;;  %v2097_v52 = vsel %vm6335_vm2, %v2000_v57, 0.0  ;;  %v2096_v13 = vsel %vm6336_vm8, %v1999_v60, 0.0 }
 0xdfa   : >> { %2080 = vrot.lane.b32.xlu1 %v2075_v24, %s3846_s12  ;;  %2078 = vrot.lane.b32.xlu0 %v2074_v25, %s3846_s12  ;;  %v2001_v63 = vsel %vm6337_vm5, %v1999_v60, 0.0  ;;  %v2002_v53 = vsel %vm6338_vm6, %v2000_v57, 0.0  ;;  %v2045_v14 = vsel %vm6339_vm14, %v1999_v60, 0.0  ;;  %v2046_v58 = vsel %vm6340_vm0, %v2000_v57, 0.0 }
 0xdfb   : >> { %v2005_v61 = vrot.slane %v2001_v63, 1  ;;  %v2006_v62 = vrot.slane %v2002_v53, 1  ;;  %v2049_v16 = vrot.slane %v2045_v14, 1  ;;  %v2050_v4 = vrot.slane %v2046_v58, 1 }
 0xdfc   : >> { %v2118_v5 = vsel %vm6341_vm15, %v1999_v60, 0.0  ;;  %v2119_v6 = vsel %vm6342_vm1, %v2000_v57, 0.0  ;;  %vm6343_vm2 = vcmp.eq.s32.totalorder %v4925_v51, 7  ;;  %vm6344_vm8 = vcmp.eq.s32.totalorder %v4923_v48, 7 }
 0xdfd   : >> { %v2162_v7 = vsel %vm6343_vm2, %v1999_v60, 0.0  ;;  %v2163_v8 = vsel %vm6344_vm8, %v2000_v57, 0.0  ;;  %vm6345_vm5 = vcmask 1046528   ;;  %v2121_v11 = vrot.slane %v2119_v6, 7 }
 0xdfe   : >> { %v2010_v22 = vsel %vm6345_vm5, %v2006_v62, %v2005_v61  ;;  %vm6346_vm6 = vmmov %vm6345_vm5  ;;  %2086 = vrot.lane.b32.xlu1 %v2075_v24, %s3845_s11  ;;  %2084 = vrot.lane.b32.xlu0 %v2074_v25, %s3845_s11  ;;  %v2124_v12 = vrot.slane %v2118_v5, 7  ;;  %v2165_v26 = vrot.slane %v2163_v8, 7  ;;  %v2168_v19 = vrot.slane %v2162_v7, 7 }
 0xdff   : >> { %v2007_v23 = vsel %vm6346_vm6, %v2005_v61, %v2006_v62  ;;  %vm6347_vm14 = vmmov %vm6345_vm5  ;;  %vm6349_vm15 = vcmp.eq.s32.totalorder %v4925_v51, 1  ;;  %vm6350_vm1 = vcmp.eq.s32.totalorder %v4923_v48, 1  ;;  %vm6351_vm2 = vcmp.eq.s32.totalorder %v4925_v51, 6 }
 0xe00   : >> { %v2054_v9 = vsel %vm6347_vm14, %v2050_v4, %v2049_v16  ;;  %vm6348_vm0 = vmmov %vm6345_vm5  ;;  %v2030_v32 = vsel %vm6349_vm15, %v1999_v60, 0.0  ;;  %v2031_v15 = vsel %vm6350_vm1, %v2000_v57, 0.0  ;;  %v2147_v17 = vsel %vm6351_vm2, %v1999_v60, 0.0 }
 0xe01   : >> { %v2051_v29 = vsel %vm6348_vm0, %v2049_v16, %v2050_v4  ;;  %vm6352_vm8 = vcmp.eq.s32.totalorder %v4923_v48, 6  ;;  %vm6353_vm5 = vcmask 1040384   ;;  %v2034_v42 = vrot.slane %v2030_v32, 1 }
 0xe02   : >> { %v2148_v18 = vsel %vm6352_vm8, %v2000_v57, 0.0  ;;  %v2125_v21 = vsel %vm6353_vm5, %v2124_v12, %v2121_v11  ;;  %vm6354_vm6 = vmmov %vm6353_vm5  ;;  %v2035_v43 = vrot.slane %v2031_v15, 1  ;;  %v2153_v20 = vrot.slane %v2147_v17, 7  ;;  %2102 = vrot.lane.b32.xlu1 %v2097_v52, %s3847_s13  ;;  %2100 = vrot.lane.b32.xlu0 %v2096_v13, %s3847_s13 }
 0xe03   : >> { %v2127_v41 = vsel %vm6354_vm6, %v2121_v11, %v2124_v12  ;;  %vm6355_vm14 = vmmov %vm6353_vm5  ;;  %v2150_v44 = vrot.slane %v2148_v18, 7  ;;  %vm6357_vm15 = vcmask 1046528  }
 0xe04   : >> { %v2169_v59 = vsel %vm6355_vm14, %v2168_v19, %v2165_v26  ;;  %vm6356_vm0 = vmmov %vm6353_vm5  ;;  %v2040_v45 = vsel %vm6357_vm15, %v2035_v43, %v2034_v42  ;;  %vm6361_vm5 = vcmask 252928  }
 0xe05   : >> { %v2171_v3 = vsel %vm6356_vm0, %v2165_v26, %v2168_v19  ;;  %vm6358_vm1 = vmmov %vm6357_vm15  ;;  %vm6365_vm15 = vcmp.le.s32.totalorder %v4002_v2, 14 }
 0xe06   : >> { %v2036_v46 = vsel %vm6358_vm1, %v2034_v42, %v2035_v43  ;;  %vm6359_vm2 = vmmov %vm6356_vm0  ;;  %2108 = vrot.lane.b32.xlu1 %v2097_v52, %s3848_s14  ;;  %2106 = vrot.lane.b32.xlu0 %v2096_v13, %s3848_s14  ;;  %vm6366_vm1 = vcmask 7168  }
 0xe07   : >> { %v5329_v47 = vsel %vm6359_vm2, %v2153_v20, %v2150_v44  ;;  %vm6360_vm8 = vmmov %vm6356_vm0 }
 0xe08   : >> { %v5332_v27 = vsel %vm6360_vm8, %v2150_v44, %v2153_v20  ;;  %vm6362_vm6 = vmmov %vm6361_vm5 }
 0xe09   : >> { %vm6363_vm14 = vmmov %vm6361_vm5 }
 0xe0a   : >> { %2014 = vrot.lane.b32.xlu1 %v2010_v22, %s3846_s12  ;;  %2012 = vrot.lane.b32.xlu0 %v2007_v23, %s3846_s12  ;;  %vm6364_vm0 = vmmov %vm6361_vm5 }
 0xe0b   : >> { %vm6367_vm2 = vmmov %vm6366_vm1 }
 0xe0c   : >> { %vm6368_vm8 = vmmov %vm6366_vm1 }
 0xe0e   : >> { %2020 = vrot.lane.b32.xlu1 %v2010_v22, %s3845_s11  ;;  %2018 = vrot.lane.b32.xlu0 %v2007_v23, %s3845_s11  ;;  %v2042_v22 = vsel %vm6365_vm15, %v2040_v45, 0.0  ;;  %vm6373_vm15 = vmmov %vm6366_vm1 }
 0xe12   : >> { %2058 = vrot.lane.b32.xlu1 %v2054_v9, %s3847_s13  ;;  %2056 = vrot.lane.b32.xlu0 %v2051_v29, %s3847_s13 }
 0xe16   : >> { %2064 = vrot.lane.b32.xlu1 %v2054_v9, %s3848_s14  ;;  %2062 = vrot.lane.b32.xlu0 %v2051_v29, %s3848_s14 }
 0xe1a   : >> { %2131 = vrot.lane.b32.xlu1 %v2125_v21, %s3846_s12  ;;  %2129 = vrot.lane.b32.xlu0 %v2127_v41, %s3846_s12 }
 0xe1e   : >> { %2137 = vrot.lane.b32.xlu1 %v2125_v21, %s3845_s11  ;;  %2135 = vrot.lane.b32.xlu0 %v2127_v41, %s3845_s11 }
 0xe22   : >> { %2175 = vrot.lane.b32.xlu1 %v2169_v59, %s3847_s13  ;;  %2173 = vrot.lane.b32.xlu0 %v2171_v3, %s3847_s13 }
 0xe26   : >> { %2181 = vrot.lane.b32.xlu1 %v2169_v59, %s3848_s14  ;;  %2179 = vrot.lane.b32.xlu0 %v2171_v3, %s3848_s14 }
 0xe6c   : >> { %v2081_v54 = vpop.permute.xlu1 %2080  ;;  %v2079_v10 = vpop.permute.xlu0 %2078 }
 0xe70   : >> { %v2087_v34 = vpop.permute.xlu1 %2086  ;;  %v2085_v49 = vpop.permute.xlu0 %2084 }
 0xe71   : >> { %v2091_v7 = vsel %vm6363_vm14, %v2081_v54, %v2087_v34  ;;  %v2090_v8 = vsel %vm6364_vm0, %v2079_v10, %v2085_v49  ;;  %vm6371_vm14 = vmmov %vm6364_vm0 }
 0xe72   : >> { %v2093_v15 = vsel %vm4125_vm7, %v2091_v7, 0.0  ;;  %v2092_v17 = vsel %vm4125_vm7, %v2090_v8, 0.0 }
 0xe74   : >> { %v2103_v57 = vpop.permute.xlu1 %2102  ;;  %v2101_v60 = vpop.permute.xlu0 %2100 }
 0xe78   : >> { %v2109_v24 = vpop.permute.xlu1 %2108  ;;  %v2107_v25 = vpop.permute.xlu0 %2106 }
 0xe79   : >> { %v2113_v41 = vsel %vm6368_vm8, %v2103_v57, %v2109_v24  ;;  %vm6375_vm8 = vcmp.eq.s32.totalorder %v4925_v51, 4 }
 0xe7a   : >> { %v2115_v43 = vsel %vm4120_vm4, %v2113_v41, 0.0 }
 0xe7c   : >> { %v2015_v52 = vpop.permute.xlu1 %2014  ;;  %v2013_v13 = vpop.permute.xlu0 %2012 }
 0xe80   : >> { %v2021_v63 = vpop.permute.xlu1 %2020  ;;  %v2019_v53 = vpop.permute.xlu0 %2018 }
 0xe81   : >> { %v2025_v14 = vsel %vm6361_vm5, %v2015_v52, %v2021_v63  ;;  %v2024_v58 = vsel %vm6362_vm6, %v2013_v13, %v2019_v53  ;;  %vm6369_vm5 = vmmov %vm6366_vm1 }
 0xe82   : >> { %v2027_v61 = vsel %vm4162_vm13, %v2025_v14, 0.0  ;;  %v2026_v62 = vsel %vm4125_vm7, %v2024_v58, 0.0  ;;  %v2112_v59 = vsel %vm6369_vm5, %v2101_v60, %v2107_v25  ;;  %vm6370_vm6 = vmmov %vm6364_vm0  ;;  %vm6372_vm0 = vcmp.ge.s32.totalorder %v3999_v1, 1 }
 0xe83   : >> { %v2029_v5 = vmax.f32 %v5271_v50, %v2027_v61  ;;  %v2028_v6 = vmax.f32 %v5276_v56, %v2026_v62  ;;  %v2114_v44 = vsel %vm4120_vm4, %v2112_v59, 0.0  ;;  %v2158_v13 = vsel %vm6372_vm0, %v5332_v27, 0.0 }
 0xe84   : >> { %v2059_v16 = vpop.permute.xlu1 %2058  ;;  %v2057_v4 = vpop.permute.xlu0 %2056  ;;  %vm6376_vm5 = vcmp.eq.s32.totalorder %v4925_v51, 0  ;;  %vm6379_vm0 = vcmp.eq.s32.totalorder %v4923_v48, 2 }
 0xe85   : >> { %v2044_v29 = vmax.f32 %v2029_v5, %v2042_v22  ;;  %v2043_v12 = vmax.f32 %v2028_v6, %v2036_v46 }
 0xe88   : >> { %v2065_v23 = vpop.permute.xlu1 %2064  ;;  %v2063_v9 = vpop.permute.xlu0 %2062 }
 0xe89   : >> { %v2069_v11 = vsel %vm6366_vm1, %v2059_v16, %v2065_v23  ;;  %v2068_v26 = vsel %vm6367_vm2, %v2057_v4, %v2063_v9  ;;  %vm6374_vm2 = vcmp.eq.s32.totalorder %v4923_v48, 4 }
 0xe8a   : >> { %v2071_v50 = vsel %vm4154_vm12, %v2069_v11, 0.0  ;;  %v2070_v56 = vsel %vm4120_vm4, %v2068_v26, 0.0 }
 0xe8b   : >> { %v2073_v19 = vmax.f32 %v2044_v29, %v2071_v50  ;;  %v2072_v32 = vmax.f32 %v2043_v12, %v2070_v56 }
 0xe8c   : >> { %v2132_v18 = vpop.permute.xlu1 %2131  ;;  %v2130_v21 = vpop.permute.xlu0 %2129 }
 0xe8d   : >> { %v2095_v3 = vmax.f32 %v2073_v19, %v2093_v15  ;;  %v2094_v42 = vmax.f32 %v2072_v32, %v2092_v17 }
 0xe8f   : >> { %v2117_v46 = vmax.f32 %v2095_v3, %v2115_v43  ;;  %v2116_v10 = vmax.f32 %v2094_v42, %v2114_v44 }
 0xe90   : >> { %v2138_v20 = vpop.permute.xlu1 %2137  ;;  %v2136_v45 = vpop.permute.xlu0 %2135 }
 0xe91   : >> { %v2142_v54 = vsel %vm6370_vm6, %v2132_v18, %v2138_v20  ;;  %v2141_v34 = vsel %vm6371_vm14, %v2130_v21, %v2136_v45  ;;  %vm6377_vm6 = vcmp.eq.s32.totalorder %v4923_v48, 0  ;;  %vm6378_vm14 = vcmp.eq.s32.totalorder %v4925_v51, 2 }
 0xe92   : >> { %v2144_v49 = vsel %vm4125_vm7, %v2142_v54, 0.0  ;;  %v2143_v57 = vsel %vm4142_vm11, %v2141_v34, 0.0 }
 0xe93   : >> { %v2146_v60 = vmax.f32 %v2117_v46, %v2144_v49  ;;  %v2145_v24 = vmax.f32 %v2116_v10, %v2143_v57 }
 0xe94   : >> { %v2176_v25 = vpop.permute.xlu1 %2175  ;;  %v2174_v52 = vpop.permute.xlu0 %2173 }
 0xe95   : >> { %v2161_v63 = vmax.f32 %v2146_v60, %v5329_v47  ;;  %v2160_v53 = vmax.f32 %v2145_v24, %v2158_v13 }
 0xe98   : >> { %v2182_v14 = vpop.permute.xlu1 %2181  ;;  %v2180_v58 = vpop.permute.xlu0 %2179 }
 0xe99   : >> { %v2186_v61 = vsel %vm6373_vm15, %v2176_v25, %v2182_v14  ;;  %v2185_v62 = vsel %vm6366_vm1, %v2174_v52, %v2180_v58  ;;  %vm6380_vm15 = vcmp.eq.s32.totalorder %v4925_v51, 5  ;;  %vm6381_vm1 = vcmp.eq.s32.totalorder %v4923_v48, 5 }
 0xe9a   : >> { %v2188_v16 = vsel %vm4120_vm4, %v2186_v61, 0.0  ;;  %v2187_v4 = vsel %vm4133_vm9, %v2185_v62, 0.0 }
 0xe9b   : >> { %v5396_v5 = vmax.f32 %v2161_v63, %v2188_v16  ;;  %v5398_v6 = vmax.f32 %v2160_v53, %v2187_v4 }
 0xe9d   : >> { %v2192_v47 = vmax.f32 %v5268_v0, %v5396_v5  ;;  %v5404_v27 = vmul.f32 %v5396_v5, %v4103_v30  ;;  %v2191_v7 = vmax.f32 %v5273_v55, %v5398_v6  ;;  %v5410_v8 = vmul.f32 %v5398_v6, %v4093_v28 }
 0xe9f   : >> { %v2196_v22 = vsub.f32 %v5396_v5, %v5404_v27  ;;  %v2195_v23 = vsub.f32 %v5398_v6, %v5410_v8 }
 0xea1   : >> { %v2271_v9 = vsel %vm1673_vm10, %v2196_v22, 0.0  ;;  %v2270_v29 = vsel %vm1672_vm3, %v2195_v23, 0.0  ;;  %v2293_v11 = vsel %vm6374_vm2, %v2196_v22, 0.0  ;;  %v2292_v12 = vsel %vm6375_vm8, %v2195_v23, 0.0 }
 0xea2   : >> { %2276 = vrot.lane.b32.xlu1 %v2271_v9, %s3846_s12  ;;  %2274 = vrot.lane.b32.xlu0 %v2270_v29, %s3846_s12  ;;  %v2197_v26 = vsel %vm6376_vm5, %v2195_v23, 0.0  ;;  %v2198_v50 = vsel %vm6377_vm6, %v2196_v22, 0.0  ;;  %v2241_v56 = vsel %vm6378_vm14, %v2195_v23, 0.0  ;;  %v2242_v19 = vsel %vm6379_vm0, %v2196_v22, 0.0 }
 0xea3   : >> { %v2201_v32 = vrot.slane %v2197_v26, 1  ;;  %v2202_v15 = vrot.slane %v2198_v50, 1  ;;  %v2245_v17 = vrot.slane %v2241_v56, 1  ;;  %v2246_v18 = vrot.slane %v2242_v19, 1 }
 0xea4   : >> { %v2314_v21 = vsel %vm6380_vm15, %v2195_v23, 0.0  ;;  %v2315_v41 = vsel %vm6381_vm1, %v2196_v22, 0.0  ;;  %vm6382_vm2 = vcmp.eq.s32.totalorder %v4925_v51, 7  ;;  %vm6383_vm8 = vcmp.eq.s32.totalorder %v4923_v48, 7 }
 0xea5   : >> { %v2358_v59 = vsel %vm6382_vm2, %v2195_v23, 0.0  ;;  %v2359_v3 = vsel %vm6383_vm8, %v2196_v22, 0.0  ;;  %vm6384_vm5 = vcmask 1046528   ;;  %v2317_v45 = vrot.slane %v2315_v41, 7 }
 0xea6   : >> { %v2206_v42 = vsel %vm6384_vm5, %v2202_v15, %v2201_v32  ;;  %vm6385_vm6 = vmmov %vm6384_vm5  ;;  %2282 = vrot.lane.b32.xlu1 %v2271_v9, %s3845_s11  ;;  %2280 = vrot.lane.b32.xlu0 %v2270_v29, %s3845_s11  ;;  %v2320_v46 = vrot.slane %v2314_v21, 7  ;;  %v2361_v54 = vrot.slane %v2359_v3, 7  ;;  %v2364_v10 = vrot.slane %v2358_v59, 7 }
 0xea7   : >> { %v2203_v43 = vsel %vm6385_vm6, %v2201_v32, %v2202_v15  ;;  %vm6386_vm14 = vmmov %vm6384_vm5  ;;  %vm6388_vm15 = vcmp.eq.s32.totalorder %v4925_v51, 1  ;;  %vm6389_vm1 = vcmp.eq.s32.totalorder %v4923_v48, 1  ;;  %vm6390_vm2 = vcmp.eq.s32.totalorder %v4925_v51, 6 }
 0xea8   : >> { %v2250_v44 = vsel %vm6386_vm14, %v2246_v18, %v2245_v17  ;;  %vm6387_vm0 = vmmov %vm6384_vm5  ;;  %v2226_v34 = vsel %vm6388_vm15, %v2195_v23, 0.0  ;;  %v2227_v49 = vsel %vm6389_vm1, %v2196_v22, 0.0  ;;  %v2343_v57 = vsel %vm6390_vm2, %v2195_v23, 0.0 }
 0xea9   : >> { %v2247_v20 = vsel %vm6387_vm0, %v2245_v17, %v2246_v18  ;;  %vm6391_vm8 = vcmp.eq.s32.totalorder %v4923_v48, 6  ;;  %vm6392_vm5 = vcmask 1040384   ;;  %v2230_v63 = vrot.slane %v2226_v34, 1 }
 0xeaa   : >> { %v2344_v60 = vsel %vm6391_vm8, %v2196_v22, 0.0  ;;  %v2321_v24 = vsel %vm6392_vm5, %v2320_v46, %v2317_v45  ;;  %vm6393_vm6 = vmmov %vm6392_vm5  ;;  %v2231_v53 = vrot.slane %v2227_v49, 1  ;;  %v2349_v58 = vrot.slane %v2343_v57, 7  ;;  %2298 = vrot.lane.b32.xlu1 %v2293_v11, %s3847_s13  ;;  %2296 = vrot.lane.b32.xlu0 %v2292_v12, %s3847_s13 }
 0xeab   : >> { %v2323_v25 = vsel %vm6393_vm6, %v2317_v45, %v2320_v46  ;;  %vm6394_vm14 = vmmov %vm6392_vm5  ;;  %v2346_v14 = vrot.slane %v2344_v60, 7  ;;  %vm6396_vm15 = vcmask 1046528  }
 0xeac   : >> { %v2365_v52 = vsel %vm6394_vm14, %v2364_v10, %v2361_v54  ;;  %vm6395_vm0 = vmmov %vm6392_vm5  ;;  %v2236_v61 = vsel %vm6396_vm15, %v2231_v53, %v2230_v63  ;;  %vm6400_vm5 = vcmask 252928  }
 0xead   : >> { %v2367_v13 = vsel %vm6395_vm0, %v2361_v54, %v2364_v10  ;;  %vm6397_vm1 = vmmov %vm6396_vm15  ;;  %vm6404_vm15 = vcmp.le.s32.totalorder %v4002_v2, 14 }
 0xeae   : >> { %v2232_v62 = vsel %vm6397_vm1, %v2230_v63, %v2231_v53  ;;  %vm6398_vm2 = vmmov %vm6395_vm0  ;;  %2304 = vrot.lane.b32.xlu1 %v2293_v11, %s3848_s14  ;;  %2302 = vrot.lane.b32.xlu0 %v2292_v12, %s3848_s14  ;;  %v2238_v45 = vsel %vm6404_vm15, %v2236_v61, 0.0  ;;  %vm6405_vm1 = vcmask 7168  }
 0xeaf   : >> { %v5465_v16 = vsel %vm6398_vm2, %v2349_v58, %v2346_v14  ;;  %vm6399_vm8 = vmmov %vm6395_vm0 }
 0xeb0   : >> { %v5468_v4 = vsel %vm6399_vm8, %v2346_v14, %v2349_v58  ;;  %vm6401_vm6 = vmmov %vm6400_vm5 }
 0xeb1   : >> { %vm6402_vm14 = vmmov %vm6400_vm5 }
 0xeb2   : >> { %2210 = vrot.lane.b32.xlu1 %v2206_v42, %s3846_s12  ;;  %2208 = vrot.lane.b32.xlu0 %v2203_v43, %s3846_s12  ;;  %vm6403_vm0 = vmmov %vm6400_vm5 }
 0xeb3   : >> { %vm6406_vm2 = vmmov %vm6405_vm1 }
 0xeb4   : >> { %vm6407_vm8 = vmmov %vm6405_vm1 }
 0xeb5   : >> { %vm6412_vm15 = vmmov %vm6405_vm1 }
 0xeb6   : >> { %2216 = vrot.lane.b32.xlu1 %v2206_v42, %s3845_s11  ;;  %2214 = vrot.lane.b32.xlu0 %v2203_v43, %s3845_s11 }
 0xeba   : >> { %2254 = vrot.lane.b32.xlu1 %v2250_v44, %s3847_s13  ;;  %2252 = vrot.lane.b32.xlu0 %v2247_v20, %s3847_s13 }
 0xebe   : >> { %2260 = vrot.lane.b32.xlu1 %v2250_v44, %s3848_s14  ;;  %2258 = vrot.lane.b32.xlu0 %v2247_v20, %s3848_s14 }
 0xec2   : >> { %2327 = vrot.lane.b32.xlu1 %v2321_v24, %s3846_s12  ;;  %2325 = vrot.lane.b32.xlu0 %v2323_v25, %s3846_s12 }
 0xec6   : >> { %2333 = vrot.lane.b32.xlu1 %v2321_v24, %s3845_s11  ;;  %2331 = vrot.lane.b32.xlu0 %v2323_v25, %s3845_s11 }
 0xeca   : >> { %2371 = vrot.lane.b32.xlu1 %v2365_v52, %s3847_s13  ;;  %2369 = vrot.lane.b32.xlu0 %v2367_v13, %s3847_s13 }
 0xece   : >> { %2377 = vrot.lane.b32.xlu1 %v2365_v52, %s3848_s14  ;;  %2375 = vrot.lane.b32.xlu0 %v2367_v13, %s3848_s14 }
 0xf14   : >> { %v2277_v22 = vpop.permute.xlu1 %2276  ;;  %v2275_v23 = vpop.permute.xlu0 %2274 }
 0xf18   : >> { %v2283_v9 = vpop.permute.xlu1 %2282  ;;  %v2281_v29 = vpop.permute.xlu0 %2280 }
 0xf19   : >> { %v2287_v44 = vsel %vm6402_vm14, %v2277_v22, %v2283_v9  ;;  %v2286_v20 = vsel %vm6403_vm0, %v2275_v23, %v2281_v29  ;;  %vm6410_vm14 = vmmov %vm6403_vm0 }
 0xf1a   : >> { %v2289_v25 = vsel %vm4125_vm7, %v2287_v44, 0.0  ;;  %v2288_v52 = vsel %vm4125_vm7, %v2286_v20, 0.0 }
 0xf1c   : >> { %v2299_v11 = vpop.permute.xlu1 %2298  ;;  %v2297_v12 = vpop.permute.xlu0 %2296 }
 0xf20   : >> { %v2305_v26 = vpop.permute.xlu1 %2304  ;;  %v2303_v50 = vpop.permute.xlu0 %2302 }
 0xf21   : >> { %v2309_v53 = vsel %vm6407_vm8, %v2299_v11, %v2305_v26  ;;  %vm6414_vm8 = vcmp.eq.s32.totalorder %v4925_v51, 4 }
 0xf24   : >> { %v2211_v56 = vpop.permute.xlu1 %2210  ;;  %v2209_v19 = vpop.permute.xlu0 %2208 }
 0xf28   : >> { %v2217_v32 = vpop.permute.xlu1 %2216  ;;  %v2215_v15 = vpop.permute.xlu0 %2214 }
 0xf29   : >> { %v2221_v17 = vsel %vm6400_vm5, %v2211_v56, %v2217_v32  ;;  %v2220_v18 = vsel %vm6401_vm6, %v2209_v19, %v2215_v15  ;;  %vm6408_vm5 = vmmov %vm6405_vm1 }
 0xf2a   : >> { %v2223_v21 = vsel %vm4162_vm13, %v2221_v17, 0.0  ;;  %v2222_v41 = vsel %vm4125_vm7, %v2220_v18, 0.0  ;;  %v2308_v14 = vsel %vm6408_vm5, %v2297_v12, %v2303_v50  ;;  %vm6409_vm6 = vmmov %vm6403_vm0  ;;  %vm6411_vm0 = vcmp.ge.s32.totalorder %v3999_v1, 1 }
 0xf2b   : >> { %v2225_v42 = vmax.f32 %v5404_v27, %v2223_v21  ;;  %v2224_v43 = vmax.f32 %v5410_v8, %v2222_v41  ;;  %v2310_v22 = vsel %vm4120_vm4, %v2308_v14, 0.0  ;;  %v2354_v18 = vsel %vm6411_vm0, %v5468_v4, 0.0 }
 0xf2c   : >> { %v2255_v59 = vpop.permute.xlu1 %2254  ;;  %v2253_v3 = vpop.permute.xlu0 %2252  ;;  %vm6415_vm5 = vcmp.eq.s32.totalorder %v4925_v51, 0  ;;  %vm6418_vm0 = vcmp.eq.s32.totalorder %v4923_v48, 2 }
 0xf2d   : >> { %v2240_v10 = vmax.f32 %v2225_v42, %v2238_v45  ;;  %v2239_v49 = vmax.f32 %v2224_v43, %v2232_v62  ;;  %v2311_v62 = vsel %vm4120_vm4, %v2309_v53, 0.0 }
 0xf30   : >> { %v2261_v46 = vpop.permute.xlu1 %2260  ;;  %v2259_v54 = vpop.permute.xlu0 %2258 }
 0xf31   : >> { %v2265_v34 = vsel %vm6405_vm1, %v2255_v59, %v2261_v46  ;;  %v2264_v57 = vsel %vm6406_vm2, %v2253_v3, %v2259_v54  ;;  %vm6413_vm2 = vcmp.eq.s32.totalorder %v4923_v48, 4 }
 0xf32   : >> { %v2267_v27 = vsel %vm4154_vm12, %v2265_v34, 0.0  ;;  %v2266_v8 = vsel %vm4120_vm4, %v2264_v57, 0.0 }
 0xf33   : >> { %v2269_v60 = vmax.f32 %v2240_v10, %v2267_v27  ;;  %v2268_v24 = vmax.f32 %v2239_v49, %v2266_v8 }
 0xf34   : >> { %v2328_v13 = vpop.permute.xlu1 %2327  ;;  %v2326_v63 = vpop.permute.xlu0 %2325 }
 0xf35   : >> { %v2291_v58 = vmax.f32 %v2269_v60, %v2289_v25  ;;  %v2290_v61 = vmax.f32 %v2268_v24, %v2288_v52 }
 0xf37   : >> { %v2313_v29 = vmax.f32 %v2291_v58, %v2311_v62  ;;  %v2312_v19 = vmax.f32 %v2290_v61, %v2310_v22 }
 0xf38   : >> { %v2334_v23 = vpop.permute.xlu1 %2333  ;;  %v2332_v9 = vpop.permute.xlu0 %2331 }
 0xf39   : >> { %v2338_v56 = vsel %vm6409_vm6, %v2328_v13, %v2334_v23  ;;  %v2337_v32 = vsel %vm6410_vm14, %v2326_v63, %v2332_v9  ;;  %vm6416_vm6 = vcmp.eq.s32.totalorder %v4923_v48, 0  ;;  %vm6417_vm14 = vcmp.eq.s32.totalorder %v4925_v51, 2 }
 0xf3a   : >> { %v2340_v11 = vsel %vm4125_vm7, %v2338_v56, 0.0  ;;  %v2339_v12 = vsel %vm4142_vm11, %v2337_v32, 0.0 }
 0xf3b   : >> { %v2342_v26 = vmax.f32 %v2313_v29, %v2340_v11  ;;  %v2341_v50 = vmax.f32 %v2312_v19, %v2339_v12 }
 0xf3c   : >> { %v2372_v15 = vpop.permute.xlu1 %2371  ;;  %v2370_v17 = vpop.permute.xlu0 %2369 }
 0xf3d   : >> { %v2357_v21 = vmax.f32 %v2342_v26, %v5465_v16  ;;  %v2356_v41 = vmax.f32 %v2341_v50, %v2354_v18 }
 0xf40   : >> { %v2378_v59 = vpop.permute.xlu1 %2377  ;;  %v2376_v3 = vpop.permute.xlu0 %2375 }
 0xf41   : >> { %v2382_v42 = vsel %vm6412_vm15, %v2372_v15, %v2378_v59  ;;  %v2381_v43 = vsel %vm6405_vm1, %v2370_v17, %v2376_v3  ;;  %vm6419_vm15 = vcmp.eq.s32.totalorder %v4925_v51, 5  ;;  %vm6420_vm1 = vcmp.eq.s32.totalorder %v4923_v48, 5 }
 0xf42   : >> { %v2384_v44 = vsel %vm4120_vm4, %v2382_v42, 0.0  ;;  %v2383_v20 = vsel %vm4133_vm9, %v2381_v43, 0.0 }
 0xf43   : >> { %v2386_v45 = vmax.f32 %v2357_v21, %v2384_v44  ;;  %v2385_v46 = vmax.f32 %v2356_v41, %v2383_v20 }
 0xf45   : >> { %v5535_v4 = vmax.f32 %v2192_v47, %v2386_v45  ;;  %v5538_v16 = vmul.f32 %v2386_v45, %v4103_v30  ;;  %v5543_v54 = vmax.f32 %v2191_v7, %v2385_v46  ;;  %v5546_v10 = vmul.f32 %v2385_v46, %v4093_v28 }
 0xf47   : >> { %v2392_v34 = vsub.f32 %v2386_v45, %v5538_v16  ;;  %v2391_v49 = vsub.f32 %v2385_v46, %v5546_v10 }
 0xf49   : >> { %v2467_v0 = vsel %vm1673_vm10, %v2392_v34, 0.0  ;;  %v2466_v5 = vsel %vm1672_vm3, %v2391_v49, 0.0  ;;  %v2489_v47 = vsel %vm6413_vm2, %v2392_v34, 0.0  ;;  %v2488_v55 = vsel %vm6414_vm8, %v2391_v49, 0.0 }
 0xf4a   : >> { %2472 = vrot.lane.b32.xlu1 %v2467_v0, %s3846_s12  ;;  %2470 = vrot.lane.b32.xlu0 %v2466_v5, %s3846_s12  ;;  %v2393_v6 = vsel %vm6415_vm5, %v2391_v49, 0.0  ;;  %v2394_v7 = vsel %vm6416_vm6, %v2392_v34, 0.0  ;;  %v2437_v57 = vsel %vm6417_vm14, %v2391_v49, 0.0  ;;  %v2438_v27 = vsel %vm6418_vm0, %v2392_v34, 0.0 }
 0xf4b   : >> { %v2397_v8 = vrot.slane %v2393_v6, 1  ;;  %v2398_v60 = vrot.slane %v2394_v7, 1  ;;  %v2441_v24 = vrot.slane %v2437_v57, 1  ;;  %v2442_v25 = vrot.slane %v2438_v27, 1 }
 0xf4c   : >> { %v2510_v52 = vsel %vm6419_vm15, %v2391_v49, 0.0  ;;  %v2511_v13 = vsel %vm6420_vm1, %v2392_v34, 0.0  ;;  %vm6421_vm2 = vcmp.eq.s32.totalorder %v4925_v51, 7  ;;  %vm6422_vm8 = vcmp.eq.s32.totalorder %v4923_v48, 7 }
 0xf4d   : >> { %v2554_v63 = vsel %vm6421_vm2, %v2391_v49, 0.0  ;;  %v2555_v53 = vsel %vm6422_vm8, %v2392_v34, 0.0  ;;  %vm6423_vm5 = vcmask 1046528   ;;  %v2513_v22 = vrot.slane %v2511_v13, 7 }
 0xf4e   : >> { %v2402_v14 = vsel %vm6423_vm5, %v2398_v60, %v2397_v8  ;;  %vm6424_vm6 = vmmov %vm6423_vm5  ;;  %2478 = vrot.lane.b32.xlu1 %v2467_v0, %s3845_s11  ;;  %2476 = vrot.lane.b32.xlu0 %v2466_v5, %s3845_s11  ;;  %v2516_v23 = vrot.slane %v2510_v52, 7  ;;  %v2557_v9 = vrot.slane %v2555_v53, 7  ;;  %v2560_v29 = vrot.slane %v2554_v63, 7 }
 0xf4f   : >> { %v2399_v58 = vsel %vm6424_vm6, %v2397_v8, %v2398_v60  ;;  %vm6425_vm14 = vmmov %vm6423_vm5  ;;  %vm6427_vm15 = vcmp.eq.s32.totalorder %v4925_v51, 1  ;;  %vm6428_vm1 = vcmp.eq.s32.totalorder %v4923_v48, 1  ;;  %vm6429_vm2 = vcmp.eq.s32.totalorder %v4925_v51, 6 }
 0xf50   : >> { %v2446_v61 = vsel %vm6425_vm14, %v2442_v25, %v2441_v24  ;;  %vm6426_vm0 = vmmov %vm6423_vm5  ;;  %v2422_v56 = vsel %vm6427_vm15, %v2391_v49, 0.0  ;;  %v2423_v19 = vsel %vm6428_vm1, %v2392_v34, 0.0  ;;  %v2539_v32 = vsel %vm6429_vm2, %v2391_v49, 0.0 }
 0xf51   : >> { %v2443_v62 = vsel %vm6426_vm0, %v2441_v24, %v2442_v25  ;;  %vm6430_vm8 = vcmp.eq.s32.totalorder %v4923_v48, 6  ;;  %vm6431_vm5 = vcmask 1040384   ;;  %v2426_v17 = vrot.slane %v2422_v56, 1 }
 0xf52   : >> { %v2540_v11 = vsel %vm6430_vm8, %v2392_v34, 0.0  ;;  %v2517_v12 = vsel %vm6431_vm5, %v2516_v23, %v2513_v22  ;;  %vm6432_vm6 = vmmov %vm6431_vm5  ;;  %v2427_v18 = vrot.slane %v2423_v19, 1  ;;  %v2545_v41 = vrot.slane %v2539_v32, 7  ;;  %2494 = vrot.lane.b32.xlu1 %v2489_v47, %s3847_s13  ;;  %2492 = vrot.lane.b32.xlu0 %v2488_v55, %s3847_s13 }
 0xf53   : >> { %v2519_v26 = vsel %vm6432_vm6, %v2513_v22, %v2516_v23  ;;  %vm6433_vm14 = vmmov %vm6431_vm5  ;;  %v2542_v21 = vrot.slane %v2540_v11, 7  ;;  %vm6435_vm15 = vcmask 1046528  }
 0xf54   : >> { %v2561_v50 = vsel %vm6433_vm14, %v2560_v29, %v2557_v9  ;;  %vm6434_vm0 = vmmov %vm6431_vm5  ;;  %v2432_v59 = vsel %vm6435_vm15, %v2427_v18, %v2426_v17  ;;  %vm6439_vm5 = vcmask 252928  }
 0xf55   : >> { %v2563_v15 = vsel %vm6434_vm0, %v2557_v9, %v2560_v29  ;;  %vm6436_vm1 = vmmov %vm6435_vm15  ;;  %vm6443_vm15 = vcmp.le.s32.totalorder %v4002_v2, 14 }
 0xf56   : >> { %v2428_v3 = vsel %vm6436_vm1, %v2426_v17, %v2427_v18  ;;  %vm6437_vm2 = vmmov %vm6434_vm0  ;;  %2500 = vrot.lane.b32.xlu1 %v2489_v47, %s3848_s14  ;;  %2498 = vrot.lane.b32.xlu0 %v2488_v55, %s3848_s14  ;;  %vm6444_vm1 = vcmask 7168  }
 0xf57   : >> { %v5599_v42 = vsel %vm6437_vm2, %v2545_v41, %v2542_v21  ;;  %vm6438_vm8 = vmmov %vm6434_vm0 }
 0xf58   : >> { %v5602_v43 = vsel %vm6438_vm8, %v2542_v21, %v2545_v41  ;;  %vm6440_vm6 = vmmov %vm6439_vm5 }
 0xf59   : >> { %vm6441_vm14 = vmmov %vm6439_vm5 }
 0xf5a   : >> { %2406 = vrot.lane.b32.xlu1 %v2402_v14, %s3846_s12  ;;  %2404 = vrot.lane.b32.xlu0 %v2399_v58, %s3846_s12  ;;  %vm6442_vm0 = vmmov %vm6439_vm5 }
 0xf5b   : >> { %vm6445_vm2 = vmmov %vm6444_vm1 }
 0xf5c   : >> { %vm6446_vm8 = vmmov %vm6444_vm1 }
 0xf5e   : >> { %2412 = vrot.lane.b32.xlu1 %v2402_v14, %s3845_s11  ;;  %2410 = vrot.lane.b32.xlu0 %v2399_v58, %s3845_s11  ;;  %v2434_v14 = vsel %vm6443_vm15, %v2432_v59, 0.0  ;;  %vm6451_vm15 = vmmov %vm6444_vm1 }
 0xf62   : >> { %2450 = vrot.lane.b32.xlu1 %v2446_v61, %s3847_s13  ;;  %2448 = vrot.lane.b32.xlu0 %v2443_v62, %s3847_s13 }
 0xf66   : >> { %2456 = vrot.lane.b32.xlu1 %v2446_v61, %s3848_s14  ;;  %2454 = vrot.lane.b32.xlu0 %v2443_v62, %s3848_s14 }
 0xf6a   : >> { %2523 = vrot.lane.b32.xlu1 %v2517_v12, %s3846_s12  ;;  %2521 = vrot.lane.b32.xlu0 %v2519_v26, %s3846_s12 }
 0xf6e   : >> { %2529 = vrot.lane.b32.xlu1 %v2517_v12, %s3845_s11  ;;  %2527 = vrot.lane.b32.xlu0 %v2519_v26, %s3845_s11 }
 0xf72   : >> { %2567 = vrot.lane.b32.xlu1 %v2561_v50, %s3847_s13  ;;  %2565 = vrot.lane.b32.xlu0 %v2563_v15, %s3847_s13 }
 0xf76   : >> { %2573 = vrot.lane.b32.xlu1 %v2561_v50, %s3848_s14  ;;  %2571 = vrot.lane.b32.xlu0 %v2563_v15, %s3848_s14 }
 0xfbc   : >> { %v2473_v44 = vpop.permute.xlu1 %2472  ;;  %v2471_v20 = vpop.permute.xlu0 %2470 }
 0xfc0   : >> { %v2479_v45 = vpop.permute.xlu1 %2478  ;;  %v2477_v46 = vpop.permute.xlu0 %2476 }
 0xfc1   : >> { %v2483_v63 = vsel %vm6441_vm14, %v2473_v44, %v2479_v45  ;;  %v2482_v53 = vsel %vm6442_vm0, %v2471_v20, %v2477_v46  ;;  %vm6449_vm14 = vmmov %vm6442_vm0 }
 0xfc2   : >> { %v2485_v19 = vsel %vm4125_vm7, %v2483_v63, 0.0  ;;  %v2484_v32 = vsel %vm4125_vm7, %v2482_v53, 0.0 }
 0xfc4   : >> { %v2495_v34 = vpop.permute.xlu1 %2494  ;;  %v2493_v49 = vpop.permute.xlu0 %2492 }
 0xfc8   : >> { %v2501_v0 = vpop.permute.xlu1 %2500  ;;  %v2499_v5 = vpop.permute.xlu0 %2498 }
 0xfc9   : >> { %v2505_v26 = vsel %vm6446_vm8, %v2495_v34, %v2501_v0  ;;  %vm6453_vm8 = vcmp.eq.s32.totalorder %v4925_v51, 4 }
 0xfca   : >> { %v2507_v18 = vsel %vm4120_vm4, %v2505_v26, 0.0 }
 0xfcc   : >> { %v2407_v47 = vpop.permute.xlu1 %2406  ;;  %v2405_v55 = vpop.permute.xlu0 %2404 }
 0xfd0   : >> { %v2413_v6 = vpop.permute.xlu1 %2412  ;;  %v2411_v7 = vpop.permute.xlu0 %2410 }
 0xfd1   : >> { %v2417_v57 = vsel %vm6439_vm5, %v2407_v47, %v2413_v6  ;;  %v2416_v27 = vsel %vm6440_vm6, %v2405_v55, %v2411_v7  ;;  %vm6447_vm5 = vmmov %vm6444_vm1 }
 0xfd2   : >> { %v2419_v8 = vsel %vm4162_vm13, %v2417_v57, 0.0  ;;  %v2418_v60 = vsel %vm4125_vm7, %v2416_v27, 0.0  ;;  %v2504_v50 = vsel %vm6447_vm5, %v2493_v49, %v2499_v5  ;;  %vm6448_vm6 = vmmov %vm6442_vm0  ;;  %vm6450_vm0 = vcmp.ge.s32.totalorder %v3999_v1, 1 }
 0xfd3   : >> { %v2421_v52 = vmax.f32 %v5538_v16, %v2419_v8  ;;  %v2420_v13 = vmax.f32 %v5546_v10, %v2418_v60  ;;  %v2506_v21 = vsel %vm4120_vm4, %v2504_v50, 0.0  ;;  %v2550_v55 = vsel %vm6450_vm0, %v5602_v43, 0.0 }
 0xfd4   : >> { %v2451_v24 = vpop.permute.xlu1 %2450  ;;  %v2449_v25 = vpop.permute.xlu0 %2448  ;;  %vm6454_vm5 = vcmp.eq.s32.totalorder %v4925_v51, 0  ;;  %vm6457_vm0 = vcmp.eq.s32.totalorder %v4923_v48, 2 }
 0xfd5   : >> { %v2436_v62 = vmax.f32 %v2421_v52, %v2434_v14  ;;  %v2435_v23 = vmax.f32 %v2420_v13, %v2428_v3 }
 0xfd8   : >> { %v2457_v58 = vpop.permute.xlu1 %2456  ;;  %v2455_v61 = vpop.permute.xlu0 %2454 }
 0xfd9   : >> { %v2461_v22 = vsel %vm6444_vm1, %v2451_v24, %v2457_v58  ;;  %v2460_v9 = vsel %vm6445_vm2, %v2449_v25, %v2455_v61  ;;  %vm6452_vm2 = vcmp.eq.s32.totalorder %v4923_v48, 4 }
 0xfda   : >> { %v2463_v16 = vsel %vm4154_vm12, %v2461_v22, 0.0  ;;  %v2462_v10 = vsel %vm4120_vm4, %v2460_v9, 0.0 }
 0xfdb   : >> { %v2465_v29 = vmax.f32 %v2436_v62, %v2463_v16  ;;  %v2464_v56 = vmax.f32 %v2435_v23, %v2462_v10 }
 0xfdc   : >> { %v2524_v11 = vpop.permute.xlu1 %2523  ;;  %v2522_v12 = vpop.permute.xlu0 %2521 }
 0xfdd   : >> { %v2487_v15 = vmax.f32 %v2465_v29, %v2485_v19  ;;  %v2486_v17 = vmax.f32 %v2464_v56, %v2484_v32 }
 0xfdf   : >> { %v2509_v3 = vmax.f32 %v2487_v15, %v2507_v18  ;;  %v2508_v20 = vmax.f32 %v2486_v17, %v2506_v21 }
 0xfe0   : >> { %v2530_v41 = vpop.permute.xlu1 %2529  ;;  %v2528_v59 = vpop.permute.xlu0 %2527 }
 0xfe1   : >> { %v2534_v44 = vsel %vm6448_vm6, %v2524_v11, %v2530_v41  ;;  %v2533_v45 = vsel %vm6449_vm14, %v2522_v12, %v2528_v59  ;;  %vm6455_vm6 = vcmp.eq.s32.totalorder %v4923_v48, 0  ;;  %vm6456_vm14 = vcmp.eq.s32.totalorder %v4925_v51, 2 }
 0xfe2   : >> { %v2536_v46 = vsel %vm4125_vm7, %v2534_v44, 0.0  ;;  %v2535_v34 = vsel %vm4142_vm11, %v2533_v45, 0.0 }
 0xfe3   : >> { %v2538_v49 = vmax.f32 %v2509_v3, %v2536_v46  ;;  %v2537_v0 = vmax.f32 %v2508_v20, %v2535_v34 }
 0xfe4   : >> { %v2568_v5 = vpop.permute.xlu1 %2567  ;;  %v2566_v47 = vpop.permute.xlu0 %2565 }
 0xfe5   : >> { %v2553_v6 = vmax.f32 %v2538_v49, %v5599_v42  ;;  %v2552_v7 = vmax.f32 %v2537_v0, %v2550_v55 }
 0xfe8   : >> { %v2574_v57 = vpop.permute.xlu1 %2573  ;;  %v2572_v27 = vpop.permute.xlu0 %2571 }
 0xfe9   : >> { %v2578_v8 = vsel %vm6451_vm15, %v2568_v5, %v2574_v57  ;;  %v2577_v60 = vsel %vm6444_vm1, %v2566_v47, %v2572_v27  ;;  %vm6458_vm15 = vcmp.eq.s32.totalorder %v4925_v51, 5  ;;  %vm6459_vm1 = vcmp.eq.s32.totalorder %v4923_v48, 5 }
 0xfea   : >> { %v2580_v24 = vsel %vm4120_vm4, %v2578_v8, 0.0  ;;  %v2579_v25 = vsel %vm4133_vm9, %v2577_v60, 0.0 }
 0xfeb   : >> { %v5666_v52 = vmax.f32 %v2553_v6, %v2580_v24  ;;  %v5668_v13 = vmax.f32 %v2552_v7, %v2579_v25 }
 0xfed   : >> { %v2584_v42 = vmax.f32 %v5535_v4, %v5666_v52  ;;  %v5674_v43 = vmul.f32 %v5666_v52, %v4103_v30  ;;  %v2583_v63 = vmax.f32 %v5543_v54, %v5668_v13  ;;  %v5680_v53 = vmul.f32 %v5668_v13, %v4093_v28 }
 0xfef   : >> { %v2588_v14 = vsub.f32 %v5666_v52, %v5674_v43  ;;  %v2587_v58 = vsub.f32 %v5668_v13, %v5680_v53 }
 0xff1   : >> { %v2663_v61 = vsel %vm1673_vm10, %v2588_v14, 0.0  ;;  %v2662_v62 = vsel %vm1672_vm3, %v2587_v58, 0.0  ;;  %v2685_v22 = vsel %vm6452_vm2, %v2588_v14, 0.0  ;;  %v2684_v23 = vsel %vm6453_vm8, %v2587_v58, 0.0 }
 0xff2   : >> { %2668 = vrot.lane.b32.xlu1 %v2663_v61, %s3846_s12  ;;  %2666 = vrot.lane.b32.xlu0 %v2662_v62, %s3846_s12  ;;  %v2589_v9 = vsel %vm6454_vm5, %v2587_v58, 0.0  ;;  %v2590_v16 = vsel %vm6455_vm6, %v2588_v14, 0.0  ;;  %v2633_v10 = vsel %vm6456_vm14, %v2587_v58, 0.0  ;;  %v2634_v29 = vsel %vm6457_vm0, %v2588_v14, 0.0 }
 0xff3   : >> { %v2593_v56 = vrot.slane %v2589_v9, 1  ;;  %v2594_v19 = vrot.slane %v2590_v16, 1  ;;  %v2637_v32 = vrot.slane %v2633_v10, 1  ;;  %v2638_v11 = vrot.slane %v2634_v29, 1 }
 0xff4   : >> { %v2706_v12 = vsel %vm6458_vm15, %v2587_v58, 0.0  ;;  %v2707_v26 = vsel %vm6459_vm1, %v2588_v14, 0.0  ;;  %vm6460_vm2 = vcmp.eq.s32.totalorder %v4925_v51, 7  ;;  %vm6461_vm8 = vcmp.eq.s32.totalorder %v4923_v48, 7 }
 0xff5   : >> { %v2750_v50 = vsel %vm6460_vm2, %v2587_v58, 0.0  ;;  %v2751_v15 = vsel %vm6461_vm8, %v2588_v14, 0.0  ;;  %vm6462_vm5 = vcmask 1046528   ;;  %v2709_v59 = vrot.slane %v2707_v26, 7 }
 0xff6   : >> { %v2598_v17 = vsel %vm6462_vm5, %v2594_v19, %v2593_v56  ;;  %vm6463_vm6 = vmmov %vm6462_vm5  ;;  %2674 = vrot.lane.b32.xlu1 %v2663_v61, %s3845_s11  ;;  %2672 = vrot.lane.b32.xlu0 %v2662_v62, %s3845_s11  ;;  %v2712_v3 = vrot.slane %v2706_v12, 7  ;;  %v2753_v44 = vrot.slane %v2751_v15, 7  ;;  %v2756_v20 = vrot.slane %v2750_v50, 7 }
 0xff7   : >> { %v2595_v18 = vsel %vm6463_vm6, %v2593_v56, %v2594_v19  ;;  %vm6464_vm14 = vmmov %vm6462_vm5  ;;  %vm6466_vm15 = vcmp.eq.s32.totalorder %v4925_v51, 1  ;;  %vm6467_vm1 = vcmp.eq.s32.totalorder %v4923_v48, 1  ;;  %vm6468_vm2 = vcmp.eq.s32.totalorder %v4925_v51, 6 }
 0xff8   : >> { %v2642_v21 = vsel %vm6464_vm14, %v2638_v11, %v2637_v32  ;;  %vm6465_vm0 = vmmov %vm6462_vm5  ;;  %v2618_v45 = vsel %vm6466_vm15, %v2587_v58, 0.0  ;;  %v2619_v46 = vsel %vm6467_vm1, %v2588_v14, 0.0  ;;  %v2735_v34 = vsel %vm6468_vm2, %v2587_v58, 0.0 }
 0xff9   : >> { %v2639_v41 = vsel %vm6465_vm0, %v2637_v32, %v2638_v11  ;;  %vm6469_vm8 = vcmp.eq.s32.totalorder %v4923_v48, 6  ;;  %vm6470_vm5 = vcmask 1040384   ;;  %v2622_v6 = vrot.slane %v2618_v45, 1 }
 0xffa   : >> { %v2736_v49 = vsel %vm6469_vm8, %v2588_v14, 0.0  ;;  %v2713_v0 = vsel %vm6470_vm5, %v2712_v3, %v2709_v59  ;;  %vm6471_vm6 = vmmov %vm6470_vm5  ;;  %v2623_v7 = vrot.slane %v2619_v46, 1  ;;  %v2741_v27 = vrot.slane %v2735_v34, 7  ;;  %2690 = vrot.lane.b32.xlu1 %v2685_v22, %s3847_s13  ;;  %2688 = vrot.lane.b32.xlu0 %v2684_v23, %s3847_s13 }
 0xffb   : >> { %v2715_v5 = vsel %vm6471_vm6, %v2709_v59, %v2712_v3  ;;  %vm6472_vm14 = vmmov %vm6470_vm5  ;;  %v2738_v57 = vrot.slane %v2736_v49, 7  ;;  %vm6474_vm15 = vcmask 1046528  }
 0xffc   : >> { %v2757_v47 = vsel %vm6472_vm14, %v2756_v20, %v2753_v44  ;;  %vm6473_vm0 = vmmov %vm6470_vm5  ;;  %v2628_v8 = vsel %vm6474_vm15, %v2623_v7, %v2622_v6  ;;  %vm6478_vm5 = vcmask 252928  }
 0xffd   : >> { %v2759_v55 = vsel %vm6473_vm0, %v2753_v44, %v2756_v20  ;;  %vm6475_vm1 = vmmov %vm6474_vm15  ;;  %vm6482_vm15 = vcmp.le.s32.totalorder %v4002_v2, 14 }
 0xffe   : >> { %v2624_v60 = vsel %vm6475_vm1, %v2622_v6, %v2623_v7  ;;  %vm6476_vm2 = vmmov %vm6473_vm0  ;;  %2696 = vrot.lane.b32.xlu1 %v2685_v22, %s3848_s14  ;;  %2694 = vrot.lane.b32.xlu0 %v2684_v23, %s3848_s14  ;;  %v2630_v59 = vsel %vm6482_vm15, %v2628_v8, 0.0  ;;  %vm6483_vm1 = vcmask 7168  }
 0xfff   : >> { %v5735_v24 = vsel %vm6476_vm2, %v2741_v27, %v2738_v57  ;;  %vm6477_vm8 = vmmov %vm6473_vm0 }
0x1000   : >> { %v5738_v25 = vsel %vm6477_vm8, %v2738_v57, %v2741_v27  ;;  %vm6479_vm6 = vmmov %vm6478_vm5 }
0x1001   : >> { %vm6480_vm14 = vmmov %vm6478_vm5 }
0x1002   : >> { %2602 = vrot.lane.b32.xlu1 %v2598_v17, %s3846_s12  ;;  %2600 = vrot.lane.b32.xlu0 %v2595_v18, %s3846_s12  ;;  %vm6481_vm0 = vmmov %vm6478_vm5 }
0x1003   : >> { %vm6484_vm2 = vmmov %vm6483_vm1 }
0x1004   : >> { %vm6485_vm8 = vmmov %vm6483_vm1 }
0x1005   : >> { %vm6490_vm15 = vmmov %vm6483_vm1 }
0x1006   : >> { %2608 = vrot.lane.b32.xlu1 %v2598_v17, %s3845_s11  ;;  %2606 = vrot.lane.b32.xlu0 %v2595_v18, %s3845_s11 }
0x100a   : >> { %2646 = vrot.lane.b32.xlu1 %v2642_v21, %s3847_s13  ;;  %2644 = vrot.lane.b32.xlu0 %v2639_v41, %s3847_s13 }
0x100e   : >> { %2652 = vrot.lane.b32.xlu1 %v2642_v21, %s3848_s14  ;;  %2650 = vrot.lane.b32.xlu0 %v2639_v41, %s3848_s14 }
0x1012   : >> { %2719 = vrot.lane.b32.xlu1 %v2713_v0, %s3846_s12  ;;  %2717 = vrot.lane.b32.xlu0 %v2715_v5, %s3846_s12 }
0x1016   : >> { %2725 = vrot.lane.b32.xlu1 %v2713_v0, %s3845_s11  ;;  %2723 = vrot.lane.b32.xlu0 %v2715_v5, %s3845_s11 }
0x101a   : >> { %2763 = vrot.lane.b32.xlu1 %v2757_v47, %s3847_s13  ;;  %2761 = vrot.lane.b32.xlu0 %v2759_v55, %s3847_s13 }
0x101e   : >> { %2769 = vrot.lane.b32.xlu1 %v2757_v47, %s3848_s14  ;;  %2767 = vrot.lane.b32.xlu0 %v2759_v55, %s3848_s14 }
0x1064   : >> { %v2669_v14 = vpop.permute.xlu1 %2668  ;;  %v2667_v58 = vpop.permute.xlu0 %2666 }
0x1068   : >> { %v2675_v61 = vpop.permute.xlu1 %2674  ;;  %v2673_v62 = vpop.permute.xlu0 %2672 }
0x1069   : >> { %v2679_v21 = vsel %vm6480_vm14, %v2669_v14, %v2675_v61  ;;  %v2678_v41 = vsel %vm6481_vm0, %v2667_v58, %v2673_v62  ;;  %vm6488_vm14 = vmmov %vm6481_vm0 }
0x106a   : >> { %v2681_v5 = vsel %vm4125_vm7, %v2679_v21, 0.0  ;;  %v2680_v47 = vsel %vm4125_vm7, %v2678_v41, 0.0 }
0x106c   : >> { %v2691_v22 = vpop.permute.xlu1 %2690  ;;  %v2689_v23 = vpop.permute.xlu0 %2688 }
0x1070   : >> { %v2697_v9 = vpop.permute.xlu1 %2696  ;;  %v2695_v16 = vpop.permute.xlu0 %2694 }
0x1071   : >> { %v2701_v7 = vsel %vm6485_vm8, %v2691_v22, %v2697_v9  ;;  %vm6492_vm8 = vcmp.eq.s32.totalorder %v4925_v51, 4 }
0x1074   : >> { %v2603_v10 = vpop.permute.xlu1 %2602  ;;  %v2601_v29 = vpop.permute.xlu0 %2600 }
0x1078   : >> { %v2609_v56 = vpop.permute.xlu1 %2608  ;;  %v2607_v19 = vpop.permute.xlu0 %2606 }
0x1079   : >> { %v2613_v32 = vsel %vm6478_vm5, %v2603_v10, %v2609_v56  ;;  %v2612_v11 = vsel %vm6479_vm6, %v2601_v29, %v2607_v19  ;;  %vm6486_vm5 = vmmov %vm6483_vm1 }
0x107a   : >> { %v2615_v12 = vsel %vm4162_vm13, %v2613_v32, 0.0  ;;  %v2614_v26 = vsel %vm4125_vm7, %v2612_v11, 0.0  ;;  %v2700_v57 = vsel %vm6486_vm5, %v2689_v23, %v2695_v16  ;;  %vm6487_vm6 = vmmov %vm6481_vm0  ;;  %vm6489_vm0 = vcmp.ge.s32.totalorder %v3999_v1, 1 }
0x107b   : >> { %v2617_v17 = vmax.f32 %v5674_v43, %v2615_v12  ;;  %v2616_v18 = vmax.f32 %v5680_v53, %v2614_v26  ;;  %v2702_v14 = vsel %vm4120_vm4, %v2700_v57, 0.0  ;;  %v2746_v11 = vsel %vm6489_vm0, %v5738_v25, 0.0 }
0x107c   : >> { %v2647_v50 = vpop.permute.xlu1 %2646  ;;  %v2645_v15 = vpop.permute.xlu0 %2644  ;;  %vm6493_vm5 = vcmp.eq.s32.totalorder %v4925_v51, 0  ;;  %vm6496_vm0 = vcmp.eq.s32.totalorder %v4923_v48, 2 }
0x107d   : >> { %v2632_v20 = vmax.f32 %v2617_v17, %v2630_v59  ;;  %v2631_v46 = vmax.f32 %v2616_v18, %v2624_v60  ;;  %v2703_v60 = vsel %vm4120_vm4, %v2701_v7, 0.0 }
0x1080   : >> { %v2653_v3 = vpop.permute.xlu1 %2652  ;;  %v2651_v44 = vpop.permute.xlu0 %2650 }
0x1081   : >> { %v2657_v45 = vsel %vm6483_vm1, %v2647_v50, %v2653_v3  ;;  %v2656_v34 = vsel %vm6484_vm2, %v2645_v15, %v2651_v44  ;;  %vm6491_vm2 = vcmp.eq.s32.totalorder %v4923_v48, 4 }
0x1082   : >> { %v2659_v43 = vsel %vm4154_vm12, %v2657_v45, 0.0  ;;  %v2658_v53 = vsel %vm4120_vm4, %v2656_v34, 0.0 }
0x1083   : >> { %v2661_v49 = vmax.f32 %v2632_v20, %v2659_v43  ;;  %v2660_v0 = vmax.f32 %v2631_v46, %v2658_v53 }
0x1084   : >> { %v2720_v55 = vpop.permute.xlu1 %2719  ;;  %v2718_v6 = vpop.permute.xlu0 %2717 }
0x1085   : >> { %v2683_v27 = vmax.f32 %v2661_v49, %v2681_v5  ;;  %v2682_v8 = vmax.f32 %v2660_v0, %v2680_v47 }
0x1087   : >> { %v2705_v62 = vmax.f32 %v2683_v27, %v2703_v60  ;;  %v2704_v29 = vmax.f32 %v2682_v8, %v2702_v14 }
0x1088   : >> { %v2726_v58 = vpop.permute.xlu1 %2725  ;;  %v2724_v61 = vpop.permute.xlu0 %2723 }
0x1089   : >> { %v2730_v10 = vsel %vm6487_vm6, %v2720_v55, %v2726_v58  ;;  %v2729_v56 = vsel %vm6488_vm14, %v2718_v6, %v2724_v61  ;;  %vm6494_vm6 = vcmp.eq.s32.totalorder %v4923_v48, 0  ;;  %vm6495_vm14 = vcmp.eq.s32.totalorder %v4925_v51, 2 }
0x108a   : >> { %v2732_v22 = vsel %vm4125_vm7, %v2730_v10, 0.0  ;;  %v2731_v23 = vsel %vm4142_vm11, %v2729_v56, 0.0 }
0x108b   : >> { %v2734_v9 = vmax.f32 %v2705_v62, %v2732_v22  ;;  %v2733_v16 = vmax.f32 %v2704_v29, %v2731_v23 }
0x108c   : >> { %v2764_v19 = vpop.permute.xlu1 %2763  ;;  %v2762_v32 = vpop.permute.xlu0 %2761 }
0x108d   : >> { %v2749_v12 = vmax.f32 %v2734_v9, %v5735_v24  ;;  %v2748_v26 = vmax.f32 %v2733_v16, %v2746_v11 }
0x1090   : >> { %v2770_v50 = vpop.permute.xlu1 %2769  ;;  %v2768_v15 = vpop.permute.xlu0 %2767 }
0x1091   : >> { %v2774_v17 = vsel %vm6490_vm15, %v2764_v19, %v2770_v50  ;;  %v2773_v18 = vsel %vm6483_vm1, %v2762_v32, %v2768_v15  ;;  %vm6497_vm15 = vcmp.eq.s32.totalorder %v4925_v51, 5  ;;  %vm6498_vm1 = vcmp.eq.s32.totalorder %v4923_v48, 5 }
0x1092   : >> { %v2776_v21 = vsel %vm4120_vm4, %v2774_v17, 0.0  ;;  %v2775_v41 = vsel %vm4133_vm9, %v2773_v18, 0.0 }
0x1093   : >> { %v2778_v59 = vmax.f32 %v2749_v12, %v2776_v21  ;;  %v2777_v3 = vmax.f32 %v2748_v26, %v2775_v41 }
0x1095   : >> { %v5805_v25 = vmax.f32 %v2584_v42, %v2778_v59  ;;  %v5808_v24 = vmul.f32 %v2778_v59, %v4103_v30  ;;  %v5813_v44 = vmax.f32 %v2583_v63, %v2777_v3  ;;  %v5816_v20 = vmul.f32 %v2777_v3, %v4093_v28 }
0x1097   : >> { %v2784_v45 = vsub.f32 %v2778_v59, %v5808_v24  ;;  %v2783_v46 = vsub.f32 %v2777_v3, %v5816_v20 }
0x1099   : >> { %v2859_v4 = vsel %vm1673_vm10, %v2784_v45, 0.0  ;;  %v2858_v52 = vsel %vm1672_vm3, %v2783_v46, 0.0  ;;  %v2881_v42 = vsel %vm6491_vm2, %v2784_v45, 0.0  ;;  %v2880_v54 = vsel %vm6492_vm8, %v2783_v46, 0.0 }
0x109a   : >> { %2864 = vrot.lane.b32.xlu1 %v2859_v4, %s3846_s12  ;;  %2862 = vrot.lane.b32.xlu0 %v2858_v52, %s3846_s12  ;;  %v2785_v13 = vsel %vm6493_vm5, %v2783_v46, 0.0  ;;  %v2786_v63 = vsel %vm6494_vm6, %v2784_v45, 0.0  ;;  %v2829_v34 = vsel %vm6495_vm14, %v2783_v46, 0.0  ;;  %v2830_v43 = vsel %vm6496_vm0, %v2784_v45, 0.0 }
0x109b   : >> { %v2789_v53 = vrot.slane %v2785_v13, 1  ;;  %v2790_v49 = vrot.slane %v2786_v63, 1  ;;  %v2833_v0 = vrot.slane %v2829_v34, 1  ;;  %v2834_v5 = vrot.slane %v2830_v43, 1 }
0x109c   : >> { %v2902_v47 = vsel %vm6497_vm15, %v2783_v46, 0.0  ;;  %v2903_v55 = vsel %vm6498_vm1, %v2784_v45, 0.0  ;;  %vm6499_vm2 = vcmp.eq.s32.totalorder %v4925_v51, 7  ;;  %vm6500_vm8 = vcmp.eq.s32.totalorder %v4923_v48, 7 }
0x109d   : >> { %v2946_v6 = vsel %vm6499_vm2, %v2783_v46, 0.0  ;;  %v2947_v7 = vsel %vm6500_vm8, %v2784_v45, 0.0  ;;  %vm6501_vm5 = vcmask 1046528   ;;  %v2905_v14 = vrot.slane %v2903_v55, 7 }
0x109e   : >> { %v2794_v57 = vsel %vm6501_vm5, %v2790_v49, %v2789_v53  ;;  %vm6502_vm6 = vmmov %vm6501_vm5  ;;  %2870 = vrot.lane.b32.xlu1 %v2859_v4, %s3845_s11  ;;  %2868 = vrot.lane.b32.xlu0 %v2858_v52, %s3845_s11  ;;  %v2908_v58 = vrot.slane %v2902_v47, 7  ;;  %v2949_v61 = vrot.slane %v2947_v7, 7  ;;  %v2952_v62 = vrot.slane %v2946_v6, 7 }
0x109f   : >> { %v2791_v27 = vsel %vm6502_vm6, %v2789_v53, %v2790_v49  ;;  %vm6503_vm14 = vmmov %vm6501_vm5  ;;  %vm6505_vm15 = vcmp.eq.s32.totalorder %v4925_v51, 1  ;;  %vm6506_vm1 = vcmp.eq.s32.totalorder %v4923_v48, 1  ;;  %vm6507_vm2 = vcmp.eq.s32.totalorder %v4925_v51, 6 }
0x10a0   : >> { %v2838_v8 = vsel %vm6503_vm14, %v2834_v5, %v2833_v0  ;;  %vm6504_vm0 = vmmov %vm6501_vm5  ;;  %v2814_v10 = vsel %vm6505_vm15, %v2783_v46, 0.0  ;;  %v2815_v29 = vsel %vm6506_vm1, %v2784_v45, 0.0  ;;  %v2931_v56 = vsel %vm6507_vm2, %v2783_v46, 0.0 }
0x10a1   : >> { %v2835_v60 = vsel %vm6504_vm0, %v2833_v0, %v2834_v5  ;;  %vm6508_vm8 = vcmp.eq.s32.totalorder %v4923_v48, 6  ;;  %vm6509_vm5 = vcmask 1040384   ;;  %v2818_v32 = vrot.slane %v2814_v10, 1 }
0x10a2   : >> { %v2932_v22 = vsel %vm6508_vm8, %v2784_v45, 0.0  ;;  %v2909_v23 = vsel %vm6509_vm5, %v2908_v58, %v2905_v14  ;;  %vm6510_vm6 = vmmov %vm6509_vm5  ;;  %v2819_v11 = vrot.slane %v2815_v29, 1  ;;  %v2937_v26 = vrot.slane %v2931_v56, 7  ;;  %2886 = vrot.lane.b32.xlu1 %v2881_v42, %s3847_s13  ;;  %2884 = vrot.lane.b32.xlu0 %v2880_v54, %s3847_s13 }
0x10a3   : >> { %v2911_v9 = vsel %vm6510_vm6, %v2905_v14, %v2908_v58  ;;  %vm6511_vm14 = vmmov %vm6509_vm5  ;;  %v2934_v12 = vrot.slane %v2932_v22, 7  ;;  %vm6513_vm15 = vcmask 1046528  }
0x10a4   : >> { %v2953_v16 = vsel %vm6511_vm14, %v2952_v62, %v2949_v61  ;;  %vm6512_vm0 = vmmov %vm6509_vm5  ;;  %v2824_v50 = vsel %vm6513_vm15, %v2819_v11, %v2818_v32  ;;  %vm6517_vm5 = vcmask 252928  }
0x10a5   : >> { %v2955_v19 = vsel %vm6512_vm0, %v2949_v61, %v2952_v62  ;;  %vm6514_vm1 = vmmov %vm6513_vm15  ;;  %vm6521_vm15 = vcmp.le.s32.totalorder %v4002_v2, 14 }
0x10a6   : >> { %v2820_v15 = vsel %vm6514_vm1, %v2818_v32, %v2819_v11  ;;  %vm6515_vm2 = vmmov %vm6512_vm0  ;;  %2892 = vrot.lane.b32.xlu1 %v2881_v42, %s3848_s14  ;;  %2890 = vrot.lane.b32.xlu0 %v2880_v54, %s3848_s14  ;;  %vm6522_vm1 = vcmask 7168  }
0x10a7   : >> { %v5869_v17 = vsel %vm6515_vm2, %v2937_v26, %v2934_v12  ;;  %vm6516_vm8 = vmmov %vm6512_vm0 }
0x10a8   : >> { %v5872_v18 = vsel %vm6516_vm8, %v2934_v12, %v2937_v26  ;;  %vm6518_vm6 = vmmov %vm6517_vm5 }
0x10a9   : >> { %vm6519_vm14 = vmmov %vm6517_vm5 }
0x10aa   : >> { %2798 = vrot.lane.b32.xlu1 %v2794_v57, %s3846_s12  ;;  %2796 = vrot.lane.b32.xlu0 %v2791_v27, %s3846_s12  ;;  %vm6520_vm0 = vmmov %vm6517_vm5 }
0x10ab   : >> { %vm6523_vm2 = vmmov %vm6522_vm1 }
0x10ac   : >> { %vm6524_vm8 = vmmov %vm6522_vm1 }
0x10ae   : >> { %2804 = vrot.lane.b32.xlu1 %v2794_v57, %s3845_s11  ;;  %2802 = vrot.lane.b32.xlu0 %v2791_v27, %s3845_s11  ;;  %v2826_v57 = vsel %vm6521_vm15, %v2824_v50, 0.0  ;;  %vm6529_vm15 = vmmov %vm6522_vm1 }
0x10b2   : >> { %2842 = vrot.lane.b32.xlu1 %v2838_v8, %s3847_s13  ;;  %2840 = vrot.lane.b32.xlu0 %v2835_v60, %s3847_s13 }
0x10b6   : >> { %2848 = vrot.lane.b32.xlu1 %v2838_v8, %s3848_s14  ;;  %2846 = vrot.lane.b32.xlu0 %v2835_v60, %s3848_s14 }
0x10ba   : >> { %2915 = vrot.lane.b32.xlu1 %v2909_v23, %s3846_s12  ;;  %2913 = vrot.lane.b32.xlu0 %v2911_v9, %s3846_s12 }
0x10be   : >> { %2921 = vrot.lane.b32.xlu1 %v2909_v23, %s3845_s11  ;;  %2919 = vrot.lane.b32.xlu0 %v2911_v9, %s3845_s11 }
0x10c2   : >> { %2959 = vrot.lane.b32.xlu1 %v2953_v16, %s3847_s13  ;;  %2957 = vrot.lane.b32.xlu0 %v2955_v19, %s3847_s13 }
0x10c6   : >> { %2965 = vrot.lane.b32.xlu1 %v2953_v16, %s3848_s14  ;;  %2963 = vrot.lane.b32.xlu0 %v2955_v19, %s3848_s14 }
0x110c   : >> { %v2865_v21 = vpop.permute.xlu1 %2864  ;;  %v2863_v41 = vpop.permute.xlu0 %2862 }
0x1110   : >> { %v2871_v59 = vpop.permute.xlu1 %2870  ;;  %v2869_v3 = vpop.permute.xlu0 %2868 }
0x1111   : >> { %v2875_v6 = vsel %vm6519_vm14, %v2865_v21, %v2871_v59  ;;  %v2874_v7 = vsel %vm6520_vm0, %v2863_v41, %v2869_v3  ;;  %vm6527_vm14 = vmmov %vm6520_vm0 }
0x1112   : >> { %v2877_v29 = vsel %vm4125_vm7, %v2875_v6, 0.0  ;;  %v2876_v56 = vsel %vm4125_vm7, %v2874_v7, 0.0 }
0x1114   : >> { %v2887_v45 = vpop.permute.xlu1 %2886  ;;  %v2885_v46 = vpop.permute.xlu0 %2884 }
0x1118   : >> { %v2893_v4 = vpop.permute.xlu1 %2892  ;;  %v2891_v52 = vpop.permute.xlu0 %2890 }
0x1119   : >> { %v2897_v9 = vsel %vm6524_vm8, %v2887_v45, %v2893_v4  ;;  %vm6531_vm8 = vcmp.eq.s32.totalorder %v4925_v51, 4 }
0x111a   : >> { %v2899_v11 = vsel %vm4120_vm4, %v2897_v9, 0.0 }
0x111c   : >> { %v2799_v42 = vpop.permute.xlu1 %2798  ;;  %v2797_v54 = vpop.permute.xlu0 %2796 }
0x1120   : >> { %v2805_v13 = vpop.permute.xlu1 %2804  ;;  %v2803_v63 = vpop.permute.xlu0 %2802 }
0x1121   : >> { %v2809_v34 = vsel %vm6517_vm5, %v2799_v42, %v2805_v13  ;;  %v2808_v43 = vsel %vm6518_vm6, %v2797_v54, %v2803_v63  ;;  %vm6525_vm5 = vmmov %vm6522_vm1 }
0x1122   : >> { %v2811_v53 = vsel %vm4162_vm13, %v2809_v34, 0.0  ;;  %v2810_v49 = vsel %vm4125_vm7, %v2808_v43, 0.0  ;;  %v2896_v16 = vsel %vm6525_vm5, %v2885_v46, %v2891_v52  ;;  %vm6526_vm6 = vmmov %vm6520_vm0  ;;  %vm6528_vm0 = vcmp.ge.s32.totalorder %v3999_v1, 1 }
0x1123   : >> { %v2813_v47 = vmax.f32 %v5808_v24, %v2811_v53  ;;  %v2812_v55 = vmax.f32 %v5816_v20, %v2810_v49  ;;  %v2898_v12 = vsel %vm4120_vm4, %v2896_v16, 0.0  ;;  %v2942_v54 = vsel %vm6528_vm0, %v5872_v18, 0.0 }
0x1124   : >> { %v2843_v0 = vpop.permute.xlu1 %2842  ;;  %v2841_v5 = vpop.permute.xlu0 %2840  ;;  %vm6532_vm5 = vcmp.eq.s32.totalorder %v4925_v51, 0  ;;  %vm6537_vm0 = vcmp.eq.s32.totalorder %v4923_v48, 5 }
0x1125   : >> { %v2828_v60 = vmax.f32 %v2813_v47, %v2826_v57  ;;  %v2827_v58 = vmax.f32 %v2812_v55, %v2820_v15 }
0x1128   : >> { %v2849_v27 = vpop.permute.xlu1 %2848  ;;  %v2847_v8 = vpop.permute.xlu0 %2846 }
0x1129   : >> { %v2853_v14 = vsel %vm6522_vm1, %v2843_v0, %v2849_v27  ;;  %v2852_v61 = vsel %vm6523_vm2, %v2841_v5, %v2847_v8  ;;  %vm6530_vm2 = vcmp.eq.s32.totalorder %v4923_v48, 4 }
0x112a   : >> { %v2855_v24 = vsel %vm4154_vm12, %v2853_v14, 0.0  ;;  %v2854_v20 = vsel %vm4120_vm4, %v2852_v61, 0.0 }
0x112b   : >> { %v2857_v62 = vmax.f32 %v2828_v60, %v2855_v24  ;;  %v2856_v10 = vmax.f32 %v2827_v58, %v2854_v20 }
0x112c   : >> { %v2916_v22 = vpop.permute.xlu1 %2915  ;;  %v2914_v23 = vpop.permute.xlu0 %2913 }
0x112d   : >> { %v2879_v19 = vmax.f32 %v2857_v62, %v2877_v29  ;;  %v2878_v32 = vmax.f32 %v2856_v10, %v2876_v56 }
0x112f   : >> { %v2901_v15 = vmax.f32 %v2879_v19, %v2899_v11  ;;  %v2900_v41 = vmax.f32 %v2878_v32, %v2898_v12 }
0x1130   : >> { %v2922_v26 = vpop.permute.xlu1 %2921  ;;  %v2920_v50 = vpop.permute.xlu0 %2919 }
0x1131   : >> { %v2926_v21 = vsel %vm6526_vm6, %v2916_v22, %v2922_v26  ;;  %v2925_v59 = vsel %vm6527_vm14, %v2914_v23, %v2920_v50  ;;  %vm6533_vm6 = vcmp.eq.s32.totalorder %v4923_v48, 0  ;;  %vm6536_vm14 = vcmp.eq.s32.totalorder %v4925_v51, 5 }
0x1132   : >> { %v2928_v3 = vsel %vm4125_vm7, %v2926_v21, 0.0  ;;  %v2927_v45 = vsel %vm4142_vm11, %v2925_v59, 0.0 }
0x1133   : >> { %v2930_v46 = vmax.f32 %v2901_v15, %v2928_v3  ;;  %v2929_v4 = vmax.f32 %v2900_v41, %v2927_v45 }
0x1134   : >> { %v2960_v52 = vpop.permute.xlu1 %2959  ;;  %v2958_v42 = vpop.permute.xlu0 %2957 }
0x1135   : >> { %v2945_v13 = vmax.f32 %v2930_v46, %v5869_v17  ;;  %v2944_v63 = vmax.f32 %v2929_v4, %v2942_v54 }
0x1138   : >> { %v2966_v34 = vpop.permute.xlu1 %2965  ;;  %v2964_v43 = vpop.permute.xlu0 %2963 }
0x1139   : >> { %v2970_v53 = vsel %vm6529_vm15, %v2960_v52, %v2966_v34  ;;  %v2969_v49 = vsel %vm6522_vm1, %v2958_v42, %v2964_v43  ;;  %vm6538_vm15 = vcmp.eq.s32.totalorder %v4925_v51, 7  ;;  %vm6539_vm1 = vcmp.eq.s32.totalorder %v4923_v48, 7 }
0x113a   : >> { %v2972_v0 = vsel %vm4120_vm4, %v2970_v53, 0.0  ;;  %v2971_v5 = vsel %vm4133_vm9, %v2969_v49, 0.0 }
0x113b   : >> { %v5936_v47 = vmax.f32 %v2945_v13, %v2972_v0  ;;  %v5938_v55 = vmax.f32 %v2944_v63, %v2971_v5 }
0x113d   : >> { %v5942_v17 = vmul.f32 %v5936_v47, %v4103_v30  ;;  %v5946_v18 = vmul.f32 %v5938_v55, %v4093_v28  ;;  %v2976_v6 = vmax.f32 %v5805_v25, %v5936_v47  ;;  %v2975_v7 = vmax.f32 %v5813_v44, %v5938_v55 }
0x113f   : >> { %v2980_v57 = vsub.f32 %v5936_v47, %v5942_v17  ;;  %v2979_v27 = vsub.f32 %v5938_v55, %v5946_v18 }
0x1141   : >> { %v3055_v8 = vsel %vm1673_vm10, %v2980_v57, 0.0  ;;  %v3054_v60 = vsel %vm1672_vm3, %v2979_v27, 0.0  ;;  %v3077_v14 = vsel %vm6530_vm2, %v2980_v57, 0.0  ;;  %v3076_v58 = vsel %vm6531_vm8, %v2979_v27, 0.0 }
0x1142   : >> { %3060 = vrot.lane.b32.xlu1 %v3055_v8, %s3846_s12  ;;  %3058 = vrot.lane.b32.xlu0 %v3054_v60, %s3846_s12  ;;  %v2981_v61 = vsel %vm6532_vm5, %v2979_v27, 0.0  ;;  %v2982_v24 = vsel %vm6533_vm6, %v2980_v57, 0.0  ;;  %vm6534_vm10 = vcmp.eq.s32.totalorder %v4925_v51, 2  ;;  %vm6535_vm3 = vcmp.eq.s32.totalorder %v4923_v48, 2 }
0x1143   : >> { %v3025_v20 = vsel %vm6534_vm10, %v2979_v27, 0.0  ;;  %v3026_v62 = vsel %vm6535_vm3, %v2980_v57, 0.0  ;;  %v2985_v10 = vrot.slane %v2981_v61, 1  ;;  %v2986_v29 = vrot.slane %v2982_v24, 1 }
0x1144   : >> { %v3029_v56 = vrot.slane %v3025_v20, 1  ;;  %v3030_v22 = vrot.slane %v3026_v62, 1  ;;  %v3098_v23 = vsel %vm6536_vm14, %v2979_v27, 0.0  ;;  %v3099_v9 = vsel %vm6537_vm0, %v2980_v57, 0.0 }
0x1145   : >> { %v3142_v16 = vsel %vm6538_vm15, %v2979_v27, 0.0  ;;  %v3143_v19 = vsel %vm6539_vm1, %v2980_v57, 0.0  ;;  %vm6540_vm2 = vcmask 1046528   ;;  %v3101_v50 = vrot.slane %v3099_v9, 7 }
0x1146   : >> { %v2990_v32 = vsel %vm6540_vm2, %v2986_v29, %v2985_v10  ;;  %vm6541_vm8 = vmmov %vm6540_vm2  ;;  %3066 = vrot.lane.b32.xlu1 %v3055_v8, %s3845_s11  ;;  %3064 = vrot.lane.b32.xlu0 %v3054_v60, %s3845_s11  ;;  %v3104_v15 = vrot.slane %v3098_v23, 7  ;;  %v3145_v21 = vrot.slane %v3143_v19, 7  ;;  %v3148_v41 = vrot.slane %v3142_v16, 7 }
0x1147   : >> { %v2987_v11 = vsel %vm6541_vm8, %v2985_v10, %v2986_v29  ;;  %vm6542_vm5 = vmmov %vm6540_vm2  ;;  %vm6544_vm10 = vcmp.eq.s32.totalorder %v4925_v51, 1  ;;  %vm6545_vm3 = vcmp.eq.s32.totalorder %v4923_v48, 1  ;;  %vm6546_vm14 = vcmp.eq.s32.totalorder %v4925_v51, 6 }
0x1148   : >> { %v3034_v12 = vsel %vm6542_vm5, %v3030_v22, %v3029_v56  ;;  %vm6543_vm6 = vmmov %vm6540_vm2  ;;  %v3010_v59 = vsel %vm6544_vm10, %v2979_v27, 0.0  ;;  %v3011_v3 = vsel %vm6545_vm3, %v2980_v57, 0.0  ;;  %v3127_v45 = vsel %vm6546_vm14, %v2979_v27, 0.0 }
0x1149   : >> { %v3031_v26 = vsel %vm6543_vm6, %v3029_v56, %v3030_v22  ;;  %vm6547_vm0 = vcmp.eq.s32.totalorder %v4923_v48, 6  ;;  %vm6548_vm15 = vcmask 1040384   ;;  %v3014_v13 = vrot.slane %v3010_v59, 1  ;;  %vm6552_vm6 = vmmov %vm6542_vm5 }
0x114a   : >> { %v3128_v46 = vsel %vm6547_vm0, %v2980_v57, 0.0  ;;  %v3105_v4 = vsel %vm6548_vm15, %v3104_v15, %v3101_v50  ;;  %vm6549_vm1 = vmmov %vm6548_vm15  ;;  %v3015_v63 = vrot.slane %v3011_v3, 1  ;;  %v3133_v43 = vrot.slane %v3127_v45, 7  ;;  %3082 = vrot.lane.b32.xlu1 %v3077_v14, %s3847_s13  ;;  %3080 = vrot.lane.b32.xlu0 %v3076_v58, %s3847_s13 }
0x114b   : >> { %v3107_v52 = vsel %vm6549_vm1, %v3101_v50, %v3104_v15  ;;  %vm6550_vm2 = vmmov %vm6549_vm1  ;;  %v3130_v34 = vrot.slane %v3128_v46, 7  ;;  %vm6555_vm14 = vcmask 252928  }
0x114c   : >> { %v3149_v42 = vsel %vm6550_vm2, %v3148_v41, %v3145_v21  ;;  %vm6551_vm8 = vmmov %vm6549_vm1  ;;  %v3020_v53 = vsel %vm6542_vm5, %v3015_v63, %v3014_v13  ;;  %v3016_v49 = vsel %vm6552_vm6, %v3014_v13, %v3015_v63  ;;  %vm6559_vm2 = vcmp.le.s32.totalorder %v4002_v2, 14 }
0x114d   : >> { %v3151_v54 = vsel %vm6551_vm8, %v3145_v21, %v3148_v41  ;;  %vm6553_vm10 = vmmov %vm6549_vm1  ;;  %v3022_v50 = vsel %vm6559_vm2, %v3020_v53, 0.0  ;;  %vm6560_vm8 = vcmask 7168   ;;  %vm6569_vm2 = vcmask 261120  }
0x114e   : >> { %v6005_v0 = vsel %vm6553_vm10, %v3133_v43, %v3130_v34  ;;  %vm6554_vm3 = vmmov %vm6549_vm1  ;;  %3088 = vrot.lane.b32.xlu1 %v3077_v14, %s3848_s14  ;;  %3086 = vrot.lane.b32.xlu0 %v3076_v58, %s3848_s14 }
0x114f   : >> { %v6008_v5 = vsel %vm6554_vm3, %v3130_v34, %v3133_v43  ;;  %vm6556_vm0 = vmmov %vm6555_vm14 }
0x1150   : >> { %vm6557_vm15 = vmmov %vm6556_vm0 }
0x1151   : >> { %vm6558_vm1 = vmmov %vm6556_vm0 }
0x1152   : >> { %2994 = vrot.lane.b32.xlu1 %v2990_v32, %s3846_s12  ;;  %2992 = vrot.lane.b32.xlu0 %v2987_v11, %s3846_s12  ;;  %vm6561_vm5 = vmmov %vm6560_vm8 }
0x1153   : >> { %vm6562_vm6 = vmmov %vm6561_vm5 }
0x1154   : >> { %vm6563_vm10 = vmmov %vm6561_vm5 }
0x1155   : >> { %vm6564_vm3 = vmmov %vm6556_vm0 }
0x1156   : >> { %3000 = vrot.lane.b32.xlu1 %v2990_v32, %s3845_s11  ;;  %2998 = vrot.lane.b32.xlu0 %v2987_v11, %s3845_s11 }
0x115a   : >> { %3038 = vrot.lane.b32.xlu1 %v3034_v12, %s3847_s13  ;;  %3036 = vrot.lane.b32.xlu0 %v3031_v26, %s3847_s13 }
0x115e   : >> { %3044 = vrot.lane.b32.xlu1 %v3034_v12, %s3848_s14  ;;  %3042 = vrot.lane.b32.xlu0 %v3031_v26, %s3848_s14 }
0x1162   : >> { %3111 = vrot.lane.b32.xlu1 %v3105_v4, %s3846_s12  ;;  %3109 = vrot.lane.b32.xlu0 %v3107_v52, %s3846_s12 }
0x1166   : >> { %3117 = vrot.lane.b32.xlu1 %v3105_v4, %s3845_s11  ;;  %3115 = vrot.lane.b32.xlu0 %v3107_v52, %s3845_s11 }
0x116a   : >> { %3155 = vrot.lane.b32.xlu1 %v3149_v42, %s3847_s13  ;;  %3153 = vrot.lane.b32.xlu0 %v3151_v54, %s3847_s13 }
0x116e   : >> { %3161 = vrot.lane.b32.xlu1 %v3149_v42, %s3848_s14  ;;  %3159 = vrot.lane.b32.xlu0 %v3151_v54, %s3848_s14 }
0x11b4   : >> { %v3061_v57 = vpop.permute.xlu1 %3060  ;;  %v3059_v27 = vpop.permute.xlu0 %3058 }
0x11b8   : >> { %v3067_v8 = vpop.permute.xlu1 %3066  ;;  %v3065_v60 = vpop.permute.xlu0 %3064 }
0x11b9   : >> { %v3071_v12 = vsel %vm6557_vm15, %v3061_v57, %v3067_v8  ;;  %v3070_v26 = vsel %vm6558_vm1, %v3059_v27, %v3065_v60  ;;  %vm6567_vm15 = vmmov %vm6561_vm5 }
0x11ba   : >> { %v3073_v52 = vsel %vm4125_vm7, %v3071_v12, 0.0  ;;  %v3072_v42 = vsel %vm4125_vm7, %v3070_v26, 0.0  ;;  %vm6568_vm1 = vmmov %vm6561_vm5 }
0x11bc   : >> { %v3083_v14 = vpop.permute.xlu1 %3082  ;;  %v3081_v58 = vpop.permute.xlu0 %3080 }
0x11c0   : >> { %v3089_v61 = vpop.permute.xlu1 %3088  ;;  %v3087_v24 = vpop.permute.xlu0 %3086 }
0x11c1   : >> { %v3093_v63 = vsel %vm6562_vm6, %v3083_v14, %v3089_v61  ;;  %v3092_v34 = vsel %vm6563_vm10, %v3081_v58, %v3087_v24 }
0x11c2   : >> { %v3094_v57 = vsel %vm4120_vm4, %v3092_v34, 0.0 }
0x11c4   : >> { %v2995_v20 = vpop.permute.xlu1 %2994  ;;  %v2993_v62 = vpop.permute.xlu0 %2992 }
0x11c8   : >> { %v3001_v10 = vpop.permute.xlu1 %3000  ;;  %v2999_v29 = vpop.permute.xlu0 %2998 }
0x11c9   : >> { %v3005_v56 = vsel %vm6555_vm14, %v2995_v20, %v3001_v10  ;;  %v3004_v22 = vsel %vm6556_vm0, %v2993_v62, %v2999_v29  ;;  %vm6565_vm14 = vmmov %vm6556_vm0  ;;  %vm6566_vm0 = vcmp.ge.s32.totalorder %v3999_v1, 1 }
0x11ca   : >> { %v3007_v23 = vsel %vm4162_vm13, %v3005_v56, 0.0  ;;  %v3006_v9 = vsel %vm4125_vm7, %v3004_v22, 0.0  ;;  %v3138_v22 = vsel %vm6566_vm0, %v6008_v5, 0.0 }
0x11cb   : >> { %v3009_v32 = vmax.f32 %v5942_v17, %v3007_v23  ;;  %v3008_v11 = vmax.f32 %v5946_v18, %v3006_v9 }
0x11cc   : >> { %v3039_v16 = vpop.permute.xlu1 %3038  ;;  %v3037_v19 = vpop.permute.xlu0 %3036 }
0x11cd   : >> { %v3024_v41 = vmax.f32 %v3009_v32, %v3022_v50  ;;  %v3023_v3 = vmax.f32 %v3008_v11, %v3016_v49  ;;  %v3095_v49 = vsel %vm4120_vm4, %v3093_v63, 0.0 }
0x11d0   : >> { %v3045_v15 = vpop.permute.xlu1 %3044  ;;  %v3043_v21 = vpop.permute.xlu0 %3042 }
0x11d1   : >> { %v3049_v59 = vsel %vm6560_vm8, %v3039_v16, %v3045_v15  ;;  %v3048_v45 = vsel %vm6561_vm5, %v3037_v19, %v3043_v21  ;;  %vm6570_vm8 = vmmov %vm6569_vm2 }
0x11d2   : >> { %v3051_v17 = vsel %vm4154_vm12, %v3049_v59, 0.0  ;;  %v3050_v18 = vsel %vm4120_vm4, %v3048_v45, 0.0 }
0x11d3   : >> { %v3053_v46 = vmax.f32 %v3024_v41, %v3051_v17  ;;  %v3052_v4 = vmax.f32 %v3023_v3, %v3050_v18 }
0x11d4   : >> { %v3112_v54 = vpop.permute.xlu1 %3111  ;;  %v3110_v13 = vpop.permute.xlu0 %3109 }
0x11d5   : >> { %v3075_v43 = vmax.f32 %v3053_v46, %v3073_v52  ;;  %v3074_v53 = vmax.f32 %v3052_v4, %v3072_v42 }
0x11d7   : >> { %v3097_v60 = vmax.f32 %v3075_v43, %v3095_v49  ;;  %v3096_v62 = vmax.f32 %v3074_v53, %v3094_v57 }
0x11d8   : >> { %v3118_v27 = vpop.permute.xlu1 %3117  ;;  %v3116_v8 = vpop.permute.xlu0 %3115 }
0x11d9   : >> { %v3122_v20 = vsel %vm6564_vm3, %v3112_v54, %v3118_v27  ;;  %v3121_v10 = vsel %vm6565_vm14, %v3110_v13, %v3116_v8 }
0x11da   : >> { %v3124_v14 = vsel %vm4125_vm7, %v3122_v20, 0.0  ;;  %v3123_v58 = vsel %vm4142_vm11, %v3121_v10, 0.0 }
0x11db   : >> { %v3126_v61 = vmax.f32 %v3097_v60, %v3124_v14  ;;  %v3125_v24 = vmax.f32 %v3096_v62, %v3123_v58 }
0x11dc   : >> { %v3156_v29 = vpop.permute.xlu1 %3155  ;;  %v3154_v56 = vpop.permute.xlu0 %3153 }
0x11dd   : >> { %v3141_v23 = vmax.f32 %v3126_v61, %v6005_v0  ;;  %v3140_v9 = vmax.f32 %v3125_v24, %v3138_v22 }
0x11e0   : >> { %v3162_v16 = vpop.permute.xlu1 %3161  ;;  %v3160_v19 = vpop.permute.xlu0 %3159 }
0x11e1   : >> { %v3166_v32 = vsel %vm6567_vm15, %v3156_v29, %v3162_v16  ;;  %v3165_v11 = vsel %vm6568_vm1, %v3154_v56, %v3160_v19 }
0x11e2   : >> { %v3168_v12 = vsel %vm4120_vm4, %v3166_v32, 0.0  ;;  %v3167_v26 = vsel %vm4133_vm9, %v3165_v11, 0.0 }
0x11e3   : >> { %v3170_v23 = vmax.f32 %v3141_v23, %v3168_v12   ;;  %v3169_v22 = vmax.f32 %v3140_v9, %v3167_v26  }
0x11e5   : >> { %v3172_v5 = vmax.f32 %v2976_v6, %v3170_v23   ;;  %v3171_v0 = vmax.f32 %v2975_v7, %v3169_v22   ;;  %v1570_v50 = vmul.f32 %v3169_v22, %v270_v31  ;;  %v1571_v15 = vmul.f32 %v3170_v23, %v271_v33 }
0x11e7   : >> { %v1572_v21 = vsel %vm6569_vm2, %v1570_v50, 0.0  ;;  %v1573_v41 = vsel %vm6570_vm8, %v1571_v15, 0.0  ;;  %v6571_v24 = vmov %v3172_v5 }
0x11e8   : >> { %v1574_v59 = vadd.f32 %v1573_v41, %v1572_v21 }
0x11ea   : >> { %1575 = vadd.xlane.f32.xlu0 %v1574_v59 }
0x1273   : >> { %v1576_v3 = vpop.xlane.xlu0 %1575 }
0x1274   : >> { %v1577_v25 = vrot.slane %v1576_v3, 4 }
0x1276   : >> { %v1578_v47 = vadd.f32 %v1577_v25, %v1576_v3  ;;  %v6572_v25 = vmov %v3171_v0 }
0x1278   : >> { %v1579_v6 = vrot.slane %v1578_v47, 2 }
0x127a   : >> { %v1580_v44 = vadd.f32 %v1579_v6, %v1578_v47 }
0x127c   : >> { %v1581_v55 = vrot.slane %v1580_v44, 1 }
0x127e   : >> { %v1582_v7 = vadd.f32 %v1581_v55, %v1580_v44 }
0x1280   : >> { %3415 = vpush %v1582_v7 }
0x12b1   : >> { %s3416_s22 = spop %3415 }
0x12b2   : >> { %p1584_p4 = scmp.gt.f32.partialorder %s3416_s22, 0.5 }
0x12b4   : >> { %p1585_p6 = pnand %p1584_p4, %p1569_p3 }
0x12b5   : > { %v6574_v61 = vmov (%p1585_p6), %v3172_v5  ;;  %v6575_v62 = vmov (%p1585_p6), %v3171_v0 }
0x12b6   : > { %1588 = sbr.rel (!%p1585_p6) target bundleno = 3234 (0xca2), region = 111 }
0x12bb PF: > { %vm6576_vm5 = vcmask 261120   ;;  %s6113_s23 = scalar_lea.hbm %s6197_s3, %s3993_s16  ;;  %s3195_s0 = sshll.u32 %s4455_s18, 4  ;;  %v3828_v62 = vphi %v6275_v62, %v6575_v62   ;;  %v3824_v61 = vphi %v6274_v61, %v6574_v61   ;;  %s6116_s0 = int_to_ptr.vmem [resolvable:$true] %s3195_s0 }
0x12bc   : > { %3174 = vst.msk [vmem:[%s4455_s18] sm:$0xff] %vm6576_vm5, %v3828_v62  ;;  %vm6577_vm6 = vmmov %vm6576_vm5  ;;  %s3177_s28 = scalar_lea.sflag [#allocation7], %s3981_s15  ;;  %s3636_s30 = scalar_lea.vmem %s6116_s0, 256 }
0x12bd   : > { %3175 = vst.msk [vmem:[%s4455_s18 + $0x8] sm:$0xff] %vm6577_vm6, %v3824_v61  ;;  %p3637_p10 = scmp.ne.s32.totalorder %s6116_s0, %s3636_s30  ;;  %p6578_p12 = scmp.ne.s32.totalorder %s6227_s9, 0 }
0x12be   : > { %s3849_s5 = smov [#allocation8]  }
0x12bf   : > { %p3638_p5 = pnand %p3637_p10, %p6578_p12  ;;  %s3640_s8 = sshll.u32 %s3849_s5, 4  ;;  %s3641_s8 = int_to_ptr.vmem [resolvable:$false] %s3640_s8 }
0x12c0   : > { %s3642_s27 = scalar_lea.vmem %s3641_s8, 512  ;;  %p3643_p13 = scmp.lt.s32.totalorder %s6116_s0, %s3641_s8 }
0x12c1   : > { %p3639_p11 = pneg %p3638_p5  ;;  %p3644_p2 = scmp.lt.s32.totalorder %s3642_s27, %s3636_s30 }
0x12c3   : > { %p3645_p7 = por %p3644_p2, %p3643_p13 }
0x12c5   : > { %p3646_p8 = pnand %p3645_p7, %p3639_p11 }
0x12c7   : > { %3649 = shalt.err (!%p3646_p8)
}
0x12c8   : > { %s3650_s18 = scalar_lea.hbm %s6113_s23, 256  ;;  %s3654_s12 = scalar_lea.hbm %s6197_s3, 512 }
0x12c9   : > { %p3651_p9 = scmp.ne.s32.totalorder %s6113_s23, %s3650_s18  ;;  %p3655_p3 = scmp.lt.s32.totalorder %s6113_s23, %s6197_s3 }
0x12ca   : > { %p3656_p4 = scmp.lt.s32.totalorder %s3654_s12, %s3650_s18 }
0x12cb   : > { %p3652_p0 = pnand %p3651_p9, %p6578_p12 }
0x12cc   : > { %p3657_p6 = por %p3656_p4, %p3655_p3 }
0x12cd   : > { %p3653_p1 = pneg %p3652_p0 }
0x12cf   : > { %p3658_p10 = pnand %p3657_p6, %p3653_p1 }
0x12d1   : > { %3661 = shalt.err (!%p3658_p10)
}
0x12d2   : > { %s3850_s21 = smov 128   ;;  %s3851_s22 = smov 8  }
0x12d3   : > { %3419 = dma.vmem_to_hbm [thread:$0]  (%p6578_p12), %s6116_s0, 256, %s6113_s23, %s3177_s28, %s3850_s21, %s3850_s21, %s3851_s22  }
0x12d4   : > { %s6148_s30 = scalar_lea.hbm %s6198_s4, %s3993_s16  ;;  %s3211_s5 = sshll.u32 %s4458_s19, 4  ;;  %s6151_s5 = int_to_ptr.vmem [resolvable:$true] %s3211_s5 }
0x12d5   : > { %s3182_s8 = scalar_lea.sflag [#allocation10], %s3981_s15  ;;  %s3662_s27 = scalar_lea.vmem %s6151_s5, 256 }
0x12d6   : > { %p3663_p5 = scmp.ne.s32.totalorder %s6151_s5, %s3662_s27  ;;  %s3852_s18 = smov [#allocation9]  }
0x12d7   : > { %s3666_s7 = sshll.u32 %s3852_s18, 4  ;;  %s3667_s7 = int_to_ptr.vmem [resolvable:$false] %s3666_s7 }
0x12d8   : > { %p3664_p11 = pnand %p3663_p5, %p6578_p12  ;;  %s3668_s23 = scalar_lea.vmem %s3667_s7, 512 }
0x12d9   : > { %p3669_p2 = scmp.lt.s32.totalorder %s6151_s5, %s3667_s7  ;;  %p3670_p7 = scmp.lt.s32.totalorder %s3668_s23, %s3662_s27 }
0x12da   : > { %p3665_p13 = pneg %p3664_p11 }
0x12db   : > { %p3671_p8 = por %p3670_p7, %p3669_p2 }
0x12dd   : > { %p3672_p9 = pnand %p3671_p8, %p3665_p13 }
0x12df   : > { %3675 = shalt.err (!%p3672_p9)
}
0x12e0   : > { %s3676_s16 = scalar_lea.hbm %s6148_s30, 256  ;;  %s3680_s0 = scalar_lea.hbm %s6198_s4, 512 }
0x12e1   : > { %p3677_p0 = scmp.ne.s32.totalorder %s6148_s30, %s3676_s16  ;;  %p3681_p4 = scmp.lt.s32.totalorder %s6148_s30, %s6198_s4 }
0x12e2   : > { %p3682_p6 = scmp.lt.s32.totalorder %s3680_s0, %s3676_s16 }
0x12e3   : > { %p3678_p1 = pnand %p3677_p0, %p6578_p12 }
0x12e4   : > { %p3683_p10 = por %p3682_p6, %p3681_p4 }
0x12e5   : > { %p3679_p3 = pneg %p3678_p1 }
0x12e7   : > { %p3684_p5 = pnand %p3683_p10, %p3679_p3 }
0x12e9   : > { %3687 = shalt.err (!%p3684_p5)
}
0x12ea   : > { %3420 = dma.vmem_to_hbm [thread:$0]  (%p6578_p12), %s6151_s5, 256, %s6148_s30, %s3182_s8, %s3850_s21, %s3850_s21, %s3851_s22  }
0x12eb PF: > { %s3226_s12 = sand.u32 1, %s3768_s1   ;;  %p6579_p11 = scmp.ne.s32.totalorder %s6228_s10, 0 }
0x12ec   : > { %p6580_p13 = scmp.ge.s32.totalorder %s3780_s26, 2  ;;  %s3227_s13 = scalar_lea.sflag [#allocation7], %s3226_s12 }
0x12ee   : > { %p3428_p2 = pnand %p6580_p13, %p6579_p11 }
0x12f0   : > { %p3429_p7 = pneg %p3428_p2 }
0x12f2   : > { %3759 = dma.done.wait (%p3429_p7), %s3227_s13, 256  }
0x12f3   : > { %3761 = vsyncadd (%p3429_p7), %s3227_s13, 4294967040  ;;  %s3236_s14 = scalar_lea.sflag [#allocation10], %s3226_s12 }
0x12f4   : > { %3763 = dma.done.wait (%p3429_p7), %s3236_s14, 256  }
0x12f5   : > { %3765 = vsyncadd (%p3429_p7), %s3236_s14, 4294967040  ;;  %p31_p12 = scmp.ge.s32.totalorder %s3909_s29, 4   ;;  %s6581_s1 = smov %s3772_s24 }
0x12f6   : > { %s6582_s24 = smov %s3776_s25  ;;  %s6583_s25 = smov %s3921_s6 }
0x12f7   : > { %s6584_s26 = smov %s3909_s29  ;;  %33 = sbr.rel (!%p31_p12) target bundleno = 32 (0x20), region = 122 }
0x12fc   :  { %3241 = vsyncpa [#allocation6], 1 }
0x12fd   :  { %3243 = vsyncpa [#allocation6 + $0x1], 1 }
0x12fe   :  { %3244 = vsyncpa [#allocation7], 1 }
0x12ff   :  { %3246 = vsyncpa [#allocation7 + $0x1], 1 }
0x1300   :  { %3247 = vsyncpa [#allocation10], 1 }
0x1301   :  { %3249 = vsyncpa [#allocation10 + $0x1], 1 }

</bundles_post_ra>
